<compile_context>
chip_gen: v7x
topology: tpu7x:2x2x1
jax: 0.10.0
libtpu: 0.0.40
codegen_flags: <defaults>
</compile_context>

<pallas_src>
import jax
import jax.numpy as jnp
from jax import lax
from jax.experimental import pallas as pl
from jax.experimental.pallas import tpu as pltpu

EPS = 1e-5
C = 128                     # hidden channel width of the model


# ---------------------------------------------------------------------------
# Fused whole-network Pallas kernel (per-sample grid step)
# ---------------------------------------------------------------------------
def _make_net_kernel(H, W):
    OH, OW = H - 4, W - 4
    M, M5 = H * W, OH * OW

    def kernel(xcol_ref,
               w1_ref, t1_ref, w2_ref, t2_ref, w3_ref, t3_ref, w4_ref, t4_ref,
               w5_ref, b5_ref,
               o_ref,
               a_ref, cols_ref, cols5_ref):
        """One sample of the network.

        xcol_ref : (1, M, C)  bf16   layer-1 im2col, K zero-padded 9 -> C
        w1_ref   : (C, C)     bf16   layer-1 weights (rows 9..C-1 zero), BN folded
        wK_ref   : (9C, C)    bf16   3x3 weights, tap-major, BN scale folded
        w5_ref   : (25C, C)   bf16   5x5 head weights, Cout zero-padded to C
        tK_ref   : (1, C)     f32    folded BN shift (conv bias folded in)
        b5_ref   : (1, C)     f32    head bias broadcast over lanes
        o_ref    : (1, M5, C) f32    sigmoid output on the valid positions
        a_ref    : (H+2, WP, C) bf16 VMEM activation, halo-1 zeros, WP 8-aligned
        cols_ref : (M, 9C)    bf16   3x3 im2col scratch
        cols5_ref: (M5, 25C)  bf16   5x5 im2col scratch
        """
        # Halo ring must be zero (SAME padding).  Re-zeroed every grid step so
        # each megacore shard is self-contained; buffer is tiny (~40 KiB).
        a_ref[...] = jnp.zeros_like(a_ref)

        # ---- layer 1: single (M, C) x (C, C) MXU matmul (K padded 9 -> C).
        acc = jnp.dot(xcol_ref[0], w1_ref[...],
                      preferred_element_type=jnp.float32)
        y = jnp.maximum(acc + t1_ref[...], 0.0).astype(jnp.bfloat16)
        a_ref[1:1 + H, 1:1 + W, :] = y.reshape(H, W, C)

        # ---- layers 2..4: im2col once into bf16 scratch, then one long-K
        #      (M, 9C) x (9C, C) matmul per layer (accumulation in the MXU).
        for w_ref, t_ref in ((w2_ref, t2_ref), (w3_ref, t3_ref),
                             (w4_ref, t4_ref)):
            for t in range(9):
                dh, dw = divmod(t, 3)
                win = a_ref[dh:dh + H, dw:dw + W, :]
                cols_ref[:, t * C:(t + 1) * C] = win.reshape(M, C)
            acc = jnp.dot(cols_ref[...], w_ref[...],
                          preferred_element_type=jnp.float32)
            y = jnp.maximum(acc + t_ref[...], 0.0).astype(jnp.bfloat16)
            a_ref[1:1 + H, 1:1 + W, :] = y.reshape(H, W, C)

        # ---- head: 5x5 VALID conv on the (OH, OW) valid positions only,
        #      one (M5, 25C) x (25C, C) matmul; Cout zero-padded to C lanes so
        #      the store is lane dense (wrapper keeps channel 0).
        for t in range(25):
            dh, dw = divmod(t, 5)
            win = a_ref[1 + dh:1 + dh + OH, 1 + dw:1 + dw + OW, :]
            cols5_ref[:, t * C:(t + 1) * C] = win.reshape(M5, C)
        acc = jnp.dot(cols5_ref[...], w5_ref[...],
                      preferred_element_type=jnp.float32)
        o_ref[0] = jax.nn.sigmoid(acc + b5_ref[...])

    return kernel


# ---------------------------------------------------------------------------
# JAX wrapper: parameter folding/packing + single pallas_call
# ---------------------------------------------------------------------------
def net_forward_pallas(x_nchw, params):
    N, cin, H, W = x_nchw.shape
    assert cin == 1 and H >= 5 and W >= 5, "Net needs cin=1 and H,W >= 5"
    OH, OW = H - 4, W - 4
    M, M5 = H * W, OH * OW
    WP = ((W + 2 + 7) // 8) * 8          # sublane-aligned scratch width

    # ---- layer-1 im2col in the wrapper (tiny: N*M*9 values), K padded to C.
    x_pad = jnp.pad(x_nchw[:, 0], ((0, 0), (1, 1), (1, 1)))   # (N, H+2, W+2)
    taps = [x_pad[:, dh:dh + H, dw:dw + W].reshape(N, M)
            for dh in range(3) for dw in range(3)]
    xcol = jnp.stack(taps, axis=-1)                            # (N, M, 9)
    xcol = jnp.pad(xcol, ((0, 0), (0, 0), (0, C - 9))).astype(jnp.bfloat16)

    args = [xcol]
    in_specs = [pl.BlockSpec((1, M, C), lambda n: (n, 0, 0))]

    # ---- fold BatchNorm (eval mode) into the conv weights / per-channel shift.
    for li, (w, b, gamma, beta, mean, var) in enumerate(params["convs"]):
        scale = gamma / jnp.sqrt(var + EPS)                    # (C,)
        shift = (b - mean) * scale + beta                      # (C,)
        if li == 0:
            wf = w.reshape(9, C) * scale[None, :]              # f32 fold
            wf = jnp.pad(wf, ((0, C - 9), (0, 0)))             # K 9 -> C
        else:
            wf = w.reshape(9 * C, C) * scale[None, :]          # tap-major rows
        args += [wf.astype(jnp.bfloat16),
                 shift.reshape(1, C).astype(jnp.float32)]
        in_specs += [pl.BlockSpec(tuple(wf.shape), lambda n: (0, 0)),
                     pl.BlockSpec((1, C), lambda n: (0, 0))]

    w5, b5 = params["out"]
    w5f = jnp.pad(w5.reshape(25 * C, 1),
                  ((0, 0), (0, C - 1))).astype(jnp.bfloat16)   # Cout 1 -> C
    b5f = jnp.broadcast_to(b5.reshape(1, 1), (1, C)).astype(jnp.float32)
    args += [w5f, b5f]
    in_specs += [pl.BlockSpec((25 * C, C), lambda n: (0, 0)),
                 pl.BlockSpec((1, C), lambda n: (0, 0))]

    flops = N * (2 * M * C * C + 3 * 2 * M * 9 * C * C + 2 * M5 * 25 * C * C)
    bytes_accessed = (sum(int(a.size) * a.dtype.itemsize for a in args)
                      + N * M5 * C * 4)

    out = pl.pallas_call(
        _make_net_kernel(H, W),
        out_shape=jax.ShapeDtypeStruct((N, M5, C), jnp.float32),
        grid=(N,),
        in_specs=in_specs,
        out_specs=pl.BlockSpec((1, M5, C), lambda n: (n, 0, 0)),
        scratch_shapes=[pltpu.VMEM((H + 2, WP, C), jnp.bfloat16),   # activations
                        pltpu.VMEM((M, 9 * C), jnp.bfloat16),       # 3x3 im2col
                        pltpu.VMEM((M5, 25 * C), jnp.bfloat16)],    # 5x5 im2col
        compiler_params=pltpu.CompilerParams(
            dimension_semantics=("parallel",),
            vmem_limit_bytes=32 * 1024 * 1024),
        cost_estimate=pl.CostEstimate(flops=int(flops),
                                      transcendentals=int(N * M5 * C),
                                      bytes_accessed=int(bytes_accessed)),
    )(*args)

    # Real output channel 0 of the valid region; matches torch's x.view(-1, 1).
    return out[:, :, 0].reshape(-1, 1)


# ---------------------------------------------------------------------------
# Parameters (deterministic synthetic init; shapes follow nn.Module.__init__)
# ---------------------------------------------------------------------------
def init_params(key):
    params = {"convs": [], "out": None}
    cin = 1
    for _ in range(4):
        key, kw_, kb, kg, kbe, km, kv = jax.random.split(key, 7)
        fan_in = 3 * 3 * cin
        w = jax.random.normal(kw_, (3, 3, cin, C), jnp.float32) / jnp.sqrt(
            float(fan_in))                              # HWIO
        b = 0.1 * jax.random.normal(kb, (C,), jnp.float32)
        gamma = 1.0 + 0.1 * jax.random.normal(kg, (C,), jnp.float32)
        beta = 0.1 * jax.random.normal(kbe, (C,), jnp.float32)
        mean = 0.1 * jax.random.normal(km, (C,), jnp.float32)
        var = 1.0 + 0.1 * jax.random.uniform(kv, (C,), jnp.float32)
        params["convs"].append((w, b, gamma, beta, mean, var))
        cin = C
    key, kw5, kb5 = jax.random.split(key, 3)
    w5 = jax.random.normal(kw5, (5, 5, C, 1), jnp.float32) / jnp.sqrt(
        float(5 * 5 * C))
    b5 = 0.1 * jax.random.normal(kb5, (1,), jnp.float32)
    params["out"] = (w5, b5)
    return params


# ---------------------------------------------------------------------------
# Pure-JAX f32 reference (conv + bias, BN formula, relu / sigmoid)
# ---------------------------------------------------------------------------
def net_forward_ref(x_nchw, params):
    x = jnp.transpose(x_nchw, (0, 2, 3, 1))
    dn = ("NHWC", "HWIO", "NHWC")
    for (w, b, gamma, beta, mean, var) in params["convs"]:
        x = lax.conv_general_dilated(x, w, (1, 1), "SAME",
                                     dimension_numbers=dn) + b
        x = gamma * (x - mean) / jnp.sqrt(var + EPS) + beta
        x = jnp.maximum(x, 0.0)
    w5, b5 = params["out"]
    x = lax.conv_general_dilated(x, w5, (1, 1), "VALID",
                                 dimension_numbers=dn) + b5
    return jax.nn.sigmoid(x).reshape(-1, 1)


if __name__ == "__main__":
    key = jax.random.PRNGKey(0)
    pkey, xkey = jax.random.split(key)
    params = init_params(pkey)

    N, H, W = 2, 8, 8                                    # small synthetic board
    x_nchw = jax.random.normal(xkey, (N, 1, H, W), jnp.float32)

    out = jax.jit(net_forward_pallas)(x_nchw, params)
    out = jax.block_until_ready(out)

    ref = net_forward_ref(x_nchw, params)
    assert out.shape == (N * (H - 4) * (W - 4), 1), out.shape
    err = float(jnp.max(jnp.abs(out - ref)))
    # bf16 weights/activations (all layers) vs. f32 reference -> loose tol.
    if err > 3e-2:
        raise AssertionError(f"Pallas output mismatch vs reference: {err}")
    print("KERNEL_OK")
</pallas_src>

<mosaic_0001>
module attributes {stable_mosaic.version = 11 : i64} {
  func.func @kernel(%arg0: i32, %arg1: memref<1x64x128xbf16, #tpu.memory_space<vmem>>, %arg2: memref<128x128xbf16, #tpu.memory_space<vmem>>, %arg3: memref<1x128xf32, #tpu.memory_space<vmem>>, %arg4: memref<1152x128xbf16, #tpu.memory_space<vmem>>, %arg5: memref<1x128xf32, #tpu.memory_space<vmem>>, %arg6: memref<1152x128xbf16, #tpu.memory_space<vmem>>, %arg7: memref<1x128xf32, #tpu.memory_space<vmem>>, %arg8: memref<1152x128xbf16, #tpu.memory_space<vmem>>, %arg9: memref<1x128xf32, #tpu.memory_space<vmem>>, %arg10: memref<3200x128xbf16, #tpu.memory_space<vmem>>, %arg11: memref<1x128xf32, #tpu.memory_space<vmem>>, %arg12: memref<1x16x128xf32, #tpu.memory_space<vmem>>, %arg13: memref<10x16x128xbf16, #tpu.memory_space<vmem>>, %arg14: memref<64x1152xbf16, #tpu.memory_space<vmem>>, %arg15: memref<16x3200xbf16, #tpu.memory_space<vmem>>) attributes {dimension_semantics = [#tpu.dimension_semantics<parallel>], iteration_bounds = array<i64: 2>, scalar_prefetch = 0 : i64, scratch_operands = 3 : i64, tpu.core_type = #tpu.core_type<tc>, window_params = [{transform_indices = @transform_0, window_bounds = array<i64: 1, 64, 128>}, {pipeline_mode = #tpu.pipeline_mode<synchronous>, transform_indices = @transform_1, window_bounds = array<i64: 128, 128>}, {pipeline_mode = #tpu.pipeline_mode<synchronous>, transform_indices = @transform_2, window_bounds = array<i64: 1, 128>}, {pipeline_mode = #tpu.pipeline_mode<synchronous>, transform_indices = @transform_3, window_bounds = array<i64: 1152, 128>}, {pipeline_mode = #tpu.pipeline_mode<synchronous>, transform_indices = @transform_4, window_bounds = array<i64: 1, 128>}, {pipeline_mode = #tpu.pipeline_mode<synchronous>, transform_indices = @transform_5, window_bounds = array<i64: 1152, 128>}, {pipeline_mode = #tpu.pipeline_mode<synchronous>, transform_indices = @transform_6, window_bounds = array<i64: 1, 128>}, {pipeline_mode = #tpu.pipeline_mode<synchronous>, transform_indices = @transform_7, window_bounds = array<i64: 1152, 128>}, {pipeline_mode = #tpu.pipeline_mode<synchronous>, transform_indices = @transform_8, window_bounds = array<i64: 1, 128>}, {pipeline_mode = #tpu.pipeline_mode<synchronous>, transform_indices = @transform_9, window_bounds = array<i64: 3200, 128>}, {pipeline_mode = #tpu.pipeline_mode<synchronous>, transform_indices = @transform_10, window_bounds = array<i64: 1, 128>}, {transform_indices = @transform_11, window_bounds = array<i64: 1, 16, 128>}]} {
    %cst = arith.constant 0.000000e+00 : bf16
    %0 = vector.broadcast %cst : bf16 to vector<10x16x128xbf16>
    %c0 = arith.constant 0 : index
    %c0_0 = arith.constant 0 : index
    %c0_1 = arith.constant 0 : index
    %1 = vector.load %arg13[%c0, %c0_0, %c0_1] : memref<10x16x128xbf16, #tpu.memory_space<vmem>>, vector<10x16x128xbf16>
    tpu.vector_store %arg13[%c0, %c0_0, %c0_1], %0 {strides = array<i32>} : memref<10x16x128xbf16, #tpu.memory_space<vmem>>, vector<10x16x128xbf16>,
    %c0_2 = arith.constant 0 : index
    %c0_3 = arith.constant 0 : index
    %c0_4 = arith.constant 0 : index
    %2 = vector.load %arg1[%c0_2, %c0_3, %c0_4] : memref<1x64x128xbf16, #tpu.memory_space<vmem>>, vector<1x64x128xbf16>
    %3 = vector.shape_cast %2 : vector<1x64x128xbf16> to vector<64x128xbf16>
    %c0_5 = arith.constant 0 : index
    %c0_6 = arith.constant 0 : index
    %4 = vector.load %arg2[%c0_5, %c0_6] : memref<128x128xbf16, #tpu.memory_space<vmem>>, vector<128x128xbf16>
    %cst_7 = arith.constant dense<0.000000e+00> : vector<64x128xf32>
    %5 = tpu.matmul %3, %4, %cst_7 {dimension_numbers = #tpu.dot_dimension_numbers<[1], [0], [0], [1], [0, 0, 1, 1], [], []>} : vector<64x128xbf16>, vector<128x128xbf16>, vector<64x128xf32> -> vector<64x128xf32>
    %c0_8 = arith.constant 0 : index
    %c0_9 = arith.constant 0 : index
    %6 = vector.load %arg3[%c0_8, %c0_9] : memref<1x128xf32, #tpu.memory_space<vmem>>, vector<1x128xf32>
    %7 = vector.broadcast %6 : vector<1x128xf32> to vector<64x128xf32>
    %8 = arith.addf %5, %7 : vector<64x128xf32>
    %cst_10 = arith.constant 0.000000e+00 : f32
    %9 = vector.broadcast %cst_10 : f32 to vector<64x128xf32>
    %10 = arith.maximumf %8, %9 : vector<64x128xf32>
    %11 = arith.truncf %10 : vector<64x128xf32> to vector<64x128xbf16>
    %12 = vector.shape_cast %11 : vector<64x128xbf16> to vector<8x8x128xbf16>
    %c1 = arith.constant 1 : index
    %c1_11 = arith.constant 1 : index
    %c0_12 = arith.constant 0 : index
    %13 = vector.load %arg13[%c1, %c1_11, %c0_12] : memref<10x16x128xbf16, #tpu.memory_space<vmem>>, vector<8x8x128xbf16>
    tpu.vector_store %arg13[%c1, %c1_11, %c0_12], %12 {strides = array<i32>} : memref<10x16x128xbf16, #tpu.memory_space<vmem>>, vector<8x8x128xbf16>,
    %c0_13 = arith.constant 0 : index
    %c0_14 = arith.constant 0 : index
    %c0_15 = arith.constant 0 : index
    %14 = vector.load %arg13[%c0_13, %c0_14, %c0_15] : memref<10x16x128xbf16, #tpu.memory_space<vmem>>, vector<8x8x128xbf16>
    %15 = vector.shape_cast %14 : vector<8x8x128xbf16> to vector<64x128xbf16>
    %c0_16 = arith.constant 0 : index
    %c0_17 = arith.constant 0 : index
    %16 = vector.load %arg14[%c0_16, %c0_17] : memref<64x1152xbf16, #tpu.memory_space<vmem>>, vector<64x128xbf16>
    tpu.vector_store %arg14[%c0_16, %c0_17], %15 {strides = array<i32>} : memref<64x1152xbf16, #tpu.memory_space<vmem>>, vector<64x128xbf16>,
    %c0_18 = arith.constant 0 : index
    %c1_19 = arith.constant 1 : index
    %c0_20 = arith.constant 0 : index
    %17 = vector.load %arg13[%c0_18, %c1_19, %c0_20] : memref<10x16x128xbf16, #tpu.memory_space<vmem>>, vector<8x8x128xbf16>
    %18 = vector.shape_cast %17 : vector<8x8x128xbf16> to vector<64x128xbf16>
    %c0_21 = arith.constant 0 : index
    %c128 = arith.constant 128 : index
    %19 = vector.load %arg14[%c0_21, %c128] : memref<64x1152xbf16, #tpu.memory_space<vmem>>, vector<64x128xbf16>
    tpu.vector_store %arg14[%c0_21, %c128], %18 {strides = array<i32>} : memref<64x1152xbf16, #tpu.memory_space<vmem>>, vector<64x128xbf16>,
    %c0_22 = arith.constant 0 : index
    %c2 = arith.constant 2 : index
    %c0_23 = arith.constant 0 : index
    %20 = vector.load %arg13[%c0_22, %c2, %c0_23] : memref<10x16x128xbf16, #tpu.memory_space<vmem>>, vector<8x8x128xbf16>
    %21 = vector.shape_cast %20 : vector<8x8x128xbf16> to vector<64x128xbf16>
    %c0_24 = arith.constant 0 : index
    %c256 = arith.constant 256 : index
    %22 = vector.load %arg14[%c0_24, %c256] : memref<64x1152xbf16, #tpu.memory_space<vmem>>, vector<64x128xbf16>
    tpu.vector_store %arg14[%c0_24, %c256], %21 {strides = array<i32>} : memref<64x1152xbf16, #tpu.memory_space<vmem>>, vector<64x128xbf16>,
    %c1_25 = arith.constant 1 : index
    %c0_26 = arith.constant 0 : index
    %c0_27 = arith.constant 0 : index
    %23 = vector.load %arg13[%c1_25, %c0_26, %c0_27] : memref<10x16x128xbf16, #tpu.memory_space<vmem>>, vector<8x8x128xbf16>
    %24 = vector.shape_cast %23 : vector<8x8x128xbf16> to vector<64x128xbf16>
    %c0_28 = arith.constant 0 : index
    %c384 = arith.constant 384 : index
    %25 = vector.load %arg14[%c0_28, %c384] : memref<64x1152xbf16, #tpu.memory_space<vmem>>, vector<64x128xbf16>
    tpu.vector_store %arg14[%c0_28, %c384], %24 {strides = array<i32>} : memref<64x1152xbf16, #tpu.memory_space<vmem>>, vector<64x128xbf16>,
    %c1_29 = arith.constant 1 : index
    %c1_30 = arith.constant 1 : index
    %c0_31 = arith.constant 0 : index
    %26 = vector.load %arg13[%c1_29, %c1_30, %c0_31] : memref<10x16x128xbf16, #tpu.memory_space<vmem>>, vector<8x8x128xbf16>
    %27 = vector.shape_cast %26 : vector<8x8x128xbf16> to vector<64x128xbf16>
    %c0_32 = arith.constant 0 : index
    %c512 = arith.constant 512 : index
    %28 = vector.load %arg14[%c0_32, %c512] : memref<64x1152xbf16, #tpu.memory_space<vmem>>, vector<64x128xbf16>
    tpu.vector_store %arg14[%c0_32, %c512], %27 {strides = array<i32>} : memref<64x1152xbf16, #tpu.memory_space<vmem>>, vector<64x128xbf16>,
    %c1_33 = arith.constant 1 : index
    %c2_34 = arith.constant 2 : index
    %c0_35 = arith.constant 0 : index
    %29 = vector.load %arg13[%c1_33, %c2_34, %c0_35] : memref<10x16x128xbf16, #tpu.memory_space<vmem>>, vector<8x8x128xbf16>
    %30 = vector.shape_cast %29 : vector<8x8x128xbf16> to vector<64x128xbf16>
    %c0_36 = arith.constant 0 : index
    %c640 = arith.constant 640 : index
    %31 = vector.load %arg14[%c0_36, %c640] : memref<64x1152xbf16, #tpu.memory_space<vmem>>, vector<64x128xbf16>
    tpu.vector_store %arg14[%c0_36, %c640], %30 {strides = array<i32>} : memref<64x1152xbf16, #tpu.memory_space<vmem>>, vector<64x128xbf16>,
    %c2_37 = arith.constant 2 : index
    %c0_38 = arith.constant 0 : index
    %c0_39 = arith.constant 0 : index
    %32 = vector.load %arg13[%c2_37, %c0_38, %c0_39] : memref<10x16x128xbf16, #tpu.memory_space<vmem>>, vector<8x8x128xbf16>
    %33 = vector.shape_cast %32 : vector<8x8x128xbf16> to vector<64x128xbf16>
    %c0_40 = arith.constant 0 : index
    %c768 = arith.constant 768 : index
    %34 = vector.load %arg14[%c0_40, %c768] : memref<64x1152xbf16, #tpu.memory_space<vmem>>, vector<64x128xbf16>
    tpu.vector_store %arg14[%c0_40, %c768], %33 {strides = array<i32>} : memref<64x1152xbf16, #tpu.memory_space<vmem>>, vector<64x128xbf16>,
    %c2_41 = arith.constant 2 : index
    %c1_42 = arith.constant 1 : index
    %c0_43 = arith.constant 0 : index
    %35 = vector.load %arg13[%c2_41, %c1_42, %c0_43] : memref<10x16x128xbf16, #tpu.memory_space<vmem>>, vector<8x8x128xbf16>
    %36 = vector.shape_cast %35 : vector<8x8x128xbf16> to vector<64x128xbf16>
    %c0_44 = arith.constant 0 : index
    %c896 = arith.constant 896 : index
    %37 = vector.load %arg14[%c0_44, %c896] : memref<64x1152xbf16, #tpu.memory_space<vmem>>, vector<64x128xbf16>
    tpu.vector_store %arg14[%c0_44, %c896], %36 {strides = array<i32>} : memref<64x1152xbf16, #tpu.memory_space<vmem>>, vector<64x128xbf16>,
    %c2_45 = arith.constant 2 : index
    %c2_46 = arith.constant 2 : index
    %c0_47 = arith.constant 0 : index
    %38 = vector.load %arg13[%c2_45, %c2_46, %c0_47] : memref<10x16x128xbf16, #tpu.memory_space<vmem>>, vector<8x8x128xbf16>
    %39 = vector.shape_cast %38 : vector<8x8x128xbf16> to vector<64x128xbf16>
    %c0_48 = arith.constant 0 : index
    %c1024 = arith.constant 1024 : index
    %40 = vector.load %arg14[%c0_48, %c1024] : memref<64x1152xbf16, #tpu.memory_space<vmem>>, vector<64x128xbf16>
    tpu.vector_store %arg14[%c0_48, %c1024], %39 {strides = array<i32>} : memref<64x1152xbf16, #tpu.memory_space<vmem>>, vector<64x128xbf16>,
    %c0_49 = arith.constant 0 : index
    %c0_50 = arith.constant 0 : index
    %41 = vector.load %arg14[%c0_49, %c0_50] : memref<64x1152xbf16, #tpu.memory_space<vmem>>, vector<64x1152xbf16>
    %c0_51 = arith.constant 0 : index
    %c0_52 = arith.constant 0 : index
    %42 = vector.load %arg4[%c0_51, %c0_52] : memref<1152x128xbf16, #tpu.memory_space<vmem>>, vector<1152x128xbf16>
    %cst_53 = arith.constant dense<0.000000e+00> : vector<64x128xf32>
    %43 = tpu.matmul %41, %42, %cst_53 {dimension_numbers = #tpu.dot_dimension_numbers<[1], [0], [0], [1], [0, 0, 1, 1], [], []>} : vector<64x1152xbf16>, vector<1152x128xbf16>, vector<64x128xf32> -> vector<64x128xf32>
    %c0_54 = arith.constant 0 : index
    %c0_55 = arith.constant 0 : index
    %44 = vector.load %arg5[%c0_54, %c0_55] : memref<1x128xf32, #tpu.memory_space<vmem>>, vector<1x128xf32>
    %45 = vector.broadcast %44 : vector<1x128xf32> to vector<64x128xf32>
    %46 = arith.addf %43, %45 : vector<64x128xf32>
    %cst_56 = arith.constant 0.000000e+00 : f32
    %47 = vector.broadcast %cst_56 : f32 to vector<64x128xf32>
    %48 = arith.maximumf %46, %47 : vector<64x128xf32>
    %49 = arith.truncf %48 : vector<64x128xf32> to vector<64x128xbf16>
    %50 = vector.shape_cast %49 : vector<64x128xbf16> to vector<8x8x128xbf16>
    %c1_57 = arith.constant 1 : index
    %c1_58 = arith.constant 1 : index
    %c0_59 = arith.constant 0 : index
    %51 = vector.load %arg13[%c1_57, %c1_58, %c0_59] : memref<10x16x128xbf16, #tpu.memory_space<vmem>>, vector<8x8x128xbf16>
    tpu.vector_store %arg13[%c1_57, %c1_58, %c0_59], %50 {strides = array<i32>} : memref<10x16x128xbf16, #tpu.memory_space<vmem>>, vector<8x8x128xbf16>,
    %c0_60 = arith.constant 0 : index
    %c0_61 = arith.constant 0 : index
    %c0_62 = arith.constant 0 : index
    %52 = vector.load %arg13[%c0_60, %c0_61, %c0_62] : memref<10x16x128xbf16, #tpu.memory_space<vmem>>, vector<8x8x128xbf16>
    %53 = vector.shape_cast %52 : vector<8x8x128xbf16> to vector<64x128xbf16>
    %c0_63 = arith.constant 0 : index
    %c0_64 = arith.constant 0 : index
    %54 = vector.load %arg14[%c0_63, %c0_64] : memref<64x1152xbf16, #tpu.memory_space<vmem>>, vector<64x128xbf16>
    tpu.vector_store %arg14[%c0_63, %c0_64], %53 {strides = array<i32>} : memref<64x1152xbf16, #tpu.memory_space<vmem>>, vector<64x128xbf16>,
    %c0_65 = arith.constant 0 : index
    %c1_66 = arith.constant 1 : index
    %c0_67 = arith.constant 0 : index
    %55 = vector.load %arg13[%c0_65, %c1_66, %c0_67] : memref<10x16x128xbf16, #tpu.memory_space<vmem>>, vector<8x8x128xbf16>
    %56 = vector.shape_cast %55 : vector<8x8x128xbf16> to vector<64x128xbf16>
    %c0_68 = arith.constant 0 : index
    %c128_69 = arith.constant 128 : index
    %57 = vector.load %arg14[%c0_68, %c128_69] : memref<64x1152xbf16, #tpu.memory_space<vmem>>, vector<64x128xbf16>
    tpu.vector_store %arg14[%c0_68, %c128_69], %56 {strides = array<i32>} : memref<64x1152xbf16, #tpu.memory_space<vmem>>, vector<64x128xbf16>,
    %c0_70 = arith.constant 0 : index
    %c2_71 = arith.constant 2 : index
    %c0_72 = arith.constant 0 : index
    %58 = vector.load %arg13[%c0_70, %c2_71, %c0_72] : memref<10x16x128xbf16, #tpu.memory_space<vmem>>, vector<8x8x128xbf16>
    %59 = vector.shape_cast %58 : vector<8x8x128xbf16> to vector<64x128xbf16>
    %c0_73 = arith.constant 0 : index
    %c256_74 = arith.constant 256 : index
    %60 = vector.load %arg14[%c0_73, %c256_74] : memref<64x1152xbf16, #tpu.memory_space<vmem>>, vector<64x128xbf16>
    tpu.vector_store %arg14[%c0_73, %c256_74], %59 {strides = array<i32>} : memref<64x1152xbf16, #tpu.memory_space<vmem>>, vector<64x128xbf16>,
    %c1_75 = arith.constant 1 : index
    %c0_76 = arith.constant 0 : index
    %c0_77 = arith.constant 0 : index
    %61 = vector.load %arg13[%c1_75, %c0_76, %c0_77] : memref<10x16x128xbf16, #tpu.memory_space<vmem>>, vector<8x8x128xbf16>
    %62 = vector.shape_cast %61 : vector<8x8x128xbf16> to vector<64x128xbf16>
    %c0_78 = arith.constant 0 : index
    %c384_79 = arith.constant 384 : index
    %63 = vector.load %arg14[%c0_78, %c384_79] : memref<64x1152xbf16, #tpu.memory_space<vmem>>, vector<64x128xbf16>
    tpu.vector_store %arg14[%c0_78, %c384_79], %62 {strides = array<i32>} : memref<64x1152xbf16, #tpu.memory_space<vmem>>, vector<64x128xbf16>,
    %c1_80 = arith.constant 1 : index
    %c1_81 = arith.constant 1 : index
    %c0_82 = arith.constant 0 : index
    %64 = vector.load %arg13[%c1_80, %c1_81, %c0_82] : memref<10x16x128xbf16, #tpu.memory_space<vmem>>, vector<8x8x128xbf16>
    %65 = vector.shape_cast %64 : vector<8x8x128xbf16> to vector<64x128xbf16>
    %c0_83 = arith.constant 0 : index
    %c512_84 = arith.constant 512 : index
    %66 = vector.load %arg14[%c0_83, %c512_84] : memref<64x1152xbf16, #tpu.memory_space<vmem>>, vector<64x128xbf16>
    tpu.vector_store %arg14[%c0_83, %c512_84], %65 {strides = array<i32>} : memref<64x1152xbf16, #tpu.memory_space<vmem>>, vector<64x128xbf16>,
    %c1_85 = arith.constant 1 : index
    %c2_86 = arith.constant 2 : index
    %c0_87 = arith.constant 0 : index
    %67 = vector.load %arg13[%c1_85, %c2_86, %c0_87] : memref<10x16x128xbf16, #tpu.memory_space<vmem>>, vector<8x8x128xbf16>
    %68 = vector.shape_cast %67 : vector<8x8x128xbf16> to vector<64x128xbf16>
    %c0_88 = arith.constant 0 : index
    %c640_89 = arith.constant 640 : index
    %69 = vector.load %arg14[%c0_88, %c640_89] : memref<64x1152xbf16, #tpu.memory_space<vmem>>, vector<64x128xbf16>
    tpu.vector_store %arg14[%c0_88, %c640_89], %68 {strides = array<i32>} : memref<64x1152xbf16, #tpu.memory_space<vmem>>, vector<64x128xbf16>,
    %c2_90 = arith.constant 2 : index
    %c0_91 = arith.constant 0 : index
    %c0_92 = arith.constant 0 : index
    %70 = vector.load %arg13[%c2_90, %c0_91, %c0_92] : memref<10x16x128xbf16, #tpu.memory_space<vmem>>, vector<8x8x128xbf16>
    %71 = vector.shape_cast %70 : vector<8x8x128xbf16> to vector<64x128xbf16>
    %c0_93 = arith.constant 0 : index
    %c768_94 = arith.constant 768 : index
    %72 = vector.load %arg14[%c0_93, %c768_94] : memref<64x1152xbf16, #tpu.memory_space<vmem>>, vector<64x128xbf16>
    tpu.vector_store %arg14[%c0_93, %c768_94], %71 {strides = array<i32>} : memref<64x1152xbf16, #tpu.memory_space<vmem>>, vector<64x128xbf16>,
    %c2_95 = arith.constant 2 : index
    %c1_96 = arith.constant 1 : index
    %c0_97 = arith.constant 0 : index
    %73 = vector.load %arg13[%c2_95, %c1_96, %c0_97] : memref<10x16x128xbf16, #tpu.memory_space<vmem>>, vector<8x8x128xbf16>
    %74 = vector.shape_cast %73 : vector<8x8x128xbf16> to vector<64x128xbf16>
    %c0_98 = arith.constant 0 : index
    %c896_99 = arith.constant 896 : index
    %75 = vector.load %arg14[%c0_98, %c896_99] : memref<64x1152xbf16, #tpu.memory_space<vmem>>, vector<64x128xbf16>
    tpu.vector_store %arg14[%c0_98, %c896_99], %74 {strides = array<i32>} : memref<64x1152xbf16, #tpu.memory_space<vmem>>, vector<64x128xbf16>,
    %c2_100 = arith.constant 2 : index
    %c2_101 = arith.constant 2 : index
    %c0_102 = arith.constant 0 : index
    %76 = vector.load %arg13[%c2_100, %c2_101, %c0_102] : memref<10x16x128xbf16, #tpu.memory_space<vmem>>, vector<8x8x128xbf16>
    %77 = vector.shape_cast %76 : vector<8x8x128xbf16> to vector<64x128xbf16>
    %c0_103 = arith.constant 0 : index
    %c1024_104 = arith.constant 1024 : index
    %78 = vector.load %arg14[%c0_103, %c1024_104] : memref<64x1152xbf16, #tpu.memory_space<vmem>>, vector<64x128xbf16>
    tpu.vector_store %arg14[%c0_103, %c1024_104], %77 {strides = array<i32>} : memref<64x1152xbf16, #tpu.memory_space<vmem>>, vector<64x128xbf16>,
    %c0_105 = arith.constant 0 : index
    %c0_106 = arith.constant 0 : index
    %79 = vector.load %arg14[%c0_105, %c0_106] : memref<64x1152xbf16, #tpu.memory_space<vmem>>, vector<64x1152xbf16>
    %c0_107 = arith.constant 0 : index
    %c0_108 = arith.constant 0 : index
    %80 = vector.load %arg6[%c0_107, %c0_108] : memref<1152x128xbf16, #tpu.memory_space<vmem>>, vector<1152x128xbf16>
    %cst_109 = arith.constant dense<0.000000e+00> : vector<64x128xf32>
    %81 = tpu.matmul %79, %80, %cst_109 {dimension_numbers = #tpu.dot_dimension_numbers<[1], [0], [0], [1], [0, 0, 1, 1], [], []>} : vector<64x1152xbf16>, vector<1152x128xbf16>, vector<64x128xf32> -> vector<64x128xf32>
    %c0_110 = arith.constant 0 : index
    %c0_111 = arith.constant 0 : index
    %82 = vector.load %arg7[%c0_110, %c0_111] : memref<1x128xf32, #tpu.memory_space<vmem>>, vector<1x128xf32>
    %83 = vector.broadcast %82 : vector<1x128xf32> to vector<64x128xf32>
    %84 = arith.addf %81, %83 : vector<64x128xf32>
    %cst_112 = arith.constant 0.000000e+00 : f32
    %85 = vector.broadcast %cst_112 : f32 to vector<64x128xf32>
    %86 = arith.maximumf %84, %85 : vector<64x128xf32>
    %87 = arith.truncf %86 : vector<64x128xf32> to vector<64x128xbf16>
    %88 = vector.shape_cast %87 : vector<64x128xbf16> to vector<8x8x128xbf16>
    %c1_113 = arith.constant 1 : index
    %c1_114 = arith.constant 1 : index
    %c0_115 = arith.constant 0 : index
    %89 = vector.load %arg13[%c1_113, %c1_114, %c0_115] : memref<10x16x128xbf16, #tpu.memory_space<vmem>>, vector<8x8x128xbf16>
    tpu.vector_store %arg13[%c1_113, %c1_114, %c0_115], %88 {strides = array<i32>} : memref<10x16x128xbf16, #tpu.memory_space<vmem>>, vector<8x8x128xbf16>,
    %c0_116 = arith.constant 0 : index
    %c0_117 = arith.constant 0 : index
    %c0_118 = arith.constant 0 : index
    %90 = vector.load %arg13[%c0_116, %c0_117, %c0_118] : memref<10x16x128xbf16, #tpu.memory_space<vmem>>, vector<8x8x128xbf16>
    %91 = vector.shape_cast %90 : vector<8x8x128xbf16> to vector<64x128xbf16>
    %c0_119 = arith.constant 0 : index
    %c0_120 = arith.constant 0 : index
    %92 = vector.load %arg14[%c0_119, %c0_120] : memref<64x1152xbf16, #tpu.memory_space<vmem>>, vector<64x128xbf16>
    tpu.vector_store %arg14[%c0_119, %c0_120], %91 {strides = array<i32>} : memref<64x1152xbf16, #tpu.memory_space<vmem>>, vector<64x128xbf16>,
    %c0_121 = arith.constant 0 : index
    %c1_122 = arith.constant 1 : index
    %c0_123 = arith.constant 0 : index
    %93 = vector.load %arg13[%c0_121, %c1_122, %c0_123] : memref<10x16x128xbf16, #tpu.memory_space<vmem>>, vector<8x8x128xbf16>
    %94 = vector.shape_cast %93 : vector<8x8x128xbf16> to vector<64x128xbf16>
    %c0_124 = arith.constant 0 : index
    %c128_125 = arith.constant 128 : index
    %95 = vector.load %arg14[%c0_124, %c128_125] : memref<64x1152xbf16, #tpu.memory_space<vmem>>, vector<64x128xbf16>
    tpu.vector_store %arg14[%c0_124, %c128_125], %94 {strides = array<i32>} : memref<64x1152xbf16, #tpu.memory_space<vmem>>, vector<64x128xbf16>,
    %c0_126 = arith.constant 0 : index
    %c2_127 = arith.constant 2 : index
    %c0_128 = arith.constant 0 : index
    %96 = vector.load %arg13[%c0_126, %c2_127, %c0_128] : memref<10x16x128xbf16, #tpu.memory_space<vmem>>, vector<8x8x128xbf16>
    %97 = vector.shape_cast %96 : vector<8x8x128xbf16> to vector<64x128xbf16>
    %c0_129 = arith.constant 0 : index
    %c256_130 = arith.constant 256 : index
    %98 = vector.load %arg14[%c0_129, %c256_130] : memref<64x1152xbf16, #tpu.memory_space<vmem>>, vector<64x128xbf16>
    tpu.vector_store %arg14[%c0_129, %c256_130], %97 {strides = array<i32>} : memref<64x1152xbf16, #tpu.memory_space<vmem>>, vector<64x128xbf16>,
    %c1_131 = arith.constant 1 : index
    %c0_132 = arith.constant 0 : index
    %c0_133 = arith.constant 0 : index
    %99 = vector.load %arg13[%c1_131, %c0_132, %c0_133] : memref<10x16x128xbf16, #tpu.memory_space<vmem>>, vector<8x8x128xbf16>
    %100 = vector.shape_cast %99 : vector<8x8x128xbf16> to vector<64x128xbf16>
    %c0_134 = arith.constant 0 : index
    %c384_135 = arith.constant 384 : index
    %101 = vector.load %arg14[%c0_134, %c384_135] : memref<64x1152xbf16, #tpu.memory_space<vmem>>, vector<64x128xbf16>
    tpu.vector_store %arg14[%c0_134, %c384_135], %100 {strides = array<i32>} : memref<64x1152xbf16, #tpu.memory_space<vmem>>, vector<64x128xbf16>,
    %c1_136 = arith.constant 1 : index
    %c1_137 = arith.constant 1 : index
    %c0_138 = arith.constant 0 : index
    %102 = vector.load %arg13[%c1_136, %c1_137, %c0_138] : memref<10x16x128xbf16, #tpu.memory_space<vmem>>, vector<8x8x128xbf16>
    %103 = vector.shape_cast %102 : vector<8x8x128xbf16> to vector<64x128xbf16>
    %c0_139 = arith.constant 0 : index
    %c512_140 = arith.constant 512 : index
    %104 = vector.load %arg14[%c0_139, %c512_140] : memref<64x1152xbf16, #tpu.memory_space<vmem>>, vector<64x128xbf16>
    tpu.vector_store %arg14[%c0_139, %c512_140], %103 {strides = array<i32>} : memref<64x1152xbf16, #tpu.memory_space<vmem>>, vector<64x128xbf16>,
    %c1_141 = arith.constant 1 : index
    %c2_142 = arith.constant 2 : index
    %c0_143 = arith.constant 0 : index
    %105 = vector.load %arg13[%c1_141, %c2_142, %c0_143] : memref<10x16x128xbf16, #tpu.memory_space<vmem>>, vector<8x8x128xbf16>
    %106 = vector.shape_cast %105 : vector<8x8x128xbf16> to vector<64x128xbf16>
    %c0_144 = arith.constant 0 : index
    %c640_145 = arith.constant 640 : index
    %107 = vector.load %arg14[%c0_144, %c640_145] : memref<64x1152xbf16, #tpu.memory_space<vmem>>, vector<64x128xbf16>
    tpu.vector_store %arg14[%c0_144, %c640_145], %106 {strides = array<i32>} : memref<64x1152xbf16, #tpu.memory_space<vmem>>, vector<64x128xbf16>,
    %c2_146 = arith.constant 2 : index
    %c0_147 = arith.constant 0 : index
    %c0_148 = arith.constant 0 : index
    %108 = vector.load %arg13[%c2_146, %c0_147, %c0_148] : memref<10x16x128xbf16, #tpu.memory_space<vmem>>, vector<8x8x128xbf16>
    %109 = vector.shape_cast %108 : vector<8x8x128xbf16> to vector<64x128xbf16>
    %c0_149 = arith.constant 0 : index
    %c768_150 = arith.constant 768 : index
    %110 = vector.load %arg14[%c0_149, %c768_150] : memref<64x1152xbf16, #tpu.memory_space<vmem>>, vector<64x128xbf16>
    tpu.vector_store %arg14[%c0_149, %c768_150], %109 {strides = array<i32>} : memref<64x1152xbf16, #tpu.memory_space<vmem>>, vector<64x128xbf16>,
    %c2_151 = arith.constant 2 : index
    %c1_152 = arith.constant 1 : index
    %c0_153 = arith.constant 0 : index
    %111 = vector.load %arg13[%c2_151, %c1_152, %c0_153] : memref<10x16x128xbf16, #tpu.memory_space<vmem>>, vector<8x8x128xbf16>
    %112 = vector.shape_cast %111 : vector<8x8x128xbf16> to vector<64x128xbf16>
    %c0_154 = arith.constant 0 : index
    %c896_155 = arith.constant 896 : index
    %113 = vector.load %arg14[%c0_154, %c896_155] : memref<64x1152xbf16, #tpu.memory_space<vmem>>, vector<64x128xbf16>
    tpu.vector_store %arg14[%c0_154, %c896_155], %112 {strides = array<i32>} : memref<64x1152xbf16, #tpu.memory_space<vmem>>, vector<64x128xbf16>,
    %c2_156 = arith.constant 2 : index
    %c2_157 = arith.constant 2 : index
    %c0_158 = arith.constant 0 : index
    %114 = vector.load %arg13[%c2_156, %c2_157, %c0_158] : memref<10x16x128xbf16, #tpu.memory_space<vmem>>, vector<8x8x128xbf16>
    %115 = vector.shape_cast %114 : vector<8x8x128xbf16> to vector<64x128xbf16>
    %c0_159 = arith.constant 0 : index
    %c1024_160 = arith.constant 1024 : index
    %116 = vector.load %arg14[%c0_159, %c1024_160] : memref<64x1152xbf16, #tpu.memory_space<vmem>>, vector<64x128xbf16>
    tpu.vector_store %arg14[%c0_159, %c1024_160], %115 {strides = array<i32>} : memref<64x1152xbf16, #tpu.memory_space<vmem>>, vector<64x128xbf16>,
    %c0_161 = arith.constant 0 : index
    %c0_162 = arith.constant 0 : index
    %117 = vector.load %arg14[%c0_161, %c0_162] : memref<64x1152xbf16, #tpu.memory_space<vmem>>, vector<64x1152xbf16>
    %c0_163 = arith.constant 0 : index
    %c0_164 = arith.constant 0 : index
    %118 = vector.load %arg8[%c0_163, %c0_164] : memref<1152x128xbf16, #tpu.memory_space<vmem>>, vector<1152x128xbf16>
    %cst_165 = arith.constant dense<0.000000e+00> : vector<64x128xf32>
    %119 = tpu.matmul %117, %118, %cst_165 {dimension_numbers = #tpu.dot_dimension_numbers<[1], [0], [0], [1], [0, 0, 1, 1], [], []>} : vector<64x1152xbf16>, vector<1152x128xbf16>, vector<64x128xf32> -> vector<64x128xf32>
    %c0_166 = arith.constant 0 : index
    %c0_167 = arith.constant 0 : index
    %120 = vector.load %arg9[%c0_166, %c0_167] : memref<1x128xf32, #tpu.memory_space<vmem>>, vector<1x128xf32>
    %121 = vector.broadcast %120 : vector<1x128xf32> to vector<64x128xf32>
    %122 = arith.addf %119, %121 : vector<64x128xf32>
    %cst_168 = arith.constant 0.000000e+00 : f32
    %123 = vector.broadcast %cst_168 : f32 to vector<64x128xf32>
    %124 = arith.maximumf %122, %123 : vector<64x128xf32>
    %125 = arith.truncf %124 : vector<64x128xf32> to vector<64x128xbf16>
    %126 = vector.shape_cast %125 : vector<64x128xbf16> to vector<8x8x128xbf16>
    %c1_169 = arith.constant 1 : index
    %c1_170 = arith.constant 1 : index
    %c0_171 = arith.constant 0 : index
    %127 = vector.load %arg13[%c1_169, %c1_170, %c0_171] : memref<10x16x128xbf16, #tpu.memory_space<vmem>>, vector<8x8x128xbf16>
    tpu.vector_store %arg13[%c1_169, %c1_170, %c0_171], %126 {strides = array<i32>} : memref<10x16x128xbf16, #tpu.memory_space<vmem>>, vector<8x8x128xbf16>,
    %c1_172 = arith.constant 1 : index
    %c1_173 = arith.constant 1 : index
    %c0_174 = arith.constant 0 : index
    %128 = vector.load %arg13[%c1_172, %c1_173, %c0_174] : memref<10x16x128xbf16, #tpu.memory_space<vmem>>, vector<4x4x128xbf16>
    %129 = vector.shape_cast %128 : vector<4x4x128xbf16> to vector<16x128xbf16>
    %c0_175 = arith.constant 0 : index
    %c0_176 = arith.constant 0 : index
    %130 = vector.load %arg15[%c0_175, %c0_176] : memref<16x3200xbf16, #tpu.memory_space<vmem>>, vector<16x128xbf16>
    tpu.vector_store %arg15[%c0_175, %c0_176], %129 {strides = array<i32>} : memref<16x3200xbf16, #tpu.memory_space<vmem>>, vector<16x128xbf16>,
    %c1_177 = arith.constant 1 : index
    %c2_178 = arith.constant 2 : index
    %c0_179 = arith.constant 0 : index
    %131 = vector.load %arg13[%c1_177, %c2_178, %c0_179] : memref<10x16x128xbf16, #tpu.memory_space<vmem>>, vector<4x4x128xbf16>
    %132 = vector.shape_cast %131 : vector<4x4x128xbf16> to vector<16x128xbf16>
    %c0_180 = arith.constant 0 : index
    %c128_181 = arith.constant 128 : index
    %133 = vector.load %arg15[%c0_180, %c128_181] : memref<16x3200xbf16, #tpu.memory_space<vmem>>, vector<16x128xbf16>
    tpu.vector_store %arg15[%c0_180, %c128_181], %132 {strides = array<i32>} : memref<16x3200xbf16, #tpu.memory_space<vmem>>, vector<16x128xbf16>,
    %c1_182 = arith.constant 1 : index
    %c3 = arith.constant 3 : index
    %c0_183 = arith.constant 0 : index
    %134 = vector.load %arg13[%c1_182, %c3, %c0_183] : memref<10x16x128xbf16, #tpu.memory_space<vmem>>, vector<4x4x128xbf16>
    %135 = vector.shape_cast %134 : vector<4x4x128xbf16> to vector<16x128xbf16>
    %c0_184 = arith.constant 0 : index
    %c256_185 = arith.constant 256 : index
    %136 = vector.load %arg15[%c0_184, %c256_185] : memref<16x3200xbf16, #tpu.memory_space<vmem>>, vector<16x128xbf16>
    tpu.vector_store %arg15[%c0_184, %c256_185], %135 {strides = array<i32>} : memref<16x3200xbf16, #tpu.memory_space<vmem>>, vector<16x128xbf16>,
    %c1_186 = arith.constant 1 : index
    %c4 = arith.constant 4 : index
    %c0_187 = arith.constant 0 : index
    %137 = vector.load %arg13[%c1_186, %c4, %c0_187] : memref<10x16x128xbf16, #tpu.memory_space<vmem>>, vector<4x4x128xbf16>
    %138 = vector.shape_cast %137 : vector<4x4x128xbf16> to vector<16x128xbf16>
    %c0_188 = arith.constant 0 : index
    %c384_189 = arith.constant 384 : index
    %139 = vector.load %arg15[%c0_188, %c384_189] : memref<16x3200xbf16, #tpu.memory_space<vmem>>, vector<16x128xbf16>
    tpu.vector_store %arg15[%c0_188, %c384_189], %138 {strides = array<i32>} : memref<16x3200xbf16, #tpu.memory_space<vmem>>, vector<16x128xbf16>,
    %c1_190 = arith.constant 1 : index
    %c5 = arith.constant 5 : index
    %c0_191 = arith.constant 0 : index
    %140 = vector.load %arg13[%c1_190, %c5, %c0_191] : memref<10x16x128xbf16, #tpu.memory_space<vmem>>, vector<4x4x128xbf16>
    %141 = vector.shape_cast %140 : vector<4x4x128xbf16> to vector<16x128xbf16>
    %c0_192 = arith.constant 0 : index
    %c512_193 = arith.constant 512 : index
    %142 = vector.load %arg15[%c0_192, %c512_193] : memref<16x3200xbf16, #tpu.memory_space<vmem>>, vector<16x128xbf16>
    tpu.vector_store %arg15[%c0_192, %c512_193], %141 {strides = array<i32>} : memref<16x3200xbf16, #tpu.memory_space<vmem>>, vector<16x128xbf16>,
    %c2_194 = arith.constant 2 : index
    %c1_195 = arith.constant 1 : index
    %c0_196 = arith.constant 0 : index
    %143 = vector.load %arg13[%c2_194, %c1_195, %c0_196] : memref<10x16x128xbf16, #tpu.memory_space<vmem>>, vector<4x4x128xbf16>
    %144 = vector.shape_cast %143 : vector<4x4x128xbf16> to vector<16x128xbf16>
    %c0_197 = arith.constant 0 : index
    %c640_198 = arith.constant 640 : index
    %145 = vector.load %arg15[%c0_197, %c640_198] : memref<16x3200xbf16, #tpu.memory_space<vmem>>, vector<16x128xbf16>
    tpu.vector_store %arg15[%c0_197, %c640_198], %144 {strides = array<i32>} : memref<16x3200xbf16, #tpu.memory_space<vmem>>, vector<16x128xbf16>,
    %c2_199 = arith.constant 2 : index
    %c2_200 = arith.constant 2 : index
    %c0_201 = arith.constant 0 : index
    %146 = vector.load %arg13[%c2_199, %c2_200, %c0_201] : memref<10x16x128xbf16, #tpu.memory_space<vmem>>, vector<4x4x128xbf16>
    %147 = vector.shape_cast %146 : vector<4x4x128xbf16> to vector<16x128xbf16>
    %c0_202 = arith.constant 0 : index
    %c768_203 = arith.constant 768 : index
    %148 = vector.load %arg15[%c0_202, %c768_203] : memref<16x3200xbf16, #tpu.memory_space<vmem>>, vector<16x128xbf16>
    tpu.vector_store %arg15[%c0_202, %c768_203], %147 {strides = array<i32>} : memref<16x3200xbf16, #tpu.memory_space<vmem>>, vector<16x128xbf16>,
    %c2_204 = arith.constant 2 : index
    %c3_205 = arith.constant 3 : index
    %c0_206 = arith.constant 0 : index
    %149 = vector.load %arg13[%c2_204, %c3_205, %c0_206] : memref<10x16x128xbf16, #tpu.memory_space<vmem>>, vector<4x4x128xbf16>
    %150 = vector.shape_cast %149 : vector<4x4x128xbf16> to vector<16x128xbf16>
    %c0_207 = arith.constant 0 : index
    %c896_208 = arith.constant 896 : index
    %151 = vector.load %arg15[%c0_207, %c896_208] : memref<16x3200xbf16, #tpu.memory_space<vmem>>, vector<16x128xbf16>
    tpu.vector_store %arg15[%c0_207, %c896_208], %150 {strides = array<i32>} : memref<16x3200xbf16, #tpu.memory_space<vmem>>, vector<16x128xbf16>,
    %c2_209 = arith.constant 2 : index
    %c4_210 = arith.constant 4 : index
    %c0_211 = arith.constant 0 : index
    %152 = vector.load %arg13[%c2_209, %c4_210, %c0_211] : memref<10x16x128xbf16, #tpu.memory_space<vmem>>, vector<4x4x128xbf16>
    %153 = vector.shape_cast %152 : vector<4x4x128xbf16> to vector<16x128xbf16>
    %c0_212 = arith.constant 0 : index
    %c1024_213 = arith.constant 1024 : index
    %154 = vector.load %arg15[%c0_212, %c1024_213] : memref<16x3200xbf16, #tpu.memory_space<vmem>>, vector<16x128xbf16>
    tpu.vector_store %arg15[%c0_212, %c1024_213], %153 {strides = array<i32>} : memref<16x3200xbf16, #tpu.memory_space<vmem>>, vector<16x128xbf16>,
    %c2_214 = arith.constant 2 : index
    %c5_215 = arith.constant 5 : index
    %c0_216 = arith.constant 0 : index
    %155 = vector.load %arg13[%c2_214, %c5_215, %c0_216] : memref<10x16x128xbf16, #tpu.memory_space<vmem>>, vector<4x4x128xbf16>
    %156 = vector.shape_cast %155 : vector<4x4x128xbf16> to vector<16x128xbf16>
    %c0_217 = arith.constant 0 : index
    %c1152 = arith.constant 1152 : index
    %157 = vector.load %arg15[%c0_217, %c1152] : memref<16x3200xbf16, #tpu.memory_space<vmem>>, vector<16x128xbf16>
    tpu.vector_store %arg15[%c0_217, %c1152], %156 {strides = array<i32>} : memref<16x3200xbf16, #tpu.memory_space<vmem>>, vector<16x128xbf16>,
    %c3_218 = arith.constant 3 : index
    %c1_219 = arith.constant 1 : index
    %c0_220 = arith.constant 0 : index
    %158 = vector.load %arg13[%c3_218, %c1_219, %c0_220] : memref<10x16x128xbf16, #tpu.memory_space<vmem>>, vector<4x4x128xbf16>
    %159 = vector.shape_cast %158 : vector<4x4x128xbf16> to vector<16x128xbf16>
    %c0_221 = arith.constant 0 : index
    %c1280 = arith.constant 1280 : index
    %160 = vector.load %arg15[%c0_221, %c1280] : memref<16x3200xbf16, #tpu.memory_space<vmem>>, vector<16x128xbf16>
    tpu.vector_store %arg15[%c0_221, %c1280], %159 {strides = array<i32>} : memref<16x3200xbf16, #tpu.memory_space<vmem>>, vector<16x128xbf16>,
    %c3_222 = arith.constant 3 : index
    %c2_223 = arith.constant 2 : index
    %c0_224 = arith.constant 0 : index
    %161 = vector.load %arg13[%c3_222, %c2_223, %c0_224] : memref<10x16x128xbf16, #tpu.memory_space<vmem>>, vector<4x4x128xbf16>
    %162 = vector.shape_cast %161 : vector<4x4x128xbf16> to vector<16x128xbf16>
    %c0_225 = arith.constant 0 : index
    %c1408 = arith.constant 1408 : index
    %163 = vector.load %arg15[%c0_225, %c1408] : memref<16x3200xbf16, #tpu.memory_space<vmem>>, vector<16x128xbf16>
    tpu.vector_store %arg15[%c0_225, %c1408], %162 {strides = array<i32>} : memref<16x3200xbf16, #tpu.memory_space<vmem>>, vector<16x128xbf16>,
    %c3_226 = arith.constant 3 : index
    %c3_227 = arith.constant 3 : index
    %c0_228 = arith.constant 0 : index
    %164 = vector.load %arg13[%c3_226, %c3_227, %c0_228] : memref<10x16x128xbf16, #tpu.memory_space<vmem>>, vector<4x4x128xbf16>
    %165 = vector.shape_cast %164 : vector<4x4x128xbf16> to vector<16x128xbf16>
    %c0_229 = arith.constant 0 : index
    %c1536 = arith.constant 1536 : index
    %166 = vector.load %arg15[%c0_229, %c1536] : memref<16x3200xbf16, #tpu.memory_space<vmem>>, vector<16x128xbf16>
    tpu.vector_store %arg15[%c0_229, %c1536], %165 {strides = array<i32>} : memref<16x3200xbf16, #tpu.memory_space<vmem>>, vector<16x128xbf16>,
    %c3_230 = arith.constant 3 : index
    %c4_231 = arith.constant 4 : index
    %c0_232 = arith.constant 0 : index
    %167 = vector.load %arg13[%c3_230, %c4_231, %c0_232] : memref<10x16x128xbf16, #tpu.memory_space<vmem>>, vector<4x4x128xbf16>
    %168 = vector.shape_cast %167 : vector<4x4x128xbf16> to vector<16x128xbf16>
    %c0_233 = arith.constant 0 : index
    %c1664 = arith.constant 1664 : index
    %169 = vector.load %arg15[%c0_233, %c1664] : memref<16x3200xbf16, #tpu.memory_space<vmem>>, vector<16x128xbf16>
    tpu.vector_store %arg15[%c0_233, %c1664], %168 {strides = array<i32>} : memref<16x3200xbf16, #tpu.memory_space<vmem>>, vector<16x128xbf16>,
    %c3_234 = arith.constant 3 : index
    %c5_235 = arith.constant 5 : index
    %c0_236 = arith.constant 0 : index
    %170 = vector.load %arg13[%c3_234, %c5_235, %c0_236] : memref<10x16x128xbf16, #tpu.memory_space<vmem>>, vector<4x4x128xbf16>
    %171 = vector.shape_cast %170 : vector<4x4x128xbf16> to vector<16x128xbf16>
    %c0_237 = arith.constant 0 : index
    %c1792 = arith.constant 1792 : index
    %172 = vector.load %arg15[%c0_237, %c1792] : memref<16x3200xbf16, #tpu.memory_space<vmem>>, vector<16x128xbf16>
    tpu.vector_store %arg15[%c0_237, %c1792], %171 {strides = array<i32>} : memref<16x3200xbf16, #tpu.memory_space<vmem>>, vector<16x128xbf16>,
    %c4_238 = arith.constant 4 : index
    %c1_239 = arith.constant 1 : index
    %c0_240 = arith.constant 0 : index
    %173 = vector.load %arg13[%c4_238, %c1_239, %c0_240] : memref<10x16x128xbf16, #tpu.memory_space<vmem>>, vector<4x4x128xbf16>
    %174 = vector.shape_cast %173 : vector<4x4x128xbf16> to vector<16x128xbf16>
    %c0_241 = arith.constant 0 : index
    %c1920 = arith.constant 1920 : index
    %175 = vector.load %arg15[%c0_241, %c1920] : memref<16x3200xbf16, #tpu.memory_space<vmem>>, vector<16x128xbf16>
    tpu.vector_store %arg15[%c0_241, %c1920], %174 {strides = array<i32>} : memref<16x3200xbf16, #tpu.memory_space<vmem>>, vector<16x128xbf16>,
    %c4_242 = arith.constant 4 : index
    %c2_243 = arith.constant 2 : index
    %c0_244 = arith.constant 0 : index
    %176 = vector.load %arg13[%c4_242, %c2_243, %c0_244] : memref<10x16x128xbf16, #tpu.memory_space<vmem>>, vector<4x4x128xbf16>
    %177 = vector.shape_cast %176 : vector<4x4x128xbf16> to vector<16x128xbf16>
    %c0_245 = arith.constant 0 : index
    %c2048 = arith.constant 2048 : index
    %178 = vector.load %arg15[%c0_245, %c2048] : memref<16x3200xbf16, #tpu.memory_space<vmem>>, vector<16x128xbf16>
    tpu.vector_store %arg15[%c0_245, %c2048], %177 {strides = array<i32>} : memref<16x3200xbf16, #tpu.memory_space<vmem>>, vector<16x128xbf16>,
    %c4_246 = arith.constant 4 : index
    %c3_247 = arith.constant 3 : index
    %c0_248 = arith.constant 0 : index
    %179 = vector.load %arg13[%c4_246, %c3_247, %c0_248] : memref<10x16x128xbf16, #tpu.memory_space<vmem>>, vector<4x4x128xbf16>
    %180 = vector.shape_cast %179 : vector<4x4x128xbf16> to vector<16x128xbf16>
    %c0_249 = arith.constant 0 : index
    %c2176 = arith.constant 2176 : index
    %181 = vector.load %arg15[%c0_249, %c2176] : memref<16x3200xbf16, #tpu.memory_space<vmem>>, vector<16x128xbf16>
    tpu.vector_store %arg15[%c0_249, %c2176], %180 {strides = array<i32>} : memref<16x3200xbf16, #tpu.memory_space<vmem>>, vector<16x128xbf16>,
    %c4_250 = arith.constant 4 : index
    %c4_251 = arith.constant 4 : index
    %c0_252 = arith.constant 0 : index
    %182 = vector.load %arg13[%c4_250, %c4_251, %c0_252] : memref<10x16x128xbf16, #tpu.memory_space<vmem>>, vector<4x4x128xbf16>
    %183 = vector.shape_cast %182 : vector<4x4x128xbf16> to vector<16x128xbf16>
    %c0_253 = arith.constant 0 : index
    %c2304 = arith.constant 2304 : index
    %184 = vector.load %arg15[%c0_253, %c2304] : memref<16x3200xbf16, #tpu.memory_space<vmem>>, vector<16x128xbf16>
    tpu.vector_store %arg15[%c0_253, %c2304], %183 {strides = array<i32>} : memref<16x3200xbf16, #tpu.memory_space<vmem>>, vector<16x128xbf16>,
    %c4_254 = arith.constant 4 : index
    %c5_255 = arith.constant 5 : index
    %c0_256 = arith.constant 0 : index
    %185 = vector.load %arg13[%c4_254, %c5_255, %c0_256] : memref<10x16x128xbf16, #tpu.memory_space<vmem>>, vector<4x4x128xbf16>
    %186 = vector.shape_cast %185 : vector<4x4x128xbf16> to vector<16x128xbf16>
    %c0_257 = arith.constant 0 : index
    %c2432 = arith.constant 2432 : index
    %187 = vector.load %arg15[%c0_257, %c2432] : memref<16x3200xbf16, #tpu.memory_space<vmem>>, vector<16x128xbf16>
    tpu.vector_store %arg15[%c0_257, %c2432], %186 {strides = array<i32>} : memref<16x3200xbf16, #tpu.memory_space<vmem>>, vector<16x128xbf16>,
    %c5_258 = arith.constant 5 : index
    %c1_259 = arith.constant 1 : index
    %c0_260 = arith.constant 0 : index
    %188 = vector.load %arg13[%c5_258, %c1_259, %c0_260] : memref<10x16x128xbf16, #tpu.memory_space<vmem>>, vector<4x4x128xbf16>
    %189 = vector.shape_cast %188 : vector<4x4x128xbf16> to vector<16x128xbf16>
    %c0_261 = arith.constant 0 : index
    %c2560 = arith.constant 2560 : index
    %190 = vector.load %arg15[%c0_261, %c2560] : memref<16x3200xbf16, #tpu.memory_space<vmem>>, vector<16x128xbf16>
    tpu.vector_store %arg15[%c0_261, %c2560], %189 {strides = array<i32>} : memref<16x3200xbf16, #tpu.memory_space<vmem>>, vector<16x128xbf16>,
    %c5_262 = arith.constant 5 : index
    %c2_263 = arith.constant 2 : index
    %c0_264 = arith.constant 0 : index
    %191 = vector.load %arg13[%c5_262, %c2_263, %c0_264] : memref<10x16x128xbf16, #tpu.memory_space<vmem>>, vector<4x4x128xbf16>
    %192 = vector.shape_cast %191 : vector<4x4x128xbf16> to vector<16x128xbf16>
    %c0_265 = arith.constant 0 : index
    %c2688 = arith.constant 2688 : index
    %193 = vector.load %arg15[%c0_265, %c2688] : memref<16x3200xbf16, #tpu.memory_space<vmem>>, vector<16x128xbf16>
    tpu.vector_store %arg15[%c0_265, %c2688], %192 {strides = array<i32>} : memref<16x3200xbf16, #tpu.memory_space<vmem>>, vector<16x128xbf16>,
    %c5_266 = arith.constant 5 : index
    %c3_267 = arith.constant 3 : index
    %c0_268 = arith.constant 0 : index
    %194 = vector.load %arg13[%c5_266, %c3_267, %c0_268] : memref<10x16x128xbf16, #tpu.memory_space<vmem>>, vector<4x4x128xbf16>
    %195 = vector.shape_cast %194 : vector<4x4x128xbf16> to vector<16x128xbf16>
    %c0_269 = arith.constant 0 : index
    %c2816 = arith.constant 2816 : index
    %196 = vector.load %arg15[%c0_269, %c2816] : memref<16x3200xbf16, #tpu.memory_space<vmem>>, vector<16x128xbf16>
    tpu.vector_store %arg15[%c0_269, %c2816], %195 {strides = array<i32>} : memref<16x3200xbf16, #tpu.memory_space<vmem>>, vector<16x128xbf16>,
    %c5_270 = arith.constant 5 : index
    %c4_271 = arith.constant 4 : index
    %c0_272 = arith.constant 0 : index
    %197 = vector.load %arg13[%c5_270, %c4_271, %c0_272] : memref<10x16x128xbf16, #tpu.memory_space<vmem>>, vector<4x4x128xbf16>
    %198 = vector.shape_cast %197 : vector<4x4x128xbf16> to vector<16x128xbf16>
    %c0_273 = arith.constant 0 : index
    %c2944 = arith.constant 2944 : index
    %199 = vector.load %arg15[%c0_273, %c2944] : memref<16x3200xbf16, #tpu.memory_space<vmem>>, vector<16x128xbf16>
    tpu.vector_store %arg15[%c0_273, %c2944], %198 {strides = array<i32>} : memref<16x3200xbf16, #tpu.memory_space<vmem>>, vector<16x128xbf16>,
    %c5_274 = arith.constant 5 : index
    %c5_275 = arith.constant 5 : index
    %c0_276 = arith.constant 0 : index
    %200 = vector.load %arg13[%c5_274, %c5_275, %c0_276] : memref<10x16x128xbf16, #tpu.memory_space<vmem>>, vector<4x4x128xbf16>
    %201 = vector.shape_cast %200 : vector<4x4x128xbf16> to vector<16x128xbf16>
    %c0_277 = arith.constant 0 : index
    %c3072 = arith.constant 3072 : index
    %202 = vector.load %arg15[%c0_277, %c3072] : memref<16x3200xbf16, #tpu.memory_space<vmem>>, vector<16x128xbf16>
    tpu.vector_store %arg15[%c0_277, %c3072], %201 {strides = array<i32>} : memref<16x3200xbf16, #tpu.memory_space<vmem>>, vector<16x128xbf16>,
    %c0_278 = arith.constant 0 : index
    %c0_279 = arith.constant 0 : index
    %203 = vector.load %arg15[%c0_278, %c0_279] : memref<16x3200xbf16, #tpu.memory_space<vmem>>, vector<16x3200xbf16>
    %c0_280 = arith.constant 0 : index
    %c0_281 = arith.constant 0 : index
    %204 = vector.load %arg10[%c0_280, %c0_281] : memref<3200x128xbf16, #tpu.memory_space<vmem>>, vector<3200x128xbf16>
    %cst_282 = arith.constant dense<0.000000e+00> : vector<16x128xf32>
    %205 = tpu.matmul %203, %204, %cst_282 {dimension_numbers = #tpu.dot_dimension_numbers<[1], [0], [0], [1], [0, 0, 1, 1], [], []>} : vector<16x3200xbf16>, vector<3200x128xbf16>, vector<16x128xf32> -> vector<16x128xf32>
    %c0_283 = arith.constant 0 : index
    %c0_284 = arith.constant 0 : index
    %206 = vector.load %arg11[%c0_283, %c0_284] : memref<1x128xf32, #tpu.memory_space<vmem>>, vector<1x128xf32>
    %207 = vector.broadcast %206 : vector<1x128xf32> to vector<16x128xf32>
    %208 = arith.addf %205, %207 : vector<16x128xf32>
    %209 = arith.negf %208 : vector<16x128xf32>
    %210 = math.exp %209 : vector<16x128xf32>
    %cst_285 = arith.constant 1.000000e+00 : f32
    %211 = vector.broadcast %cst_285 : f32 to vector<16x128xf32>
    %212 = arith.addf %211, %210 : vector<16x128xf32>
    %213 = arith.divf %211, %212 : vector<16x128xf32>
    %c0_286 = arith.constant 0 : index
    %c0_287 = arith.constant 0 : index
    %c0_288 = arith.constant 0 : index
    %214 = vector.load %arg12[%c0_286, %c0_287, %c0_288] : memref<1x16x128xf32, #tpu.memory_space<vmem>>, vector<1x16x128xf32>
    %215 = vector.shape_cast %214 : vector<1x16x128xf32> to vector<16x128xf32>
    %216 = vector.shape_cast %213 : vector<16x128xf32> to vector<1x16x128xf32>
    tpu.vector_store %arg12[%c0_286, %c0_287, %c0_288], %216 {strides = array<i32>} : memref<1x16x128xf32, #tpu.memory_space<vmem>>, vector<1x16x128xf32>,
    return
  }
  func.func @transform_0(%arg0: i32) -> (i32, i32, i32) {
    %c0_i32 = arith.constant 0 : i32
    %c0_i32_0 = arith.constant 0 : i32
    %c0_i32_1 = arith.constant 0 : i32
    return %arg0, %c0_i32, %c0_i32_0 : i32, i32, i32
  }
  func.func @transform_1(%arg0: i32) -> (i32, i32) {
    %c0_i32 = arith.constant 0 : i32
    %c0_i32_0 = arith.constant 0 : i32
    %c0_i32_1 = arith.constant 0 : i32
    return %c0_i32, %c0_i32_0 : i32, i32
  }
  func.func @transform_2(%arg0: i32) -> (i32, i32) {
    %c0_i32 = arith.constant 0 : i32
    %c0_i32_0 = arith.constant 0 : i32
    %c0_i32_1 = arith.constant 0 : i32
    return %c0_i32, %c0_i32_0 : i32, i32
  }
  func.func @transform_3(%arg0: i32) -> (i32, i32) {
    %c0_i32 = arith.constant 0 : i32
    %c0_i32_0 = arith.constant 0 : i32
    %c0_i32_1 = arith.constant 0 : i32
    return %c0_i32, %c0_i32_0 : i32, i32
  }
  func.func @transform_4(%arg0: i32) -> (i32, i32) {
    %c0_i32 = arith.constant 0 : i32
    %c0_i32_0 = arith.constant 0 : i32
    %c0_i32_1 = arith.constant 0 : i32
    return %c0_i32, %c0_i32_0 : i32, i32
  }
  func.func @transform_5(%arg0: i32) -> (i32, i32) {
    %c0_i32 = arith.constant 0 : i32
    %c0_i32_0 = arith.constant 0 : i32
    %c0_i32_1 = arith.constant 0 : i32
    return %c0_i32, %c0_i32_0 : i32, i32
  }
  func.func @transform_6(%arg0: i32) -> (i32, i32) {
    %c0_i32 = arith.constant 0 : i32
    %c0_i32_0 = arith.constant 0 : i32
    %c0_i32_1 = arith.constant 0 : i32
    return %c0_i32, %c0_i32_0 : i32, i32
  }
  func.func @transform_7(%arg0: i32) -> (i32, i32) {
    %c0_i32 = arith.constant 0 : i32
    %c0_i32_0 = arith.constant 0 : i32
    %c0_i32_1 = arith.constant 0 : i32
    return %c0_i32, %c0_i32_0 : i32, i32
  }
  func.func @transform_8(%arg0: i32) -> (i32, i32) {
    %c0_i32 = arith.constant 0 : i32
    %c0_i32_0 = arith.constant 0 : i32
    %c0_i32_1 = arith.constant 0 : i32
    return %c0_i32, %c0_i32_0 : i32, i32
  }
  func.func @transform_9(%arg0: i32) -> (i32, i32) {
    %c0_i32 = arith.constant 0 : i32
    %c0_i32_0 = arith.constant 0 : i32
    %c0_i32_1 = arith.constant 0 : i32
    return %c0_i32, %c0_i32_0 : i32, i32
  }
  func.func @transform_10(%arg0: i32) -> (i32, i32) {
    %c0_i32 = arith.constant 0 : i32
    %c0_i32_0 = arith.constant 0 : i32
    %c0_i32_1 = arith.constant 0 : i32
    return %c0_i32, %c0_i32_0 : i32, i32
  }
  func.func @transform_11(%arg0: i32) -> (i32, i32, i32) {
    %c0_i32 = arith.constant 0 : i32
    %c0_i32_0 = arith.constant 0 : i32
    %c0_i32_1 = arith.constant 0 : i32
    return %arg0, %c0_i32, %c0_i32_0 : i32, i32, i32
  }
}

</mosaic_0001>

<bundles_post_ra>
// kernel: squeeze.3
= control target key start
LH: loop header
LB: loop body
LE: loop exit
PB: predicated region body
PF: predicated region fallthrough
CT: control target
= control target key end

     0   :  { %s85_s0 = inlined_call_operand.vmem [shape: f32[2,16], index: 0, kind: input, shape index: {}]   ;;  %s86_s1 = inlined_call_operand.hbm [shape: f32[32,1], index: 1, kind: output, shape index: {}]  }
   0x1   :  { %v5_v0 = vld [vmem:[%s85_s0] sm:$0x3] }
   0x2   :  { %6 = vst [vmem:[#allocation3] sm:$0x3] %v5_v0 }
   0x3   :  { %2 = vsyncpa [#allocation1], 0  ;;  %vm8_vm0 = vcmask 130048   ;;  %s58_s0 = smov 16   ;;  %vm14_vm1 = vcmask 261248   ;;  %s59_s8 = smov [#allocation0]  }
   0x4   :  { %s26_s9 = sshll.u32 %s59_s8, 4  ;;  %s27_s9 = int_to_ptr.vmem [resolvable:$true] %s26_s9 }
   0x5   :  { %s34_s10 = scalar_lea.vmem %s27_s9, 16  ;;  %s38_s11 = scalar_lea.vmem %s27_s9, 32 }
   0x6   :  { %p35_p0 = scmp.ne.s32.totalorder %s27_s9, %s34_s10  ;;  %p39_p1 = scmp.lt.s32.totalorder %s27_s9, %s27_s9 }
   0x7   :  { %p40_p2 = scmp.lt.s32.totalorder %s38_s11, %s34_s10 }
   0x9   :  { %v11_v1 = vld [vmem:[#allocation3 + $0x1] sm:$0x1]   ;;  %v7_v2 = vld [vmem:[#allocation3] sm:$0x1]   ;;  %p41_p3 = por %p40_p2, %p39_p1 }
   0xa   :  { %12 = vrot.lane.b32.xlu0 %v11_v1, %s58_s0  ;;  %9 = vst.msk [vmem:[#allocation2] sm:$0x1] %vm8_vm0, %v7_v2  }
   0xb   :  { %p42_p4 = pnand %p41_p3, %p35_p0 }
  0x7c   :  { %v13_v3 = vpop.permute.xlu0 %12  }
  0x7d   :  { %15 = vst.msk [vmem:[#allocation2] sm:$0x1] %vm14_vm1, %v13_v3  }
  0x84   :  { %v19_v4 = vld [vmem:[#allocation2] sm:$0x1] }
  0x85   :  { %21 = vst [vmem:[#allocation0] sm:$0x1] %v19_v4 }
  0x86   :  { %45 = shalt.err (!%p42_p4)
}
  0x87   :  { %s46_s14 = scalar_lea.hbm %s86_s1, 16 }
  0x88   :  { %p47_p5 = scmp.ne.s32.totalorder %s86_s1, %s46_s14  ;;  %p50_p6 = scmp.lt.u32.totalorder %s46_s14, %s86_s1 }
  0x8a   :  { %p52_p7 = pnand %p50_p6, %p47_p5 }
  0x8c   :  { %55 = shalt.err (!%p52_p7)
}
  0x8d   :  { %29 = dma.vmem_to_hbm [thread:$0]  %s27_s9, 16, %s86_s1, [#allocation1]  }
  0x8e   :  { %56 = dma.done.wait [#allocation1], 16  }
  0x8f   :  { %57 = vsyncadd [#allocation1], 4294967280 }
  0x90   :  { %31 = vsyncpa [#allocation1], 1 }

// kernel: net_forward_pallas.1
= control target key start
LH: loop header
LB: loop body
LE: loop exit
PB: predicated region body
PF: predicated region fallthrough
CT: control target
= control target key end

     0   :  { %s14417_s17 = smov 0   ;;  %s16856_s0 = inlined_call_operand.vmem [shape: bf16[2,64,128], index: 0, kind: input, shape index: {}]   ;;  %s16857_s1 = inlined_call_operand.vmem [shape: bf16[128,128], index: 1, kind: input, shape index: {}]   ;;  %s16858_s2 = inlined_call_operand.vmem [shape: f32[1,128], index: 2, kind: input, shape index: {}]   ;;  %s16859_s3 = inlined_call_operand.vmem [shape: bf16[1152,128], index: 3, kind: input, shape index: {}]   ;;  %s16860_s4 = inlined_call_operand.vmem [shape: f32[1,128], index: 4, kind: input, shape index: {}]   ;;  %s16861_s5 = inlined_call_operand.vmem [shape: bf16[1152,128], index: 5, kind: input, shape index: {}]   ;;  %s16862_s6 = inlined_call_operand.vmem [shape: f32[1,128], index: 6, kind: input, shape index: {}]   ;;  %s16863_s7 = inlined_call_operand.vmem [shape: bf16[1152,128], index: 7, kind: input, shape index: {}]   ;;  %s16864_s8 = inlined_call_operand.vmem [shape: f32[1,128], index: 8, kind: input, shape index: {}]   ;;  %s16865_s9 = inlined_call_operand.vmem [shape: bf16[3200,128], index: 9, kind: input, shape index: {}]   ;;  %s16866_s10 = inlined_call_operand.vmem [shape: f32[1,128], index: 10, kind: input, shape index: {}]   ;;  %s16867_s11 = inlined_call_operand.vmem [shape: f32[2,16,128], index: 11, kind: output, shape index: {}]  }
   0x1 LB: > { %s11526_s18 = sadd.s32 4294967295, %s14351_s17   ;;  %p11530_p0 = scmp.ge.s32.totalorder %s14351_s17, 1  ;;  %s14351_s17 = sphi %s14417_s17, %s21_s17  }
   0x2   : > { %p337_p1 = scmp.lt.s32.totalorder %s14351_s17, 3 }
   0x4   : > { %p338_p2 = pnand %p11530_p0, %p337_p1 }
   0x5   : > { %v13565_v0 = vld [vmem:[%s16857_s1] sm:$0xff] (!%p338_p2)   ;;  %p377_p3 = scmp.lt.s32.totalorder (!%p338_p2), %s11526_s18, 1  ;;  %v13566_v1 = vld [vmem:[%s16857_s1 + $0x8] sm:$0xff] (!%p338_p2)   ;;  %v14353_v2 = vmov (!%p338_p2), 0   ;;  %v13567_v3 = vld [vmem:[%s16857_s1 + $0x10] sm:$0xff] (!%p338_p2)   ;;  %vm663_vm0 = vcmask (!%p338_p2), 1044480  }
   0x6   : > { %341 = sbr.rel (%p338_p2) target bundleno = 1742 (0x6ce), region = 64  ;;  %13437 = vmatprep.subr.bf16.mxu0 (!%p338_p2), %v13565_v0  ;;  %391 = vst [vmem:[#allocation2 + $0x18] sm:$0xff] (!%p338_p2), %v14353_v2  ;;  %388 = vst [vmem:[#allocation2] sm:$0xff] (!%p338_p2), %v14353_v2  ;;  %v13568_v4 = vld [vmem:[%s16857_s1 + $0x18] sm:$0xff] (!%p338_p2)   ;;  %v13569_v6 = vld [vmem:[%s16857_s1 + $0x20] sm:$0xff] (!%p338_p2)   ;;  %vm957_vm2 = vcmask (!%p338_p2), 1042432  }
   0x7   : > { %389 = vst [vmem:[#allocation2 + $0x8] sm:$0xff] (!%p338_p2), %v14353_v2  ;;  %390 = vst [vmem:[#allocation2 + $0x10] sm:$0xff] (!%p338_p2), %v14353_v2  ;;  %13438 = vmatpush3.bf16.msra.mxu0 (!%p338_p2), %v13565_v0  ;;  %v13570_v7 = vld [vmem:[%s16857_s1 + $0x28] sm:$0xff] (!%p338_p2)   ;;  %v13571_v8 = vld [vmem:[%s16857_s1 + $0x30] sm:$0xff] (!%p338_p2)   ;;  %vm664_vm1 = vsmask.f32 (!%p338_p2), 4354 }
   0x8   : > { %392 = vst [vmem:[#allocation2 + $0x20] sm:$0xff] (!%p338_p2), %v14353_v2  ;;  %393 = vst [vmem:[#allocation2 + $0x28] sm:$0xff] (!%p338_p2), %v14353_v2  ;;  %13439 = vmatprep.subr.bf16.mxu0 (!%p338_p2), %v13566_v1  ;;  %v13572_v9 = vld [vmem:[%s16857_s1 + $0x38] sm:$0xff] (!%p338_p2)   ;;  %v13577_v10 = vld [vmem:[%s16859_s3 + $0xc0] sm:$0xff] (!%p338_p2)   ;;  %vm958_vm3 = vcmask (!%p338_p2), 1046532   ;;  %vm6895_vm9 = vcmask (!%p338_p2), 1040384  }
   0x9   : > { %394 = vst [vmem:[#allocation2 + $0x30] sm:$0xff] (!%p338_p2), %v14353_v2  ;;  %395 = vst [vmem:[#allocation2 + $0x38] sm:$0xff] (!%p338_p2), %v14353_v2  ;;  %v13578_v13 = vld [vmem:[%s16859_s3 + $0x80] sm:$0xff] (!%p338_p2)   ;;  %v13579_v15 = vld [vmem:[%s16859_s3 + $0xc8] sm:$0xff] (!%p338_p2)   ;;  %vm774_vm4 = vsmask.f32 (!%p338_p2), 3328 }
   0xa   : > { %396 = vst [vmem:[#allocation2 + $0x40] sm:$0xff] (!%p338_p2), %v14353_v2  ;;  %397 = vst [vmem:[#allocation2 + $0x48] sm:$0xff] (!%p338_p2), %v14353_v2  ;;  %v13580_v16 = vld [vmem:[%s16859_s3 + $0x88] sm:$0xff] (!%p338_p2)   ;;  %v13581_v17 = vld [vmem:[%s16859_s3 + $0x40] sm:$0xff] (!%p338_p2)   ;;  %vm775_vm5 = vsmask.f32 (!%p338_p2), 7440 }
   0xb   : > { %13440 = vmatpush3.bf16.msra.mxu0 (!%p338_p2), %v13566_v1  ;;  %v13582_v18 = vld [vmem:[%s16859_s3] sm:$0xff] (!%p338_p2)   ;;  %v13583_v19 = vld [vmem:[%s16859_s3 + $0xd0] sm:$0xff] (!%p338_p2)   ;;  %12648 = vmatprep.subr.bf16.mxu1 (!%p338_p2), %v13581_v17  ;;  %v13585_v21 = vld [vmem:[%s16859_s3 + $0x48] sm:$0xff] (!%p338_p2)   ;;  %vm6896_vm10 = vcmask (!%p338_p2), 1042434   ;;  %vm6898_vm11 = vcmask (!%p338_p2), 1044484   ;;  %vm6900_vm12 = vcmask (!%p338_p2), 1046534  }
   0xc   : > { %13441 = vmatprep.subr.bf16.mxu0 (!%p338_p2), %v13567_v3  ;;  %v13584_v20 = vld [vmem:[%s16859_s3 + $0x90] sm:$0xff] (!%p338_p2)   ;;  %12649 = vmatpush3.bf16.msra.mxu1 (!%p338_p2), %v13582_v18  ;;  %v13586_v22 = vld [vmem:[%s16859_s3 + $0x8] sm:$0xff] (!%p338_p2)   ;;  %v13587_v23 = vld [vmem:[%s16859_s3 + $0xd8] sm:$0xff] (!%p338_p2)   ;;  %vm6773_vm14 = vsmask.f32 (!%p338_p2), 1280 }
   0xd   : > { %s16887_s18 = smov (!%p377_p3, %s11526_s18), 1  ;;  %12650 = vmatprep.subr.bf16.mxu1 %v13585_v21  ;;  %v13588_v24 = vld [vmem:[%s16859_s3 + $0x98] sm:$0xff]   ;;  %v13589_v25 = vld [vmem:[%s16859_s3 + $0x50] sm:$0xff]   ;;  %v13591_v27 = vld [vmem:[%s16859_s3 + $0xe0] sm:$0xff]   ;;  %vm6774_vm15 = vsmask.f32 3336 }
   0xe   : > { %s12602_s25 = sshll.u32 %s16887_s18, 5  ;;  %v13590_v26 = vld [vmem:[%s16859_s3 + $0x10] sm:$0xff]   ;;  %v13592_v28 = vld [vmem:[%s16859_s3 + $0xa0] sm:$0xff]   ;;  %v13593_v29 = vld [vmem:[%s16859_s3 + $0x58] sm:$0xff]   ;;  %s12603_s13 = sshll.u32 %s16887_s18, 4 }
   0xf   : > { %s381_s28 = scalar_lea.vmem %s16856_s0, %s12602_s25  ;;  %13442 = vmatpush3.bf16.msra.mxu0 %v13567_v3  ;;  %v13594_v30 = vld [vmem:[%s16859_s3 + $0x18] sm:$0xff]   ;;  %v13595_v31 = vld [vmem:[%s16859_s3 + $0xe8] sm:$0xff]   ;;  %v13597_v33 = vld [vmem:[%s16859_s3 + $0x60] sm:$0xff]  }
  0x10   : > { %v13573_v5 = vld [vmem:[%s381_s28] sm:$0xff]   ;;  %13443 = vmatprep.subr.bf16.mxu0 %v13568_v4  ;;  %v13574_v11 = vld [vmem:[%s381_s28 + $0x8] sm:$0xff]   ;;  %v13575_v12 = vld [vmem:[%s381_s28 + $0x10] sm:$0xff]   ;;  %12651 = vmatpush3.bf16.msra.mxu1 %v13586_v22 }
  0x11   : > { %13453 = vmatprep.mubr.bf16.mxu0 %v13573_v5  ;;  %v13576_v14 = vld [vmem:[%s381_s28 + $0x18] sm:$0xff]   ;;  %12652 = vmatprep.subr.bf16.mxu1 %v13589_v25  ;;  %v13596_v32 = vld [vmem:[%s16859_s3 + $0xa8] sm:$0xff]   ;;  %v13598_v34 = vld [vmem:[%s16859_s3 + $0x20] sm:$0xff]   ;;  %s386_s28 = scalar_lea.vmem %s16867_s11, %s12603_s13 }
  0x12   : > { %v13599_v35 = vld [vmem:[%s16859_s3 + $0xf0] sm:$0xff]   ;;  %v13601_v37 = vld [vmem:[%s16859_s3 + $0x68] sm:$0xff]   ;;  %v13603_v39 = vld [vmem:[%s16859_s3 + $0xf8] sm:$0xff]  }
  0x13   : > { %13444 = vmatpush3.bf16.msra.mxu0 %v13568_v4  ;;  %v13600_v36 = vld [vmem:[%s16859_s3 + $0xb0] sm:$0xff]   ;;  %v13602_v38 = vld [vmem:[%s16859_s3 + $0x28] sm:$0xff]   ;;  %v13604_v40 = vld [vmem:[%s16859_s3 + $0xb8] sm:$0xff]  }
  0x14   : > { %13445 = vmatprep.subr.bf16.mxu0 %v13569_v6  ;;  %12653 = vmatpush3.bf16.msra.mxu1 %v13590_v26  ;;  %v13606_v41 = vld [vmem:[%s16859_s3 + $0x70] sm:$0xff]   ;;  %v13612_v43 = vld [vmem:[%s16859_s3 + $0x1c0] sm:$0xff]   ;;  %v13615_v44 = vld [vmem:[%s16859_s3 + $0x78] sm:$0xff]  }
  0x15   : > { %12654 = vmatprep.subr.bf16.mxu1 %v13593_v29  ;;  %v13607_v42 = vld [vmem:[%s16859_s3 + $0x30] sm:$0xff]   ;;  %v13616_v45 = vld [vmem:[%s16859_s3 + $0x38] sm:$0xff]   ;;  %v13623_v46 = vld [vmem:[%s16859_s3 + $0x140] sm:$0xff]  }
  0x16   : > { %v726_v47 = vld [vmem:[#allocation2] sm:$0x1f]  ;;  %v1372_v51 = vld [vmem:[#allocation2 + $0x48] sm:$0x1f]  ;;  %vm14582_vm6 = vmand %vm663_vm0, %vm664_vm1  ;;  %vm6776_vm1 = vsmask.f32 5392 }
  0x17   : > { %13446 = vmatpush3.bf16.msra.mxu0 %v13569_v6  ;;  %v11560_v48 = vcombine.low %v726_v47, %v726_v47  ;;  %v11678_v52 = vcombine.low %v1372_v51, %v1372_v51  ;;  %v909_v55 = vld [vmem:[#allocation2] sm:$0x1e]  ;;  %v14560_v60 = vld [vmem:[%s16858_s2] ss:$0 sm:$0xff]  ;;  %v11561_v62 = vcombine.high %v726_v47, %v726_v47  ;;  %v669_v47 = vld [vmem:[#allocation2 + $0x10] sm:$0x1f] }
  0x18   : > { %13447 = vmatprep.subr.bf16.mxu0 %v13570_v7  ;;  %12655 = vmatpush3.bf16.msra.mxu1 %v13594_v30  ;;  %v11580_v61 = vcombine.low %v909_v55, %v909_v55  ;;  %v11581_v63 = vcombine.high %v909_v55, %v909_v55  ;;  %vm14599_vm7 = vmor %vm957_vm2, %vm958_vm3  ;;  %vm6778_vm3 = vsmask.f32 7448 }
  0x19   : > { %12656 = vmatprep.subr.bf16.mxu1 %v13597_v33  ;;  %v778_v49 = vshrl.u32 %v11560_v48, 16  ;;  %v781_v50 = vshll.u32 %v11560_v48, 16  ;;  %v1512_v53 = vshrl.u32 %v11678_v52, 16  ;;  %v1515_v54 = vshll.u32 %v11678_v52, 16  ;;  %v666_v33 = vld [vmem:[#allocation2 + $0x8] sm:$0x1f]  ;;  %vm14606_vm8 = vmor %vm774_vm4, %vm775_vm5 }
  0x1a   : > { %v14562_v1 = vrot.slane %v11580_v61, 9  ;;  %v14565_v5 = vshll.u32 %v11561_v62, 16  ;;  %vm15802_vm13 = vmor %vm6895_vm9, %vm6896_vm10  ;;  %vm6977_vm4 = vsmask.f32 256  ;;  %vm6978_vm5 = vsmask.f32 2312 }
  0x1b   : > { %13448 = vmatpush3.bf16.msra.mxu0 %v13570_v7  ;;  %v780_v56 = vrot.slane %v778_v49, 4  ;;  %v783_v57 = vrot.slane %v781_v50, 5  ;;  %v1514_v58 = vrot.slane %v1512_v53, 4  ;;  %v1517_v59 = vrot.slane %v1515_v54, 5  ;;  %vm15817_vm0 = vmor %vm15802_vm13, %vm6898_vm11 }
  0x1c   : > { %13449 = vmatprep.subr.bf16.mxu0 %v13571_v8  ;;  %12657 = vmatpush3.bf16.msra.mxu1 %v13598_v34  ;;  %vm15838_vm2 = vmor %vm15817_vm0, %vm6900_vm12  ;;  %vm6982_vm9 = vsmask.f32 6424 }
  0x1d   : > { %12658 = vmatprep.subr.bf16.mxu1 %v13601_v37  ;;  %v784_v2 = vor.u32 %v783_v57, %v780_v56  ;;  %vm6979_vm11 = vmor %vm6977_vm4, %vm6978_vm5 }
  0x1f   : > { %13450 = vmatpush3.bf16.msra.mxu0 %v13571_v8  ;;  %v14568_v8 = vrot.slane %v11581_v63, 5 }
  0x20   : > { %13451 = vmatprep.subr.bf16.mxu0 %v13572_v9  ;;  %12659 = vmatpush3.bf16.msra.mxu1 %v13602_v38 }
  0x21   : > { %12660 = vmatprep.subr.bf16.mxu1 %v13606_v41 }
  0x23   : > { %13452 = vmatpush3.bf16.msra.mxu0 %v13572_v9  ;;  %v11679_v9 = vcombine.high %v1372_v51, %v1372_v51 }
  0x24   : > { %12688 = vmatprep.subr.bf16.mxu0 %v13577_v10  ;;  %12661 = vmatpush3.bf16.msra.mxu1 %v13607_v42 }
  0x25   : > { %12662 = vmatprep.subr.bf16.mxu1 %v13615_v44  ;;  %v14575_v22 = vshll.u32 %v11679_v9, 16 }
  0x26   : > { %13454 = vmatmul.mubr.bf16.vlgmr.msra.gmra.mrb[0].mxu0 %v13574_v11 }
  0x27   : > { %13457 = vmatprep.mubr.bf16.mxu0 %v13575_v12  ;;  %12689 = vmatpush3.bf16.msra.mxu0 %v13578_v13  ;;  %v1518_v13 = vor.u32 %v1517_v59, %v1514_v58 }
  0x28   : > { %12690 = vmatprep.subr.bf16.mxu0 %v13579_v15  ;;  %12663 = vmatpush3.bf16.msra.mxu1 %v13616_v45 }
  0x29   : > { %12728 = vmatprep.subr.bf16.mxu1 %v13623_v46  ;;  %v14577_v25 = vrot.slane %v1518_v13, 4 }
  0x2b   : > { %12691 = vmatpush3.bf16.msra.mxu0 %v13580_v16  ;;  %v14572_v16 = vrot.slane %v784_v2, 4 }
  0x2c   : > { %12692 = vmatprep.subr.bf16.mxu0 %v13583_v19  ;;  %v789_v19 = vrot.slane %v14565_v5, 5 }
  0x2e   : > { %13458 = vmatmul.mubr.bf16.gmra.mrb[4].mxu0 %v13576_v14 }
  0x2f   : > { %12693 = vmatpush3.bf16.msra.mxu0 %v13584_v20 }
  0x30   : > { %12694 = vmatprep.subr.bf16.mxu0 %v13587_v23 }
  0x33   : > { %12695 = vmatpush3.bf16.msra.mxu0 %v13588_v24 }
  0x34   : > { %12696 = vmatprep.subr.bf16.mxu0 %v13591_v27  ;;  %v672_v27 = vld [vmem:[#allocation2 + $0x18] sm:$0x1f] }
  0x37   : > { %12697 = vmatpush3.bf16.msra.mxu0 %v13592_v28 }
  0x38   : > { %12698 = vmatprep.subr.bf16.mxu0 %v13595_v31 }
  0x3b   : > { %12699 = vmatpush3.bf16.msra.mxu0 %v13596_v32 }
  0x3c   : > { %12700 = vmatprep.subr.bf16.mxu0 %v13599_v35 }
  0x3f   : > { %12701 = vmatpush3.bf16.msra.mxu0 %v13600_v36 }
  0x40   : > { %12702 = vmatprep.subr.bf16.mxu0 %v13603_v39 }
  0x43   : > { %12703 = vmatpush3.bf16.msra.mxu0 %v13604_v40  ;;  %v675_v40 = vld [vmem:[#allocation2 + $0x20] sm:$0x1f] }
  0x44   : > { %12768 = vmatprep.subr.bf16.mxu0 %v13612_v43 }
  0xf9   : > { %v13455_v0 = vpop.f32.mrb[0].mxu0 }
  0xfa   : > { %v544_v3 = vadd.f32 %v13455_v0, %v14560_v60  ;;  %v535_v4 = vpop.f32.mrb[1].mxu0 }
  0xfb   : > { %v536_v6 = vadd.f32 %v14560_v60, %v535_v4  ;;  %v13456_v7 = vpop.f32.mrb[2].mxu0 }
  0xfc   : > { %v568_v10 = vmax.f32 %v544_v3, 0.0  ;;  %v547_v11 = vadd.f32 %v13456_v7, %v14560_v60  ;;  %v538_v12 = vpop.f32.mrb[3].mxu0 }
  0xfd   : > { %v566_v14 = vmax.f32 %v536_v6, 0.0  ;;  %v539_v15 = vadd.f32 %v14560_v60, %v538_v12  ;;  %v684_v6 = vld [vmem:[#allocation2 + $0x38] sm:$0x1f]  ;;  %v678_v12 = vld [vmem:[#allocation2 + $0x28] sm:$0x1f] }
  0xfe   : > { %v12606_v17 = vpack.c.bf16 %v568_v10, %v568_v10  ;;  %v569_v18 = vmax.f32 %v547_v11, 0.0 }
  0xff   : > { %v12604_v20 = vpack.c.bf16 %v566_v14, %v566_v14  ;;  %v567_v21 = vmax.f32 %v539_v15, 0.0  ;;  %v14120_v15 = vld [vmem:[%s16865_s9 + $0x80] sm:$0xff]  }
 0x100   : > { %v613_v23 = vshrl.u32 %v12606_v17, 16  ;;  %v12607_v24 = vpack.c.bf16 %v569_v18, %v569_v18  ;;  %v616_v26 = vshll.u32 %v12606_v17, 16  ;;  %v1523_v17 = vrot.slane %v14575_v22, 5 }
 0x101   : > { %v599_v28 = vshrl.u32 %v12604_v20, 16  ;;  %v602_v29 = vshll.u32 %v12604_v20, 16  ;;  %v12605_v30 = vpack.c.bf16 %v567_v21, %v567_v21  ;;  %v13459_v31 = vpop.f32.mrb[4].mxu0  ;;  %v687_v20 = vld [vmem:[#allocation2 + $0x40] sm:$0x1f]  ;;  %v963_v22 = vsel %vm14599_vm7, %v14562_v1, %v14568_v8 }
 0x102   : > { %v615_v32 = vrot.slane %v613_v23, 7  ;;  %v620_v34 = vshrl.u32 %v12607_v24, 16  ;;  %v623_v35 = vshll.u32 %v12607_v24, 16  ;;  %v560_v36 = vadd.f32 %v13459_v31, %v14560_v60  ;;  %v551_v37 = vpop.f32.mrb[5].mxu0 }
 0x103   : > { %v601_v39 = vrot.slane %v599_v28, 7  ;;  %v606_v41 = vshrl.u32 %v12605_v30, 16  ;;  %v609_v42 = vshll.u32 %v12605_v30, 16  ;;  %v552_v43 = vadd.f32 %v14560_v60, %v551_v37  ;;  %v13460_v44 = vpop.f32.mrb[6].mxu0  ;;  %v681_v28 = vld [vmem:[#allocation2 + $0x30] sm:$0x1f] }
 0x104   : > { %v618_v45 = vor.u32 %v616_v26, %v615_v32  ;;  %v622_v46 = vrot.slane %v620_v34, 7  ;;  %v572_v48 = vmax.f32 %v560_v36, 0.0  ;;  %v563_v49 = vadd.f32 %v13460_v44, %v14560_v60  ;;  %v554_v50 = vpop.f32.mrb[7].mxu0 }
 0x105   : > { %v604_v51 = vor.u32 %v602_v29, %v601_v39  ;;  %v608_v52 = vrot.slane %v606_v41, 7  ;;  %v570_v53 = vmax.f32 %v552_v43, 0.0  ;;  %v555_v54 = vadd.f32 %v14560_v60, %v554_v50 }
 0x106   : > { %v673_v55 = vsel %vm14582_vm6, %v618_v45, %v672_v27  ;;  %v625_v56 = vor.u32 %v623_v35, %v622_v46  ;;  %v12610_v57 = vpack.c.bf16 %v572_v48, %v572_v48  ;;  %v573_v58 = vmax.f32 %v563_v49, 0.0 }
 0x107   : > { %674 = vst [vmem:[#allocation2 + $0x18] sm:$0x1f] %v673_v55  ;;  %v667_v59 = vsel %vm14582_vm6, %v604_v51, %v666_v33  ;;  %v611_v61 = vor.u32 %v609_v42, %v608_v52  ;;  %v12608_v62 = vpack.c.bf16 %v570_v53, %v570_v53  ;;  %v571_v63 = vmax.f32 %v555_v54, 0.0 }
 0x108   : > { %668 = vst [vmem:[#allocation2 + $0x8] sm:$0x1f] %v667_v59  ;;  %v676_v0 = vsel %vm14582_vm6, %v625_v56, %v675_v40  ;;  %v641_v2 = vshrl.u32 %v12610_v57, 16  ;;  %v644_v3 = vshll.u32 %v12610_v57, 16  ;;  %v12611_v60 = vpack.c.bf16 %v573_v58, %v573_v58  ;;  %v13614_v58 = vld [vmem:[%s16859_s3 + $0x180] sm:$0xff]  }
 0x109   : > { %677 = vst [vmem:[#allocation2 + $0x20] sm:$0x1f] %v676_v0  ;;  %v670_v4 = vsel %vm14582_vm6, %v611_v61, %v669_v47  ;;  %v627_v7 = vshrl.u32 %v12608_v62, 16  ;;  %v630_v9 = vshll.u32 %v12608_v62, 16  ;;  %v12609_v10 = vpack.c.bf16 %v571_v63, %v571_v63  ;;  %v13617_v0 = vld [vmem:[%s16859_s3 + $0x1c8] sm:$0xff]  }
 0x10a   : > { %671 = vst [vmem:[#allocation2 + $0x10] sm:$0x1f] %v670_v4  ;;  %v643_v11 = vrot.slane %v641_v2, 7  ;;  %v648_v13 = vshrl.u32 %v12611_v60, 16  ;;  %v651_v14 = vshll.u32 %v12611_v60, 16  ;;  %v14621_v33 = vsel %vm14606_vm8, %v14572_v16, %v789_v19 }
 0x10b   : > { %v629_v18 = vrot.slane %v627_v7, 7  ;;  %v634_v21 = vshrl.u32 %v12609_v10, 16  ;;  %v637_v23 = vshll.u32 %v12609_v10, 16  ;;  %v14628_v36 = vsel %vm14606_vm8, %v14577_v25, %v1523_v17 }
 0x10c   : > { %v646_v26 = vor.u32 %v644_v3, %v643_v11  ;;  %v650_v27 = vrot.slane %v648_v13, 7  ;;  %v13618_v11 = vld [vmem:[%s16859_s3 + $0x188] sm:$0xff]  }
 0x10d   : > { %v632_v29 = vor.u32 %v630_v9, %v629_v18  ;;  %v636_v30 = vrot.slane %v634_v21, 7 }
 0x10e   : > { %v685_v31 = vsel %vm14582_vm6, %v646_v26, %v684_v6  ;;  %v653_v32 = vor.u32 %v651_v14, %v650_v27  ;;  %v729_v34 = vld [vmem:[#allocation2 + $0x18] sm:$0x1f] }
 0x10f   : > { %v14623_v35 = vld [vmem:[#allocation2 + $0x18] sm:$0x1e]  ;;  %686 = vst [vmem:[#allocation2 + $0x38] sm:$0x1f] %v685_v31  ;;  %v679_v1 = vsel %vm14582_vm6, %v632_v29, %v678_v12  ;;  %v639_v8 = vor.u32 %v637_v23, %v636_v30  ;;  %v910_v37 = vld [vmem:[#allocation2 + $0x8] sm:$0x1e]  ;;  %v11566_v39 = vcombine.low %v729_v34, %v729_v34  ;;  %v11567_v40 = vcombine.high %v729_v34, %v729_v34 }
 0x110   : > { %v727_v5 = vld [vmem:[#allocation2 + $0x8] sm:$0x1f]  ;;  %680 = vst [vmem:[#allocation2 + $0x28] sm:$0x1f] %v679_v1  ;;  %v688_v16 = vsel %vm14582_vm6, %v653_v32, %v687_v20  ;;  %v11582_v19 = vcombine.low %v910_v37, %v910_v37  ;;  %v11583_v41 = vcombine.high %v910_v37, %v910_v37  ;;  %v11586_v45 = vcombine.low %v14623_v35, %v14623_v35  ;;  %v13613_v4 = vld [vmem:[#allocation2 + $0x18] ss:$8 sps:$4 sm:$0xff]  }
 0x111   : > { %v11562_v42 = vcombine.low %v727_v5, %v727_v5  ;;  %689 = vst [vmem:[#allocation2 + $0x40] sm:$0x1f] %v688_v16  ;;  %v682_v25 = vsel %vm14582_vm6, %v639_v8, %v681_v28  ;;  %v13605_v43 = vld [vmem:[#allocation2 + $0x8] ss:$8 sps:$4 sm:$0xff]   ;;  %v11563_v44 = vcombine.high %v727_v5, %v727_v5  ;;  %v11587_v46 = vcombine.high %v14623_v35, %v14623_v35  ;;  %v730_v26 = vld [vmem:[#allocation2 + $0x20] sm:$0x1f] }
 0x112   : > { %683 = vst [vmem:[#allocation2 + $0x30] sm:$0x1f] %v682_v25  ;;  %v11597_v47 = vrot.slane %v11582_v19, 9  ;;  %v966_v48 = vrot.slane %v11583_v41, 5  ;;  %v728_v51 = vld [vmem:[#allocation2 + $0x10] sm:$0x1f]  ;;  %2361 = vmatprep.mubr.bf16.mxu0 %v13605_v43  ;;  %v11568_v16 = vcombine.low %v730_v26, %v730_v26  ;;  %v11569_v19 = vcombine.high %v730_v26, %v730_v26 }
 0x113   : > { %v792_v49 = vshrl.u32 %v11562_v42, 16  ;;  %v795_v50 = vshll.u32 %v11562_v42, 16  ;;  %v801_v52 = vshll.u32 %v11563_v44, 16  ;;  %v11564_v53 = vcombine.low %v728_v51, %v728_v51  ;;  %v911_v56 = vld [vmem:[#allocation2 + $0x10] sm:$0x1e]  ;;  %v13625_v34 = vld [vmem:[%s16859_s3 + $0x100] sm:$0xff]  }
 0x114   : > { %v11565_v54 = vcombine.high %v728_v51, %v728_v51  ;;  %v820_v55 = vshrl.u32 %v11566_v39, 16  ;;  %v967_v57 = vsel %vm14599_vm7, %v11597_v47, %v966_v48  ;;  %v823_v62 = vshll.u32 %v11566_v39, 16  ;;  %v13634_v31 = vld [vmem:[%s16859_s3 + $0x1d0] sm:$0xff]   ;;  %v13624_v5 = vld [vmem:[#allocation2] ss:$8 sps:$4 sm:$0xff]   ;;  %v13639_v51 = vld [vmem:[%s16859_s3 + $0x1d8] sm:$0xff]  }
 0x115   : > { %v794_v59 = vrot.slane %v792_v49, 4  ;;  %v797_v61 = vrot.slane %v795_v50, 5  ;;  %v11604_v63 = vcombine.low %v963_v22, %v967_v57  ;;  %v803_v2 = vrot.slane %v801_v52, 5  ;;  %v13637_v47 = vld [vmem:[%s16859_s3 + $0x148] sm:$0xff]  }
 0x116   : > { %v806_v3 = vshrl.u32 %v11564_v53, 16  ;;  %v809_v60 = vshll.u32 %v11564_v53, 16  ;;  %v815_v7 = vshll.u32 %v11565_v54, 16  ;;  %v822_v9 = vrot.slane %v820_v55, 4 }
 0x117   : > { %v798_v6 = vor.u32 %v797_v61, %v794_v59  ;;  %v825_v10 = vrot.slane %v823_v62, 5  ;;  %2362 = vmatmul.mubr.bf16.vlgmr.msra.gmra.mrb[8].mxu0 %v11604_v63  ;;  %v829_v14 = vshll.u32 %v11567_v40, 16  ;;  %v11584_v17 = vcombine.low %v911_v56, %v911_v56  ;;  %v731_v27 = vld [vmem:[#allocation2 + $0x28] sm:$0x1f]  ;;  %v13636_v40 = vld [vmem:[%s16859_s3 + $0x190] sm:$0xff]  }
 0x118   : > { %v808_v12 = vrot.slane %v806_v3, 4  ;;  %v811_v13 = vrot.slane %v809_v60, 5  ;;  %2369 = vmatprep.mubr.bf16.mxu0 %v13613_v4  ;;  %12769 = vmatpush3.bf16.msra.mxu0 %v13614_v58  ;;  %v817_v20 = vrot.slane %v815_v7, 5  ;;  %v11585_v23 = vcombine.high %v911_v56, %v911_v56  ;;  %v914_v55 = vld [vmem:[#allocation2 + $0x28] sm:$0x1e]  ;;  %v13641_v63 = vld [vmem:[%s16859_s3 + $0x150] sm:$0xff]  }
 0x119   : > { %v799_v18 = vrot.slane %v798_v6, 4  ;;  %v826_v21 = vor.u32 %v825_v10, %v822_v9  ;;  %12770 = vmatprep.subr.bf16.mxu0 %v13617_v0  ;;  %v831_v29 = vrot.slane %v829_v14, 5  ;;  %v11598_v30 = vrot.slane %v11584_v17, 9  ;;  %v13638_v56 = vld [vmem:[%s16859_s3 + $0x108] sm:$0xff]   ;;  %v732_v62 = vld [vmem:[#allocation2 + $0x30] sm:$0x1f] }
 0x11a   : > { %v812_v28 = vor.u32 %v811_v13, %v808_v12  ;;  %v11599_v22 = vrot.slane %v11586_v45, 9  ;;  %v970_v1 = vrot.slane %v11585_v23, 5  ;;  %v974_v8 = vrot.slane %v11587_v46, 5  ;;  %v13635_v46 = vld [vmem:[#allocation2 + $0x28] ss:$8 sps:$4 sm:$0xff]   ;;  %v13640_v4 = vld [vmem:[%s16859_s3 + $0x198] sm:$0xff]  }
 0x11b   : > { %v804_v32 = vsel %vm14606_vm8, %v799_v18, %v803_v2  ;;  %v827_v35 = vrot.slane %v826_v21, 4  ;;  %v11570_v43 = vcombine.low %v731_v27, %v731_v27  ;;  %v11571_v48 = vcombine.high %v731_v27, %v731_v27  ;;  %v13652_v17 = vld [vmem:[%s16859_s3 + $0x1e0] sm:$0xff]  }
 0x11c   : > { %v11576_v37 = vcombine.low %v14621_v33, %v804_v32  ;;  %v813_v39 = vrot.slane %v812_v28, 4  ;;  %12771 = vmatpush3.bf16.msra.mxu0 %v13618_v11  ;;  %v971_v42 = vsel %vm14599_vm7, %v11598_v30, %v970_v1  ;;  %v975_v25 = vsel %vm14599_vm7, %v11599_v22, %v974_v8  ;;  %v913_v33 = vld [vmem:[#allocation2 + $0x20] sm:$0x1e]  ;;  %v733_v11 = vld [vmem:[#allocation2 + $0x38] sm:$0x1f] }
 0x11d   : > { %v832_v41 = vsel %vm14606_vm8, %v827_v35, %v831_v29  ;;  %v11605_v45 = vcombine.low %v971_v42, %v975_v25  ;;  %12772 = vmatprep.subr.bf16.mxu0 %v13634_v31  ;;  %v834_v49 = vshrl.u32 %v11568_v16, 16  ;;  %v837_v52 = vshll.u32 %v11568_v16, 16  ;;  %v13654_v27 = vld [vmem:[%s16859_s3 + $0x1a0] sm:$0xff]   ;;  %v13642_v29 = vld [vmem:[#allocation2 + $0x10] ss:$8 sps:$4 sm:$0xff]  }
 0x11e   : > { %2296 = vmatprep.mubr.bf16.mxu1 %v11576_v37  ;;  %v818_v44 = vsel %vm14606_vm8, %v813_v39, %v817_v20  ;;  %v843_v53 = vshll.u32 %v11569_v19, 16  ;;  %v848_v54 = vshrl.u32 %v11570_v43, 16  ;;  %v851_v58 = vshll.u32 %v11570_v43, 16  ;;  %v13643_v20 = vld [vmem:[%s16859_s3 + $0x110] sm:$0xff]   ;;  %v13655_v31 = vld [vmem:[%s16859_s3 + $0x158] sm:$0xff]  }
 0x11f   : > { %2297 = vmatmul.mubr.bf16.vlgmr.msra.gmra.mrb[0].mxu1 %v13624_v5  ;;  %v11577_v50 = vcombine.low %v818_v44, %v832_v41  ;;  %2370 = vmatmul.mubr.bf16.gmra.mrb[12].mxu0 %v11605_v45  ;;  %v836_v57 = vrot.slane %v834_v49, 4  ;;  %v857_v59 = vshll.u32 %v11571_v48, 16  ;;  %v11588_v61 = vcombine.low %v913_v33, %v913_v33  ;;  %v915_v35 = vld [vmem:[#allocation2 + $0x30] sm:$0x1e]  ;;  %v13653_v37 = vld [vmem:[#allocation2 + $0x38] ss:$8 sps:$4 sm:$0xff]  }
 0x120   : > { %12729 = vmatpush3.bf16.msra.mxu1 %v13625_v34  ;;  %2377 = vmatprep.mubr.bf16.mxu0 %v13635_v46  ;;  %v839_v0 = vrot.slane %v837_v52, 5  ;;  %v845_v2 = vrot.slane %v843_v53, 5  ;;  %v850_v3 = vrot.slane %v848_v54, 4  ;;  %v11589_v60 = vcombine.high %v913_v33, %v913_v33  ;;  %v13657_v5 = vld [vmem:[%s16859_s3 + $0x1e8] sm:$0xff]   ;;  %v916_v25 = vld [vmem:[#allocation2 + $0x38] sm:$0x1e] }
 0x121   : > { %2304 = vmatprep.mubr.bf16.mxu1 %v11577_v50  ;;  %12773 = vmatpush3.bf16.msra.mxu0 %v13636_v40  ;;  %v853_v6 = vrot.slane %v851_v58, 5  ;;  %v859_v7 = vrot.slane %v857_v59, 5  ;;  %v11590_v9 = vcombine.low %v914_v55, %v914_v55  ;;  %v11591_v10 = vcombine.high %v914_v55, %v914_v55  ;;  %v13656_v33 = vld [vmem:[%s16859_s3 + $0x118] sm:$0xff]   ;;  %v13659_v49 = vld [vmem:[%s16859_s3 + $0x160] sm:$0xff]   ;;  %v13658_v53 = vld [vmem:[%s16859_s3 + $0x1a8] sm:$0xff]  }
 0x122   : > { %12730 = vmatprep.subr.bf16.mxu1 %v13637_v47  ;;  %12774 = vmatprep.subr.bf16.mxu0 %v13639_v51  ;;  %v840_v12 = vor.u32 %v839_v0, %v836_v57  ;;  %v11600_v13 = vrot.slane %v11588_v61, 9  ;;  %v978_v14 = vrot.slane %v11589_v60, 5  ;;  %v11572_v18 = vcombine.low %v732_v62, %v732_v62  ;;  %v1365_v47 = vld [vmem:[#allocation2 + $0x10] sm:$0x1f]  ;;  %v1366_v58 = vld [vmem:[#allocation2 + $0x18] sm:$0x1f] }
 0x123   : > { %v854_v21 = vor.u32 %v853_v6, %v850_v3  ;;  %v11601_v23 = vrot.slane %v11590_v9, 9  ;;  %v982_v26 = vrot.slane %v11591_v10, 5  ;;  %v11573_v28 = vcombine.high %v732_v62, %v732_v62  ;;  %v13661_v59 = vld [vmem:[%s16859_s3 + $0x120] sm:$0xff]   ;;  %v13670_v0 = vld [vmem:[%s16859_s3 + $0x1f0] sm:$0xff]  }
 0x124   : > { %12731 = vmatpush3.bf16.msra.mxu1 %v13638_v56  ;;  %v841_v30 = vrot.slane %v840_v12, 4  ;;  %v979_v22 = vsel %vm14599_vm7, %v11600_v13, %v978_v14  ;;  %v11574_v32 = vcombine.low %v733_v11, %v733_v11  ;;  %v11575_v34 = vcombine.high %v733_v11, %v733_v11  ;;  %v13660_v9 = vld [vmem:[#allocation2 + $0x20] ss:$8 sps:$4 sm:$0xff]  }
 0x125   : > { %12732 = vmatprep.subr.bf16.mxu1 %v13641_v63  ;;  %12775 = vmatpush3.bf16.msra.mxu0 %v13640_v4  ;;  %v855_v1 = vrot.slane %v854_v21, 4  ;;  %v983_v8 = vsel %vm14599_vm7, %v11601_v23, %v982_v26  ;;  %v862_v39 = vshrl.u32 %v11572_v18, 16  ;;  %v865_v40 = vshll.u32 %v11572_v18, 16  ;;  %v14731_v21 = vld [vmem:[#allocation2 + $0x48] sm:$0x1e]  ;;  %v13671_v26 = vld [vmem:[%s16859_s3 + $0x1b0] sm:$0xff]  }
 0x126   : > { %v846_v16 = vsel %vm14606_vm8, %v841_v30, %v845_v2  ;;  %v11606_v19 = vcombine.low %v979_v22, %v983_v8  ;;  %12776 = vmatprep.subr.bf16.mxu0 %v13652_v17  ;;  %v871_v41 = vshll.u32 %v11573_v28, 16  ;;  %v876_v42 = vshrl.u32 %v11574_v32, 16  ;;  %v1228_v30 = vld [vmem:[#allocation2 + $0x8] sm:$0x1e]  ;;  %v1229_v8 = vld [vmem:[#allocation2 + $0x10] sm:$0x1e] }
 0x127   : > { %2305 = vmatmul.mubr.bf16.gmra.mrb[4].mxu1 %v13642_v29  ;;  %v860_v43 = vsel %vm14606_vm8, %v855_v1, %v859_v7  ;;  %v864_v44 = vrot.slane %v862_v39, 4  ;;  %v867_v45 = vrot.slane %v865_v40, 5  ;;  %v879_v46 = vshll.u32 %v11574_v32, 16  ;;  %v13676_v7 = vld [vmem:[%s16859_s3 + $0x168] sm:$0xff]   ;;  %v13678_v1 = vld [vmem:[%s16859_s3 + $0x1f8] sm:$0xff]   ;;  %v13680_v40 = vld [vmem:[%s16859_s3 + $0x170] sm:$0xff]  }
 0x128   : > { %12733 = vmatpush3.bf16.msra.mxu1 %v13643_v20  ;;  %v11578_v48 = vcombine.low %v846_v16, %v860_v43  ;;  %2378 = vmatmul.mubr.bf16.gmra.mrb[16].mxu0 %v11606_v19  ;;  %v873_v50 = vrot.slane %v871_v41, 5  ;;  %v878_v51 = vrot.slane %v876_v42, 4  ;;  %v885_v52 = vshll.u32 %v11575_v34, 16  ;;  %v1367_v16 = vld [vmem:[#allocation2 + $0x20] sm:$0x1f] }
 0x129   : > { %12734 = vmatprep.subr.bf16.mxu1 %v13655_v31  ;;  %2385 = vmatprep.mubr.bf16.mxu0 %v13653_v37  ;;  %v868_v54 = vor.u32 %v867_v45, %v864_v44  ;;  %v881_v55 = vrot.slane %v879_v46, 5  ;;  %v11592_v56 = vcombine.low %v915_v35, %v915_v35  ;;  %v11593_v57 = vcombine.high %v915_v35, %v915_v35  ;;  %v13677_v35 = vld [vmem:[%s16859_s3 + $0x128] sm:$0xff]   ;;  %v13679_v45 = vld [vmem:[%s16859_s3 + $0x1b8] sm:$0xff]  }
 0x12a   : > { %12777 = vmatpush3.bf16.msra.mxu0 %v13654_v27  ;;  %2312 = vmatprep.mubr.bf16.mxu1 %v11578_v48  ;;  %v887_v61 = vrot.slane %v885_v52, 5  ;;  %v11594_v62 = vcombine.low %v916_v25, %v916_v25  ;;  %v11595_v63 = vcombine.high %v916_v25, %v916_v25  ;;  %v11664_v2 = vcombine.low %v1365_v47, %v1365_v47  ;;  %v1368_v48 = vld [vmem:[#allocation2 + $0x28] sm:$0x1f] }
 0x12b   : > { %12778 = vmatprep.subr.bf16.mxu0 %v13657_v5  ;;  %v869_v3 = vrot.slane %v868_v54, 4  ;;  %v882_v60 = vor.u32 %v881_v55, %v878_v51  ;;  %v11602_v4 = vrot.slane %v11592_v56, 9  ;;  %v986_v6 = vrot.slane %v11593_v57, 5  ;;  %v13682_v51 = vld [vmem:[%s16859_s3 + $0x130] sm:$0xff]  }
 0x12c   : > { %12735 = vmatpush3.bf16.msra.mxu1 %v13656_v33  ;;  %v11603_v10 = vrot.slane %v11594_v62, 9  ;;  %v990_v11 = vrot.slane %v11595_v63, 5  ;;  %v11665_v12 = vcombine.high %v1365_v47, %v1365_v47  ;;  %v11666_v13 = vcombine.low %v1366_v58, %v1366_v58  ;;  %v13681_v55 = vld [vmem:[#allocation2 + $0x30] ss:$8 sps:$4 sm:$0xff]  }
 0x12d   : > { %12736 = vmatprep.subr.bf16.mxu1 %v13659_v49  ;;  %v874_v14 = vsel %vm14606_vm8, %v869_v3, %v873_v50  ;;  %v883_v17 = vrot.slane %v882_v60, 4  ;;  %v987_v18 = vsel %vm14599_vm7, %v11602_v4, %v986_v6  ;;  %v11667_v20 = vcombine.high %v1366_v58, %v1366_v58  ;;  %v13693_v6 = vld [vmem:[%s16859_s3 + $0x138] sm:$0xff]  }
 0x12e   : > { %12779 = vmatpush3.bf16.msra.mxu0 %v13658_v53  ;;  %v991_v23 = vsel %vm14599_vm7, %v11603_v10, %v990_v11  ;;  %v1414_v27 = vshrl.u32 %v11664_v2, 16  ;;  %v1417_v28 = vshll.u32 %v11664_v2, 16  ;;  %v1423_v29 = vshll.u32 %v11665_v12, 16  ;;  %v1048_v12 = vld [vmem:[#allocation2 + $0x8] sm:$0x1f] }
 0x12f   : > { %2313 = vmatmul.mubr.bf16.gmra.mrb[8].mxu1 %v13660_v9  ;;  %12780 = vmatprep.subr.bf16.mxu0 %v13670_v0  ;;  %v888_v22 = vsel %vm14606_vm8, %v883_v17, %v887_v61  ;;  %v11607_v31 = vcombine.low %v987_v18, %v991_v23  ;;  %v1428_v32 = vshrl.u32 %v11666_v13, 16  ;;  %v1431_v34 = vshll.u32 %v11666_v13, 16  ;;  %v1049_v13 = vld [vmem:[#allocation2 + $0x10] sm:$0x1f]  ;;  %v14774_v23 = vld [vmem:[%s16859_s3 + $0x200] sm:$0xff]  }
 0x130   : > { %12737 = vmatpush3.bf16.msra.mxu1 %v13661_v59  ;;  %v11579_v37 = vcombine.low %v874_v14, %v888_v22  ;;  %v1416_v5 = vrot.slane %v1414_v27, 4  ;;  %v1419_v39 = vrot.slane %v1417_v28, 5  ;;  %v11698_v19 = vcombine.low %v14731_v21, %v14731_v21  ;;  %v13692_v59 = vld [vmem:[%s16859_s3 + $0x178] sm:$0xff]  }
 0x131   : > { %12738 = vmatprep.subr.bf16.mxu1 %v13676_v7  ;;  %2386 = vmatmul.mubr.bf16.gmra.mrb[20].mxu0 %v11607_v31  ;;  %v1430_v41 = vrot.slane %v1428_v32, 4  ;;  %v1433_v42 = vrot.slane %v1431_v34, 5  ;;  %v1437_v25 = vshll.u32 %v11667_v20, 16  ;;  %v11632_v43 = vcombine.low %v1228_v30, %v1228_v30 }
 0x132   : > { %2320 = vmatprep.mubr.bf16.mxu1 %v11579_v37  ;;  %12781 = vmatpush3.bf16.msra.mxu0 %v13671_v26  ;;  %v1420_v33 = vor.u32 %v1419_v39, %v1416_v5  ;;  %v1425_v44 = vrot.slane %v1423_v29, 5  ;;  %v11633_v46 = vcombine.high %v1228_v30, %v1228_v30  ;;  %v11634_v47 = vcombine.low %v1229_v8, %v1229_v8  ;;  %v13687_v26 = vld [vmem:[#allocation2 + $0x10] ss:$8 sps:$4 sm:$0xff]  }
 0x133   : > { %v1434_v49 = vor.u32 %v1433_v42, %v1430_v41  ;;  %v1439_v50 = vrot.slane %v1437_v25, 5  ;;  %12782 = vmatprep.subr.bf16.mxu0 %v13678_v1  ;;  %v11635_v52 = vcombine.high %v1229_v8, %v1229_v8  ;;  %v11648_v53 = vrot.slane %v11632_v43, 9  ;;  %v1230_v41 = vld [vmem:[#allocation2 + $0x18] sm:$0x1e] }
 0x134   : > { %12739 = vmatpush3.bf16.msra.mxu1 %v13677_v35  ;;  %v1421_v54 = vrot.slane %v1420_v33, 4  ;;  %v1278_v56 = vrot.slane %v11633_v46, 5  ;;  %v11649_v57 = vrot.slane %v11634_v47, 9  ;;  %v11668_v58 = vcombine.low %v1367_v16, %v1367_v16 }
 0x135   : > { %12740 = vmatprep.subr.bf16.mxu1 %v13680_v40  ;;  %v1435_v61 = vrot.slane %v1434_v49, 4  ;;  %v1282_v62 = vrot.slane %v11635_v52, 5  ;;  %v11669_v63 = vcombine.high %v1367_v16, %v1367_v16  ;;  %v11670_v0 = vcombine.low %v1368_v48, %v1368_v48  ;;  %v1369_v49 = vld [vmem:[#allocation2 + $0x30] sm:$0x1f] }
 0x136   : > { %v1426_v2 = vsel %vm14606_vm8, %v1421_v54, %v1425_v44  ;;  %12783 = vmatpush3.bf16.msra.mxu0 %v13679_v45  ;;  %v1279_v3 = vsel %vm14599_vm7, %v11648_v53, %v1278_v56  ;;  %v11671_v60 = vcombine.high %v1368_v48, %v1368_v48  ;;  %v1442_v4 = vshrl.u32 %v11668_v58, 16  ;;  %v1231_v44 = vld [vmem:[#allocation2 + $0x20] sm:$0x1e] }
 0x137   : > { %2321 = vmatmul.mubr.bf16.gmra.mrb[12].mxu1 %v13681_v55  ;;  %v1440_v7 = vsel %vm14606_vm8, %v1435_v61, %v1439_v50  ;;  %v1283_v9 = vsel %vm14599_vm7, %v11649_v57, %v1282_v62  ;;  %v1445_v10 = vshll.u32 %v11668_v58, 16  ;;  %v1451_v11 = vshll.u32 %v11669_v63, 16  ;;  %v1370_v58 = vld [vmem:[#allocation2 + $0x38] sm:$0x1f]  ;;  %v13703_v63 = vld [vmem:[#allocation2 + $0x20] ss:$8 sps:$4 sm:$0xff]  }
 0x138   : > { %12741 = vmatpush3.bf16.msra.mxu1 %v13682_v51  ;;  %v11680_v14 = vcombine.low %v1426_v2, %v1440_v7  ;;  %v11656_v17 = vcombine.low %v1279_v3, %v1283_v9  ;;  %v1444_v18 = vrot.slane %v1442_v4, 4  ;;  %v1456_v20 = vshrl.u32 %v11670_v0, 16 }
 0x139   : > { %12742 = vmatprep.subr.bf16.mxu1 %v13692_v59  ;;  %v1447_v27 = vrot.slane %v1445_v10, 5  ;;  %v1453_v28 = vrot.slane %v1451_v11, 5  ;;  %v1459_v29 = vshll.u32 %v11670_v0, 16  ;;  %v1465_v30 = vshll.u32 %v11671_v60, 16  ;;  %v1050_v11 = vld [vmem:[#allocation2 + $0x18] sm:$0x1f] }
 0x13a   : > { %2491 = vmatprep.mubr.bf16.mxu0 %v11680_v14  ;;  %2426 = vmatprep.mubr.bf16.mxu1 %v11656_v17  ;;  %v1458_v22 = vrot.slane %v1456_v20, 4  ;;  %v11612_v31 = vcombine.low %v1048_v12, %v1048_v12  ;;  %v11613_v32 = vcombine.high %v1048_v12, %v1048_v12  ;;  %v11614_v34 = vcombine.low %v1049_v13, %v1049_v13  ;;  %v1051_v20 = vld [vmem:[#allocation2 + $0x20] sm:$0x1f] }
 0x13b   : > { %2492 = vmatmul.mubr.bf16.vlgmr.msra.gmra.mrb[24].mxu0 %v13687_v26  ;;  %v1448_v35 = vor.u32 %v1447_v27, %v1444_v18  ;;  %v1461_v1 = vrot.slane %v1459_v29, 5  ;;  %v1467_v8 = vrot.slane %v1465_v30, 5  ;;  %v11615_v37 = vcombine.high %v1049_v13, %v1049_v13  ;;  %v13708_v18 = vld [vmem:[%s16859_s3 + $0x208] sm:$0xff]  }
 0x13c   : > { %12743 = vmatpush3.bf16.msra.mxu1 %v13693_v6  ;;  %v1097_v5 = vshrl.u32 %v11612_v31, 16  ;;  %v1100_v39 = vshll.u32 %v11612_v31, 16  ;;  %v1106_v40 = vshll.u32 %v11613_v32, 16  ;;  %v1111_v16 = vshrl.u32 %v11614_v34, 16 }
 0x13d   : > { %13461 = vmatprep.subr.bf16.mxu1 %v14774_v23  ;;  %v1449_v42 = vrot.slane %v1448_v35, 4  ;;  %v1462_v25 = vor.u32 %v1461_v1, %v1458_v22  ;;  %v1114_v43 = vshll.u32 %v11614_v34, 16  ;;  %v1120_v33 = vshll.u32 %v11615_v37, 16 }
 0x13e   : > { %v1099_v45 = vrot.slane %v1097_v5, 4  ;;  %v1102_v46 = vrot.slane %v1100_v39, 5  ;;  %v1108_v47 = vrot.slane %v1106_v40, 5  ;;  %v1113_v48 = vrot.slane %v1111_v16, 4 }
 0x13f   : > { %v1454_v50 = vsel %vm14606_vm8, %v1449_v42, %v1453_v28  ;;  %v1463_v51 = vrot.slane %v1462_v25, 4  ;;  %v1116_v52 = vrot.slane %v1114_v43, 5  ;;  %v1122_v53 = vrot.slane %v1120_v33, 5  ;;  %v1232_v43 = vld [vmem:[#allocation2 + $0x28] sm:$0x1e]  ;;  %v13709_v33 = vld [vmem:[%s16859_s3 + $0x210] sm:$0xff]  }
 0x140   : > { %v1103_v54 = vor.u32 %v1102_v46, %v1099_v45  ;;  %v11636_v55 = vcombine.low %v1230_v41, %v1230_v41  ;;  %v11637_v56 = vcombine.high %v1230_v41, %v1230_v41  ;;  %v11638_v57 = vcombine.low %v1231_v44, %v1231_v44 }
 0x141   : > { %v1468_v59 = vsel %vm14606_vm8, %v1463_v51, %v1467_v8  ;;  %v1117_v61 = vor.u32 %v1116_v52, %v1113_v48  ;;  %v11639_v62 = vcombine.high %v1231_v44, %v1231_v44  ;;  %v11672_v0 = vcombine.low %v1369_v49, %v1369_v49  ;;  %v1233_v48 = vld [vmem:[#allocation2 + $0x30] sm:$0x1e] }
 0x142   : > { %v11681_v2 = vcombine.low %v1454_v50, %v1468_v59  ;;  %v1104_v3 = vrot.slane %v1103_v54, 4  ;;  %v11650_v60 = vrot.slane %v11636_v55, 9  ;;  %v1286_v4 = vrot.slane %v11637_v56, 5  ;;  %v1371_v56 = vld [vmem:[#allocation2 + $0x40] sm:$0x1f] }
 0x143   : > { %v1118_v6 = vrot.slane %v1117_v61, 4  ;;  %v11651_v7 = vrot.slane %v11638_v57, 9  ;;  %v1290_v9 = vrot.slane %v11639_v62, 5  ;;  %v11673_v10 = vcombine.high %v1369_v49, %v1369_v49 }
 0x144   : > { %2499 = vmatprep.mubr.bf16.mxu0 %v11681_v2  ;;  %v1109_v12 = vsel %vm14606_vm8, %v1104_v3, %v1108_v47  ;;  %v1287_v13 = vsel %vm14599_vm7, %v11650_v60, %v1286_v4  ;;  %v11674_v14 = vcombine.low %v1370_v58, %v1370_v58  ;;  %v11675_v17 = vcombine.high %v1370_v58, %v1370_v58  ;;  %v13723_v3 = vld [vmem:[%s16859_s3 + $0x218] sm:$0xff]  }
 0x145   : > { %v1123_v26 = vsel %vm14606_vm8, %v1118_v6, %v1122_v53  ;;  %v1291_v27 = vsel %vm14599_vm7, %v11651_v7, %v1290_v9  ;;  %2500 = vmatmul.mubr.bf16.gmra.mrb[28].mxu0 %v13703_v63  ;;  %v1470_v28 = vshrl.u32 %v11672_v0, 16  ;;  %v1473_v29 = vshll.u32 %v11672_v0, 16  ;;  %v13718_v9 = vld [vmem:[#allocation2 + $0x30] ss:$8 sps:$4 sm:$0xff]  }
 0x146   : > { %v11628_v30 = vcombine.low %v1109_v12, %v1123_v26  ;;  %v11657_v22 = vcombine.low %v1287_v13, %v1291_v27  ;;  %v1479_v31 = vshll.u32 %v11673_v10, 16  ;;  %v1484_v32 = vshrl.u32 %v11674_v14, 16  ;;  %v1052_v10 = vld [vmem:[#allocation2 + $0x28] sm:$0x1f] }
 0x147   : > { %v1472_v34 = vrot.slane %v1470_v28, 4  ;;  %v1475_v35 = vrot.slane %v1473_v29, 5  ;;  %v1487_v1 = vshll.u32 %v11674_v14, 16  ;;  %v1493_v8 = vshll.u32 %v11675_v17, 16  ;;  %v1053_v17 = vld [vmem:[#allocation2 + $0x30] sm:$0x1f] }
 0x148   : > { %2427 = vmatmul.mubr.bf16.vlgmr.msra.gmra.mrb[16].mxu1 %v11628_v30  ;;  %v1481_v37 = vrot.slane %v1479_v31, 5  ;;  %v1486_v5 = vrot.slane %v1484_v32, 4  ;;  %v11616_v39 = vcombine.low %v1050_v11, %v1050_v11  ;;  %v11617_v40 = vcombine.high %v1050_v11, %v1050_v11  ;;  %v13724_v28 = vld [vmem:[%s16859_s3 + $0x220] sm:$0xff]  }
 0x149   : > { %13462 = vmatpush3.bf16.msra.mxu1 %v14774_v23  ;;  %2434 = vmatprep.mubr.bf16.mxu1 %v11657_v22  ;;  %v1476_v16 = vor.u32 %v1475_v35, %v1472_v34  ;;  %v1489_v41 = vrot.slane %v1487_v1, 5  ;;  %v1495_v42 = vrot.slane %v1493_v8, 5  ;;  %v11618_v25 = vcombine.low %v1051_v20, %v1051_v20  ;;  %v1234_v1 = vld [vmem:[#allocation2 + $0x38] sm:$0x1e] }
 0x14a   : > { %13463 = vmatprep.subr.bf16.mxu1 %v13708_v18  ;;  %v11619_v44 = vcombine.high %v1051_v20, %v1051_v20  ;;  %v1125_v45 = vshrl.u32 %v11616_v39, 16  ;;  %v1128_v46 = vshll.u32 %v11616_v39, 16  ;;  %v1134_v47 = vshll.u32 %v11617_v40, 16 }
 0x14b   : > { %v1477_v49 = vrot.slane %v1476_v16, 4  ;;  %v1490_v50 = vor.u32 %v1489_v41, %v1486_v5  ;;  %v1139_v51 = vshrl.u32 %v11618_v25, 16  ;;  %v1142_v23 = vshll.u32 %v11618_v25, 16  ;;  %v1235_v25 = vld [vmem:[#allocation2 + $0x40] sm:$0x1e] }
 0x14c   : > { %v1127_v52 = vrot.slane %v1125_v45, 4  ;;  %v1130_v53 = vrot.slane %v1128_v46, 5  ;;  %v1136_v54 = vrot.slane %v1134_v47, 5  ;;  %v1148_v55 = vshll.u32 %v11619_v44, 16  ;;  %v13734_v46 = vld [vmem:[%s16859_s3 + $0x228] sm:$0xff]  }
 0x14d   : > { %v1482_v57 = vsel %vm14606_vm8, %v1477_v49, %v1481_v37  ;;  %v1491_v58 = vrot.slane %v1490_v50, 4  ;;  %13464 = vmatpush3.bf16.msra.mxu1 %v13708_v18  ;;  %v1141_v59 = vrot.slane %v1139_v51, 4  ;;  %v1144_v61 = vrot.slane %v1142_v23, 5 }
 0x14e   : > { %13465 = vmatprep.subr.bf16.mxu1 %v13709_v33  ;;  %v1131_v62 = vor.u32 %v1130_v53, %v1127_v52  ;;  %v1150_v63 = vrot.slane %v1148_v55, 5  ;;  %v11640_v0 = vcombine.low %v1232_v43, %v1232_v43  ;;  %v11641_v2 = vcombine.high %v1232_v43, %v1232_v43 }
 0x14f   : > { %v1496_v60 = vsel %vm14606_vm8, %v1491_v58, %v1495_v42  ;;  %v1145_v4 = vor.u32 %v1144_v61, %v1141_v59  ;;  %v11642_v6 = vcombine.low %v1233_v48, %v1233_v48  ;;  %v11643_v7 = vcombine.high %v1233_v48, %v1233_v48  ;;  %v1055_v59 = vld [vmem:[#allocation2 + $0x40] sm:$0x1f] }
 0x150   : > { %v11682_v11 = vcombine.low %v1482_v57, %v1496_v60  ;;  %v1132_v12 = vrot.slane %v1131_v62, 4  ;;  %v11652_v13 = vrot.slane %v11640_v0, 9  ;;  %v1294_v14 = vrot.slane %v11641_v2, 5  ;;  %v13735_v2 = vld [vmem:[%s16859_s3 + $0x230] sm:$0xff]  }
 0x151   : > { %v1146_v18 = vrot.slane %v1145_v4, 4  ;;  %13466 = vmatpush3.bf16.msra.mxu1 %v13709_v33  ;;  %v11653_v20 = vrot.slane %v11642_v6, 9  ;;  %v1298_v26 = vrot.slane %v11643_v7, 5  ;;  %v11676_v27 = vcombine.low %v1371_v56, %v1371_v56  ;;  %v13733_v7 = vld [vmem:[#allocation2 + $0x40] ss:$8 sps:$4 sm:$0xff]  }
 0x152   : > { %2507 = vmatprep.mubr.bf16.mxu0 %v11682_v11  ;;  %v1137_v29 = vsel %vm14606_vm8, %v1132_v12, %v1136_v54  ;;  %v1295_v30 = vsel %vm14599_vm7, %v11652_v13, %v1294_v14  ;;  %v11677_v22 = vcombine.high %v1371_v56, %v1371_v56  ;;  %13467 = vmatprep.subr.bf16.mxu1 %v13723_v3  ;;  %v1054_v54 = vld [vmem:[#allocation2 + $0x38] sm:$0x1f] }
 0x153   : > { %v1151_v31 = vsel %vm14606_vm8, %v1146_v18, %v1150_v63  ;;  %v1299_v32 = vsel %vm14599_vm7, %v11653_v20, %v1298_v26  ;;  %2508 = vmatmul.mubr.bf16.gmra.mrb[32].mxu0 %v13718_v9  ;;  %v1498_v34 = vshrl.u32 %v11676_v27, 16  ;;  %v1501_v35 = vshll.u32 %v11676_v27, 16  ;;  %v13744_v13 = vld [vmem:[%s16859_s3 + $0x238] sm:$0xff]   ;;  %v1545_v26 = vld [vmem:[#allocation2 + $0x10] sm:$0x1e] }
 0x154   : > { %v11629_v8 = vcombine.low %v1137_v29, %v1151_v31  ;;  %v11658_v37 = vcombine.low %v1295_v30, %v1299_v32  ;;  %v1507_v5 = vshll.u32 %v11677_v22, 16  ;;  %v11620_v39 = vcombine.low %v1052_v10, %v1052_v10  ;;  %v1546_v29 = vld [vmem:[#allocation2 + $0x18] sm:$0x1e] }
 0x155   : > { %v1500_v40 = vrot.slane %v1498_v34, 4  ;;  %v1503_v16 = vrot.slane %v1501_v35, 5  ;;  %13468 = vmatpush3.bf16.msra.mxu1 %v13723_v3  ;;  %v11621_v41 = vcombine.high %v1052_v10, %v1052_v10  ;;  %v11622_v42 = vcombine.low %v1053_v17, %v1053_v17 }
 0x156   : > { %2435 = vmatmul.mubr.bf16.gmra.mrb[20].mxu1 %v11629_v8  ;;  %v1509_v43 = vrot.slane %v1507_v5, 5  ;;  %13469 = vmatprep.subr.bf16.mxu1 %v13724_v28  ;;  %v11623_v33 = vcombine.high %v1053_v17, %v1053_v17  ;;  %v1153_v44 = vshrl.u32 %v11620_v39, 16  ;;  %v1156_v45 = vshll.u32 %v11620_v39, 16 }
 0x157   : > { %2442 = vmatprep.mubr.bf16.mxu1 %v11658_v37  ;;  %v1504_v47 = vor.u32 %v1503_v16, %v1500_v40  ;;  %v1162_v48 = vshll.u32 %v11621_v41, 16  ;;  %v1167_v49 = vshrl.u32 %v11622_v42, 16  ;;  %v1170_v50 = vshll.u32 %v11622_v42, 16 }
 0x158   : > { %v1155_v51 = vrot.slane %v1153_v44, 4  ;;  %v1158_v23 = vrot.slane %v1156_v45, 5  ;;  %v1176_v52 = vshll.u32 %v11623_v33, 16  ;;  %v11644_v53 = vcombine.low %v1234_v1, %v1234_v1 }
 0x159   : > { %v1505_v55 = vrot.slane %v1504_v47, 4  ;;  %v1164_v56 = vrot.slane %v1162_v48, 5  ;;  %v1169_v57 = vrot.slane %v1167_v49, 4  ;;  %v1172_v58 = vrot.slane %v1170_v50, 5  ;;  %13470 = vmatpush3.bf16.msra.mxu1 %v13724_v28  ;;  %v1549_v47 = vld [vmem:[#allocation2 + $0x30] sm:$0x1e] }
 0x15a   : > { %v1159_v61 = vor.u32 %v1158_v23, %v1155_v51  ;;  %v1178_v62 = vrot.slane %v1176_v52, 5  ;;  %v11645_v63 = vcombine.high %v1234_v1, %v1234_v1  ;;  %v11646_v0 = vcombine.low %v1235_v25, %v1235_v25  ;;  %13471 = vmatprep.subr.bf16.mxu1 %v13734_v46  ;;  %v1547_v23 = vld [vmem:[#allocation2 + $0x20] sm:$0x1e] }
 0x15b   : > { %v1510_v3 = vsel %vm14606_vm8, %v1505_v55, %v1509_v43  ;;  %v1173_v60 = vor.u32 %v1172_v58, %v1169_v57  ;;  %v11647_v4 = vcombine.high %v1235_v25, %v1235_v25  ;;  %v11654_v6 = vrot.slane %v11644_v53, 9  ;;  %v1548_v25 = vld [vmem:[#allocation2 + $0x28] sm:$0x1e] }
 0x15c   : > { %v11683_v9 = vcombine.low %v1510_v3, %v14628_v36  ;;  %v1160_v10 = vrot.slane %v1159_v61, 4  ;;  %v1302_v11 = vrot.slane %v11645_v63, 5  ;;  %v11655_v12 = vrot.slane %v11646_v0, 9  ;;  %v1550_v61 = vld [vmem:[#allocation2 + $0x38] sm:$0x1e] }
 0x15d   : > { %v1174_v14 = vrot.slane %v1173_v60, 4  ;;  %v1306_v17 = vrot.slane %v11647_v4, 5  ;;  %13472 = vmatpush3.bf16.msra.mxu1 %v13734_v46  ;;  %v11624_v18 = vcombine.low %v1054_v54, %v1054_v54  ;;  %v11625_v20 = vcombine.high %v1054_v54, %v1054_v54 }
 0x15e   : > { %2515 = vmatprep.mubr.bf16.mxu0 %v11683_v9  ;;  %v1165_v27 = vsel %vm14606_vm8, %v1160_v10, %v1164_v56  ;;  %v1303_v36 = vsel %vm14599_vm7, %v11654_v6, %v1302_v11  ;;  %13473 = vmatprep.subr.bf16.mxu1 %v13735_v2  ;;  %v11626_v28 = vcombine.low %v1055_v59, %v1055_v59  ;;  %v1551_v9 = vld [vmem:[#allocation2 + $0x40] sm:$0x1e] }
 0x15f   : > { %v1179_v30 = vsel %vm14606_vm8, %v1174_v14, %v1178_v62  ;;  %v1307_v22 = vsel %vm14599_vm7, %v11655_v12, %v1306_v17  ;;  %2516 = vmatmul.mubr.bf16.gmra.mrb[36].mxu0 %v13733_v7  ;;  %v11627_v31 = vcombine.high %v1055_v59, %v1055_v59  ;;  %v1181_v32 = vshrl.u32 %v11624_v18, 16 }
 0x160   : > { %v11630_v34 = vcombine.low %v1165_v27, %v1179_v30  ;;  %v11659_v35 = vcombine.low %v1303_v36, %v1307_v22  ;;  %v1184_v1 = vshll.u32 %v11624_v18, 16  ;;  %v1190_v8 = vshll.u32 %v11625_v20, 16 }
 0x161   : > { %v1183_v37 = vrot.slane %v1181_v32, 4  ;;  %v1195_v5 = vshrl.u32 %v11626_v28, 16  ;;  %v1198_v39 = vshll.u32 %v11626_v28, 16  ;;  %v1204_v40 = vshll.u32 %v11627_v31, 16  ;;  %13474 = vmatpush3.bf16.msra.mxu1 %v13735_v2 }
 0x162   : > { %2443 = vmatmul.mubr.bf16.gmra.mrb[24].mxu1 %v11630_v34  ;;  %v1186_v16 = vrot.slane %v1184_v1, 5  ;;  %v11684_v41 = vcombine.low %v1545_v26, %v1545_v26  ;;  %v11685_v42 = vcombine.high %v1545_v26, %v1545_v26  ;;  %13475 = vmatprep.subr.bf16.mxu1 %v13744_v13  ;;  %v11699_v43 = vcombine.high %v14731_v21, %v14731_v21 }
 0x163   : > { %2450 = vmatprep.mubr.bf16.mxu1 %v11659_v35  ;;  %v1192_v33 = vrot.slane %v1190_v8, 5  ;;  %v1197_v44 = vrot.slane %v1195_v5, 4  ;;  %v1200_v45 = vrot.slane %v1198_v39, 5  ;;  %v11686_v46 = vcombine.low %v1546_v29, %v1546_v29 }
 0x164   : > { %v1187_v48 = vor.u32 %v1186_v16, %v1183_v37  ;;  %v11687_v49 = vcombine.high %v1546_v29, %v1546_v29  ;;  %v11700_v50 = vrot.slane %v11684_v41, 9  ;;  %v1595_v51 = vrot.slane %v11685_v42, 5  ;;  %v13758_v16 = vld [vmem:[%s16861_s5 + $0x80] sm:$0xff]   ;;  %v13759_v41 = vld [vmem:[%s16861_s5 + $0xc8] sm:$0xff]  }
 0x165   : > { %v1201_v52 = vor.u32 %v1200_v45, %v1197_v44  ;;  %v1206_v53 = vrot.slane %v1204_v40, 5  ;;  %v11701_v54 = vrot.slane %v11686_v46, 9  ;;  %13476 = vmatpush3.bf16.msra.mxu1 %v13744_v13  ;;  %v11690_v58 = vcombine.low %v1548_v25, %v1548_v25  ;;  %v13757_v40 = vld [vmem:[%s16861_s5 + $0xc0] sm:$0xff]   ;;  %v13760_v42 = vld [vmem:[%s16861_s5 + $0x88] sm:$0xff]   ;;  %v13764_v44 = vld [vmem:[%s16861_s5 + $0x90] sm:$0xff]  }
 0x166   : > { %v1188_v55 = vrot.slane %v1187_v48, 4  ;;  %v1599_v56 = vrot.slane %v11687_v49, 5  ;;  %v11691_v59 = vcombine.high %v1548_v25, %v1548_v25  ;;  %v11707_v62 = vrot.slane %v11698_v19, 9  ;;  %12860 = vmatprep.subr.bf16.mxu1 %v13757_v40  ;;  %v13761_v25 = vld [vmem:[%s16861_s5 + $0x40] sm:$0xff]   ;;  %v13765_v45 = vld [vmem:[%s16861_s5 + $0x48] sm:$0xff]   ;;  %v13768_v48 = vld [vmem:[%s16861_s5 + $0x98] sm:$0xff]  }
 0x167   : > { %v1202_v57 = vrot.slane %v1201_v52, 4  ;;  %v1596_v0 = vsel %vm14599_vm7, %v11700_v50, %v1595_v51  ;;  %v11692_v2 = vcombine.low %v1549_v47, %v1549_v47  ;;  %v1623_v3 = vrot.slane %v11699_v43, 5  ;;  %v13762_v43 = vld [vmem:[%s16861_s5] sm:$0xff]   ;;  %12820 = vmatprep.subr.bf16.mxu0 %v13761_v25  ;;  %v13766_v46 = vld [vmem:[%s16861_s5 + $0x8] sm:$0xff]   ;;  %v13769_v49 = vld [vmem:[%s16861_s5 + $0x50] sm:$0xff]  }
 0x168   : > { %v1193_v63 = vsel %vm14606_vm8, %v1188_v55, %v1192_v33  ;;  %v1600_v4 = vsel %vm14599_vm7, %v11701_v54, %v1599_v56  ;;  %v11688_v6 = vcombine.low %v1547_v23, %v1547_v23  ;;  %v11689_v7 = vcombine.high %v1547_v23, %v1547_v23  ;;  %v13763_v33 = vld [vmem:[%s16861_s5 + $0xd0] sm:$0xff]   ;;  %12821 = vmatpush3.bf16.msra.mxu0 %v13762_v43  ;;  %v13771_v51 = vld [vmem:[%s16861_s5 + $0xe0] sm:$0xff]   ;;  %v13773_v23 = vld [vmem:[%s16861_s5 + $0x58] sm:$0xff]  }
 0x169   : > { %v1207_v60 = vsel %vm14606_vm8, %v1202_v57, %v1206_v53  ;;  %v11693_v21 = vcombine.high %v1549_v47, %v1549_v47  ;;  %v11694_v19 = vcombine.low %v1550_v61, %v1550_v61  ;;  %v11695_v11 = vcombine.high %v1550_v61, %v1550_v61  ;;  %12822 = vmatprep.subr.bf16.mxu0 %v13765_v45  ;;  %v13767_v47 = vld [vmem:[%s16861_s5 + $0xd8] sm:$0xff]   ;;  %v13770_v50 = vld [vmem:[%s16861_s5 + $0x10] sm:$0xff]   ;;  %v13772_v52 = vld [vmem:[%s16861_s5 + $0xa0] sm:$0xff]  }
 0x16a   : > { %v11631_v10 = vcombine.low %v1193_v63, %v1207_v60  ;;  %v11708_v12 = vcombine.low %v1596_v0, %v1600_v4  ;;  %v11703_v13 = vrot.slane %v11690_v58, 9  ;;  %v1607_v14 = vrot.slane %v11691_v59, 5  ;;  %v13775_v53 = vld [vmem:[%s16861_s5 + $0xe8] sm:$0xff]   ;;  %v13774_v54 = vld [vmem:[%s16861_s5 + $0x18] sm:$0xff]   ;;  %v13777_v55 = vld [vmem:[%s16861_s5 + $0x60] sm:$0xff]  }
 0x16b   : > { %v11704_v17 = vrot.slane %v11692_v2, 9  ;;  %v1611_v18 = vrot.slane %v11693_v21, 5  ;;  %v11705_v20 = vrot.slane %v11694_v19, 9  ;;  %v1615_v26 = vrot.slane %v11695_v11, 5  ;;  %v13776_v56 = vld [vmem:[%s16861_s5 + $0xa8] sm:$0xff]   ;;  %v13779_v57 = vld [vmem:[%s16861_s5 + $0xf0] sm:$0xff]  }
 0x16c   : > { %2451 = vmatmul.mubr.bf16.gmra.mrb[28].mxu1 %v11631_v10  ;;  %v11702_v27 = vrot.slane %v11688_v6, 9  ;;  %v1603_v36 = vrot.slane %v11689_v7, 5  ;;  %v11696_v28 = vcombine.low %v1551_v9, %v1551_v9  ;;  %v11697_v29 = vcombine.high %v1551_v9, %v1551_v9  ;;  %12823 = vmatpush3.bf16.msra.mxu0 %v13766_v46  ;;  %v13778_v58 = vld [vmem:[%s16861_s5 + $0x20] sm:$0xff]   ;;  %v13781_v59 = vld [vmem:[%s16861_s5 + $0x68] sm:$0xff]   ;;  %v13783_v0 = vld [vmem:[%s16861_s5 + $0xf8] sm:$0xff]  }
 0x16d   : > { %13477 = vmatprep.mubr.bf16.mxu1 %v11708_v12  ;;  %v1608_v30 = vsel %vm14599_vm7, %v11703_v13, %v1607_v14  ;;  %v1612_v22 = vsel %vm14599_vm7, %v11704_v17, %v1611_v18  ;;  %v1616_v31 = vsel %vm14599_vm7, %v11705_v20, %v1615_v26  ;;  %v1624_v5 = vsel %vm14599_vm7, %v11707_v62, %v1623_v3  ;;  %v13780_v62 = vld [vmem:[%s16861_s5 + $0xb0] sm:$0xff]   ;;  %v13782_v60 = vld [vmem:[%s16861_s5 + $0x28] sm:$0xff]   ;;  %v13784_v9 = vld [vmem:[%s16861_s5 + $0xb8] sm:$0xff]  }
 0x16e   : > { %v1604_v32 = vsel %vm14599_vm7, %v11702_v27, %v1603_v36  ;;  %v11706_v34 = vrot.slane %v11696_v28, 9  ;;  %v1619_v35 = vrot.slane %v11697_v29, 5  ;;  %v11710_v8 = vcombine.low %v1612_v22, %v1616_v31  ;;  %12824 = vmatprep.subr.bf16.mxu0 %v13769_v49  ;;  %v13786_v6 = vld [vmem:[%s16861_s5 + $0x70] sm:$0xff]   ;;  %v13792_v10 = vld [vmem:[%s16861_s5 + $0x1c0] sm:$0xff]   ;;  %v13795_v11 = vld [vmem:[%s16861_s5 + $0x78] sm:$0xff]  }
 0x16f   : > { %v11709_v1 = vcombine.low %v1604_v32, %v1608_v30  ;;  %v13787_v21 = vld [vmem:[%s16861_s5 + $0x30] sm:$0xff]   ;;  %v14958_v12 = vld [vmem:[%s16860_s4] ss:$0 sm:$0xff]  ;;  %v13796_v28 = vld [vmem:[%s16861_s5 + $0x38] sm:$0xff]  }
 0x170   : > { %v1620_v37 = vsel %vm14599_vm7, %v11706_v34, %v1619_v35  ;;  %12825 = vmatpush3.bf16.msra.mxu0 %v13770_v50  ;;  %v13803_v31 = vld [vmem:[%s16861_s5 + $0x140] sm:$0xff]  }
 0x171   : > { %v11711_v39 = vcombine.low %v1620_v37, %v1624_v5  ;;  %12826 = vmatprep.subr.bf16.mxu0 %v13773_v23 }
 0x174   : > { %13478 = vmatmul.mubr.bf16.vlgmr.msra.gmra.mrb[32].mxu1 %v11709_v1  ;;  %12827 = vmatpush3.bf16.msra.mxu0 %v13774_v54 }
 0x175   : > { %13481 = vmatprep.mubr.bf16.mxu1 %v11710_v8  ;;  %12861 = vmatpush3.bf16.msra.mxu1 %v13758_v16 }
 0x176   : > { %12862 = vmatprep.subr.bf16.mxu1 %v13759_v41  ;;  %12828 = vmatprep.subr.bf16.mxu0 %v13777_v55 }
 0x178   : > { %12829 = vmatpush3.bf16.msra.mxu0 %v13778_v58 }
 0x179   : > { %12863 = vmatpush3.bf16.msra.mxu1 %v13760_v42  ;;  %12830 = vmatprep.subr.bf16.mxu0 %v13781_v59 }
 0x17a   : > { %12864 = vmatprep.subr.bf16.mxu1 %v13763_v33 }
 0x17c   : > { %13482 = vmatmul.mubr.bf16.gmra.mrb[36].mxu1 %v11711_v39  ;;  %12831 = vmatpush3.bf16.msra.mxu0 %v13782_v60 }
 0x17d   : > { %12865 = vmatpush3.bf16.msra.mxu1 %v13764_v44  ;;  %12832 = vmatprep.subr.bf16.mxu0 %v13786_v6 }
 0x17e   : > { %12866 = vmatprep.subr.bf16.mxu1 %v13767_v47 }
 0x180   : > { %12833 = vmatpush3.bf16.msra.mxu0 %v13787_v21 }
 0x181   : > { %12867 = vmatpush3.bf16.msra.mxu1 %v13768_v48  ;;  %12834 = vmatprep.subr.bf16.mxu0 %v13795_v11 }
 0x182   : > { %12868 = vmatprep.subr.bf16.mxu1 %v13771_v51 }
 0x184   : > { %12835 = vmatpush3.bf16.msra.mxu0 %v13796_v28 }
 0x185   : > { %12869 = vmatpush3.bf16.msra.mxu1 %v13772_v52  ;;  %12900 = vmatprep.subr.bf16.mxu0 %v13803_v31 }
 0x186   : > { %12870 = vmatprep.subr.bf16.mxu1 %v13775_v53 }
 0x189   : > { %12871 = vmatpush3.bf16.msra.mxu1 %v13776_v56 }
 0x18a   : > { %12872 = vmatprep.subr.bf16.mxu1 %v13779_v57 }
 0x18d   : > { %12873 = vmatpush3.bf16.msra.mxu1 %v13780_v62 }
 0x18e   : > { %12874 = vmatprep.subr.bf16.mxu1 %v13783_v0 }
 0x191   : > { %12875 = vmatpush3.bf16.msra.mxu1 %v13784_v9 }
 0x192   : > { %12940 = vmatprep.subr.bf16.mxu1 %v13792_v10 }
 0x1ea   : > { %v12704_v61 = vpop.f32.mrb[8].mxu0 }
 0x1eb   : > { %v12705_v63 = vpop.f32.mrb[9].mxu0 }
 0x1ec   : > { %v12706_v2 = vadd.f32 %v12705_v63, %v12704_v61  ;;  %v12707_v3 = vpop.f32.mrb[10].mxu0 }
 0x1ed   : > { %v12708_v4 = vpop.f32.mrb[11].mxu0 }
 0x1ee   : > { %v12709_v7 = vadd.f32 %v12708_v4, %v12707_v3 }
 0x1f2   : > { %v12664_v19 = vpop.f32.mrb[0].mxu1  ;;  %v12710_v14 = vpop.f32.mrb[12].mxu0 }
 0x1f3   : > { %v12665_v13 = vpop.f32.mrb[1].mxu1  ;;  %v12711_v20 = vpop.f32.mrb[13].mxu0 }
 0x1f4   : > { %v12666_v17 = vadd.f32 %v12665_v13, %v12664_v19  ;;  %v12667_v18 = vpop.f32.mrb[2].mxu1  ;;  %v12712_v26 = vadd.f32 %v12711_v20, %v12710_v14  ;;  %v12713_v36 = vpop.f32.mrb[14].mxu0 }
 0x1f5   : > { %v12668_v27 = vpop.f32.mrb[3].mxu1  ;;  %v12714_v22 = vpop.f32.mrb[15].mxu0 }
 0x1f6   : > { %v2299_v29 = vadd.f32 %v12666_v17, %v14958_v12  ;;  %v12669_v30 = vadd.f32 %v12668_v27, %v12667_v18  ;;  %v12715_v32 = vadd.f32 %v12714_v22, %v12713_v36 }
 0x1f8   : > { %v2302_v34 = vadd.f32 %v12669_v30, %v14958_v12  ;;  %v14968_v35 = vadd.f32 %v12706_v2, %v2299_v29 }
 0x1fa   : > { %v12670_v1 = vpop.f32.mrb[4].mxu1  ;;  %v2367_v8 = vadd.f32 %v12709_v7, %v2302_v34 }
 0x1fb   : > { %v12671_v37 = vpop.f32.mrb[5].mxu1  ;;  %v12716_v39 = vpop.f32.mrb[16].mxu0 }
 0x1fc   : > { %v12672_v5 = vadd.f32 %v12671_v37, %v12670_v1  ;;  %v12673_v40 = vpop.f32.mrb[6].mxu1  ;;  %v12717_v16 = vpop.f32.mrb[17].mxu0 }
 0x1fd   : > { %v12674_v41 = vpop.f32.mrb[7].mxu1  ;;  %v12718_v25 = vadd.f32 %v12717_v16, %v12716_v39  ;;  %v12719_v33 = vpop.f32.mrb[18].mxu0 }
 0x1fe   : > { %v2307_v42 = vadd.f32 %v12672_v5, %v14958_v12  ;;  %v12675_v43 = vadd.f32 %v12674_v41, %v12673_v40  ;;  %v12720_v44 = vpop.f32.mrb[19].mxu0 }
 0x1ff   : > { %v12721_v46 = vadd.f32 %v12720_v44, %v12719_v33 }
 0x200   : > { %v2310_v45 = vadd.f32 %v12675_v43, %v14958_v12  ;;  %v2372_v47 = vadd.f32 %v12712_v26, %v2307_v42 }
 0x202   : > { %v12676_v48 = vpop.f32.mrb[8].mxu1  ;;  %v2375_v49 = vadd.f32 %v12715_v32, %v2310_v45 }
 0x203   : > { %v12677_v50 = vpop.f32.mrb[9].mxu1 }
 0x204   : > { %v12678_v51 = vadd.f32 %v12677_v50, %v12676_v48  ;;  %v12679_v23 = vpop.f32.mrb[10].mxu1  ;;  %v12722_v52 = vpop.f32.mrb[20].mxu0 }
 0x205   : > { %v12680_v53 = vpop.f32.mrb[11].mxu1  ;;  %v12723_v55 = vpop.f32.mrb[21].mxu0 }
 0x206   : > { %v2315_v54 = vadd.f32 %v12678_v51, %v14958_v12  ;;  %v12681_v56 = vadd.f32 %v12680_v53, %v12679_v23  ;;  %v12724_v57 = vadd.f32 %v12723_v55, %v12722_v52  ;;  %v12725_v58 = vpop.f32.mrb[22].mxu0 }
 0x207   : > { %v12726_v61 = vpop.f32.mrb[23].mxu0 }
 0x208   : > { %v2318_v59 = vadd.f32 %v12681_v56, %v14958_v12  ;;  %v2380_v62 = vadd.f32 %v12718_v25, %v2315_v54  ;;  %v12727_v63 = vadd.f32 %v12726_v61, %v12725_v58 }
 0x20a   : > { %v12682_v0 = vpop.f32.mrb[12].mxu1  ;;  %v2383_v2 = vadd.f32 %v12721_v46, %v2318_v59 }
 0x20b   : > { %v12683_v3 = vpop.f32.mrb[13].mxu1 }
 0x20c   : > { %v12684_v60 = vadd.f32 %v12683_v3, %v12682_v0  ;;  %v12685_v4 = vpop.f32.mrb[14].mxu1 }
 0x20d   : > { %v12686_v6 = vpop.f32.mrb[15].mxu1 }
 0x20e   : > { %v2323_v7 = vadd.f32 %v12684_v60, %v14958_v12  ;;  %v12687_v9 = vadd.f32 %v12686_v6, %v12685_v4  ;;  %v12784_v10 = vpop.f32.mrb[24].mxu0 }
 0x20f   : > { %v12785_v21 = vpop.f32.mrb[25].mxu0 }
 0x210   : > { %v2326_v19 = vadd.f32 %v12687_v9, %v14958_v12  ;;  %v2388_v11 = vadd.f32 %v12724_v57, %v2323_v7  ;;  %v12786_v13 = vadd.f32 %v12785_v21, %v12784_v10  ;;  %v12787_v14 = vpop.f32.mrb[26].mxu0 }
 0x211   : > { %v12788_v17 = vpop.f32.mrb[27].mxu0 }
 0x212   : > { %v2391_v18 = vadd.f32 %v12727_v63, %v2326_v19  ;;  %v12789_v20 = vadd.f32 %v12788_v17, %v12787_v14 }
 0x218   : > { %v12790_v26 = vpop.f32.mrb[28].mxu0 }
 0x219   : > { %v12791_v27 = vpop.f32.mrb[29].mxu0 }
 0x21a   : > { %v12792_v36 = vadd.f32 %v12791_v27, %v12790_v26  ;;  %v12793_v28 = vpop.f32.mrb[30].mxu0 }
 0x21b   : > { %v12744_v29 = vpop.f32.mrb[16].mxu1  ;;  %v12794_v30 = vpop.f32.mrb[31].mxu0 }
 0x21c   : > { %v12745_v22 = vpop.f32.mrb[17].mxu1  ;;  %v12795_v31 = vadd.f32 %v12794_v30, %v12793_v28  ;;  %v2925_v28 = vld [vmem:[#allocation2] sm:$0x1e] }
 0x21d   : > { %v12746_v32 = vadd.f32 %v12745_v22, %v12744_v29  ;;  %v12747_v34 = vpop.f32.mrb[18].mxu1  ;;  %v14981_v22 = vld [vmem:[#allocation2 + $0x48] sm:$0x1f] }
 0x21e   : > { %v12748_v1 = vpop.f32.mrb[19].mxu1 }
 0x21f   : > { %v2429_v37 = vadd.f32 %v12746_v32, %v14968_v35  ;;  %v12749_v12 = vadd.f32 %v12748_v1, %v12747_v34  ;;  %v11817_v34 = vcombine.low %v2925_v28, %v2925_v28  ;;  %v11818_v1 = vcombine.high %v2925_v28, %v2925_v28  ;;  %v2685_v28 = vld [vmem:[#allocation2 + $0x8] sm:$0x1f] }
 0x221   : > { %v2432_v5 = vadd.f32 %v12749_v12, %v2367_v8  ;;  %v2494_v39 = vadd.f32 %v12786_v13, %v2429_v37 }
 0x223   : > { %v14977_v40 = vadd.f32 %v12789_v20, %v2432_v5 }
 0x226   : > { %v12796_v16 = vpop.f32.mrb[32].mxu0 }
 0x227   : > { %v12797_v41 = vpop.f32.mrb[33].mxu0 }
 0x228   : > { %v12798_v42 = vadd.f32 %v12797_v41, %v12796_v16  ;;  %v12799_v25 = vpop.f32.mrb[34].mxu0 }
 0x229   : > { %v12750_v43 = vpop.f32.mrb[20].mxu1  ;;  %v12800_v33 = vpop.f32.mrb[35].mxu0 }
 0x22a   : > { %v12751_v44 = vpop.f32.mrb[21].mxu1  ;;  %v12801_v45 = vadd.f32 %v12800_v33, %v12799_v25  ;;  %v14991_v25 = vcombine.low %v14981_v22, %v14981_v22 }
 0x22b   : > { %v12752_v46 = vadd.f32 %v12751_v44, %v12750_v43  ;;  %v12753_v48 = vpop.f32.mrb[22].mxu1 }
 0x22c   : > { %v12754_v50 = vpop.f32.mrb[23].mxu1 }
 0x22d   : > { %v2437_v51 = vadd.f32 %v12752_v46, %v2372_v47  ;;  %v12755_v23 = vadd.f32 %v12754_v50, %v12753_v48  ;;  %v14996_v46 = vrot.slane %v11818_v1, 5 }
 0x22f   : > { %v2440_v52 = vadd.f32 %v12755_v23, %v2375_v49  ;;  %v2502_v35 = vadd.f32 %v12792_v36, %v2437_v51  ;;  %v2745_v49 = vld [vmem:[#allocation2] sm:$0x1f] }
 0x230   : > { %v11797_v13 = vcombine.low %v2745_v49, %v2745_v49  ;;  %v11798_v26 = vcombine.high %v2745_v49, %v2745_v49 }
 0x231   : > { %v2505_v53 = vadd.f32 %v12795_v31, %v2440_v52 }
 0x232   : > { %v12802_v8 = vpop.f32.mrb[36].mxu0  ;;  %v2794_v29 = vshrl.u32 %v11797_v13, 16  ;;  %v14987_v16 = vshll.u32 %v11798_v26, 16 }
 0x233   : > { %v12803_v54 = vpop.f32.mrb[37].mxu0 }
 0x234   : > { %v12804_v55 = vadd.f32 %v12803_v54, %v12802_v8  ;;  %v12805_v56 = vpop.f32.mrb[38].mxu0  ;;  %v14983_v5 = vrot.slane %v2794_v29, 4  ;;  %v2805_v23 = vrot.slane %v14987_v16, 5 }
 0x235   : > { %v12756_v57 = vpop.f32.mrb[24].mxu1  ;;  %v12806_v58 = vpop.f32.mrb[39].mxu0 }
 0x236   : > { %v12757_v59 = vpop.f32.mrb[25].mxu1  ;;  %v12807_v61 = vadd.f32 %v12806_v58, %v12805_v56 }
 0x237   : > { %v12758_v63 = vadd.f32 %v12757_v59, %v12756_v57  ;;  %v12759_v0 = vpop.f32.mrb[26].mxu1 }
 0x238   : > { %v12760_v3 = vpop.f32.mrb[27].mxu1 }
 0x239   : > { %v2445_v60 = vadd.f32 %v12758_v63, %v2380_v62  ;;  %v12761_v4 = vadd.f32 %v12760_v3, %v12759_v0  ;;  %v2797_v62 = vshll.u32 %v11797_v13, 16 }
 0x23b   : > { %v2448_v6 = vadd.f32 %v12761_v4, %v2383_v2  ;;  %v2510_v7 = vadd.f32 %v12798_v42, %v2445_v60 }
 0x23d   : > { %v14979_v47 = vadd.f32 %v12801_v45, %v2448_v6 }
 0x23f   : > { %v12762_v9 = vpop.f32.mrb[28].mxu1 }
 0x240   : > { %v12763_v10 = vpop.f32.mrb[29].mxu1 }
 0x241   : > { %v12764_v21 = vadd.f32 %v12763_v10, %v12762_v9  ;;  %v12765_v19 = vpop.f32.mrb[30].mxu1 }
 0x242   : > { %v12766_v14 = vpop.f32.mrb[31].mxu1 }
 0x243   : > { %v2453_v17 = vadd.f32 %v12764_v21, %v2388_v11  ;;  %v12767_v20 = vadd.f32 %v12766_v14, %v12765_v19  ;;  %v14985_v11 = vrot.slane %v2797_v62, 5  ;;  %v2691_v14 = vld [vmem:[#allocation2 + $0x18] sm:$0x1f] }
 0x245   : > { %v2456_v27 = vadd.f32 %v12767_v20, %v2391_v18  ;;  %v2518_v36 = vadd.f32 %v12804_v55, %v2453_v17  ;;  %v2800_v51 = vor.u32 %v14985_v11, %v14983_v5 }
 0x247   : > { %v13479_v30 = vpop.f32.mrb[32].mxu1  ;;  %v2521_v2 = vadd.f32 %v12807_v61, %v2456_v27 }
 0x248   : > { %v2567_v31 = vadd.f32 %v13479_v30, %v2502_v35  ;;  %v2558_v32 = vpop.f32.mrb[33].mxu1 }
 0x249   : > { %v2559_v37 = vadd.f32 %v2558_v32, %v2494_v39  ;;  %v13480_v12 = vpop.f32.mrb[34].mxu1  ;;  %v14994_v39 = vrot.slane %v11817_v34, 9 }
 0x24a   : > { %v2591_v18 = vmax.f32 %v2567_v31, 0.0  ;;  %v2570_v41 = vadd.f32 %v13480_v12, %v2505_v53  ;;  %v2561_v42 = vpop.f32.mrb[35].mxu1  ;;  %v11916_v53 = vcombine.high %v14981_v22, %v14981_v22  ;;  %v2694_v22 = vld [vmem:[#allocation2 + $0x20] sm:$0x1f]  ;;  %v3527_v12 = vshll.u32 %v14991_v25, 16 }
 0x24b   : > { %v2589_v43 = vmax.f32 %v2559_v37, 0.0  ;;  %v2562_v33 = vadd.f32 %v2561_v42, %v14977_v40  ;;  %v3524_v40 = vshrl.u32 %v14991_v25, 16 }
 0x24c   : > { %v12614_v44 = vpack.c.bf16 %v2591_v18, %v2591_v18  ;;  %v2592_v45 = vmax.f32 %v2570_v41, 0.0  ;;  %v15014_v41 = vshll.u32 %v11916_v53, 16  ;;  %v2706_v53 = vld [vmem:[#allocation2 + $0x40] sm:$0x1f] }
 0x24d   : > { %v12612_v48 = vpack.c.bf16 %v2589_v43, %v2589_v43  ;;  %v2590_v50 = vmax.f32 %v2562_v33, 0.0 }
 0x24e   : > { %v2636_v52 = vshrl.u32 %v12614_v44, 16  ;;  %v12615_v35 = vpack.c.bf16 %v2592_v45, %v2592_v45  ;;  %v2639_v8 = vshll.u32 %v12614_v44, 16  ;;  %v2801_v44 = vrot.slane %v2800_v51, 4  ;;  %v2703_v45 = vld [vmem:[#allocation2 + $0x38] sm:$0x1f] }
 0x24f   : > { %v2622_v54 = vshrl.u32 %v12612_v48, 16  ;;  %v2625_v55 = vshll.u32 %v12612_v48, 16  ;;  %v12613_v56 = vpack.c.bf16 %v2590_v50, %v2590_v50  ;;  %v13483_v57 = vpop.f32.mrb[36].mxu1 }
 0x250   : > { %v2638_v58 = vrot.slane %v2636_v52, 7  ;;  %v2643_v59 = vshrl.u32 %v12615_v35, 16  ;;  %v2646_v61 = vshll.u32 %v12615_v35, 16  ;;  %v2583_v63 = vadd.f32 %v13483_v57, %v2518_v36  ;;  %v2574_v0 = vpop.f32.mrb[37].mxu1 }
 0x251   : > { %v2624_v3 = vrot.slane %v2622_v54, 7  ;;  %v2629_v60 = vshrl.u32 %v12613_v56, 16  ;;  %v2632_v4 = vshll.u32 %v12613_v56, 16  ;;  %v2575_v6 = vadd.f32 %v2574_v0, %v2510_v7  ;;  %v13484_v49 = vpop.f32.mrb[38].mxu1 }
 0x252   : > { %v2641_v9 = vor.u32 %v2639_v8, %v2638_v58  ;;  %v2645_v10 = vrot.slane %v2643_v59, 7  ;;  %v2595_v21 = vmax.f32 %v2583_v63, 0.0  ;;  %v2586_v19 = vadd.f32 %v13484_v49, %v2521_v2  ;;  %v2577_v13 = vpop.f32.mrb[39].mxu1  ;;  %v2697_v8 = vld [vmem:[#allocation2 + $0x28] sm:$0x1f] }
 0x253   : > { %v2627_v17 = vor.u32 %v2625_v55, %v2624_v3  ;;  %v2631_v20 = vrot.slane %v2629_v60, 7  ;;  %v2593_v26 = vmax.f32 %v2575_v6, 0.0  ;;  %v2578_v27 = vadd.f32 %v2577_v13, %v14979_v47  ;;  %v2688_v47 = vld [vmem:[#allocation2 + $0x10] sm:$0x1f] }
 0x254   : > { %v2692_v36 = vsel %vm14582_vm6, %v2641_v9, %v2691_v14  ;;  %v2648_v29 = vor.u32 %v2646_v61, %v2645_v10  ;;  %v12618_v62 = vpack.c.bf16 %v2595_v21, %v2595_v21  ;;  %v2596_v30 = vmax.f32 %v2586_v19, 0.0 }
 0x255   : > { %2693 = vst [vmem:[#allocation2 + $0x18] sm:$0x1f] %v2692_v36  ;;  %v2686_v7 = vsel %vm14582_vm6, %v2627_v17, %v2685_v28  ;;  %v2634_v2 = vor.u32 %v2632_v4, %v2631_v20  ;;  %v12616_v31 = vpack.c.bf16 %v2593_v26, %v2593_v26  ;;  %v2594_v32 = vmax.f32 %v2578_v27, 0.0 }
 0x256   : > { %2687 = vst [vmem:[#allocation2 + $0x8] sm:$0x1f] %v2686_v7  ;;  %v2695_v34 = vsel %vm14582_vm6, %v2648_v29, %v2694_v22  ;;  %v2664_v1 = vshrl.u32 %v12618_v62, 16  ;;  %v12619_v37 = vpack.c.bf16 %v2596_v30, %v2596_v30  ;;  %v2667_v43 = vshll.u32 %v12618_v62, 16 }
 0x257   : > { %2696 = vst [vmem:[#allocation2 + $0x20] sm:$0x1f] %v2695_v34  ;;  %v2689_v5 = vsel %vm14582_vm6, %v2634_v2, %v2688_v47  ;;  %v2650_v11 = vshrl.u32 %v12616_v31, 16  ;;  %v12617_v18 = vpack.c.bf16 %v2594_v32, %v2594_v32  ;;  %v2653_v50 = vshll.u32 %v12616_v31, 16  ;;  %v13794_v34 = vld [vmem:[%s16861_s5 + $0x180] sm:$0xff]  }
 0x258   : > { %2690 = vst [vmem:[#allocation2 + $0x10] sm:$0x1f] %v2689_v5  ;;  %v2666_v42 = vrot.slane %v2664_v1, 7  ;;  %v2671_v33 = vshrl.u32 %v12619_v37, 16  ;;  %v15016_v35 = vrot.slane %v3524_v40, 4  ;;  %v2674_v55 = vshll.u32 %v12619_v37, 16 }
 0x259   : > { %v2652_v48 = vrot.slane %v2650_v11, 7  ;;  %v2657_v52 = vshrl.u32 %v12617_v18, 16  ;;  %v15018_v56 = vrot.slane %v3527_v12, 5  ;;  %v2660_v59 = vshll.u32 %v12617_v18, 16  ;;  %v13797_v5 = vld [vmem:[%s16861_s5 + $0x1c8] sm:$0xff]  }
 0x25a   : > { %v2669_v25 = vor.u32 %v2667_v43, %v2666_v42  ;;  %v2673_v54 = vrot.slane %v2671_v33, 7  ;;  %v3535_v61 = vrot.slane %v15014_v41, 5  ;;  %v2976_v40 = vsel %vm14599_vm7, %v14994_v39, %v14996_v46  ;;  %v2700_v39 = vld [vmem:[#allocation2 + $0x30] sm:$0x1f] }
 0x25b   : > { %v2655_v57 = vor.u32 %v2653_v50, %v2652_v48  ;;  %v2659_v58 = vrot.slane %v2657_v52, 7  ;;  %v15031_v0 = vsel %vm14606_vm8, %v2801_v44, %v2805_v23  ;;  %v13798_v50 = vld [vmem:[%s16861_s5 + $0x188] sm:$0xff]  }
 0x25c   : > { %v2704_v51 = vsel %vm14582_vm6, %v2669_v25, %v2703_v45  ;;  %v2676_v63 = vor.u32 %v2674_v55, %v2673_v54  ;;  %v2748_v3 = vld [vmem:[#allocation2 + $0x18] sm:$0x1f] }
 0x25d   : > { %v15033_v60 = vld [vmem:[#allocation2 + $0x18] sm:$0x1e]  ;;  %2705 = vst [vmem:[#allocation2 + $0x38] sm:$0x1f] %v2704_v51  ;;  %v2698_v4 = vsel %vm14582_vm6, %v2655_v57, %v2697_v8  ;;  %v2662_v6 = vor.u32 %v2660_v59, %v2659_v58  ;;  %v2926_v49 = vld [vmem:[#allocation2 + $0x8] sm:$0x1e]  ;;  %v11803_v10 = vcombine.low %v2748_v3, %v2748_v3  ;;  %v11804_v21 = vcombine.high %v2748_v3, %v2748_v3 }
 0x25e   : > { %v2746_v9 = vld [vmem:[#allocation2 + $0x8] sm:$0x1f]  ;;  %2699 = vst [vmem:[#allocation2 + $0x28] sm:$0x1f] %v2698_v4  ;;  %v2707_v16 = vsel %vm14582_vm6, %v2676_v63, %v2706_v53  ;;  %v11819_v46 = vcombine.low %v2926_v49, %v2926_v49  ;;  %v11820_v23 = vcombine.high %v2926_v49, %v2926_v49  ;;  %v11823_v20 = vcombine.low %v15033_v60, %v15033_v60  ;;  %v13793_v43 = vld [vmem:[#allocation2 + $0x18] ss:$8 sps:$4 sm:$0xff]  }
 0x25f   : > { %v11799_v19 = vcombine.low %v2746_v9, %v2746_v9  ;;  %2708 = vst [vmem:[#allocation2 + $0x40] sm:$0x1f] %v2707_v16  ;;  %v2701_v13 = vsel %vm14582_vm6, %v2662_v6, %v2700_v39  ;;  %v13785_v14 = vld [vmem:[#allocation2 + $0x8] ss:$8 sps:$4 sm:$0xff]   ;;  %v11800_v17 = vcombine.high %v2746_v9, %v2746_v9  ;;  %v11824_v26 = vcombine.high %v15033_v60, %v15033_v60  ;;  %v2749_v59 = vld [vmem:[#allocation2 + $0x20] sm:$0x1f] }
 0x260   : > { %2702 = vst [vmem:[#allocation2 + $0x30] sm:$0x1f] %v2701_v13  ;;  %v11834_v27 = vrot.slane %v11819_v46, 9  ;;  %v2979_v36 = vrot.slane %v11820_v23, 5  ;;  %v2747_v62 = vld [vmem:[#allocation2 + $0x10] sm:$0x1f]  ;;  %4373 = vmatprep.mubr.bf16.mxu1 %v13785_v14  ;;  %v11806_v13 = vcombine.high %v2749_v59, %v2749_v59 }
 0x261   : > { %v2808_v28 = vshrl.u32 %v11799_v19, 16  ;;  %v2811_v29 = vshll.u32 %v11799_v19, 16  ;;  %v2817_v30 = vshll.u32 %v11800_v17, 16  ;;  %v11801_v7 = vcombine.low %v2747_v62, %v2747_v62  ;;  %v2927_v31 = vld [vmem:[#allocation2 + $0x10] sm:$0x1e]  ;;  %v13805_v49 = vld [vmem:[%s16861_s5 + $0x100] sm:$0xff]  }
 0x262   : > { %v11802_v22 = vcombine.high %v2747_v62, %v2747_v62  ;;  %v2836_v2 = vshrl.u32 %v11803_v10, 16  ;;  %v2980_v32 = vsel %vm14599_vm7, %v11834_v27, %v2979_v36  ;;  %v2839_v37 = vshll.u32 %v11803_v10, 16  ;;  %v13814_v4 = vld [vmem:[%s16861_s5 + $0x1d0] sm:$0xff]   ;;  %v13804_v39 = vld [vmem:[#allocation2] ss:$8 sps:$4 sm:$0xff]  }
 0x263   : > { %v2810_v47 = vrot.slane %v2808_v28, 4  ;;  %v2813_v1 = vrot.slane %v2811_v29, 5  ;;  %v11841_v12 = vcombine.low %v2976_v40, %v2980_v32  ;;  %v2819_v11 = vrot.slane %v2817_v30, 5  ;;  %v13816_v23 = vld [vmem:[%s16861_s5 + $0x190] sm:$0xff]   ;;  %v13817_v29 = vld [vmem:[%s16861_s5 + $0x148] sm:$0xff]  }
 0x264   : > { %v2822_v18 = vshrl.u32 %v11801_v7, 16  ;;  %v2825_v42 = vshll.u32 %v11801_v7, 16  ;;  %v2831_v44 = vshll.u32 %v11802_v22, 16  ;;  %v2838_v45 = vrot.slane %v2836_v2, 4  ;;  %v13819_v22 = vld [vmem:[%s16861_s5 + $0x1d8] sm:$0xff]  }
 0x265   : > { %v2814_v33 = vor.u32 %v2813_v1, %v2810_v47  ;;  %v2841_v48 = vrot.slane %v2839_v37, 5  ;;  %4374 = vmatmul.mubr.bf16.vlgmr.msra.gmra.mrb[40].mxu1 %v11841_v12  ;;  %v2845_v8 = vshll.u32 %v11804_v21, 16  ;;  %v11821_v54 = vcombine.low %v2927_v31, %v2927_v31  ;;  %v2750_v51 = vld [vmem:[#allocation2 + $0x28] sm:$0x1f] }
 0x266   : > { %v2824_v52 = vrot.slane %v2822_v18, 4  ;;  %v2827_v25 = vrot.slane %v2825_v42, 5  ;;  %4381 = vmatprep.mubr.bf16.mxu1 %v13793_v43  ;;  %12941 = vmatpush3.bf16.msra.mxu1 %v13794_v34  ;;  %v2833_v57 = vrot.slane %v2831_v44, 5  ;;  %v11822_v58 = vcombine.high %v2927_v31, %v2927_v31  ;;  %v2930_v34 = vld [vmem:[#allocation2 + $0x28] sm:$0x1e]  ;;  %v13821_v18 = vld [vmem:[%s16861_s5 + $0x150] sm:$0xff]  }
 0x267   : > { %v2815_v55 = vrot.slane %v2814_v33, 4  ;;  %v2842_v53 = vor.u32 %v2841_v48, %v2838_v45  ;;  %12942 = vmatprep.subr.bf16.mxu1 %v13797_v5  ;;  %v2847_v40 = vrot.slane %v2845_v8, 5  ;;  %v11835_v3 = vrot.slane %v11821_v54, 9  ;;  %v13815_v28 = vld [vmem:[#allocation2 + $0x28] ss:$8 sps:$4 sm:$0xff]   ;;  %v13820_v45 = vld [vmem:[%s16861_s5 + $0x198] sm:$0xff]  }
 0x268   : > { %v2828_v63 = vor.u32 %v2827_v25, %v2824_v52  ;;  %v11836_v60 = vrot.slane %v11823_v20, 9  ;;  %v2983_v10 = vrot.slane %v11822_v58, 5  ;;  %v2987_v21 = vrot.slane %v11824_v26, 5  ;;  %v13818_v47 = vld [vmem:[%s16861_s5 + $0x108] sm:$0xff]   ;;  %v2752_v8 = vld [vmem:[#allocation2 + $0x38] sm:$0x1f] }
 0x269   : > { %v2820_v6 = vsel %vm14606_vm8, %v2815_v55, %v2819_v11  ;;  %v2843_v9 = vrot.slane %v2842_v53, 4  ;;  %v11805_v19 = vcombine.low %v2749_v59, %v2749_v59  ;;  %v11807_v26 = vcombine.low %v2750_v51, %v2750_v51  ;;  %v2751_v11 = vld [vmem:[#allocation2 + $0x30] sm:$0x1f]  ;;  %v13832_v53 = vld [vmem:[%s16861_s5 + $0x1e0] sm:$0xff]  }
 0x26a   : > { %v11813_v16 = vcombine.low %v15031_v0, %v2820_v6  ;;  %v2829_v46 = vrot.slane %v2828_v63, 4  ;;  %12943 = vmatpush3.bf16.msra.mxu1 %v13798_v50  ;;  %v2984_v17 = vsel %vm14599_vm7, %v11835_v3, %v2983_v10  ;;  %v2988_v20 = vsel %vm14599_vm7, %v11836_v60, %v2987_v21  ;;  %v2929_v0 = vld [vmem:[#allocation2 + $0x20] sm:$0x1e]  ;;  %v13823_v59 = vld [vmem:[%s16861_s5 + $0x110] sm:$0xff]  }
 0x26b   : > { %v2848_v14 = vsel %vm14606_vm8, %v2843_v9, %v2847_v40  ;;  %v11842_v36 = vcombine.low %v2984_v17, %v2988_v20  ;;  %12944 = vmatprep.subr.bf16.mxu1 %v13814_v4  ;;  %v11808_v62 = vcombine.high %v2750_v51, %v2750_v51  ;;  %v2850_v30 = vshrl.u32 %v11805_v19, 16  ;;  %v13834_v3 = vld [vmem:[%s16861_s5 + $0x1a0] sm:$0xff]   ;;  %v13822_v4 = vld [vmem:[#allocation2 + $0x10] ss:$8 sps:$4 sm:$0xff]  }
 0x26c   : > { %4308 = vmatprep.mubr.bf16.mxu0 %v11813_v16  ;;  %v2834_v27 = vsel %vm14606_vm8, %v2829_v46, %v2833_v57  ;;  %v2853_v2 = vshll.u32 %v11805_v19, 16  ;;  %v2859_v31 = vshll.u32 %v11806_v13, 16  ;;  %v2864_v32 = vshrl.u32 %v11807_v26, 16  ;;  %v13835_v9 = vld [vmem:[%s16861_s5 + $0x158] sm:$0xff]   ;;  %v2931_v16 = vld [vmem:[#allocation2 + $0x30] sm:$0x1e] }
 0x26d   : > { %4309 = vmatmul.mubr.bf16.vlgmr.msra.gmra.mrb[40].mxu0 %v13804_v39  ;;  %v11814_v7 = vcombine.low %v2834_v27, %v2848_v14  ;;  %4382 = vmatmul.mubr.bf16.gmra.mrb[44].mxu1 %v11842_v36  ;;  %v2852_v1 = vrot.slane %v2850_v30, 4  ;;  %v2867_v37 = vshll.u32 %v11807_v26, 16  ;;  %v2873_v12 = vshll.u32 %v11808_v62, 16  ;;  %v13837_v19 = vld [vmem:[%s16861_s5 + $0x1e8] sm:$0xff]   ;;  %v2932_v27 = vld [vmem:[#allocation2 + $0x38] sm:$0x1e] }
 0x26e   : > { %12901 = vmatpush3.bf16.msra.mxu0 %v13805_v49  ;;  %v11825_v5 = vcombine.low %v2929_v0, %v2929_v0  ;;  %4389 = vmatprep.mubr.bf16.mxu1 %v13815_v28  ;;  %v2855_v42 = vrot.slane %v2853_v2, 5  ;;  %v2861_v43 = vrot.slane %v2859_v31, 5  ;;  %v2866_v33 = vrot.slane %v2864_v32, 4  ;;  %v13836_v28 = vld [vmem:[%s16861_s5 + $0x118] sm:$0xff]   ;;  %v13839_v2 = vld [vmem:[%s16861_s5 + $0x160] sm:$0xff]  }
 0x26f   : > { %4316 = vmatprep.mubr.bf16.mxu0 %v11814_v7  ;;  %v11826_v44 = vcombine.high %v2929_v0, %v2929_v0  ;;  %12945 = vmatpush3.bf16.msra.mxu1 %v13816_v23  ;;  %v2869_v48 = vrot.slane %v2867_v37, 5  ;;  %v2875_v50 = vrot.slane %v2873_v12, 5  ;;  %v11827_v52 = vcombine.low %v2930_v34, %v2930_v34  ;;  %v13833_v23 = vld [vmem:[#allocation2 + $0x38] ss:$8 sps:$4 sm:$0xff]   ;;  %v3377_v7 = vld [vmem:[#allocation2 + $0x10] sm:$0x1f] }
 0x270   : > { %12902 = vmatprep.subr.bf16.mxu0 %v13817_v29  ;;  %v11828_v25 = vcombine.high %v2930_v34, %v2930_v34  ;;  %12946 = vmatprep.subr.bf16.mxu1 %v13819_v22  ;;  %v2856_v54 = vor.u32 %v2855_v42, %v2852_v1  ;;  %v11837_v55 = vrot.slane %v11825_v5, 9  ;;  %v11809_v58 = vcombine.low %v2751_v11, %v2751_v11 }
 0x271   : > { %v2991_v57 = vrot.slane %v11826_v44, 5  ;;  %v2870_v51 = vor.u32 %v2869_v48, %v2866_v33  ;;  %v11838_v63 = vrot.slane %v11827_v52, 9  ;;  %v11810_v60 = vcombine.high %v2751_v11, %v2751_v11  ;;  %v3378_v11 = vld [vmem:[#allocation2 + $0x18] sm:$0x1f]  ;;  %v13850_v44 = vld [vmem:[%s16861_s5 + $0x1f0] sm:$0xff]  }
 0x272   : > { %12903 = vmatpush3.bf16.msra.mxu0 %v13818_v47  ;;  %v2995_v40 = vrot.slane %v11828_v25, 5  ;;  %v2857_v6 = vrot.slane %v2856_v54, 4  ;;  %v11811_v10 = vcombine.low %v2752_v8, %v2752_v8  ;;  %v11812_v21 = vcombine.high %v2752_v8, %v2752_v8  ;;  %v13838_v47 = vld [vmem:[%s16861_s5 + $0x1a8] sm:$0xff]  }
 0x273   : > { %12904 = vmatprep.subr.bf16.mxu0 %v13821_v18  ;;  %v2992_v49 = vsel %vm14599_vm7, %v11837_v55, %v2991_v57  ;;  %12947 = vmatpush3.bf16.msra.mxu1 %v13820_v45  ;;  %v2871_v39 = vrot.slane %v2870_v51, 4  ;;  %v2878_v13 = vshrl.u32 %v11809_v58, 16  ;;  %v2881_v14 = vshll.u32 %v11809_v58, 16  ;;  %v13841_v18 = vld [vmem:[%s16861_s5 + $0x120] sm:$0xff]   ;;  %v13856_v8 = vld [vmem:[%s16861_s5 + $0x168] sm:$0xff]  }
 0x274   : > { %v2996_v46 = vsel %vm14599_vm7, %v11838_v63, %v2995_v40  ;;  %v2862_v17 = vsel %vm14606_vm8, %v2857_v6, %v2861_v43  ;;  %12948 = vmatprep.subr.bf16.mxu1 %v13832_v53  ;;  %v2887_v26 = vshll.u32 %v11810_v60, 16  ;;  %v2892_v0 = vshrl.u32 %v11811_v10, 16  ;;  %v13840_v54 = vld [vmem:[#allocation2 + $0x20] ss:$8 sps:$4 sm:$0xff]   ;;  %v13851_v60 = vld [vmem:[%s16861_s5 + $0x1b0] sm:$0xff]  }
 0x275   : > { %4317 = vmatmul.mubr.bf16.gmra.mrb[44].mxu0 %v13822_v4  ;;  %v11843_v20 = vcombine.low %v2992_v49, %v2996_v46  ;;  %v2876_v36 = vsel %vm14606_vm8, %v2871_v39, %v2875_v50  ;;  %v2880_v29 = vrot.slane %v2878_v13, 4  ;;  %v2883_v62 = vrot.slane %v2881_v14, 5  ;;  %v13857_v46 = vld [vmem:[%s16861_s5 + $0x128] sm:$0xff]  }
 0x276   : > { %12905 = vmatpush3.bf16.msra.mxu0 %v13823_v59  ;;  %v2895_v30 = vshll.u32 %v11811_v10, 16  ;;  %v11815_v22 = vcombine.low %v2862_v17, %v2876_v36  ;;  %v2889_v31 = vrot.slane %v2887_v26, 5  ;;  %v2894_v32 = vrot.slane %v2892_v0, 4  ;;  %v3379_v26 = vld [vmem:[#allocation2 + $0x20] sm:$0x1f] }
 0x277   : > { %4390 = vmatmul.mubr.bf16.gmra.mrb[48].mxu1 %v11843_v20  ;;  %12906 = vmatprep.subr.bf16.mxu0 %v13835_v9  ;;  %v2901_v34 = vshll.u32 %v11812_v21, 16  ;;  %v2884_v1 = vor.u32 %v2883_v62, %v2880_v29  ;;  %v11829_v12 = vcombine.low %v2931_v16, %v2931_v16  ;;  %v11830_v5 = vcombine.high %v2931_v16, %v2931_v16  ;;  %v3241_v9 = vld [vmem:[#allocation2 + $0x8] sm:$0x1e]  ;;  %v13860_v20 = vld [vmem:[%s16861_s5 + $0x170] sm:$0xff]  }
 0x278   : > { %4397 = vmatprep.mubr.bf16.mxu1 %v13833_v23  ;;  %12949 = vmatpush3.bf16.msra.mxu1 %v13834_v3  ;;  %v2897_v37 = vrot.slane %v2895_v30, 5  ;;  %v11831_v43 = vcombine.low %v2932_v27, %v2932_v27  ;;  %v11832_v33 = vcombine.high %v2932_v27, %v2932_v27  ;;  %v11901_v45 = vcombine.low %v3377_v7, %v3377_v7  ;;  %v13858_v23 = vld [vmem:[%s16861_s5 + $0x1f8] sm:$0xff]  }
 0x279   : > { %4324 = vmatprep.mubr.bf16.mxu0 %v11815_v22  ;;  %12950 = vmatprep.subr.bf16.mxu1 %v13837_v19  ;;  %v2903_v42 = vrot.slane %v2901_v34, 5  ;;  %v2885_v48 = vrot.slane %v2884_v1, 4  ;;  %v11839_v52 = vrot.slane %v11829_v12, 9  ;;  %v2999_v25 = vrot.slane %v11830_v5, 5  ;;  %v3242_v19 = vld [vmem:[#allocation2 + $0x10] sm:$0x1e] }
 0x27a   : > { %12907 = vmatpush3.bf16.msra.mxu0 %v13836_v28  ;;  %v2898_v50 = vor.u32 %v2897_v37, %v2894_v32  ;;  %v11840_v55 = vrot.slane %v11831_v43, 9  ;;  %v3003_v57 = vrot.slane %v11832_v33, 5  ;;  %v11902_v53 = vcombine.high %v3377_v7, %v3377_v7  ;;  %v13859_v7 = vld [vmem:[%s16861_s5 + $0x1b8] sm:$0xff]  }
 0x27b   : > { %12908 = vmatprep.subr.bf16.mxu0 %v13839_v2  ;;  %v11903_v58 = vcombine.low %v3378_v11, %v3378_v11  ;;  %v2890_v59 = vsel %vm14606_vm8, %v2885_v48, %v2889_v31  ;;  %v3000_v63 = vsel %vm14599_vm7, %v11839_v52, %v2999_v25  ;;  %v11904_v40 = vcombine.high %v3378_v11, %v3378_v11  ;;  %v3380_v31 = vld [vmem:[#allocation2 + $0x28] sm:$0x1f]  ;;  %v13861_v5 = vld [vmem:[#allocation2 + $0x30] ss:$8 sps:$4 sm:$0xff]  }
 0x27c   : > { %12951 = vmatpush3.bf16.msra.mxu1 %v13838_v47  ;;  %v2899_v51 = vrot.slane %v2898_v50, 4  ;;  %v3004_v3 = vsel %vm14599_vm7, %v11840_v55, %v3003_v57  ;;  %v3426_v4 = vshrl.u32 %v11901_v45, 16  ;;  %v3429_v6 = vshll.u32 %v11901_v45, 16  ;;  %v13862_v47 = vld [vmem:[%s16861_s5 + $0x130] sm:$0xff]   ;;  %v13872_v43 = vld [vmem:[%s16861_s5 + $0x178] sm:$0xff]  }
 0x27d   : > { %4325 = vmatmul.mubr.bf16.gmra.mrb[48].mxu0 %v13840_v54  ;;  %12952 = vmatprep.subr.bf16.mxu1 %v13850_v44  ;;  %v3435_v49 = vshll.u32 %v11902_v53, 16  ;;  %v11844_v21 = vcombine.low %v3000_v63, %v3004_v3  ;;  %v3440_v16 = vshrl.u32 %v11903_v58, 16  ;;  %v3443_v39 = vshll.u32 %v11903_v58, 16  ;;  %v13873_v54 = vld [vmem:[%s16861_s5 + $0x138] sm:$0xff]  }
 0x27e   : > { %12909 = vmatpush3.bf16.msra.mxu0 %v13841_v18  ;;  %v2904_v10 = vsel %vm14606_vm8, %v2899_v51, %v2903_v42  ;;  %v3428_v14 = vrot.slane %v3426_v4, 4  ;;  %v3431_v17 = vrot.slane %v3429_v6, 5  ;;  %v3530_v0 = vor.u32 %v15018_v56, %v15016_v35  ;;  %v3062_v51 = vld [vmem:[#allocation2 + $0x10] sm:$0x1f]  ;;  %v15177_v4 = vld [vmem:[%s16861_s5 + $0x200] sm:$0xff]  }
 0x27f   : > { %v11816_v13 = vcombine.low %v2890_v59, %v2904_v10  ;;  %12910 = vmatprep.subr.bf16.mxu0 %v13856_v8  ;;  %4398 = vmatmul.mubr.bf16.gmra.mrb[52].mxu1 %v11844_v21  ;;  %v3442_v27 = vrot.slane %v3440_v16, 4  ;;  %v3445_v36 = vrot.slane %v3443_v39, 5  ;;  %v3449_v28 = vshll.u32 %v11904_v40, 16  ;;  %v3061_v59 = vld [vmem:[#allocation2 + $0x8] sm:$0x1f] }
 0x280   : > { %v11869_v29 = vcombine.low %v3241_v9, %v3241_v9  ;;  %12953 = vmatpush3.bf16.msra.mxu1 %v13851_v60  ;;  %v3432_v62 = vor.u32 %v3431_v17, %v3428_v14  ;;  %v3437_v30 = vrot.slane %v3435_v49, 5  ;;  %v11870_v22 = vcombine.high %v3241_v9, %v3241_v9  ;;  %v13867_v6 = vld [vmem:[#allocation2 + $0x10] ss:$8 sps:$4 sm:$0xff]  }
 0x281   : > { %4332 = vmatprep.mubr.bf16.mxu0 %v11816_v13  ;;  %v11871_v2 = vcombine.low %v3242_v19, %v3242_v19  ;;  %v3446_v32 = vor.u32 %v3445_v36, %v3442_v27  ;;  %v3451_v34 = vrot.slane %v3449_v28, 5  ;;  %12954 = vmatprep.subr.bf16.mxu1 %v13858_v23  ;;  %v11872_v1 = vcombine.high %v3242_v19, %v3242_v19  ;;  %v3243_v28 = vld [vmem:[#allocation2 + $0x18] sm:$0x1e] }
 0x282   : > { %12911 = vmatpush3.bf16.msra.mxu0 %v13857_v46  ;;  %v11885_v37 = vrot.slane %v11869_v29, 9  ;;  %v3433_v12 = vrot.slane %v3432_v62, 4  ;;  %v3291_v11 = vrot.slane %v11870_v22, 5  ;;  %v11905_v42 = vcombine.low %v3379_v26, %v3379_v26  ;;  %v3244_v22 = vld [vmem:[#allocation2 + $0x20] sm:$0x1e] }
 0x283   : > { %12912 = vmatprep.subr.bf16.mxu0 %v13860_v20  ;;  %v11886_v18 = vrot.slane %v11871_v2, 9  ;;  %v3447_v33 = vrot.slane %v3446_v32, 4  ;;  %v3295_v44 = vrot.slane %v11872_v1, 5  ;;  %v11906_v45 = vcombine.high %v3379_v26, %v3379_v26 }
 0x284   : > { %v11907_v48 = vcombine.low %v3380_v31, %v3380_v31  ;;  %v3438_v50 = vsel %vm14606_vm8, %v3433_v12, %v3437_v30  ;;  %12955 = vmatpush3.bf16.msra.mxu1 %v13859_v7  ;;  %v3292_v52 = vsel %vm14599_vm7, %v11885_v37, %v3291_v11  ;;  %v11908_v25 = vcombine.high %v3380_v31, %v3380_v31 }
 0x285   : > { %4333 = vmatmul.mubr.bf16.gmra.mrb[52].mxu0 %v13861_v5  ;;  %v3454_v8 = vshrl.u32 %v11905_v42, 16  ;;  %v3452_v55 = vsel %vm14606_vm8, %v3447_v33, %v3451_v34  ;;  %v3296_v57 = vsel %vm14599_vm7, %v11886_v18, %v3295_v44  ;;  %v3457_v53 = vshll.u32 %v11905_v42, 16 }
 0x286   : > { %12913 = vmatpush3.bf16.msra.mxu0 %v13862_v47  ;;  %v3463_v58 = vshll.u32 %v11906_v45, 16  ;;  %v11917_v63 = vcombine.low %v3438_v50, %v3452_v55  ;;  %v11893_v40 = vcombine.low %v3292_v52, %v3296_v57  ;;  %v3468_v60 = vshrl.u32 %v11907_v48, 16  ;;  %v3381_v47 = vld [vmem:[#allocation2 + $0x30] sm:$0x1f] }
 0x287   : > { %v3456_v3 = vrot.slane %v3454_v8, 4  ;;  %12914 = vmatprep.subr.bf16.mxu0 %v13872_v43  ;;  %v3459_v49 = vrot.slane %v3457_v53, 5  ;;  %v3471_v10 = vshll.u32 %v11907_v48, 16  ;;  %v3477_v21 = vshll.u32 %v11908_v25, 16  ;;  %v3382_v48 = vld [vmem:[#allocation2 + $0x38] sm:$0x1f] }
 0x288   : > { %v3465_v9 = vrot.slane %v3463_v58, 5  ;;  %4503 = vmatprep.mubr.bf16.mxu1 %v11917_v63  ;;  %4438 = vmatprep.mubr.bf16.mxu0 %v11893_v40  ;;  %v3470_v16 = vrot.slane %v3468_v60, 4  ;;  %v11849_v39 = vcombine.low %v3061_v59, %v3061_v59  ;;  %v11850_v46 = vcombine.high %v3061_v59, %v3061_v59  ;;  %v13883_v58 = vld [vmem:[#allocation2 + $0x20] ss:$8 sps:$4 sm:$0xff]  }
 0x289   : > { %v11851_v23 = vcombine.low %v3062_v51, %v3062_v51  ;;  %4504 = vmatmul.mubr.bf16.vlgmr.msra.gmra.mrb[56].mxu1 %v13867_v6  ;;  %v3460_v19 = vor.u32 %v3459_v49, %v3456_v3  ;;  %v3473_v13 = vrot.slane %v3471_v10, 5  ;;  %v3479_v14 = vrot.slane %v3477_v21, 5  ;;  %v3063_v10 = vld [vmem:[#allocation2 + $0x18] sm:$0x1f] }
 0x28a   : > { %12915 = vmatpush3.bf16.msra.mxu0 %v13873_v54  ;;  %v11852_v17 = vcombine.high %v3062_v51, %v3062_v51  ;;  %v3110_v20 = vshrl.u32 %v11849_v39, 16  ;;  %v3113_v26 = vshll.u32 %v11849_v39, 16  ;;  %v3119_v27 = vshll.u32 %v11850_v46, 16 }
 0x28b   : > { %13485 = vmatprep.subr.bf16.mxu0 %v15177_v4  ;;  %v3124_v36 = vshrl.u32 %v11851_v23, 16  ;;  %v3461_v29 = vrot.slane %v3460_v19, 4  ;;  %v3474_v62 = vor.u32 %v3473_v13, %v3470_v16  ;;  %v3127_v30 = vshll.u32 %v11851_v23, 16  ;;  %v13888_v23 = vld [vmem:[%s16861_s5 + $0x208] sm:$0xff]   ;;  %v3064_v19 = vld [vmem:[#allocation2 + $0x20] sm:$0x1f] }
 0x28c   : > { %v3133_v7 = vshll.u32 %v11852_v17, 16  ;;  %v3112_v2 = vrot.slane %v3110_v20, 4  ;;  %v3115_v31 = vrot.slane %v3113_v26, 5  ;;  %v3121_v32 = vrot.slane %v3119_v27, 5 }
 0x28d   : > { %v3126_v34 = vrot.slane %v3124_v36, 4  ;;  %v3466_v1 = vsel %vm14606_vm8, %v3461_v29, %v3465_v9  ;;  %v3475_v37 = vrot.slane %v3474_v62, 4  ;;  %v3129_v12 = vrot.slane %v3127_v30, 5 }
 0x28e   : > { %v3135_v5 = vrot.slane %v3133_v7, 5  ;;  %v3116_v11 = vor.u32 %v3115_v31, %v3112_v2  ;;  %v11873_v18 = vcombine.low %v3243_v28, %v3243_v28  ;;  %v11874_v42 = vcombine.high %v3243_v28, %v3243_v28 }
 0x28f   : > { %v11875_v43 = vcombine.low %v3244_v22, %v3244_v22  ;;  %v3480_v33 = vsel %vm14606_vm8, %v3475_v37, %v3479_v14  ;;  %v3130_v44 = vor.u32 %v3129_v12, %v3126_v34  ;;  %v11876_v45 = vcombine.high %v3244_v22, %v3244_v22  ;;  %v13889_v22 = vld [vmem:[%s16861_s5 + $0x210] sm:$0xff]  }
 0x290   : > { %v11909_v50 = vcombine.low %v3381_v47, %v3381_v47  ;;  %v11918_v52 = vcombine.low %v3466_v1, %v3480_v33  ;;  %v3117_v25 = vrot.slane %v3116_v11, 4  ;;  %v11887_v8 = vrot.slane %v11873_v18, 9 }
 0x291   : > { %v3299_v54 = vrot.slane %v11874_v42, 5  ;;  %v3131_v55 = vrot.slane %v3130_v44, 4  ;;  %v11888_v57 = vrot.slane %v11875_v43, 9  ;;  %v3303_v53 = vrot.slane %v11876_v45, 5  ;;  %v3246_v43 = vld [vmem:[#allocation2 + $0x30] sm:$0x1e] }
 0x292   : > { %v11910_v59 = vcombine.high %v3381_v47, %v3381_v47  ;;  %4511 = vmatprep.mubr.bf16.mxu1 %v11918_v52  ;;  %v3122_v51 = vsel %vm14606_vm8, %v3117_v25, %v3121_v32  ;;  %v11911_v40 = vcombine.low %v3382_v48, %v3382_v48  ;;  %v11912_v3 = vcombine.high %v3382_v48, %v3382_v48 }
 0x293   : > { %v3300_v63 = vsel %vm14599_vm7, %v11887_v8, %v3299_v54  ;;  %v3136_v60 = vsel %vm14606_vm8, %v3131_v55, %v3135_v5  ;;  %v3304_v6 = vsel %vm14599_vm7, %v11888_v57, %v3303_v53  ;;  %4512 = vmatmul.mubr.bf16.gmra.mrb[60].mxu1 %v13883_v58  ;;  %v3482_v49 = vshrl.u32 %v11909_v50, 16  ;;  %v3245_v5 = vld [vmem:[#allocation2 + $0x28] sm:$0x1e]  ;;  %v3383_v54 = vld [vmem:[#allocation2 + $0x40] sm:$0x1f]  ;;  %v13903_v55 = vld [vmem:[%s16861_s5 + $0x218] sm:$0xff]  }
 0x294   : > { %v3485_v9 = vshll.u32 %v11909_v50, 16  ;;  %v11865_v21 = vcombine.low %v3122_v51, %v3136_v60  ;;  %v11894_v16 = vcombine.low %v3300_v63, %v3304_v6  ;;  %v3491_v39 = vshll.u32 %v11910_v59, 16  ;;  %v13898_v60 = vld [vmem:[#allocation2 + $0x30] ss:$8 sps:$4 sm:$0xff]  }
 0x295   : > { %v3496_v46 = vshrl.u32 %v11911_v40, 16  ;;  %v3484_v13 = vrot.slane %v3482_v49, 4  ;;  %v3499_v17 = vshll.u32 %v11911_v40, 16  ;;  %v3505_v20 = vshll.u32 %v11912_v3, 16 }
 0x296   : > { %v3487_v14 = vrot.slane %v3485_v9, 5  ;;  %4439 = vmatmul.mubr.bf16.vlgmr.msra.gmra.mrb[56].mxu0 %v11865_v21  ;;  %v3493_v26 = vrot.slane %v3491_v39, 5  ;;  %v11853_v36 = vcombine.low %v3063_v10, %v3063_v10  ;;  %v11854_v28 = vcombine.high %v3063_v10, %v3063_v10  ;;  %v3065_v21 = vld [vmem:[#allocation2 + $0x28] sm:$0x1f] }
 0x297   : > { %v3498_v27 = vrot.slane %v3496_v46, 4  ;;  %13486 = vmatpush3.bf16.msra.mxu0 %v15177_v4  ;;  %4446 = vmatprep.mubr.bf16.mxu0 %v11894_v16  ;;  %v3501_v62 = vrot.slane %v3499_v17, 5  ;;  %v3507_v30 = vrot.slane %v3505_v20, 5  ;;  %v11855_v7 = vcombine.low %v3064_v19, %v3064_v19 }
 0x298   : > { %v3488_v29 = vor.u32 %v3487_v14, %v3484_v13  ;;  %13487 = vmatprep.subr.bf16.mxu0 %v13888_v23  ;;  %v11856_v2 = vcombine.high %v3064_v19, %v3064_v19  ;;  %v3138_v31 = vshrl.u32 %v11853_v36, 16  ;;  %v3141_v32 = vshll.u32 %v11853_v36, 16  ;;  %v13904_v19 = vld [vmem:[%s16861_s5 + $0x220] sm:$0xff]   ;;  %v3066_v13 = vld [vmem:[#allocation2 + $0x30] sm:$0x1f] }
 0x299   : > { %v3147_v34 = vshll.u32 %v11854_v28, 16  ;;  %v3502_v1 = vor.u32 %v3501_v62, %v3498_v27  ;;  %v3152_v37 = vshrl.u32 %v11855_v7, 16  ;;  %v3155_v12 = vshll.u32 %v11855_v7, 16 }
 0x29a   : > { %v3489_v47 = vrot.slane %v3488_v29, 4  ;;  %v3140_v4 = vrot.slane %v3138_v31, 4  ;;  %v3143_v11 = vrot.slane %v3141_v32, 5  ;;  %v3161_v42 = vshll.u32 %v11856_v2, 16  ;;  %v13914_v32 = vld [vmem:[%s16861_s5 + $0x228] sm:$0xff]  }
 0x29b   : > { %v3149_v18 = vrot.slane %v3147_v34, 5  ;;  %v3503_v44 = vrot.slane %v3502_v1, 4  ;;  %13488 = vmatpush3.bf16.msra.mxu0 %v13888_v23  ;;  %v3154_v45 = vrot.slane %v3152_v37, 4  ;;  %v3157_v48 = vrot.slane %v3155_v12, 5  ;;  %v3248_v12 = vld [vmem:[#allocation2 + $0x40] sm:$0x1e] }
 0x29c   : > { %v3494_v33 = vsel %vm14606_vm8, %v3489_v47, %v3493_v26  ;;  %13489 = vmatprep.subr.bf16.mxu0 %v13889_v22  ;;  %v3144_v50 = vor.u32 %v3143_v11, %v3140_v4  ;;  %v3163_v52 = vrot.slane %v3161_v42, 5  ;;  %v11877_v25 = vcombine.low %v3245_v5, %v3245_v5 }
 0x29d   : > { %v11878_v8 = vcombine.high %v3245_v5, %v3245_v5  ;;  %v3508_v57 = vsel %vm14606_vm8, %v3503_v44, %v3507_v30  ;;  %v3158_v53 = vor.u32 %v3157_v48, %v3154_v45  ;;  %v11879_v58 = vcombine.low %v3246_v43, %v3246_v43  ;;  %v3247_v30 = vld [vmem:[#allocation2 + $0x38] sm:$0x1e] }
 0x29e   : > { %v11880_v59 = vcombine.high %v3246_v43, %v3246_v43  ;;  %v11919_v51 = vcombine.low %v3494_v33, %v3508_v57  ;;  %v3145_v63 = vrot.slane %v3144_v50, 4  ;;  %v11889_v40 = vrot.slane %v11877_v25, 9  ;;  %v13915_v50 = vld [vmem:[%s16861_s5 + $0x230] sm:$0xff]   ;;  %v3068_v57 = vld [vmem:[#allocation2 + $0x40] sm:$0x1f] }
 0x29f   : > { %v3307_v3 = vrot.slane %v11878_v8, 5  ;;  %v3159_v6 = vrot.slane %v3158_v53, 4  ;;  %13490 = vmatpush3.bf16.msra.mxu0 %v13889_v22  ;;  %v11890_v49 = vrot.slane %v11879_v58, 9  ;;  %v11913_v10 = vcombine.low %v3383_v54, %v3383_v54 }
 0x2a0   : > { %v3311_v9 = vrot.slane %v11880_v59, 5  ;;  %4519 = vmatprep.mubr.bf16.mxu1 %v11919_v51  ;;  %v3150_v16 = vsel %vm14606_vm8, %v3145_v63, %v3149_v18  ;;  %v11914_v46 = vcombine.high %v3383_v54, %v3383_v54  ;;  %v3531_v23 = vrot.slane %v3530_v0, 4  ;;  %13491 = vmatprep.subr.bf16.mxu0 %v13903_v55 }
 0x2a1   : > { %v3308_v39 = vsel %vm14599_vm7, %v11889_v40, %v3307_v3  ;;  %v3164_v14 = vsel %vm14606_vm8, %v3159_v6, %v3163_v52  ;;  %4520 = vmatmul.mubr.bf16.gmra.mrb[64].mxu1 %v13898_v60  ;;  %v3510_v20 = vshrl.u32 %v11913_v10, 16  ;;  %v3513_v26 = vshll.u32 %v11913_v10, 16  ;;  %v3067_v52 = vld [vmem:[#allocation2 + $0x38] sm:$0x1f]  ;;  %v13913_v60 = vld [vmem:[#allocation2 + $0x40] ss:$8 sps:$4 sm:$0xff]  }
 0x2a2   : > { %v3312_v17 = vsel %vm14599_vm7, %v11890_v49, %v3311_v9  ;;  %v11866_v27 = vcombine.low %v3150_v16, %v3164_v14  ;;  %v3519_v28 = vshll.u32 %v11914_v46, 16  ;;  %v11857_v35 = vcombine.low %v3065_v21, %v3065_v21 }
 0x2a3   : > { %v11895_v36 = vcombine.low %v3308_v39, %v3312_v17  ;;  %v3512_v56 = vrot.slane %v3510_v20, 4  ;;  %v3515_v0 = vrot.slane %v3513_v26, 5  ;;  %13492 = vmatpush3.bf16.msra.mxu0 %v13903_v55  ;;  %v11858_v29 = vcombine.high %v3065_v21, %v3065_v21  ;;  %v13924_v21 = vld [vmem:[%s16861_s5 + $0x238] sm:$0xff]  }
 0x2a4   : > { %v11859_v62 = vcombine.low %v3066_v13, %v3066_v13  ;;  %4447 = vmatmul.mubr.bf16.gmra.mrb[60].mxu0 %v11866_v27  ;;  %v3536_v7 = vsel %vm14606_vm8, %v3531_v23, %v3535_v61  ;;  %13493 = vmatprep.subr.bf16.mxu0 %v13904_v19  ;;  %v11860_v22 = vcombine.high %v3066_v13, %v3066_v13  ;;  %v3166_v2 = vshrl.u32 %v11857_v35, 16  ;;  %v3558_v20 = vld [vmem:[#allocation2 + $0x18] sm:$0x1e] }
 0x2a5   : > { %v3169_v31 = vshll.u32 %v11857_v35, 16  ;;  %4454 = vmatprep.mubr.bf16.mxu0 %v11895_v36  ;;  %v3516_v34 = vor.u32 %v3515_v0, %v3512_v56  ;;  %v3175_v47 = vshll.u32 %v11858_v29, 16  ;;  %v3521_v5 = vrot.slane %v3519_v28, 5 }
 0x2a6   : > { %v3180_v1 = vshrl.u32 %v11859_v62, 16  ;;  %v3183_v37 = vshll.u32 %v11859_v62, 16  ;;  %v3168_v4 = vrot.slane %v3166_v2, 4  ;;  %v11881_v11 = vcombine.low %v3247_v30, %v3247_v30 }
 0x2a7   : > { %v3171_v41 = vrot.slane %v3169_v31, 5  ;;  %v3517_v18 = vrot.slane %v3516_v34, 4  ;;  %v3189_v43 = vshll.u32 %v11860_v22, 16  ;;  %13494 = vmatpush3.bf16.msra.mxu0 %v13904_v19  ;;  %v3177_v44 = vrot.slane %v3175_v47, 5  ;;  %v3557_v19 = vld [vmem:[#allocation2 + $0x10] sm:$0x1e] }
 0x2a8   : > { %v3182_v61 = vrot.slane %v3180_v1, 4  ;;  %v3185_v42 = vrot.slane %v3183_v37, 5  ;;  %v11882_v45 = vcombine.high %v3247_v30, %v3247_v30  ;;  %v11883_v48 = vcombine.low %v3248_v12, %v3248_v12  ;;  %13495 = vmatprep.subr.bf16.mxu0 %v13914_v32  ;;  %v3560_v47 = vld [vmem:[#allocation2 + $0x28] sm:$0x1e] }
 0x2a9   : > { %v3172_v33 = vor.u32 %v3171_v41, %v3168_v4  ;;  %v3522_v25 = vsel %vm14606_vm8, %v3517_v18, %v3521_v5  ;;  %v11884_v54 = vcombine.high %v3248_v12, %v3248_v12  ;;  %v11891_v55 = vrot.slane %v11881_v11, 9  ;;  %v3559_v12 = vld [vmem:[#allocation2 + $0x20] sm:$0x1e]  ;;  %v3561_v5 = vld [vmem:[#allocation2 + $0x30] sm:$0x1e] }
 0x2aa   : > { %v3186_v8 = vor.u32 %v3185_v42, %v3182_v61  ;;  %v11920_v53 = vcombine.low %v3522_v25, %v3536_v7  ;;  %v3315_v59 = vrot.slane %v11882_v45, 5  ;;  %v11892_v51 = vrot.slane %v11883_v48, 9 }
 0x2ab   : > { %v3173_v58 = vrot.slane %v3172_v33, 4  ;;  %v3191_v40 = vrot.slane %v3189_v43, 5  ;;  %v3319_v3 = vrot.slane %v11884_v54, 5  ;;  %13496 = vmatpush3.bf16.msra.mxu0 %v13914_v32  ;;  %v11861_v6 = vcombine.low %v3067_v52, %v3067_v52  ;;  %v3562_v33 = vld [vmem:[#allocation2 + $0x38] sm:$0x1e] }
 0x2ac   : > { %v3187_v63 = vrot.slane %v3186_v8, 4  ;;  %4527 = vmatprep.mubr.bf16.mxu1 %v11920_v53  ;;  %13497 = vmatprep.subr.bf16.mxu0 %v13915_v50  ;;  %v11862_v9 = vcombine.high %v3067_v52, %v3067_v52  ;;  %v11863_v10 = vcombine.low %v3068_v57, %v3068_v57  ;;  %v11864_v46 = vcombine.high %v3068_v57, %v3068_v57 }
 0x2ad   : > { %v3178_v49 = vsel %vm14606_vm8, %v3173_v58, %v3177_v44  ;;  %v3320_v39 = vsel %vm14599_vm7, %v11892_v51, %v3319_v3  ;;  %4528 = vmatmul.mubr.bf16.gmra.mrb[68].mxu1 %v13913_v60  ;;  %v3194_v23 = vshrl.u32 %v11861_v6, 16  ;;  %v3316_v14 = vsel %vm14599_vm7, %v11891_v55, %v3315_v59  ;;  %v3563_v60 = vld [vmem:[#allocation2 + $0x40] sm:$0x1e] }
 0x2ae   : > { %v3192_v16 = vsel %vm14606_vm8, %v3187_v63, %v3191_v40  ;;  %v3197_v17 = vshll.u32 %v11861_v6, 16  ;;  %v11896_v26 = vcombine.low %v3316_v14, %v3320_v39  ;;  %v3208_v36 = vshrl.u32 %v11863_v10, 16  ;;  %v3564_v63 = vld [vmem:[#allocation2 + $0x48] sm:$0x1e] }
 0x2af   : > { %v11867_v13 = vcombine.low %v3178_v49, %v3192_v16  ;;  %v3196_v27 = vrot.slane %v3194_v23, 4  ;;  %v3211_v28 = vshll.u32 %v11863_v10, 16  ;;  %13498 = vmatpush3.bf16.msra.mxu0 %v13915_v50  ;;  %v3203_v56 = vshll.u32 %v11862_v9, 16 }
 0x2b0   : > { %v3199_v35 = vrot.slane %v3197_v17, 5  ;;  %v11921_v0 = vcombine.low %v3557_v19, %v3557_v19  ;;  %v11922_v29 = vcombine.high %v3557_v19, %v3557_v19  ;;  %13499 = vmatprep.subr.bf16.mxu0 %v13924_v21  ;;  %v3210_v62 = vrot.slane %v3208_v36, 4 }
 0x2b1   : > { %4455 = vmatmul.mubr.bf16.gmra.mrb[64].mxu0 %v11867_v13  ;;  %v3213_v30 = vrot.slane %v3211_v28, 5  ;;  %v3217_v7 = vshll.u32 %v11864_v46, 16  ;;  %v11923_v22 = vcombine.low %v3558_v20, %v3558_v20  ;;  %v11924_v31 = vcombine.high %v3558_v20, %v3558_v20 }
 0x2b2   : > { %4462 = vmatprep.mubr.bf16.mxu0 %v11896_v26  ;;  %v3200_v2 = vor.u32 %v3199_v35, %v3196_v27  ;;  %v11937_v32 = vrot.slane %v11921_v0, 9  ;;  %v3607_v34 = vrot.slane %v11922_v29, 5  ;;  %v3205_v41 = vrot.slane %v3203_v56, 5  ;;  %v13937_v29 = vld [vmem:[%s16863_s7 + $0xc0] sm:$0xff]  }
 0x2b3   : > { %v3214_v1 = vor.u32 %v3213_v30, %v3210_v62  ;;  %v11938_v37 = vrot.slane %v11923_v22, 9  ;;  %13500 = vmatpush3.bf16.msra.mxu0 %v13924_v21  ;;  %v3611_v11 = vrot.slane %v11924_v31, 5  ;;  %v3219_v61 = vrot.slane %v3217_v7, 5  ;;  %v13938_v62 = vld [vmem:[%s16863_s7 + $0x80] sm:$0xff]   ;;  %v13939_v30 = vld [vmem:[%s16863_s7 + $0xc8] sm:$0xff]   ;;  %v13943_v31 = vld [vmem:[%s16863_s7 + $0xd0] sm:$0xff]  }
 0x2b4   : > { %v3201_v4 = vrot.slane %v3200_v2, 4  ;;  %v11927_v42 = vcombine.low %v3560_v47, %v3560_v47  ;;  %v11928_v43 = vcombine.high %v3560_v47, %v3560_v47  ;;  %v3608_v44 = vsel %vm14599_vm7, %v11937_v32, %v3607_v34  ;;  %13032 = vmatprep.subr.bf16.mxu0 %v13937_v29  ;;  %v13940_v7 = vld [vmem:[%s16863_s7 + $0x88] sm:$0xff]   ;;  %v13941_v22 = vld [vmem:[%s16863_s7 + $0x40] sm:$0xff]   ;;  %v13944_v32 = vld [vmem:[%s16863_s7 + $0x90] sm:$0xff]  }
 0x2b5   : > { %v3215_v18 = vrot.slane %v3214_v1, 4  ;;  %v11925_v45 = vcombine.low %v3559_v12, %v3559_v12  ;;  %v11929_v48 = vcombine.low %v3561_v5, %v3561_v5  ;;  %v3612_v25 = vsel %vm14599_vm7, %v11938_v37, %v3611_v11  ;;  %v13942_v2 = vld [vmem:[%s16863_s7] sm:$0xff]   ;;  %12992 = vmatprep.subr.bf16.mxu1 %v13941_v22  ;;  %v13945_v34 = vld [vmem:[%s16863_s7 + $0x48] sm:$0xff]   ;;  %v13947_v1 = vld [vmem:[%s16863_s7 + $0xd8] sm:$0xff]  }
 0x2b6   : > { %v3206_v50 = vsel %vm14606_vm8, %v3201_v4, %v3205_v41  ;;  %v11926_v8 = vcombine.high %v3559_v12, %v3559_v12  ;;  %v11930_v55 = vcombine.high %v3561_v5, %v3561_v5  ;;  %v11931_v57 = vcombine.low %v3562_v33, %v3562_v33  ;;  %12993 = vmatpush3.bf16.msra.mxu1 %v13942_v2  ;;  %v13946_v47 = vld [vmem:[%s16863_s7 + $0x8] sm:$0xff]   ;;  %v13948_v37 = vld [vmem:[%s16863_s7 + $0x98] sm:$0xff]   ;;  %v13949_v12 = vld [vmem:[%s16863_s7 + $0x50] sm:$0xff]  }
 0x2b7   : > { %v3220_v52 = vsel %vm14606_vm8, %v3215_v18, %v3219_v61  ;;  %v11932_v53 = vcombine.high %v3562_v33, %v3562_v33  ;;  %v11945_v58 = vcombine.low %v3608_v44, %v3612_v25  ;;  %v11940_v59 = vrot.slane %v11927_v42, 9  ;;  %12994 = vmatprep.subr.bf16.mxu1 %v13945_v34  ;;  %v13950_v5 = vld [vmem:[%s16863_s7 + $0x10] sm:$0xff]   ;;  %v13951_v4 = vld [vmem:[%s16863_s7 + $0xe0] sm:$0xff]   ;;  %v13953_v41 = vld [vmem:[%s16863_s7 + $0x58] sm:$0xff]  }
 0x2b8   : > { %v11868_v54 = vcombine.low %v3206_v50, %v3220_v52  ;;  %v3619_v51 = vrot.slane %v11928_v43, 5  ;;  %v11941_v40 = vrot.slane %v11929_v48, 9  ;;  %v3623_v3 = vrot.slane %v11930_v55, 5  ;;  %v13952_v11 = vld [vmem:[%s16863_s7 + $0xa0] sm:$0xff]   ;;  %v13955_v18 = vld [vmem:[%s16863_s7 + $0xe8] sm:$0xff]   ;;  %v13954_v61 = vld [vmem:[%s16863_s7 + $0x18] sm:$0xff]  }
 0x2b9   : > { %v11939_v6 = vrot.slane %v11925_v45, 9  ;;  %v3615_v49 = vrot.slane %v11926_v8, 5  ;;  %v11942_v9 = vrot.slane %v11931_v57, 9  ;;  %v3627_v10 = vrot.slane %v11932_v53, 5  ;;  %v13957_v42 = vld [vmem:[%s16863_s7 + $0x60] sm:$0xff]   ;;  %v13956_v43 = vld [vmem:[%s16863_s7 + $0xa8] sm:$0xff]  }
 0x2ba   : > { %4463 = vmatmul.mubr.bf16.gmra.mrb[68].mxu0 %v11868_v54  ;;  %v11935_v21 = vcombine.low %v3564_v63, %v3564_v63  ;;  %v3620_v16 = vsel %vm14599_vm7, %v11940_v59, %v3619_v51  ;;  %v11933_v39 = vcombine.low %v3563_v60, %v3563_v60  ;;  %v11934_v46 = vcombine.high %v3563_v60, %v3563_v60  ;;  %v13959_v33 = vld [vmem:[%s16863_s7 + $0xf0] sm:$0xff]   ;;  %v13958_v44 = vld [vmem:[%s16863_s7 + $0x20] sm:$0xff]   ;;  %v13961_v45 = vld [vmem:[%s16863_s7 + $0x68] sm:$0xff]  }
 0x2bb   : > { %13501 = vmatprep.mubr.bf16.mxu0 %v11945_v58  ;;  %v11936_v23 = vcombine.high %v3564_v63, %v3564_v63  ;;  %v3624_v19 = vsel %vm14599_vm7, %v11941_v40, %v3623_v3  ;;  %v3616_v13 = vsel %vm14599_vm7, %v11939_v6, %v3615_v49  ;;  %v3628_v17 = vsel %vm14599_vm7, %v11942_v9, %v3627_v10  ;;  %v13960_v50 = vld [vmem:[%s16863_s7 + $0xb0] sm:$0xff]   ;;  %v13963_v25 = vld [vmem:[%s16863_s7 + $0xf8] sm:$0xff]   ;;  %v13962_v55 = vld [vmem:[%s16863_s7 + $0x28] sm:$0xff]  }
 0x2bc   : > { %v11946_v14 = vcombine.low %v3616_v13, %v3620_v16  ;;  %v11944_v20 = vrot.slane %v11935_v21, 9  ;;  %v11947_v26 = vcombine.low %v3624_v19, %v3628_v17  ;;  %v11943_v27 = vrot.slane %v11933_v39, 9  ;;  %12995 = vmatpush3.bf16.msra.mxu1 %v13946_v47  ;;  %v13966_v53 = vld [vmem:[%s16863_s7 + $0x70] sm:$0xff]   ;;  %v13964_v59 = vld [vmem:[%s16863_s7 + $0xb8] sm:$0xff]   ;;  %v13972_v51 = vld [vmem:[%s16863_s7 + $0x1c0] sm:$0xff]  }
 0x2bd   : > { %v3631_v36 = vrot.slane %v11934_v46, 5  ;;  %v3635_v28 = vrot.slane %v11936_v23, 5  ;;  %12996 = vmatprep.subr.bf16.mxu1 %v13949_v12  ;;  %v13967_v63 = vld [vmem:[%s16863_s7 + $0x30] sm:$0xff]   ;;  %v13975_v3 = vld [vmem:[%s16863_s7 + $0x78] sm:$0xff]   ;;  %v15362_v60 = vld [vmem:[%s16862_s6] ss:$0 sm:$0xff] }
 0x2be   : > { %v13976_v23 = vld [vmem:[%s16863_s7 + $0x38] sm:$0xff]   ;;  %v13983_v17 = vld [vmem:[%s16863_s7 + $0x140] sm:$0xff]  }
 0x2bf   : > { %v3632_v35 = vsel %vm14599_vm7, %v11943_v27, %v3631_v36  ;;  %v3636_v56 = vsel %vm14599_vm7, %v11944_v20, %v3635_v28 }
 0x2c0   : > { %v11948_v0 = vcombine.low %v3632_v35, %v3636_v56  ;;  %12997 = vmatpush3.bf16.msra.mxu1 %v13950_v5 }
 0x2c1   : > { %12998 = vmatprep.subr.bf16.mxu1 %v13953_v41 }
 0x2c2   : > { %13502 = vmatmul.mubr.bf16.vlgmr.msra.gmra.mrb[72].mxu0 %v11946_v14 }
 0x2c3   : > { %13505 = vmatprep.mubr.bf16.mxu0 %v11947_v26  ;;  %13033 = vmatpush3.bf16.msra.mxu0 %v13938_v62 }
 0x2c4   : > { %13034 = vmatprep.subr.bf16.mxu0 %v13939_v30  ;;  %12999 = vmatpush3.bf16.msra.mxu1 %v13954_v61 }
 0x2c5   : > { %13000 = vmatprep.subr.bf16.mxu1 %v13957_v42 }
 0x2c7   : > { %13035 = vmatpush3.bf16.msra.mxu0 %v13940_v7 }
 0x2c8   : > { %13036 = vmatprep.subr.bf16.mxu0 %v13943_v31  ;;  %13001 = vmatpush3.bf16.msra.mxu1 %v13958_v44 }
 0x2c9   : > { %13002 = vmatprep.subr.bf16.mxu1 %v13961_v45 }
 0x2ca   : > { %13506 = vmatmul.mubr.bf16.gmra.mrb[76].mxu0 %v11948_v0 }
 0x2cb   : > { %13037 = vmatpush3.bf16.msra.mxu0 %v13944_v32 }
 0x2cc   : > { %13038 = vmatprep.subr.bf16.mxu0 %v13947_v1  ;;  %13003 = vmatpush3.bf16.msra.mxu1 %v13962_v55 }
 0x2cd   : > { %13004 = vmatprep.subr.bf16.mxu1 %v13966_v53 }
 0x2cf   : > { %13039 = vmatpush3.bf16.msra.mxu0 %v13948_v37 }
 0x2d0   : > { %13040 = vmatprep.subr.bf16.mxu0 %v13951_v4  ;;  %13005 = vmatpush3.bf16.msra.mxu1 %v13967_v63 }
 0x2d1   : > { %13006 = vmatprep.subr.bf16.mxu1 %v13975_v3 }
 0x2d3   : > { %13041 = vmatpush3.bf16.msra.mxu0 %v13952_v11 }
 0x2d4   : > { %13042 = vmatprep.subr.bf16.mxu0 %v13955_v18  ;;  %13007 = vmatpush3.bf16.msra.mxu1 %v13976_v23 }
 0x2d5   : > { %13072 = vmatprep.subr.bf16.mxu1 %v13983_v17 }
 0x2d7   : > { %13043 = vmatpush3.bf16.msra.mxu0 %v13956_v43 }
 0x2d8   : > { %13044 = vmatprep.subr.bf16.mxu0 %v13959_v33 }
 0x2db   : > { %13045 = vmatpush3.bf16.msra.mxu0 %v13960_v50 }
 0x2dc   : > { %13046 = vmatprep.subr.bf16.mxu0 %v13963_v25 }
 0x2df   : > { %13047 = vmatpush3.bf16.msra.mxu0 %v13964_v59 }
 0x2e0   : > { %13112 = vmatprep.subr.bf16.mxu0 %v13972_v51 }
 0x338   : > { %v12876_v48 = vpop.f32.mrb[40].mxu1 }
 0x339   : > { %v12877_v52 = vpop.f32.mrb[41].mxu1 }
 0x33a   : > { %v12878_v8 = vadd.f32 %v12877_v52, %v12876_v48  ;;  %v12879_v54 = vpop.f32.mrb[42].mxu1 }
 0x33b   : > { %v12880_v57 = vpop.f32.mrb[43].mxu1 }
 0x33c   : > { %v12881_v58 = vadd.f32 %v12880_v57, %v12879_v54 }
 0x340   : > { %v12836_v40 = vpop.f32.mrb[40].mxu0  ;;  %v12882_v49 = vpop.f32.mrb[44].mxu1 }
 0x341   : > { %v12837_v6 = vpop.f32.mrb[41].mxu0  ;;  %v12883_v21 = vpop.f32.mrb[45].mxu1 }
 0x342   : > { %v12838_v9 = vadd.f32 %v12837_v6, %v12836_v40  ;;  %v12839_v10 = vpop.f32.mrb[42].mxu0  ;;  %v12884_v16 = vadd.f32 %v12883_v21, %v12882_v49  ;;  %v12885_v46 = vpop.f32.mrb[46].mxu1 }
 0x343   : > { %v12840_v39 = vpop.f32.mrb[43].mxu0  ;;  %v12886_v14 = vpop.f32.mrb[47].mxu1 }
 0x344   : > { %v4311_v19 = vadd.f32 %v12838_v9, %v15362_v60  ;;  %v12841_v13 = vadd.f32 %v12840_v39, %v12839_v10  ;;  %v12887_v20 = vadd.f32 %v12886_v14, %v12885_v46 }
 0x346   : > { %v4314_v26 = vadd.f32 %v12841_v13, %v15362_v60  ;;  %v15372_v27 = vadd.f32 %v12878_v8, %v4311_v19 }
 0x348   : > { %v12842_v36 = vpop.f32.mrb[44].mxu0  ;;  %v4379_v28 = vadd.f32 %v12881_v58, %v4314_v26 }
 0x349   : > { %v12843_v35 = vpop.f32.mrb[45].mxu0 }
 0x34a   : > { %v12844_v56 = vadd.f32 %v12843_v35, %v12842_v36  ;;  %v12888_v0 = vpop.f32.mrb[48].mxu1  ;;  %v12845_v29 = vpop.f32.mrb[46].mxu0 }
 0x34b   : > { %v12889_v62 = vpop.f32.mrb[49].mxu1  ;;  %v12846_v30 = vpop.f32.mrb[47].mxu0 }
 0x34c   : > { %v4319_v7 = vadd.f32 %v12844_v56, %v15362_v60  ;;  %v12890_v22 = vadd.f32 %v12889_v62, %v12888_v0  ;;  %v12847_v2 = vadd.f32 %v12846_v30, %v12845_v29  ;;  %v12891_v31 = vpop.f32.mrb[50].mxu1 }
 0x34d   : > { %v12892_v32 = vpop.f32.mrb[51].mxu1 }
 0x34e   : > { %v4322_v34 = vadd.f32 %v12847_v2, %v15362_v60  ;;  %v12893_v47 = vadd.f32 %v12892_v32, %v12891_v31  ;;  %v4384_v1 = vadd.f32 %v12884_v16, %v4319_v7 }
 0x350   : > { %v12848_v37 = vpop.f32.mrb[48].mxu0  ;;  %v4387_v12 = vadd.f32 %v12887_v20, %v4322_v34 }
 0x351   : > { %v12849_v5 = vpop.f32.mrb[49].mxu0 }
 0x352   : > { %v12850_v4 = vadd.f32 %v12849_v5, %v12848_v37  ;;  %v12851_v41 = vpop.f32.mrb[50].mxu0  ;;  %v12894_v11 = vpop.f32.mrb[52].mxu1 }
 0x353   : > { %v12852_v18 = vpop.f32.mrb[51].mxu0  ;;  %v12895_v42 = vpop.f32.mrb[53].mxu1 }
 0x354   : > { %v4327_v61 = vadd.f32 %v12850_v4, %v15362_v60  ;;  %v12853_v43 = vadd.f32 %v12852_v18, %v12851_v41  ;;  %v12896_v33 = vadd.f32 %v12895_v42, %v12894_v11  ;;  %v12897_v44 = vpop.f32.mrb[54].mxu1 }
 0x355   : > { %v12898_v48 = vpop.f32.mrb[55].mxu1 }
 0x356   : > { %v4330_v45 = vadd.f32 %v12853_v43, %v15362_v60  ;;  %v4392_v50 = vadd.f32 %v12890_v22, %v4327_v61  ;;  %v12899_v52 = vadd.f32 %v12898_v48, %v12897_v44 }
 0x358   : > { %v12854_v25 = vpop.f32.mrb[52].mxu0  ;;  %v4395_v8 = vadd.f32 %v12893_v47, %v4330_v45 }
 0x359   : > { %v12855_v54 = vpop.f32.mrb[53].mxu0 }
 0x35a   : > { %v12856_v55 = vadd.f32 %v12855_v54, %v12854_v25  ;;  %v12857_v57 = vpop.f32.mrb[54].mxu0 }
 0x35b   : > { %v12858_v53 = vpop.f32.mrb[55].mxu0 }
 0x35c   : > { %v4335_v58 = vadd.f32 %v12856_v55, %v15362_v60  ;;  %v12859_v59 = vadd.f32 %v12858_v53, %v12857_v57  ;;  %v12956_v51 = vpop.f32.mrb[56].mxu1 }
 0x35d   : > { %v12957_v63 = vpop.f32.mrb[57].mxu1 }
 0x35e   : > { %v4338_v40 = vadd.f32 %v12859_v59, %v15362_v60  ;;  %v4400_v3 = vadd.f32 %v12896_v33, %v4335_v58  ;;  %v12958_v6 = vadd.f32 %v12957_v63, %v12956_v51  ;;  %v12959_v49 = vpop.f32.mrb[58].mxu1 }
 0x35f   : > { %v12960_v9 = vpop.f32.mrb[59].mxu1 }
 0x360   : > { %v4403_v10 = vadd.f32 %v12899_v52, %v4338_v40  ;;  %v12961_v21 = vadd.f32 %v12960_v9, %v12959_v49 }
 0x366   : > { %v12962_v16 = vpop.f32.mrb[60].mxu1 }
 0x367   : > { %v12963_v39 = vpop.f32.mrb[61].mxu1 }
 0x368   : > { %v12964_v46 = vadd.f32 %v12963_v39, %v12962_v16  ;;  %v12965_v23 = vpop.f32.mrb[62].mxu1 }
 0x369   : > { %v12916_v19 = vpop.f32.mrb[56].mxu0  ;;  %v12966_v13 = vpop.f32.mrb[63].mxu1 }
 0x36a   : > { %v12917_v14 = vpop.f32.mrb[57].mxu0  ;;  %v12967_v17 = vadd.f32 %v12966_v13, %v12965_v23  ;;  %v4937_v23 = vld [vmem:[#allocation2] sm:$0x1e] }
 0x36b   : > { %v12918_v20 = vadd.f32 %v12917_v14, %v12916_v19  ;;  %v12919_v26 = vpop.f32.mrb[58].mxu0  ;;  %v15385_v14 = vld [vmem:[#allocation2 + $0x48] sm:$0x1f] }
 0x36c   : > { %v12920_v36 = vpop.f32.mrb[59].mxu0 }
 0x36d   : > { %v4441_v35 = vadd.f32 %v12918_v20, %v15372_v27  ;;  %v12921_v60 = vadd.f32 %v12920_v36, %v12919_v26  ;;  %v12054_v26 = vcombine.low %v4937_v23, %v4937_v23  ;;  %v12055_v36 = vcombine.high %v4937_v23, %v4937_v23  ;;  %v4697_v23 = vld [vmem:[#allocation2 + $0x8] sm:$0x1f] }
 0x36f   : > { %v4444_v56 = vadd.f32 %v12921_v60, %v4379_v28  ;;  %v4506_v0 = vadd.f32 %v12958_v6, %v4441_v35 }
 0x371   : > { %v15381_v29 = vadd.f32 %v12961_v21, %v4444_v56 }
 0x374   : > { %v12968_v62 = vpop.f32.mrb[64].mxu1 }
 0x375   : > { %v12969_v30 = vpop.f32.mrb[65].mxu1 }
 0x376   : > { %v12970_v7 = vadd.f32 %v12969_v30, %v12968_v62  ;;  %v12971_v22 = vpop.f32.mrb[66].mxu1 }
 0x377   : > { %v12922_v2 = vpop.f32.mrb[60].mxu0  ;;  %v12972_v31 = vpop.f32.mrb[67].mxu1 }
 0x378   : > { %v12923_v32 = vpop.f32.mrb[61].mxu0  ;;  %v12973_v34 = vadd.f32 %v12972_v31, %v12971_v22  ;;  %v15395_v22 = vcombine.low %v15385_v14, %v15385_v14 }
 0x379   : > { %v12924_v47 = vadd.f32 %v12923_v32, %v12922_v2  ;;  %v12925_v37 = vpop.f32.mrb[62].mxu0 }
 0x37a   : > { %v12926_v5 = vpop.f32.mrb[63].mxu0 }
 0x37b   : > { %v4449_v4 = vadd.f32 %v12924_v47, %v4384_v1  ;;  %v12927_v41 = vadd.f32 %v12926_v5, %v12925_v37  ;;  %v15400_v47 = vrot.slane %v12055_v36, 5 }
 0x37d   : > { %v4452_v11 = vadd.f32 %v12927_v41, %v4387_v12  ;;  %v4514_v27 = vadd.f32 %v12964_v46, %v4449_v4  ;;  %v4757_v12 = vld [vmem:[#allocation2] sm:$0x1f] }
 0x37e   : > { %v12034_v6 = vcombine.low %v4757_v12, %v4757_v12  ;;  %v12035_v16 = vcombine.high %v4757_v12, %v4757_v12 }
 0x37f   : > { %v4517_v18 = vadd.f32 %v12967_v17, %v4452_v11 }
 0x380   : > { %v12974_v28 = vpop.f32.mrb[68].mxu1  ;;  %v4806_v19 = vshrl.u32 %v12034_v6, 16  ;;  %v15391_v62 = vshll.u32 %v12035_v16, 16 }
 0x381   : > { %v12975_v61 = vpop.f32.mrb[69].mxu1 }
 0x382   : > { %v12976_v42 = vadd.f32 %v12975_v61, %v12974_v28  ;;  %v12977_v43 = vpop.f32.mrb[70].mxu1  ;;  %v15387_v56 = vrot.slane %v4806_v19, 4  ;;  %v4817_v41 = vrot.slane %v15391_v62, 5 }
 0x383   : > { %v12978_v44 = vpop.f32.mrb[71].mxu1 }
 0x384   : > { %v12928_v33 = vpop.f32.mrb[64].mxu0  ;;  %v12979_v48 = vadd.f32 %v12978_v44, %v12977_v43 }
 0x385   : > { %v12929_v45 = vpop.f32.mrb[65].mxu0 }
 0x386   : > { %v12930_v52 = vadd.f32 %v12929_v45, %v12928_v33  ;;  %v12931_v25 = vpop.f32.mrb[66].mxu0 }
 0x387   : > { %v12932_v54 = vpop.f32.mrb[67].mxu0 }
 0x388   : > { %v4457_v55 = vadd.f32 %v12930_v52, %v4392_v50  ;;  %v12933_v57 = vadd.f32 %v12932_v54, %v12931_v25  ;;  %v4809_v50 = vshll.u32 %v12034_v6, 16 }
 0x38a   : > { %v4460_v53 = vadd.f32 %v12933_v57, %v4395_v8  ;;  %v4522_v58 = vadd.f32 %v12970_v7, %v4457_v55 }
 0x38c   : > { %v15383_v1 = vadd.f32 %v12973_v34, %v4460_v53 }
 0x38d   : > { %v12934_v59 = vpop.f32.mrb[68].mxu0 }
 0x38e   : > { %v12935_v51 = vpop.f32.mrb[69].mxu0 }
 0x38f   : > { %v12936_v63 = vadd.f32 %v12935_v51, %v12934_v59  ;;  %v12937_v40 = vpop.f32.mrb[70].mxu0 }
 0x390   : > { %v12938_v49 = vpop.f32.mrb[71].mxu0 }
 0x391   : > { %v4465_v9 = vadd.f32 %v12936_v63, %v4400_v3  ;;  %v12939_v21 = vadd.f32 %v12938_v49, %v12937_v40  ;;  %v15389_v3 = vrot.slane %v4809_v50, 5  ;;  %v4703_v49 = vld [vmem:[#allocation2 + $0x18] sm:$0x1f] }
 0x393   : > { %v4468_v39 = vadd.f32 %v12939_v21, %v4403_v10  ;;  %v4530_v46 = vadd.f32 %v12976_v42, %v4465_v9  ;;  %v4812_v4 = vor.u32 %v15389_v3, %v15387_v56 }
 0x395   : > { %v13503_v13 = vpop.f32.mrb[72].mxu0  ;;  %v4533_v8 = vadd.f32 %v12979_v48, %v4468_v39 }
 0x396   : > { %v4579_v17 = vadd.f32 %v13503_v13, %v4514_v27  ;;  %v4570_v20 = vpop.f32.mrb[73].mxu0 }
 0x397   : > { %v4571_v35 = vadd.f32 %v4570_v20, %v4506_v0  ;;  %v13504_v60 = vpop.f32.mrb[74].mxu0  ;;  %v15398_v0 = vrot.slane %v12054_v26, 9 }
 0x398   : > { %v4603_v10 = vmax.f32 %v4579_v17, 0.0  ;;  %v4582_v30 = vadd.f32 %v13504_v60, %v4517_v18  ;;  %v4573_v7 = vpop.f32.mrb[75].mxu0  ;;  %v12153_v18 = vcombine.high %v15385_v14, %v15385_v14  ;;  %v4706_v14 = vld [vmem:[#allocation2 + $0x20] sm:$0x1f]  ;;  %v5539_v60 = vshll.u32 %v15395_v22, 16 }
 0x399   : > { %v4601_v2 = vmax.f32 %v4571_v35, 0.0  ;;  %v4574_v31 = vadd.f32 %v4573_v7, %v15381_v29  ;;  %v5536_v29 = vshrl.u32 %v15395_v22, 16 }
 0x39a   : > { %v12622_v32 = vpack.c.bf16 %v4603_v10, %v4603_v10  ;;  %v4604_v34 = vmax.f32 %v4582_v30, 0.0  ;;  %v15418_v30 = vshll.u32 %v12153_v18, 16  ;;  %v4718_v18 = vld [vmem:[#allocation2 + $0x40] sm:$0x1f] }
 0x39b   : > { %v12620_v37 = vpack.c.bf16 %v4601_v2, %v4601_v2  ;;  %v4602_v5 = vmax.f32 %v4574_v31, 0.0 }
 0x39c   : > { %v4648_v11 = vshrl.u32 %v12622_v32, 16  ;;  %v12623_v27 = vpack.c.bf16 %v4604_v34, %v4604_v34  ;;  %v4651_v28 = vshll.u32 %v12622_v32, 16  ;;  %v4813_v32 = vrot.slane %v4812_v4, 4  ;;  %v4715_v34 = vld [vmem:[#allocation2 + $0x38] sm:$0x1f] }
 0x39d   : > { %v4634_v61 = vshrl.u32 %v12620_v37, 16  ;;  %v4637_v42 = vshll.u32 %v12620_v37, 16  ;;  %v12621_v43 = vpack.c.bf16 %v4602_v5, %v4602_v5  ;;  %v13507_v33 = vpop.f32.mrb[76].mxu0 }
 0x39e   : > { %v4650_v44 = vrot.slane %v4648_v11, 7  ;;  %v4655_v45 = vshrl.u32 %v12623_v27, 16  ;;  %v4658_v48 = vshll.u32 %v12623_v27, 16  ;;  %v4595_v52 = vadd.f32 %v13507_v33, %v4530_v46  ;;  %v4586_v25 = vpop.f32.mrb[77].mxu0 }
 0x39f   : > { %v4636_v54 = vrot.slane %v4634_v61, 7  ;;  %v4641_v55 = vshrl.u32 %v12621_v43, 16  ;;  %v4644_v57 = vshll.u32 %v12621_v43, 16  ;;  %v4587_v53 = vadd.f32 %v4586_v25, %v4522_v58  ;;  %v13508_v12 = vpop.f32.mrb[78].mxu0 }
 0x3a0   : > { %v4653_v59 = vor.u32 %v4651_v28, %v4650_v44  ;;  %v4657_v51 = vrot.slane %v4655_v45, 7  ;;  %v4607_v63 = vmax.f32 %v4595_v52, 0.0  ;;  %v4598_v40 = vadd.f32 %v13508_v12, %v4533_v8  ;;  %v4589_v6 = vpop.f32.mrb[79].mxu0  ;;  %v4709_v28 = vld [vmem:[#allocation2 + $0x28] sm:$0x1f] }
 0x3a1   : > { %v4639_v9 = vor.u32 %v4637_v42, %v4636_v54  ;;  %v4643_v21 = vrot.slane %v4641_v55, 7  ;;  %v4605_v16 = vmax.f32 %v4587_v53, 0.0  ;;  %v4590_v39 = vadd.f32 %v4589_v6, %v15383_v1  ;;  %v4700_v1 = vld [vmem:[#allocation2 + $0x10] sm:$0x1f] }
 0x3a2   : > { %v4704_v46 = vsel %vm14582_vm6, %v4653_v59, %v4703_v49  ;;  %v4660_v19 = vor.u32 %v4658_v48, %v4657_v51  ;;  %v12626_v50 = vpack.c.bf16 %v4607_v63, %v4607_v63  ;;  %v4608_v13 = vmax.f32 %v4598_v40, 0.0 }
 0x3a3   : > { %4705 = vst [vmem:[#allocation2 + $0x18] sm:$0x1f] %v4704_v46  ;;  %v4698_v58 = vsel %vm14582_vm6, %v4639_v9, %v4697_v23  ;;  %v4646_v8 = vor.u32 %v4644_v57, %v4643_v21  ;;  %v12624_v17 = vpack.c.bf16 %v4605_v16, %v4605_v16  ;;  %v4606_v20 = vmax.f32 %v4590_v39, 0.0 }
 0x3a4   : > { %4699 = vst [vmem:[#allocation2 + $0x8] sm:$0x1f] %v4698_v58  ;;  %v4707_v26 = vsel %vm14582_vm6, %v4660_v19, %v4706_v14  ;;  %v4676_v36 = vshrl.u32 %v12626_v50, 16  ;;  %v12627_v35 = vpack.c.bf16 %v4608_v13, %v4608_v13  ;;  %v4679_v2 = vshll.u32 %v12626_v50, 16 }
 0x3a5   : > { %4708 = vst [vmem:[#allocation2 + $0x20] sm:$0x1f] %v4707_v26  ;;  %v4701_v56 = vsel %vm14582_vm6, %v4646_v8, %v4700_v1  ;;  %v4662_v3 = vshrl.u32 %v12624_v17, 16  ;;  %v12625_v10 = vpack.c.bf16 %v4606_v20, %v4606_v20  ;;  %v4665_v5 = vshll.u32 %v12624_v17, 16  ;;  %v13974_v26 = vld [vmem:[%s16863_s7 + $0x180] sm:$0xff]  }
 0x3a6   : > { %4702 = vst [vmem:[#allocation2 + $0x10] sm:$0x1f] %v4701_v56  ;;  %v4678_v7 = vrot.slane %v4676_v36, 7  ;;  %v4683_v31 = vshrl.u32 %v12627_v35, 16  ;;  %v15420_v27 = vrot.slane %v5536_v29, 4  ;;  %v4686_v42 = vshll.u32 %v12627_v35, 16 }
 0x3a7   : > { %v4664_v37 = vrot.slane %v4662_v3, 7  ;;  %v4669_v11 = vshrl.u32 %v12625_v10, 16  ;;  %v15422_v43 = vrot.slane %v5539_v60, 5  ;;  %v4672_v45 = vshll.u32 %v12625_v10, 16  ;;  %v13977_v56 = vld [vmem:[%s16863_s7 + $0x1c8] sm:$0xff]  }
 0x3a8   : > { %v4681_v22 = vor.u32 %v4679_v2, %v4678_v7  ;;  %v4685_v61 = vrot.slane %v4683_v31, 7  ;;  %v5547_v48 = vrot.slane %v15418_v30, 5  ;;  %v4988_v29 = vsel %vm14599_vm7, %v15398_v0, %v15400_v47  ;;  %v4712_v0 = vld [vmem:[#allocation2 + $0x30] sm:$0x1f] }
 0x3a9   : > { %v4667_v33 = vor.u32 %v4665_v5, %v4664_v37  ;;  %v4671_v44 = vrot.slane %v4669_v11, 7  ;;  %v15435_v25 = vsel %vm14606_vm8, %v4813_v32, %v4817_v41  ;;  %v13978_v5 = vld [vmem:[%s16863_s7 + $0x188] sm:$0xff]  }
 0x3aa   : > { %v4716_v4 = vsel %vm14582_vm6, %v4681_v22, %v4715_v34  ;;  %v4688_v52 = vor.u32 %v4686_v42, %v4685_v61  ;;  %v4760_v54 = vld [vmem:[#allocation2 + $0x18] sm:$0x1f] }
 0x3ab   : > { %v15437_v55 = vld [vmem:[#allocation2 + $0x18] sm:$0x1e]  ;;  %4717 = vst [vmem:[#allocation2 + $0x38] sm:$0x1f] %v4716_v4  ;;  %v4710_v57 = vsel %vm14582_vm6, %v4667_v33, %v4709_v28  ;;  %v4674_v53 = vor.u32 %v4672_v45, %v4671_v44  ;;  %v4938_v12 = vld [vmem:[#allocation2 + $0x8] sm:$0x1e]  ;;  %v12040_v51 = vcombine.low %v4760_v54, %v4760_v54  ;;  %v12041_v63 = vcombine.high %v4760_v54, %v4760_v54 }
 0x3ac   : > { %v4758_v59 = vld [vmem:[#allocation2 + $0x8] sm:$0x1f]  ;;  %4711 = vst [vmem:[#allocation2 + $0x28] sm:$0x1f] %v4710_v57  ;;  %v4719_v62 = vsel %vm14582_vm6, %v4688_v52, %v4718_v18  ;;  %v12056_v47 = vcombine.low %v4938_v12, %v4938_v12  ;;  %v12057_v41 = vcombine.high %v4938_v12, %v4938_v12  ;;  %v12060_v21 = vcombine.low %v15437_v55, %v15437_v55  ;;  %v13973_v2 = vld [vmem:[#allocation2 + $0x18] ss:$8 sps:$4 sm:$0xff]  }
 0x3ad   : > { %v12036_v40 = vcombine.low %v4758_v59, %v4758_v59  ;;  %4720 = vst [vmem:[#allocation2 + $0x40] sm:$0x1f] %v4719_v62  ;;  %v4713_v6 = vsel %vm14582_vm6, %v4674_v53, %v4712_v0  ;;  %v13965_v49 = vld [vmem:[#allocation2 + $0x8] ss:$8 sps:$4 sm:$0xff]   ;;  %v12037_v9 = vcombine.high %v4758_v59, %v4758_v59  ;;  %v12061_v16 = vcombine.high %v15437_v55, %v15437_v55  ;;  %v4761_v45 = vld [vmem:[#allocation2 + $0x20] sm:$0x1f] }
 0x3ae   : > { %4714 = vst [vmem:[#allocation2 + $0x30] sm:$0x1f] %v4713_v6  ;;  %v12071_v39 = vrot.slane %v12056_v47, 9  ;;  %v4991_v46 = vrot.slane %v12057_v41, 5  ;;  %v4759_v50 = vld [vmem:[#allocation2 + $0x10] sm:$0x1f]  ;;  %6385 = vmatprep.mubr.bf16.mxu0 %v13965_v49  ;;  %v12043_v6 = vcombine.high %v4761_v45, %v4761_v45 }
 0x3af   : > { %v4820_v23 = vshrl.u32 %v12036_v40, 16  ;;  %v4823_v19 = vshll.u32 %v12036_v40, 16  ;;  %v4829_v13 = vshll.u32 %v12037_v9, 16  ;;  %v12038_v58 = vcombine.low %v4759_v50, %v4759_v50  ;;  %v4939_v17 = vld [vmem:[#allocation2 + $0x10] sm:$0x1e]  ;;  %v13985_v12 = vld [vmem:[%s16863_s7 + $0x100] sm:$0xff]  }
 0x3b0   : > { %v12039_v14 = vcombine.high %v4759_v50, %v4759_v50  ;;  %v4848_v8 = vshrl.u32 %v12040_v51, 16  ;;  %v4992_v20 = vsel %vm14599_vm7, %v12071_v39, %v4991_v46  ;;  %v4851_v35 = vshll.u32 %v12040_v51, 16  ;;  %v13994_v57 = vld [vmem:[%s16863_s7 + $0x1d0] sm:$0xff]   ;;  %v13984_v0 = vld [vmem:[#allocation2] ss:$8 sps:$4 sm:$0xff]  }
 0x3b1   : > { %v4822_v1 = vrot.slane %v4820_v23, 4  ;;  %v4825_v36 = vrot.slane %v4823_v19, 5  ;;  %v12078_v60 = vcombine.low %v4988_v29, %v4992_v20  ;;  %v4831_v3 = vrot.slane %v4829_v13, 5  ;;  %v13996_v41 = vld [vmem:[%s16863_s7 + $0x190] sm:$0xff]   ;;  %v13997_v19 = vld [vmem:[%s16863_s7 + $0x148] sm:$0xff]  }
 0x3b2   : > { %v4834_v10 = vshrl.u32 %v12038_v58, 16  ;;  %v4837_v7 = vshll.u32 %v12038_v58, 16  ;;  %v4843_v32 = vshll.u32 %v12039_v14, 16  ;;  %v4850_v34 = vrot.slane %v4848_v8, 4  ;;  %v13999_v14 = vld [vmem:[%s16863_s7 + $0x1d8] sm:$0xff]  }
 0x3b3   : > { %v4826_v31 = vor.u32 %v4825_v36, %v4822_v1  ;;  %v4853_v37 = vrot.slane %v4851_v35, 5  ;;  %6386 = vmatmul.mubr.bf16.vlgmr.msra.gmra.mrb[80].mxu0 %v12078_v60  ;;  %v4857_v28 = vshll.u32 %v12041_v63, 16  ;;  %v12058_v61 = vcombine.low %v4939_v17, %v4939_v17  ;;  %v4762_v4 = vld [vmem:[#allocation2 + $0x28] sm:$0x1f] }
 0x3b4   : > { %v4836_v11 = vrot.slane %v4834_v10, 4  ;;  %v4839_v22 = vrot.slane %v4837_v7, 5  ;;  %6393 = vmatprep.mubr.bf16.mxu0 %v13973_v2  ;;  %13113 = vmatpush3.bf16.msra.mxu0 %v13974_v26  ;;  %v4845_v33 = vrot.slane %v4843_v32, 5  ;;  %v12059_v44 = vcombine.high %v4939_v17, %v4939_v17  ;;  %v4942_v26 = vld [vmem:[#allocation2 + $0x28] sm:$0x1e]  ;;  %v14001_v10 = vld [vmem:[%s16863_s7 + $0x150] sm:$0xff]  }
 0x3b5   : > { %v4827_v42 = vrot.slane %v4826_v31, 4  ;;  %v4854_v18 = vor.u32 %v4853_v37, %v4850_v34  ;;  %13114 = vmatprep.subr.bf16.mxu0 %v13977_v56  ;;  %v4859_v29 = vrot.slane %v4857_v28, 5  ;;  %v12072_v54 = vrot.slane %v12058_v61, 9  ;;  %v13995_v23 = vld [vmem:[#allocation2 + $0x28] ss:$8 sps:$4 sm:$0xff]   ;;  %v14000_v34 = vld [vmem:[%s16863_s7 + $0x198] sm:$0xff]  }
 0x3b6   : > { %v4840_v52 = vor.u32 %v4839_v22, %v4836_v11  ;;  %v12073_v55 = vrot.slane %v12060_v21, 9  ;;  %v4995_v51 = vrot.slane %v12059_v44, 5  ;;  %v4999_v63 = vrot.slane %v12061_v16, 5  ;;  %v13998_v1 = vld [vmem:[%s16863_s7 + $0x108] sm:$0xff]   ;;  %v4764_v28 = vld [vmem:[#allocation2 + $0x38] sm:$0x1f] }
 0x3b7   : > { %v4832_v53 = vsel %vm14606_vm8, %v4827_v42, %v4831_v3  ;;  %v4855_v59 = vrot.slane %v4854_v18, 4  ;;  %v12042_v40 = vcombine.low %v4761_v45, %v4761_v45  ;;  %v12044_v16 = vcombine.low %v4762_v4, %v4762_v4  ;;  %v4763_v3 = vld [vmem:[#allocation2 + $0x30] sm:$0x1f]  ;;  %v14012_v18 = vld [vmem:[%s16863_s7 + $0x1e0] sm:$0xff]  }
 0x3b8   : > { %v12050_v62 = vcombine.low %v15435_v25, %v4832_v53  ;;  %v4841_v47 = vrot.slane %v4840_v52, 4  ;;  %13115 = vmatpush3.bf16.msra.mxu0 %v13978_v5  ;;  %v4996_v9 = vsel %vm14599_vm7, %v12072_v54, %v4995_v51  ;;  %v5000_v21 = vsel %vm14599_vm7, %v12073_v55, %v4999_v63  ;;  %v4941_v25 = vld [vmem:[#allocation2 + $0x20] sm:$0x1e]  ;;  %v14003_v45 = vld [vmem:[%s16863_s7 + $0x110] sm:$0xff]  }
 0x3b9   : > { %v4860_v49 = vsel %vm14606_vm8, %v4855_v59, %v4859_v29  ;;  %v12079_v46 = vcombine.low %v4996_v9, %v5000_v21  ;;  %13116 = vmatprep.subr.bf16.mxu0 %v13994_v57  ;;  %v12045_v50 = vcombine.high %v4762_v4, %v4762_v4  ;;  %v4862_v13 = vshrl.u32 %v12042_v40, 16  ;;  %v14014_v54 = vld [vmem:[%s16863_s7 + $0x1a0] sm:$0xff]   ;;  %v14002_v57 = vld [vmem:[#allocation2 + $0x10] ss:$8 sps:$4 sm:$0xff]  }
 0x3ba   : > { %6320 = vmatprep.mubr.bf16.mxu1 %v12050_v62  ;;  %v4846_v39 = vsel %vm14606_vm8, %v4841_v47, %v4845_v33  ;;  %v4865_v8 = vshll.u32 %v12042_v40, 16  ;;  %v4871_v17 = vshll.u32 %v12043_v6, 16  ;;  %v4876_v20 = vshrl.u32 %v12044_v16, 16  ;;  %v14015_v59 = vld [vmem:[%s16863_s7 + $0x158] sm:$0xff]   ;;  %v4943_v62 = vld [vmem:[#allocation2 + $0x30] sm:$0x1e] }
 0x3bb   : > { %6321 = vmatmul.mubr.bf16.vlgmr.msra.gmra.mrb[72].mxu1 %v13984_v0  ;;  %v12051_v58 = vcombine.low %v4846_v39, %v4860_v49  ;;  %6394 = vmatmul.mubr.bf16.gmra.mrb[84].mxu0 %v12079_v46  ;;  %v4864_v36 = vrot.slane %v4862_v13, 4  ;;  %v4879_v35 = vshll.u32 %v12044_v16, 16  ;;  %v4885_v60 = vshll.u32 %v12045_v50, 16  ;;  %v14017_v40 = vld [vmem:[%s16863_s7 + $0x1e8] sm:$0xff]   ;;  %v4944_v39 = vld [vmem:[#allocation2 + $0x38] sm:$0x1e] }
 0x3bc   : > { %13073 = vmatpush3.bf16.msra.mxu1 %v13985_v12  ;;  %v12062_v56 = vcombine.low %v4941_v25, %v4941_v25  ;;  %6401 = vmatprep.mubr.bf16.mxu0 %v13995_v23  ;;  %v4867_v7 = vrot.slane %v4865_v8, 5  ;;  %v4873_v2 = vrot.slane %v4871_v17, 5  ;;  %v4878_v31 = vrot.slane %v4876_v20, 4  ;;  %v14016_v23 = vld [vmem:[%s16863_s7 + $0x118] sm:$0xff]   ;;  %v14019_v8 = vld [vmem:[%s16863_s7 + $0x160] sm:$0xff]  }
 0x3bd   : > { %6328 = vmatprep.mubr.bf16.mxu1 %v12051_v58  ;;  %v12063_v32 = vcombine.high %v4941_v25, %v4941_v25  ;;  %13117 = vmatpush3.bf16.msra.mxu0 %v13996_v41  ;;  %v4881_v37 = vrot.slane %v4879_v35, 5  ;;  %v4887_v5 = vrot.slane %v4885_v60, 5  ;;  %v12064_v11 = vcombine.low %v4942_v26, %v4942_v26  ;;  %v14013_v41 = vld [vmem:[#allocation2 + $0x38] ss:$8 sps:$4 sm:$0xff]   ;;  %v5389_v58 = vld [vmem:[#allocation2 + $0x10] sm:$0x1f] }
 0x3be   : > { %13074 = vmatprep.subr.bf16.mxu1 %v13997_v19  ;;  %v12065_v22 = vcombine.high %v4942_v26, %v4942_v26  ;;  %13118 = vmatprep.subr.bf16.mxu0 %v13999_v14  ;;  %v4868_v61 = vor.u32 %v4867_v7, %v4864_v36  ;;  %v12074_v42 = vrot.slane %v12062_v56, 9  ;;  %v12046_v44 = vcombine.low %v4763_v3, %v4763_v3 }
 0x3bf   : > { %v5003_v33 = vrot.slane %v12063_v32, 5  ;;  %v4882_v4 = vor.u32 %v4881_v37, %v4878_v31  ;;  %v12075_v52 = vrot.slane %v12064_v11, 9  ;;  %v12047_v55 = vcombine.high %v4763_v3, %v4763_v3  ;;  %v5390_v3 = vld [vmem:[#allocation2 + $0x18] sm:$0x1f]  ;;  %v14030_v32 = vld [vmem:[%s16863_s7 + $0x1f0] sm:$0xff]  }
 0x3c0   : > { %13075 = vmatpush3.bf16.msra.mxu1 %v13998_v1  ;;  %v5007_v29 = vrot.slane %v12065_v22, 5  ;;  %v4869_v53 = vrot.slane %v4868_v61, 4  ;;  %v12048_v51 = vcombine.low %v4764_v28, %v4764_v28  ;;  %v12049_v63 = vcombine.high %v4764_v28, %v4764_v28  ;;  %v14018_v1 = vld [vmem:[%s16863_s7 + $0x1a8] sm:$0xff]  }
 0x3c1   : > { %13076 = vmatprep.subr.bf16.mxu1 %v14001_v10  ;;  %v5004_v12 = vsel %vm14599_vm7, %v12074_v42, %v5003_v33  ;;  %13119 = vmatpush3.bf16.msra.mxu0 %v14000_v34  ;;  %v4883_v0 = vrot.slane %v4882_v4, 4  ;;  %v4890_v6 = vshrl.u32 %v12046_v44, 16  ;;  %v4893_v49 = vshll.u32 %v12046_v44, 16  ;;  %v14021_v10 = vld [vmem:[%s16863_s7 + $0x120] sm:$0xff]   ;;  %v14036_v28 = vld [vmem:[%s16863_s7 + $0x168] sm:$0xff]  }
 0x3c2   : > { %v5008_v47 = vsel %vm14599_vm7, %v12075_v52, %v5007_v29  ;;  %v4874_v9 = vsel %vm14606_vm8, %v4869_v53, %v4873_v2  ;;  %13120 = vmatprep.subr.bf16.mxu0 %v14012_v18  ;;  %v4899_v16 = vshll.u32 %v12047_v55, 16  ;;  %v4904_v25 = vshrl.u32 %v12048_v51, 16  ;;  %v14020_v61 = vld [vmem:[#allocation2 + $0x20] ss:$8 sps:$4 sm:$0xff]   ;;  %v14031_v55 = vld [vmem:[%s16863_s7 + $0x1b0] sm:$0xff]  }
 0x3c3   : > { %6329 = vmatmul.mubr.bf16.gmra.mrb[76].mxu1 %v14002_v57  ;;  %v12080_v21 = vcombine.low %v5004_v12, %v5008_v47  ;;  %v4888_v46 = vsel %vm14606_vm8, %v4883_v0, %v4887_v5  ;;  %v4892_v19 = vrot.slane %v4890_v6, 4  ;;  %v4895_v50 = vrot.slane %v4893_v49, 5  ;;  %v14037_v47 = vld [vmem:[%s16863_s7 + $0x128] sm:$0xff]  }
 0x3c4   : > { %13077 = vmatpush3.bf16.msra.mxu1 %v14003_v45  ;;  %v4907_v13 = vshll.u32 %v12048_v51, 16  ;;  %v12052_v14 = vcombine.low %v4874_v9, %v4888_v46  ;;  %v4901_v17 = vrot.slane %v4899_v16, 5  ;;  %v4906_v20 = vrot.slane %v4904_v25, 4  ;;  %v5391_v16 = vld [vmem:[#allocation2 + $0x20] sm:$0x1f] }
 0x3c5   : > { %6402 = vmatmul.mubr.bf16.gmra.mrb[88].mxu0 %v12080_v21  ;;  %13078 = vmatprep.subr.bf16.mxu1 %v14015_v59  ;;  %v4913_v26 = vshll.u32 %v12049_v63, 16  ;;  %v4896_v36 = vor.u32 %v4895_v50, %v4892_v19  ;;  %v12066_v60 = vcombine.low %v4943_v62, %v4943_v62  ;;  %v12067_v56 = vcombine.high %v4943_v62, %v4943_v62  ;;  %v5253_v59 = vld [vmem:[#allocation2 + $0x8] sm:$0x1e]  ;;  %v14040_v21 = vld [vmem:[%s16863_s7 + $0x170] sm:$0xff]  }
 0x3c6   : > { %6409 = vmatprep.mubr.bf16.mxu0 %v14013_v41  ;;  %13121 = vmatpush3.bf16.msra.mxu0 %v14014_v54  ;;  %v4909_v35 = vrot.slane %v4907_v13, 5  ;;  %v12068_v2 = vcombine.low %v4944_v39, %v4944_v39  ;;  %v12069_v31 = vcombine.high %v4944_v39, %v4944_v39  ;;  %v12138_v34 = vcombine.low %v5389_v58, %v5389_v58  ;;  %v14038_v41 = vld [vmem:[%s16863_s7 + $0x1f8] sm:$0xff]  }
 0x3c7   : > { %6336 = vmatprep.mubr.bf16.mxu1 %v12052_v14  ;;  %13122 = vmatprep.subr.bf16.mxu0 %v14017_v40  ;;  %v4915_v7 = vrot.slane %v4913_v26, 5  ;;  %v4897_v37 = vrot.slane %v4896_v36, 4  ;;  %v12076_v11 = vrot.slane %v12066_v60, 9  ;;  %v5011_v22 = vrot.slane %v12067_v56, 5  ;;  %v5254_v40 = vld [vmem:[#allocation2 + $0x10] sm:$0x1e] }
 0x3c8   : > { %13079 = vmatpush3.bf16.msra.mxu1 %v14016_v23  ;;  %v4910_v5 = vor.u32 %v4909_v35, %v4906_v20  ;;  %v12077_v42 = vrot.slane %v12068_v2, 9  ;;  %v5015_v33 = vrot.slane %v12069_v31, 5  ;;  %v12139_v18 = vcombine.high %v5389_v58, %v5389_v58  ;;  %v14039_v58 = vld [vmem:[%s16863_s7 + $0x1b8] sm:$0xff]  }
 0x3c9   : > { %13080 = vmatprep.subr.bf16.mxu1 %v14019_v8  ;;  %v12140_v44 = vcombine.low %v5390_v3, %v5390_v3  ;;  %v4902_v45 = vsel %vm14606_vm8, %v4897_v37, %v4901_v17  ;;  %v5012_v52 = vsel %vm14599_vm7, %v12076_v11, %v5011_v22  ;;  %v12141_v29 = vcombine.high %v5390_v3, %v5390_v3  ;;  %v5392_v17 = vld [vmem:[#allocation2 + $0x28] sm:$0x1f]  ;;  %v14041_v56 = vld [vmem:[#allocation2 + $0x30] ss:$8 sps:$4 sm:$0xff]  }
 0x3ca   : > { %13123 = vmatpush3.bf16.msra.mxu0 %v14018_v1  ;;  %v4911_v4 = vrot.slane %v4910_v5, 4  ;;  %v5016_v54 = vsel %vm14599_vm7, %v12077_v42, %v5015_v33  ;;  %v5438_v57 = vshrl.u32 %v12138_v34, 16  ;;  %v5441_v53 = vshll.u32 %v12138_v34, 16  ;;  %v14042_v1 = vld [vmem:[%s16863_s7 + $0x130] sm:$0xff]   ;;  %v14052_v2 = vld [vmem:[%s16863_s7 + $0x178] sm:$0xff]  }
 0x3cb   : > { %6337 = vmatmul.mubr.bf16.gmra.mrb[80].mxu1 %v14020_v61  ;;  %13124 = vmatprep.subr.bf16.mxu0 %v14030_v32  ;;  %v5447_v12 = vshll.u32 %v12139_v18, 16  ;;  %v12081_v63 = vcombine.low %v5012_v52, %v5016_v54  ;;  %v5452_v62 = vshrl.u32 %v12140_v44, 16  ;;  %v5455_v0 = vshll.u32 %v12140_v44, 16  ;;  %v14053_v61 = vld [vmem:[%s16863_s7 + $0x138] sm:$0xff]  }
 0x3cc   : > { %13081 = vmatpush3.bf16.msra.mxu1 %v14021_v10  ;;  %v4916_v51 = vsel %vm14606_vm8, %v4911_v4, %v4915_v7  ;;  %v5440_v49 = vrot.slane %v5438_v57, 4  ;;  %v5443_v9 = vrot.slane %v5441_v53, 5  ;;  %v5542_v25 = vor.u32 %v15422_v43, %v15420_v27  ;;  %v5074_v4 = vld [vmem:[#allocation2 + $0x10] sm:$0x1f]  ;;  %v15581_v57 = vld [vmem:[%s16863_s7 + $0x200] sm:$0xff]  }
 0x3cd   : > { %v12053_v6 = vcombine.low %v4902_v45, %v4916_v51  ;;  %13082 = vmatprep.subr.bf16.mxu1 %v14036_v28  ;;  %6410 = vmatmul.mubr.bf16.gmra.mrb[92].mxu0 %v12081_v63  ;;  %v5454_v39 = vrot.slane %v5452_v62, 4  ;;  %v5457_v46 = vrot.slane %v5455_v0, 5  ;;  %v5461_v23 = vshll.u32 %v12141_v29, 16  ;;  %v5073_v45 = vld [vmem:[#allocation2 + $0x8] sm:$0x1f] }
 0x3ce   : > { %v12106_v19 = vcombine.low %v5253_v59, %v5253_v59  ;;  %13125 = vmatpush3.bf16.msra.mxu0 %v14031_v55  ;;  %v5444_v50 = vor.u32 %v5443_v9, %v5440_v49  ;;  %v5449_v13 = vrot.slane %v5447_v12, 5  ;;  %v12107_v14 = vcombine.high %v5253_v59, %v5253_v59  ;;  %v14047_v53 = vld [vmem:[#allocation2 + $0x10] ss:$8 sps:$4 sm:$0xff]  }
 0x3cf   : > { %6344 = vmatprep.mubr.bf16.mxu1 %v12053_v6  ;;  %v12108_v8 = vcombine.low %v5254_v40, %v5254_v40  ;;  %v5458_v20 = vor.u32 %v5457_v46, %v5454_v39  ;;  %v5463_v26 = vrot.slane %v5461_v23, 5  ;;  %13126 = vmatprep.subr.bf16.mxu0 %v14038_v41  ;;  %v12109_v36 = vcombine.high %v5254_v40, %v5254_v40  ;;  %v5255_v23 = vld [vmem:[#allocation2 + $0x18] sm:$0x1e] }
 0x3d0   : > { %13083 = vmatpush3.bf16.msra.mxu1 %v14037_v47  ;;  %v12122_v35 = vrot.slane %v12106_v19, 9  ;;  %v5445_v60 = vrot.slane %v5444_v50, 4  ;;  %v5303_v3 = vrot.slane %v12107_v14, 5  ;;  %v12142_v7 = vcombine.low %v5391_v16, %v5391_v16  ;;  %v5256_v14 = vld [vmem:[#allocation2 + $0x20] sm:$0x1e] }
 0x3d1   : > { %13084 = vmatprep.subr.bf16.mxu1 %v14040_v21  ;;  %v12123_v10 = vrot.slane %v12108_v8, 9  ;;  %v5459_v31 = vrot.slane %v5458_v20, 4  ;;  %v5307_v32 = vrot.slane %v12109_v36, 5  ;;  %v12143_v34 = vcombine.high %v5391_v16, %v5391_v16 }
 0x3d2   : > { %v12144_v37 = vcombine.low %v5392_v17, %v5392_v17  ;;  %v5450_v5 = vsel %vm14606_vm8, %v5445_v60, %v5449_v13  ;;  %13127 = vmatpush3.bf16.msra.mxu0 %v14039_v58  ;;  %v5304_v11 = vsel %vm14599_vm7, %v12122_v35, %v5303_v3  ;;  %v12145_v22 = vcombine.high %v5392_v17, %v5392_v17 }
 0x3d3   : > { %6345 = vmatmul.mubr.bf16.gmra.mrb[84].mxu1 %v14041_v56  ;;  %v5466_v28 = vshrl.u32 %v12142_v7, 16  ;;  %v5464_v42 = vsel %vm14606_vm8, %v5459_v31, %v5463_v26  ;;  %v5308_v33 = vsel %vm14599_vm7, %v12123_v10, %v5307_v32  ;;  %v5469_v18 = vshll.u32 %v12142_v7, 16 }
 0x3d4   : > { %13085 = vmatpush3.bf16.msra.mxu1 %v14042_v1  ;;  %v5475_v44 = vshll.u32 %v12143_v34, 16  ;;  %v12154_v52 = vcombine.low %v5450_v5, %v5464_v42  ;;  %v12130_v29 = vcombine.low %v5304_v11, %v5308_v33  ;;  %v5480_v55 = vshrl.u32 %v12144_v37, 16  ;;  %v5393_v1 = vld [vmem:[#allocation2 + $0x30] sm:$0x1f] }
 0x3d5   : > { %v5468_v54 = vrot.slane %v5466_v28, 4  ;;  %13086 = vmatprep.subr.bf16.mxu1 %v14052_v2  ;;  %v5471_v12 = vrot.slane %v5469_v18, 5  ;;  %v5483_v51 = vshll.u32 %v12144_v37, 16  ;;  %v5489_v63 = vshll.u32 %v12145_v22, 16  ;;  %v5394_v37 = vld [vmem:[#allocation2 + $0x38] sm:$0x1f] }
 0x3d6   : > { %v5477_v59 = vrot.slane %v5475_v44, 5  ;;  %6515 = vmatprep.mubr.bf16.mxu0 %v12154_v52  ;;  %6450 = vmatprep.mubr.bf16.mxu1 %v12130_v29  ;;  %v5482_v62 = vrot.slane %v5480_v55, 4  ;;  %v12086_v0 = vcombine.low %v5073_v45, %v5073_v45  ;;  %v12087_v47 = vcombine.high %v5073_v45, %v5073_v45  ;;  %v14063_v44 = vld [vmem:[#allocation2 + $0x20] ss:$8 sps:$4 sm:$0xff]  }
 0x3d7   : > { %v12088_v41 = vcombine.low %v5074_v4, %v5074_v4  ;;  %6516 = vmatmul.mubr.bf16.vlgmr.msra.gmra.mrb[96].mxu0 %v14047_v53  ;;  %v5472_v40 = vor.u32 %v5471_v12, %v5468_v54  ;;  %v5485_v6 = vrot.slane %v5483_v51, 5  ;;  %v5491_v49 = vrot.slane %v5489_v63, 5  ;;  %v5075_v51 = vld [vmem:[#allocation2 + $0x18] sm:$0x1f] }
 0x3d8   : > { %13087 = vmatpush3.bf16.msra.mxu1 %v14053_v61  ;;  %v12089_v9 = vcombine.high %v5074_v4, %v5074_v4  ;;  %v5122_v21 = vshrl.u32 %v12086_v0, 16  ;;  %v5125_v16 = vshll.u32 %v12086_v0, 16  ;;  %v5131_v39 = vshll.u32 %v12087_v47, 16 }
 0x3d9   : > { %13509 = vmatprep.subr.bf16.mxu1 %v15581_v57  ;;  %v5136_v46 = vshrl.u32 %v12088_v41, 16  ;;  %v5473_v19 = vrot.slane %v5472_v40, 4  ;;  %v5486_v50 = vor.u32 %v5485_v6, %v5482_v62  ;;  %v5139_v13 = vshll.u32 %v12088_v41, 16  ;;  %v14068_v41 = vld [vmem:[%s16863_s7 + $0x208] sm:$0xff]   ;;  %v5076_v40 = vld [vmem:[#allocation2 + $0x20] sm:$0x1f] }
 0x3da   : > { %v5145_v58 = vshll.u32 %v12089_v9, 16  ;;  %v5124_v8 = vrot.slane %v5122_v21, 4  ;;  %v5127_v17 = vrot.slane %v5125_v16, 5  ;;  %v5133_v20 = vrot.slane %v5131_v39, 5 }
 0x3db   : > { %v5138_v26 = vrot.slane %v5136_v46, 4  ;;  %v5478_v36 = vsel %vm14606_vm8, %v5473_v19, %v5477_v59  ;;  %v5487_v35 = vrot.slane %v5486_v50, 4  ;;  %v5141_v60 = vrot.slane %v5139_v13, 5 }
 0x3dc   : > { %v5147_v56 = vrot.slane %v5145_v58, 5  ;;  %v5128_v3 = vor.u32 %v5127_v17, %v5124_v8  ;;  %v12110_v10 = vcombine.low %v5255_v23, %v5255_v23  ;;  %v12111_v7 = vcombine.high %v5255_v23, %v5255_v23 }
 0x3dd   : > { %v12112_v2 = vcombine.low %v5256_v14, %v5256_v14  ;;  %v5492_v31 = vsel %vm14606_vm8, %v5487_v35, %v5491_v49  ;;  %v5142_v32 = vor.u32 %v5141_v60, %v5138_v26  ;;  %v12113_v34 = vcombine.high %v5256_v14, %v5256_v14  ;;  %v14069_v14 = vld [vmem:[%s16863_s7 + $0x210] sm:$0xff]  }
 0x3de   : > { %v12146_v5 = vcombine.low %v5393_v1, %v5393_v1  ;;  %v12155_v11 = vcombine.low %v5478_v36, %v5492_v31  ;;  %v5129_v22 = vrot.slane %v5128_v3, 4  ;;  %v12124_v28 = vrot.slane %v12110_v10, 9 }
 0x3df   : > { %v5311_v61 = vrot.slane %v12111_v7, 5  ;;  %v5143_v42 = vrot.slane %v5142_v32, 4  ;;  %v12125_v33 = vrot.slane %v12112_v2, 9  ;;  %v5315_v18 = vrot.slane %v12113_v34, 5  ;;  %v5258_v2 = vld [vmem:[#allocation2 + $0x30] sm:$0x1e] }
 0x3e0   : > { %v12147_v45 = vcombine.high %v5393_v1, %v5393_v1  ;;  %6523 = vmatprep.mubr.bf16.mxu0 %v12155_v11  ;;  %v5134_v4 = vsel %vm14606_vm8, %v5129_v22, %v5133_v20  ;;  %v12148_v29 = vcombine.low %v5394_v37, %v5394_v37  ;;  %v12149_v54 = vcombine.high %v5394_v37, %v5394_v37 }
 0x3e1   : > { %v5312_v52 = vsel %vm14599_vm7, %v12124_v28, %v5311_v61  ;;  %v5148_v55 = vsel %vm14606_vm8, %v5143_v42, %v5147_v56  ;;  %v5316_v53 = vsel %vm14599_vm7, %v12125_v33, %v5315_v18  ;;  %6524 = vmatmul.mubr.bf16.gmra.mrb[100].mxu0 %v14063_v44  ;;  %v5494_v12 = vshrl.u32 %v12146_v5, 16  ;;  %v5257_v56 = vld [vmem:[#allocation2 + $0x28] sm:$0x1e]  ;;  %v5395_v61 = vld [vmem:[#allocation2 + $0x40] sm:$0x1f]  ;;  %v14083_v42 = vld [vmem:[%s16863_s7 + $0x218] sm:$0xff]  }
 0x3e2   : > { %v5497_v59 = vshll.u32 %v12146_v5, 16  ;;  %v12102_v63 = vcombine.low %v5134_v4, %v5148_v55  ;;  %v12131_v62 = vcombine.low %v5312_v52, %v5316_v53  ;;  %v5503_v0 = vshll.u32 %v12147_v45, 16  ;;  %v14078_v55 = vld [vmem:[#allocation2 + $0x30] ss:$8 sps:$4 sm:$0xff]  }
 0x3e3   : > { %v5508_v47 = vshrl.u32 %v12148_v29, 16  ;;  %v5496_v6 = vrot.slane %v5494_v12, 4  ;;  %v5511_v9 = vshll.u32 %v12148_v29, 16  ;;  %v5517_v21 = vshll.u32 %v12149_v54, 16 }
 0x3e4   : > { %v5499_v49 = vrot.slane %v5497_v59, 5  ;;  %6451 = vmatmul.mubr.bf16.vlgmr.msra.gmra.mrb[88].mxu1 %v12102_v63  ;;  %v5505_v16 = vrot.slane %v5503_v0, 5  ;;  %v12090_v46 = vcombine.low %v5075_v51, %v5075_v51  ;;  %v12091_v23 = vcombine.high %v5075_v51, %v5075_v51  ;;  %v5077_v63 = vld [vmem:[#allocation2 + $0x28] sm:$0x1f] }
 0x3e5   : > { %v5510_v39 = vrot.slane %v5508_v47, 4  ;;  %13510 = vmatpush3.bf16.msra.mxu1 %v15581_v57  ;;  %6458 = vmatprep.mubr.bf16.mxu1 %v12131_v62  ;;  %v5513_v50 = vrot.slane %v5511_v9, 5  ;;  %v5519_v13 = vrot.slane %v5517_v21, 5  ;;  %v12092_v58 = vcombine.low %v5076_v40, %v5076_v40 }
 0x3e6   : > { %v5500_v19 = vor.u32 %v5499_v49, %v5496_v6  ;;  %13511 = vmatprep.subr.bf16.mxu1 %v14068_v41  ;;  %v12093_v8 = vcombine.high %v5076_v40, %v5076_v40  ;;  %v5150_v17 = vshrl.u32 %v12090_v46, 16  ;;  %v5153_v20 = vshll.u32 %v12090_v46, 16  ;;  %v14084_v40 = vld [vmem:[%s16863_s7 + $0x220] sm:$0xff]   ;;  %v5078_v6 = vld [vmem:[#allocation2 + $0x30] sm:$0x1f] }
 0x3e7   : > { %v5159_v26 = vshll.u32 %v12091_v23, 16  ;;  %v5514_v36 = vor.u32 %v5513_v50, %v5510_v39  ;;  %v5164_v35 = vshrl.u32 %v12092_v58, 16  ;;  %v5167_v60 = vshll.u32 %v12092_v58, 16 }
 0x3e8   : > { %v5501_v1 = vrot.slane %v5500_v19, 4  ;;  %v5152_v57 = vrot.slane %v5150_v17, 4  ;;  %v5155_v3 = vrot.slane %v5153_v20, 5  ;;  %v5173_v7 = vshll.u32 %v12093_v8, 16  ;;  %v14094_v20 = vld [vmem:[%s16863_s7 + $0x228] sm:$0xff]  }
 0x3e9   : > { %v5161_v10 = vrot.slane %v5159_v26, 5  ;;  %v5515_v32 = vrot.slane %v5514_v36, 4  ;;  %13512 = vmatpush3.bf16.msra.mxu1 %v14068_v41  ;;  %v5166_v34 = vrot.slane %v5164_v35, 4  ;;  %v5169_v37 = vrot.slane %v5167_v60, 5  ;;  %v5260_v60 = vld [vmem:[#allocation2 + $0x40] sm:$0x1e] }
 0x3ea   : > { %v5506_v31 = vsel %vm14606_vm8, %v5501_v1, %v5505_v16  ;;  %13513 = vmatprep.subr.bf16.mxu1 %v14069_v14  ;;  %v5156_v5 = vor.u32 %v5155_v3, %v5152_v57  ;;  %v5175_v11 = vrot.slane %v5173_v7, 5  ;;  %v12114_v22 = vcombine.low %v5257_v56, %v5257_v56 }
 0x3eb   : > { %v12115_v28 = vcombine.high %v5257_v56, %v5257_v56  ;;  %v5520_v33 = vsel %vm14606_vm8, %v5515_v32, %v5519_v13  ;;  %v5170_v18 = vor.u32 %v5169_v37, %v5166_v34  ;;  %v12116_v44 = vcombine.low %v5258_v2, %v5258_v2  ;;  %v5259_v13 = vld [vmem:[#allocation2 + $0x38] sm:$0x1e] }
 0x3ec   : > { %v12117_v45 = vcombine.high %v5258_v2, %v5258_v2  ;;  %v12156_v4 = vcombine.low %v5506_v31, %v5520_v33  ;;  %v5157_v52 = vrot.slane %v5156_v5, 4  ;;  %v12126_v29 = vrot.slane %v12114_v22, 9  ;;  %v14095_v5 = vld [vmem:[%s16863_s7 + $0x230] sm:$0xff]   ;;  %v5080_v33 = vld [vmem:[#allocation2 + $0x40] sm:$0x1f] }
 0x3ed   : > { %v5319_v54 = vrot.slane %v12115_v28, 5  ;;  %v5171_v53 = vrot.slane %v5170_v18, 4  ;;  %13514 = vmatpush3.bf16.msra.mxu1 %v14069_v14  ;;  %v12127_v12 = vrot.slane %v12116_v44, 9  ;;  %v12150_v51 = vcombine.low %v5395_v61, %v5395_v61 }
 0x3ee   : > { %v5323_v59 = vrot.slane %v12117_v45, 5  ;;  %6531 = vmatprep.mubr.bf16.mxu0 %v12156_v4  ;;  %v5162_v62 = vsel %vm14606_vm8, %v5157_v52, %v5161_v10  ;;  %v12151_v47 = vcombine.high %v5395_v61, %v5395_v61  ;;  %v5543_v41 = vrot.slane %v5542_v25, 4  ;;  %13515 = vmatprep.subr.bf16.mxu1 %v14083_v42 }
 0x3ef   : > { %v5320_v0 = vsel %vm14599_vm7, %v12126_v29, %v5319_v54  ;;  %v5176_v49 = vsel %vm14606_vm8, %v5171_v53, %v5175_v11  ;;  %6532 = vmatmul.mubr.bf16.gmra.mrb[104].mxu0 %v14078_v55  ;;  %v5522_v21 = vshrl.u32 %v12150_v51, 16  ;;  %v5525_v16 = vshll.u32 %v12150_v51, 16  ;;  %v5079_v11 = vld [vmem:[#allocation2 + $0x38] sm:$0x1f]  ;;  %v14093_v55 = vld [vmem:[#allocation2 + $0x40] ss:$8 sps:$4 sm:$0xff]  }
 0x3f0   : > { %v5324_v9 = vsel %vm14599_vm7, %v12127_v12, %v5323_v59  ;;  %v12103_v39 = vcombine.low %v5162_v62, %v5176_v49  ;;  %v5531_v23 = vshll.u32 %v12151_v47, 16  ;;  %v12094_v27 = vcombine.low %v5077_v63, %v5077_v63 }
 0x3f1   : > { %v12132_v46 = vcombine.low %v5320_v0, %v5324_v9  ;;  %v5524_v43 = vrot.slane %v5522_v21, 4  ;;  %v5527_v25 = vrot.slane %v5525_v16, 5  ;;  %13516 = vmatpush3.bf16.msra.mxu1 %v14083_v42  ;;  %v12095_v19 = vcombine.high %v5077_v63, %v5077_v63  ;;  %v14104_v63 = vld [vmem:[%s16863_s7 + $0x238] sm:$0xff]  }
 0x3f2   : > { %v12096_v50 = vcombine.low %v5078_v6, %v5078_v6  ;;  %6459 = vmatmul.mubr.bf16.gmra.mrb[92].mxu1 %v12103_v39  ;;  %v5548_v58 = vsel %vm14606_vm8, %v5543_v41, %v5547_v48  ;;  %13517 = vmatprep.subr.bf16.mxu1 %v14084_v40  ;;  %v12097_v14 = vcombine.high %v5078_v6, %v5078_v6  ;;  %v5178_v8 = vshrl.u32 %v12094_v27, 16  ;;  %v5570_v21 = vld [vmem:[#allocation2 + $0x18] sm:$0x1e] }
 0x3f3   : > { %v5181_v17 = vshll.u32 %v12094_v27, 16  ;;  %6466 = vmatprep.mubr.bf16.mxu1 %v12132_v46  ;;  %v5528_v26 = vor.u32 %v5527_v25, %v5524_v43  ;;  %v5187_v1 = vshll.u32 %v12095_v19, 16  ;;  %v5533_v56 = vrot.slane %v5531_v23, 5 }
 0x3f4   : > { %v5192_v36 = vshrl.u32 %v12096_v50, 16  ;;  %v5195_v35 = vshll.u32 %v12096_v50, 16  ;;  %v5180_v57 = vrot.slane %v5178_v8, 4  ;;  %v12118_v3 = vcombine.low %v5259_v13, %v5259_v13 }
 0x3f5   : > { %v5183_v30 = vrot.slane %v5181_v17, 5  ;;  %v5529_v10 = vrot.slane %v5528_v26, 4  ;;  %v5201_v2 = vshll.u32 %v12097_v14, 16  ;;  %13518 = vmatpush3.bf16.msra.mxu1 %v14084_v40  ;;  %v5189_v32 = vrot.slane %v5187_v1, 5  ;;  %v5569_v40 = vld [vmem:[#allocation2 + $0x10] sm:$0x1e] }
 0x3f6   : > { %v5194_v48 = vrot.slane %v5192_v36, 4  ;;  %v5197_v7 = vrot.slane %v5195_v35, 5  ;;  %v12119_v34 = vcombine.high %v5259_v13, %v5259_v13  ;;  %v12120_v37 = vcombine.low %v5260_v60, %v5260_v60  ;;  %13519 = vmatprep.subr.bf16.mxu1 %v14094_v20  ;;  %v5572_v1 = vld [vmem:[#allocation2 + $0x28] sm:$0x1e] }
 0x3f7   : > { %v5184_v31 = vor.u32 %v5183_v30, %v5180_v57  ;;  %v5534_v22 = vsel %vm14606_vm8, %v5529_v10, %v5533_v56  ;;  %v12121_v61 = vcombine.high %v5260_v60, %v5260_v60  ;;  %v12128_v42 = vrot.slane %v12118_v3, 9  ;;  %v5571_v60 = vld [vmem:[#allocation2 + $0x20] sm:$0x1e]  ;;  %v5573_v56 = vld [vmem:[#allocation2 + $0x30] sm:$0x1e] }
 0x3f8   : > { %v5198_v28 = vor.u32 %v5197_v7, %v5194_v48  ;;  %v12157_v18 = vcombine.low %v5534_v22, %v5548_v58  ;;  %v5327_v45 = vrot.slane %v12119_v34, 5  ;;  %v12129_v4 = vrot.slane %v12120_v37, 9 }
 0x3f9   : > { %v5185_v44 = vrot.slane %v5184_v31, 4  ;;  %v5203_v29 = vrot.slane %v5201_v2, 5  ;;  %v5331_v54 = vrot.slane %v12121_v61, 5  ;;  %13520 = vmatpush3.bf16.msra.mxu1 %v14094_v20  ;;  %v12098_v53 = vcombine.low %v5079_v11, %v5079_v11  ;;  %v5574_v31 = vld [vmem:[#allocation2 + $0x38] sm:$0x1e] }
 0x3fa   : > { %v5199_v52 = vrot.slane %v5198_v28, 4  ;;  %6539 = vmatprep.mubr.bf16.mxu0 %v12157_v18  ;;  %13521 = vmatprep.subr.bf16.mxu1 %v14095_v5  ;;  %v12099_v59 = vcombine.high %v5079_v11, %v5079_v11  ;;  %v12100_v51 = vcombine.low %v5080_v33, %v5080_v33  ;;  %v12101_v47 = vcombine.high %v5080_v33, %v5080_v33 }
 0x3fb   : > { %v5190_v12 = vsel %vm14606_vm8, %v5185_v44, %v5189_v32  ;;  %v5332_v0 = vsel %vm14599_vm7, %v12129_v4, %v5331_v54  ;;  %6540 = vmatmul.mubr.bf16.gmra.mrb[108].mxu0 %v14093_v55  ;;  %v5206_v41 = vshrl.u32 %v12098_v53, 16  ;;  %v5328_v49 = vsel %vm14599_vm7, %v12128_v42, %v5327_v45  ;;  %v5575_v55 = vld [vmem:[#allocation2 + $0x40] sm:$0x1e] }
 0x3fc   : > { %v5204_v62 = vsel %vm14606_vm8, %v5199_v52, %v5203_v29  ;;  %v5209_v9 = vshll.u32 %v12098_v53, 16  ;;  %v12133_v16 = vcombine.low %v5328_v49, %v5332_v0  ;;  %v5220_v46 = vshrl.u32 %v12100_v51, 16  ;;  %v5576_v52 = vld [vmem:[#allocation2 + $0x48] sm:$0x1e] }
 0x3fd   : > { %v12104_v6 = vcombine.low %v5190_v12, %v5204_v62  ;;  %v5208_v39 = vrot.slane %v5206_v41, 4  ;;  %v5223_v23 = vshll.u32 %v12100_v51, 16  ;;  %13522 = vmatpush3.bf16.msra.mxu1 %v14095_v5  ;;  %v5215_v43 = vshll.u32 %v12099_v59, 16 }
 0x3fe   : > { %v5211_v27 = vrot.slane %v5209_v9, 5  ;;  %v12158_v25 = vcombine.low %v5569_v40, %v5569_v40  ;;  %v12159_v19 = vcombine.high %v5569_v40, %v5569_v40  ;;  %13523 = vmatprep.subr.bf16.mxu1 %v14104_v63  ;;  %v5222_v50 = vrot.slane %v5220_v46, 4 }
 0x3ff   : > { %6467 = vmatmul.mubr.bf16.gmra.mrb[96].mxu1 %v12104_v6  ;;  %v5225_v13 = vrot.slane %v5223_v23, 5  ;;  %v5229_v58 = vshll.u32 %v12101_v47, 16  ;;  %v12160_v14 = vcombine.low %v5570_v21, %v5570_v21  ;;  %v12161_v17 = vcombine.high %v5570_v21, %v5570_v21 }
 0x400   : > { %6474 = vmatprep.mubr.bf16.mxu1 %v12133_v16  ;;  %v5212_v8 = vor.u32 %v5211_v27, %v5208_v39  ;;  %v12174_v20 = vrot.slane %v12158_v25, 9  ;;  %v5619_v26 = vrot.slane %v12159_v19, 5  ;;  %v5217_v30 = vrot.slane %v5215_v43, 5  ;;  %v14117_v25 = vld [vmem:[%s16865_s9 + $0x40] sm:$0xff]  }
 0x401   : > { %v5226_v36 = vor.u32 %v5225_v13, %v5222_v50  ;;  %v12175_v35 = vrot.slane %v12160_v14, 9  ;;  %13524 = vmatpush3.bf16.msra.mxu1 %v14104_v63  ;;  %v5623_v3 = vrot.slane %v12161_v17, 5  ;;  %v5231_v48 = vrot.slane %v5229_v58, 5  ;;  %v14118_v19 = vld [vmem:[%s16865_s9 + $0xc0] sm:$0xff]   ;;  %13164 = vmatprep.subr.bf16.mxu0 %v14117_v25  ;;  %v14121_v13 = vld [vmem:[%s16865_s9 + $0x48] sm:$0xff]   ;;  %v14125_v17 = vld [vmem:[%s16865_s9 + $0x50] sm:$0xff]  }
 0x402   : > { %v5213_v57 = vrot.slane %v5212_v8, 4  ;;  %v12164_v7 = vcombine.low %v5572_v1, %v5572_v1  ;;  %v12165_v2 = vcombine.high %v5572_v1, %v5572_v1  ;;  %v5620_v32 = vsel %vm14599_vm7, %v12174_v20, %v5619_v26  ;;  %13186 = vmatprep.subr.bf16.mxu1 %v14118_v19  ;;  %v14119_v50 = vld [vmem:[%s16865_s9] sm:$0xff]   ;;  %v14122_v58 = vld [vmem:[%s16865_s9 + $0xc8] sm:$0xff]   ;;  %v14126_v20 = vld [vmem:[%s16865_s9 + $0xd0] sm:$0xff]  }
 0x403   : > { %v5227_v10 = vrot.slane %v5226_v36, 4  ;;  %v12162_v34 = vcombine.low %v5571_v60, %v5571_v60  ;;  %v12166_v37 = vcombine.low %v5573_v56, %v5573_v56  ;;  %v5624_v22 = vsel %vm14599_vm7, %v12175_v35, %v5623_v3  ;;  %13165 = vmatpush3.bf16.msra.mxu0 %v14119_v50  ;;  %v14123_v14 = vld [vmem:[%s16865_s9 + $0x8] sm:$0xff]   ;;  %v14127_v26 = vld [vmem:[%s16865_s9 + $0x10] sm:$0xff]   ;;  %v14129_v36 = vld [vmem:[%s16865_s9 + $0x58] sm:$0xff]  }
 0x404   : > { %v5218_v5 = vsel %vm14606_vm8, %v5213_v57, %v5217_v30  ;;  %v12163_v28 = vcombine.high %v5571_v60, %v5571_v60  ;;  %v12167_v42 = vcombine.high %v5573_v56, %v5573_v56  ;;  %v12168_v33 = vcombine.low %v5574_v31, %v5574_v31  ;;  %v14124_v8 = vld [vmem:[%s16865_s9 + $0x88] sm:$0xff]   ;;  %13166 = vmatprep.subr.bf16.mxu0 %v14121_v13  ;;  %v14128_v1 = vld [vmem:[%s16865_s9 + $0x90] sm:$0xff]   ;;  %v14130_v35 = vld [vmem:[%s16865_s9 + $0xd8] sm:$0xff]  }
 0x405   : > { %v5232_v11 = vsel %vm14606_vm8, %v5227_v10, %v5231_v48  ;;  %v12169_v18 = vcombine.high %v5574_v31, %v5574_v31  ;;  %v12182_v44 = vcombine.low %v5620_v32, %v5624_v22  ;;  %v12177_v45 = vrot.slane %v12164_v7, 9  ;;  %v14131_v60 = vld [vmem:[%s16865_s9 + $0x18] sm:$0xff]   ;;  %v14133_v57 = vld [vmem:[%s16865_s9 + $0x60] sm:$0xff]   ;;  %v14137_v32 = vld [vmem:[%s16865_s9 + $0x68] sm:$0xff]  }
 0x406   : > { %v12105_v61 = vcombine.low %v5218_v5, %v5232_v11  ;;  %v5631_v4 = vrot.slane %v12165_v2, 5  ;;  %v12178_v29 = vrot.slane %v12166_v37, 9  ;;  %v5635_v54 = vrot.slane %v12167_v42, 5  ;;  %v14132_v56 = vld [vmem:[%s16865_s9 + $0x98] sm:$0xff]   ;;  %v14134_v30 = vld [vmem:[%s16865_s9 + $0xe0] sm:$0xff]   ;;  %v14139_v11 = vld [vmem:[%s16865_s9 + $0x28] sm:$0xff]  }
 0x407   : > { %v12176_v53 = vrot.slane %v12162_v34, 9  ;;  %v5627_v24 = vrot.slane %v12163_v28, 5  ;;  %v12179_v12 = vrot.slane %v12168_v33, 9  ;;  %v5639_v59 = vrot.slane %v12169_v18, 5  ;;  %13167 = vmatpush3.bf16.msra.mxu0 %v14123_v14  ;;  %v14135_v48 = vld [vmem:[%s16865_s9 + $0x20] sm:$0xff]   ;;  %v14138_v34 = vld [vmem:[%s16865_s9 + $0xe8] sm:$0xff]  }
 0x408   : > { %6475 = vmatmul.mubr.bf16.gmra.mrb[100].mxu1 %v12105_v61  ;;  %v12172_v51 = vcombine.low %v5576_v52, %v5576_v52  ;;  %v5632_v63 = vsel %vm14599_vm7, %v12177_v45, %v5631_v4  ;;  %v12170_v62 = vcombine.low %v5575_v55, %v5575_v55  ;;  %v12171_v0 = vcombine.high %v5575_v55, %v5575_v55  ;;  %v14136_v7 = vld [vmem:[%s16865_s9 + $0xa0] sm:$0xff]   ;;  %v14140_v22 = vld [vmem:[%s16865_s9 + $0xa8] sm:$0xff]   ;;  %v14141_v28 = vld [vmem:[%s16865_s9 + $0x70] sm:$0xff]  }
 0x409   : > { %13525 = vmatprep.mubr.bf16.mxu1 %v12182_v44  ;;  %v12173_v47 = vcombine.high %v5576_v52, %v5576_v52  ;;  %v5636_v41 = vsel %vm14599_vm7, %v12178_v29, %v5635_v54  ;;  %v5628_v40 = vsel %vm14599_vm7, %v12176_v53, %v5627_v24  ;;  %v5640_v49 = vsel %vm14599_vm7, %v12179_v12, %v5639_v59  ;;  %v14142_v61 = vld [vmem:[%s16865_s9 + $0xf0] sm:$0xff]   ;;  %v15748_v33 = vld [vmem:[%s16864_s8] ss:$0 sm:$0xff]  ;;  %v14145_v12 = vld [vmem:[%s16865_s9 + $0x78] sm:$0xff]  }
 0x40a   : > { %v12183_v6 = vcombine.low %v5628_v40, %v5632_v63  ;;  %v12181_v9 = vrot.slane %v12172_v51, 9  ;;  %v12184_v21 = vcombine.low %v5636_v41, %v5640_v49  ;;  %v12180_v16 = vrot.slane %v12170_v62, 9  ;;  %13168 = vmatprep.subr.bf16.mxu0 %v14125_v17  ;;  %v14143_v29 = vld [vmem:[%s16865_s9 + $0x30] sm:$0xff]   ;;  %v14146_v59 = vld [vmem:[%s16865_s9 + $0xf8] sm:$0xff]   ;;  %v14149_v49 = vld [vmem:[%s16865_s9 + $0x140] sm:$0xff]  }
 0x40b   : > { %v5643_v39 = vrot.slane %v12171_v0, 5  ;;  %v5647_v46 = vrot.slane %v12173_v47, 5  ;;  %13169 = vmatpush3.bf16.msra.mxu0 %v14127_v26  ;;  %v14144_v54 = vld [vmem:[%s16865_s9 + $0xb0] sm:$0xff]   ;;  %v14147_v40 = vld [vmem:[%s16865_s9 + $0x38] sm:$0xff]  }
 0x40c   : > { %13170 = vmatprep.subr.bf16.mxu0 %v14129_v36 }
 0x40d   : > { %v5644_v23 = vsel %vm14599_vm7, %v12180_v16, %v5643_v39  ;;  %v5648_v27 = vsel %vm14599_vm7, %v12181_v9, %v5647_v46  ;;  %v14150_v9 = vld [vmem:[%s16865_s9 + $0x1c0] sm:$0xff]   ;;  %vm6980_vm7 = vsmask.f32 4368 }
 0x40e   : > { %v12185_v43 = vcombine.low %v5644_v23, %v5648_v27  ;;  %vm6981_vm12 = vmor %vm6979_vm11, %vm6980_vm7 }
 0x40f   : > { %13171 = vmatpush3.bf16.msra.mxu0 %v14131_v60  ;;  %vm15898_vm13 = vmor %vm6981_vm12, %vm6982_vm9 }
 0x410   : > { %13526 = vmatmul.mubr.bf16.vlgmr.msra.gmra.mrb[104].mxu1 %v12183_v6  ;;  %13172 = vmatprep.subr.bf16.mxu0 %v14133_v57  ;;  %v14148_v6 = vld [vmem:[%s16865_s9 + $0xb8] sm:$0xff]  }
 0x411   : > { %13529 = vmatprep.mubr.bf16.mxu1 %v12184_v21  ;;  %13187 = vmatpush3.bf16.msra.mxu1 %v14120_v15 }
 0x412   : > { %13188 = vmatprep.subr.bf16.mxu1 %v14122_v58 }
 0x413   : > { %13173 = vmatpush3.bf16.msra.mxu0 %v14135_v48 }
 0x414   : > { %13174 = vmatprep.subr.bf16.mxu0 %v14137_v32 }
 0x415   : > { %13189 = vmatpush3.bf16.msra.mxu1 %v14124_v8 }
 0x416   : > { %13190 = vmatprep.subr.bf16.mxu1 %v14126_v20 }
 0x417   : > { %13175 = vmatpush3.bf16.msra.mxu0 %v14139_v11 }
 0x418   : > { %13530 = vmatmul.mubr.bf16.gmra.mrb[108].mxu1 %v12185_v43  ;;  %13176 = vmatprep.subr.bf16.mxu0 %v14141_v28 }
 0x419   : > { %13191 = vmatpush3.bf16.msra.mxu1 %v14128_v1 }
 0x41a   : > { %13192 = vmatprep.subr.bf16.mxu1 %v14130_v35 }
 0x41b   : > { %13177 = vmatpush3.bf16.msra.mxu0 %v14143_v29 }
 0x41c   : > { %13178 = vmatprep.subr.bf16.mxu0 %v14145_v12 }
 0x41d   : > { %13193 = vmatpush3.bf16.msra.mxu1 %v14132_v56 }
 0x41e   : > { %13194 = vmatprep.subr.bf16.mxu1 %v14134_v30 }
 0x41f   : > { %13179 = vmatpush3.bf16.msra.mxu0 %v14147_v40 }
 0x420   : > { %13208 = vmatprep.subr.bf16.mxu0 %v14149_v49 }
 0x421   : > { %13195 = vmatpush3.bf16.msra.mxu1 %v14136_v7 }
 0x422   : > { %13196 = vmatprep.subr.bf16.mxu1 %v14138_v34 }
 0x425   : > { %13197 = vmatpush3.bf16.msra.mxu1 %v14140_v22 }
 0x426   : > { %13198 = vmatprep.subr.bf16.mxu1 %v14142_v61 }
 0x429   : > { %13199 = vmatpush3.bf16.msra.mxu1 %v14144_v54 }
 0x42a   : > { %13200 = vmatprep.subr.bf16.mxu1 %v14146_v59 }
 0x42d   : > { %13201 = vmatpush3.bf16.msra.mxu1 %v14148_v6 }
 0x42e   : > { %13230 = vmatprep.subr.bf16.mxu1 %v14150_v9 }
 0x486   : > { %v13048_v3 = vpop.f32.mrb[80].mxu0 }
 0x487   : > { %v13049_v10 = vpop.f32.mrb[81].mxu0 }
 0x488   : > { %v13050_v2 = vadd.f32 %v13049_v10, %v13048_v3  ;;  %v13051_v31 = vpop.f32.mrb[82].mxu0 }
 0x489   : > { %v13052_v37 = vpop.f32.mrb[83].mxu0 }
 0x48a   : > { %v13053_v5 = vadd.f32 %v13052_v37, %v13051_v31 }
 0x48e   : > { %v13008_v42 = vpop.f32.mrb[72].mxu1  ;;  %v13054_v44 = vpop.f32.mrb[84].mxu0 }
 0x48f   : > { %v13009_v18 = vpop.f32.mrb[73].mxu1  ;;  %v13055_v52 = vpop.f32.mrb[85].mxu0 }
 0x490   : > { %v13010_v45 = vadd.f32 %v13009_v18, %v13008_v42  ;;  %v13011_v4 = vpop.f32.mrb[74].mxu1  ;;  %v13056_v55 = vadd.f32 %v13055_v52, %v13054_v44  ;;  %v13057_v24 = vpop.f32.mrb[86].mxu0 }
 0x491   : > { %v13012_v53 = vpop.f32.mrb[75].mxu1  ;;  %v13058_v62 = vpop.f32.mrb[87].mxu0 }
 0x492   : > { %v6323_v51 = vadd.f32 %v13010_v45, %v15748_v33  ;;  %v13013_v63 = vadd.f32 %v13012_v53, %v13011_v4  ;;  %v13059_v0 = vadd.f32 %v13058_v62, %v13057_v24 }
 0x494   : > { %v6326_v47 = vadd.f32 %v13013_v63, %v15748_v33  ;;  %v15764_v41 = vadd.f32 %v13050_v2, %v6323_v51 }
 0x496   : > { %v13014_v21 = vpop.f32.mrb[76].mxu1  ;;  %v15778_v16 = vadd.f32 %v13053_v5, %v6326_v47 }
 0x497   : > { %v13015_v39 = vpop.f32.mrb[77].mxu1 }
 0x498   : > { %v13016_v46 = vadd.f32 %v13015_v39, %v13014_v21  ;;  %v13060_v23 = vpop.f32.mrb[88].mxu0  ;;  %v13017_v27 = vpop.f32.mrb[78].mxu1 }
 0x499   : > { %v13061_v43 = vpop.f32.mrb[89].mxu0  ;;  %v13018_v25 = vpop.f32.mrb[79].mxu1 }
 0x49a   : > { %v6331_v19 = vadd.f32 %v13016_v46, %v15748_v33  ;;  %v13062_v50 = vadd.f32 %v13061_v43, %v13060_v23  ;;  %v13019_v15 = vadd.f32 %v13018_v25, %v13017_v27  ;;  %v13063_v13 = vpop.f32.mrb[90].mxu0 }
 0x49b   : > { %v13064_v58 = vpop.f32.mrb[91].mxu0 }
 0x49c   : > { %v6334_v14 = vadd.f32 %v13019_v15, %v15748_v33  ;;  %v13065_v8 = vadd.f32 %v13064_v58, %v13063_v13  ;;  %v6396_v17 = vadd.f32 %v13056_v55, %v6331_v19 }
 0x49e   : > { %v13020_v20 = vpop.f32.mrb[80].mxu1  ;;  %v6399_v26 = vadd.f32 %v13059_v0, %v6334_v14 }
 0x49f   : > { %v13021_v1 = vpop.f32.mrb[81].mxu1 }
 0x4a0   : > { %v13022_v36 = vadd.f32 %v13021_v1, %v13020_v20  ;;  %v13023_v35 = vpop.f32.mrb[82].mxu1  ;;  %v13066_v60 = vpop.f32.mrb[92].mxu0 }
 0x4a1   : > { %v13024_v56 = vpop.f32.mrb[83].mxu1  ;;  %v13067_v30 = vpop.f32.mrb[93].mxu0 }
 0x4a2   : > { %v6339_v57 = vadd.f32 %v13022_v36, %v15748_v33  ;;  %v13025_v3 = vadd.f32 %v13024_v56, %v13023_v35  ;;  %v13068_v10 = vadd.f32 %v13067_v30, %v13066_v60  ;;  %v13069_v48 = vpop.f32.mrb[94].mxu0 }
 0x4a3   : > { %v13070_v2 = vpop.f32.mrb[95].mxu0 }
 0x4a4   : > { %v6342_v7 = vadd.f32 %v13025_v3, %v15748_v33  ;;  %v6404_v31 = vadd.f32 %v13062_v50, %v6339_v57  ;;  %v13071_v32 = vadd.f32 %v13070_v2, %v13069_v48 }
 0x4a6   : > { %v13026_v34 = vpop.f32.mrb[84].mxu1  ;;  %v6407_v37 = vadd.f32 %v13065_v8, %v6342_v7 }
 0x4a7   : > { %v13027_v5 = vpop.f32.mrb[85].mxu1 }
 0x4a8   : > { %v13028_v11 = vadd.f32 %v13027_v5, %v13026_v34  ;;  %v13029_v22 = vpop.f32.mrb[86].mxu1 }
 0x4a9   : > { %v13030_v28 = vpop.f32.mrb[87].mxu1 }
 0x4aa   : > { %v6347_v61 = vadd.f32 %v13028_v11, %v15748_v33  ;;  %v13031_v42 = vadd.f32 %v13030_v28, %v13029_v22  ;;  %v13128_v18 = vpop.f32.mrb[96].mxu0 }
 0x4ab   : > { %v13129_v44 = vpop.f32.mrb[97].mxu0 }
 0x4ac   : > { %v6350_v45 = vadd.f32 %v13031_v42, %v15748_v33  ;;  %v6412_v4 = vadd.f32 %v13068_v10, %v6347_v61  ;;  %v13130_v52 = vadd.f32 %v13129_v44, %v13128_v18  ;;  %v13131_v29 = vpop.f32.mrb[98].mxu0 }
 0x4ad   : > { %v13132_v54 = vpop.f32.mrb[99].mxu0 }
 0x4ae   : > { %v6415_v55 = vadd.f32 %v13071_v32, %v6350_v45  ;;  %v13133_v53 = vadd.f32 %v13132_v54, %v13131_v29 }
 0x4b4   : > { %v13134_v24 = vpop.f32.mrb[100].mxu0 }
 0x4b5   : > { %v13135_v12 = vpop.f32.mrb[101].mxu0 }
 0x4b6   : > { %v13136_v59 = vadd.f32 %v13135_v12, %v13134_v24  ;;  %v13137_v51 = vpop.f32.mrb[102].mxu0 }
 0x4b7   : > { %v13088_v63 = vpop.f32.mrb[88].mxu1  ;;  %v13138_v62 = vpop.f32.mrb[103].mxu0 }
 0x4b8   : > { %v13089_v0 = vpop.f32.mrb[89].mxu1  ;;  %v13139_v47 = vadd.f32 %v13138_v62, %v13137_v51  ;;  %v14354_v62 = vmov 1983009808  }
 0x4b9   : > { %v13090_v40 = vadd.f32 %v13089_v0, %v13088_v63  ;;  %v13091_v6 = vpop.f32.mrb[90].mxu1  ;;  %v6839_v0 = vunpack.c.l.s4 %v14354_v62 }
 0x4ba   : > { %v13092_v49 = vpop.f32.mrb[91].mxu1 }
 0x4bb   : > { %v6453_v9 = vadd.f32 %v13090_v40, %v15764_v41  ;;  %v13093_v33 = vadd.f32 %v13092_v49, %v13091_v6 }
 0x4bd   : > { %v6456_v21 = vadd.f32 %v13093_v33, %v15778_v16  ;;  %v6518_v39 = vadd.f32 %v13130_v52, %v6453_v9 }
 0x4bf   : > { %v6521_v46 = vadd.f32 %v13133_v53, %v6456_v21 }
 0x4c2   : > { %v13140_v23 = vpop.f32.mrb[104].mxu0 }
 0x4c3   : > { %v13141_v27 = vpop.f32.mrb[105].mxu0 }
 0x4c4   : > { %v13142_v43 = vadd.f32 %v13141_v27, %v13140_v23  ;;  %v13143_v25 = vpop.f32.mrb[106].mxu0  ;;  %v6840_v23 = vunpack.c.0.s8 %v6839_v0  ;;  %v6721_v0 = vld [vmem:[#allocation2 + $0x28] sm:$0x1f] }
 0x4c5   : > { %v13094_v19 = vpop.f32.mrb[92].mxu1  ;;  %v13144_v50 = vpop.f32.mrb[107].mxu0 }
 0x4c6   : > { %v13095_v15 = vpop.f32.mrb[93].mxu1  ;;  %v13145_v13 = vadd.f32 %v13144_v50, %v13143_v25 }
 0x4c7   : > { %v13096_v58 = vadd.f32 %v13095_v15, %v13094_v19  ;;  %v13097_v14 = vpop.f32.mrb[94].mxu1 }
 0x4c8   : > { %v13098_v8 = vpop.f32.mrb[95].mxu1 }
 0x4c9   : > { %v6461_v20 = vadd.f32 %v13096_v58, %v6396_v17  ;;  %v13099_v1 = vadd.f32 %v13098_v8, %v13097_v14 }
 0x4cb   : > { %v6464_v36 = vadd.f32 %v13099_v1, %v6399_v26  ;;  %v6526_v41 = vadd.f32 %v13136_v59, %v6461_v20 }
 0x4cd   : > { %v6529_v35 = vadd.f32 %v13139_v47, %v6464_v36  ;;  %v6841_v47 = vlaneseq }
 0x4ce   : > { %v13146_v60 = vpop.f32.mrb[108].mxu0 }
 0x4cf   : > { %v13147_v16 = vpop.f32.mrb[109].mxu0  ;;  %v6842_v27 = vshrl.u32 %v6841_v47, 7 }
 0x4d0   : > { %v13148_v56 = vadd.f32 %v13147_v16, %v13146_v60  ;;  %v13149_v57 = vpop.f32.mrb[110].mxu0 }
 0x4d1   : > { %v13150_v3 = vpop.f32.mrb[111].mxu0 }
 0x4d2   : > { %v13100_v30 = vpop.f32.mrb[96].mxu1  ;;  %v13151_v48 = vadd.f32 %v13150_v3, %v13149_v57 }
 0x4d3   : > { %v13101_v10 = vpop.f32.mrb[97].mxu1 }
 0x4d4   : > { %v13102_v7 = vadd.f32 %v13101_v10, %v13100_v30  ;;  %v13103_v2 = vpop.f32.mrb[98].mxu1  ;;  %v6715_v30 = vld [vmem:[#allocation2 + $0x18] sm:$0x1f] }
 0x4d5   : > { %v13104_v32 = vpop.f32.mrb[99].mxu1 }
 0x4d6   : > { %v6469_v34 = vadd.f32 %v13102_v7, %v6404_v31  ;;  %v13105_v5 = vadd.f32 %v13104_v32, %v13103_v2  ;;  %v6709_v32 = vld [vmem:[#allocation2 + $0x8] sm:$0x1f] }
 0x4d8   : > { %v6472_v11 = vadd.f32 %v13105_v5, %v6407_v37  ;;  %v6534_v22 = vadd.f32 %v13142_v43, %v6469_v34 }
 0x4da   : > { %v6537_v17 = vadd.f32 %v13145_v13, %v6472_v11 }
 0x4db   : > { %v13106_v28 = vpop.f32.mrb[100].mxu1 }
 0x4dc   : > { %v13107_v26 = vpop.f32.mrb[101].mxu1 }
 0x4dd   : > { %v13108_v61 = vadd.f32 %v13107_v26, %v13106_v28  ;;  %v13109_v42 = vpop.f32.mrb[102].mxu1  ;;  %v6718_v28 = vld [vmem:[#allocation2 + $0x20] sm:$0x1f] }
 0x4de   : > { %v13110_v18 = vpop.f32.mrb[103].mxu1 }
 0x4df   : > { %v6477_v44 = vadd.f32 %v13108_v61, %v6412_v4  ;;  %v13111_v45 = vadd.f32 %v13110_v18, %v13109_v42 }
 0x4e1   : > { %v6480_v52 = vadd.f32 %v13111_v45, %v6415_v55  ;;  %v6542_v29 = vadd.f32 %v13148_v56, %v6477_v44 }
 0x4e3   : > { %v13527_v54 = vpop.f32.mrb[104].mxu1  ;;  %v6545_v53 = vadd.f32 %v13151_v48, %v6480_v52 }
 0x4e4   : > { %v6591_v24 = vadd.f32 %v13527_v54, %v6526_v41  ;;  %v6582_v12 = vpop.f32.mrb[105].mxu1 }
 0x4e5   : > { %v6583_v59 = vadd.f32 %v6582_v12, %v6518_v39  ;;  %v13528_v51 = vpop.f32.mrb[106].mxu1 }
 0x4e6   : > { %v6615_v31 = vmax.f32 %v6591_v24, 0.0  ;;  %v6594_v63 = vadd.f32 %v13528_v51, %v6529_v35  ;;  %v6585_v37 = vpop.f32.mrb[107].mxu1  ;;  %v6727_v51 = vld [vmem:[#allocation2 + $0x38] sm:$0x1f] }
 0x4e7   : > { %v6613_v40 = vmax.f32 %v6583_v59, 0.0  ;;  %v6586_v6 = vadd.f32 %v6585_v37, %v6521_v46 }
 0x4e8   : > { %v12630_v49 = vpack.c.bf16 %v6615_v31, %v6615_v31  ;;  %v6616_v9 = vmax.f32 %v6594_v63, 0.0 }
 0x4e9   : > { %v12628_v4 = vpack.c.bf16 %v6613_v40, %v6613_v40  ;;  %v6614_v33 = vmax.f32 %v6586_v6, 0.0 }
 0x4ea   : > { %v6660_v55 = vshrl.u32 %v12630_v49, 16  ;;  %v12631_v21 = vpack.c.bf16 %v6616_v9, %v6616_v9  ;;  %v6663_v43 = vshll.u32 %v12630_v49, 16  ;;  %v6730_v49 = vld [vmem:[#allocation2 + $0x40] sm:$0x1f] }
 0x4eb   : > { %v6646_v25 = vshrl.u32 %v12628_v4, 16  ;;  %v6649_v39 = vshll.u32 %v12628_v4, 16  ;;  %v12629_v19 = vpack.c.bf16 %v6614_v33, %v6614_v33  ;;  %v13531_v50 = vpop.f32.mrb[108].mxu1 }
 0x4ec   : > { %v6662_v15 = vrot.slane %v6660_v55, 7  ;;  %v6667_v13 = vshrl.u32 %v12631_v21, 16  ;;  %v6670_v58 = vshll.u32 %v12631_v21, 16  ;;  %v6607_v14 = vadd.f32 %v13531_v50, %v6542_v29  ;;  %v6598_v8 = vpop.f32.mrb[109].mxu1  ;;  %v6724_v21 = vld [vmem:[#allocation2 + $0x30] sm:$0x1f] }
 0x4ed   : > { %v6648_v20 = vrot.slane %v6646_v25, 7  ;;  %v6653_v46 = vshrl.u32 %v12629_v19, 16  ;;  %v6656_v1 = vshll.u32 %v12629_v19, 16  ;;  %v6599_v36 = vadd.f32 %v6598_v8, %v6534_v22  ;;  %v13532_v41 = vpop.f32.mrb[110].mxu1 }
 0x4ee   : > { %v6665_v35 = vor.u32 %v6663_v43, %v6662_v15  ;;  %v6669_v60 = vrot.slane %v6667_v13, 7  ;;  %v6619_v16 = vmax.f32 %v6607_v14, 0.0  ;;  %v6610_v56 = vadd.f32 %v13532_v41, %v6545_v53  ;;  %v6601_v57 = vpop.f32.mrb[111].mxu1 }
 0x4ef   : > { %v6651_v3 = vor.u32 %v6649_v39, %v6648_v20  ;;  %v6655_v10 = vrot.slane %v6653_v46, 7  ;;  %v6617_v48 = vmax.f32 %v6599_v36, 0.0  ;;  %v6602_v7 = vadd.f32 %v6601_v57, %v6537_v17  ;;  %v6712_v17 = vld [vmem:[#allocation2 + $0x10] sm:$0x1f] }
 0x4f0   : > { %v6716_v2 = vsel %vm14582_vm6, %v6665_v35, %v6715_v30  ;;  %v6672_v34 = vor.u32 %v6670_v58, %v6669_v60  ;;  %v12634_v5 = vpack.c.bf16 %v6619_v16, %v6619_v16  ;;  %v6620_v11 = vmax.f32 %v6610_v56, 0.0 }
 0x4f1   : > { %6717 = vst [vmem:[#allocation2 + $0x18] sm:$0x1f] %v6716_v2  ;;  %v6710_v22 = vsel %vm14582_vm6, %v6651_v3, %v6709_v32  ;;  %v6658_v26 = vor.u32 %v6656_v1, %v6655_v10  ;;  %v12632_v61 = vpack.c.bf16 %v6617_v48, %v6617_v48  ;;  %v6618_v42 = vmax.f32 %v6602_v7, 0.0 }
 0x4f2   : > { %6711 = vst [vmem:[#allocation2 + $0x8] sm:$0x1f] %v6710_v22  ;;  %v6719_v18 = vsel %vm14582_vm6, %v6672_v34, %v6718_v28  ;;  %v6688_v44 = vshrl.u32 %v12634_v5, 16  ;;  %v12635_v45 = vpack.c.bf16 %v6620_v11, %v6620_v11  ;;  %v15796_v53 = vsub.s32 %v6840_v23, %v6842_v27  ;;  %v14293_v34 = vld [vmem:[%s16865_s9 + $0x540] sm:$0xff]  }
 0x4f3   : > { %6720 = vst [vmem:[#allocation2 + $0x20] sm:$0x1f] %v6719_v18  ;;  %v6713_v52 = vsel %vm14582_vm6, %v6658_v26, %v6712_v17  ;;  %v6674_v29 = vshrl.u32 %v12632_v61, 16  ;;  %v12633_v54 = vpack.c.bf16 %v6618_v42, %v6618_v42  ;;  %v6691_v12 = vshll.u32 %v12634_v5, 16 }
 0x4f4   : > { %6714 = vst [vmem:[#allocation2 + $0x10] sm:$0x1f] %v6713_v52  ;;  %v6690_v24 = vrot.slane %v6688_v44, 7  ;;  %v6695_v59 = vshrl.u32 %v12635_v45, 16  ;;  %v6677_v63 = vshll.u32 %v12632_v61, 16  ;;  %v6698_v40 = vshll.u32 %v12635_v45, 16 }
 0x4f5   : > { %v6676_v31 = vrot.slane %v6674_v29, 7  ;;  %v6681_v37 = vshrl.u32 %v12633_v54, 16  ;;  %v6684_v4 = vshll.u32 %v12633_v54, 16 }
 0x4f6   : > { %v6693_v62 = vor.u32 %v6691_v12, %v6690_v24  ;;  %v6697_v47 = vrot.slane %v6695_v59, 7 }
 0x4f7   : > { %v6679_v6 = vor.u32 %v6677_v63, %v6676_v31  ;;  %v6683_v9 = vrot.slane %v6681_v37, 7 }
 0x4f8   : > { %v6728_v33 = vsel %vm14582_vm6, %v6693_v62, %v6727_v51  ;;  %v6700_v55 = vor.u32 %v6698_v40, %v6697_v47  ;;  %v12289_v23 = vld.sshfl [vmem:[#allocation2 + $0x18] sm:$0x30 pattern:$0x76325410] }
 0x4f9   : > { %v7116_v43 = vld [vmem:[#allocation2 + $0x18] sm:$0x1c]  ;;  %6729 = vst [vmem:[#allocation2 + $0x38] sm:$0x1f] %v6728_v33  ;;  %v6722_v25 = vsel %vm14582_vm6, %v6679_v6, %v6721_v0  ;;  %v6686_v39 = vor.u32 %v6684_v4, %v6683_v9  ;;  %v7114_v50 = vld [vmem:[#allocation2 + $0x8] sm:$0x1c] }
 0x4fa   : > { %v12287_v19 = vld.sshfl [vmem:[#allocation2 + $0x8] sm:$0x30 pattern:$0x76325410]  ;;  %v7154_v15 = vcombine.high %v7116_v43, %v7116_v43  ;;  %v7161_v13 = vrot.slane %v7116_v43, %v15796_v53  ;;  %6723 = vst [vmem:[#allocation2 + $0x28] sm:$0x1f] %v6722_v25  ;;  %v6731_v58 = vsel %vm14582_vm6, %v6700_v55, %v6730_v49  ;;  %v7122_v8 = vcombine.high %v7114_v50, %v7114_v50 }
 0x4fb   : > { %v12290_v14 = vld.sshfl [vmem:[#allocation2 + $0x20] sm:$0x30 pattern:$0x76325410]  ;;  %v7129_v20 = vrot.slane %v7114_v50, %v15796_v53  ;;  %6732 = vst [vmem:[#allocation2 + $0x40] sm:$0x1f] %v6731_v58  ;;  %v6725_v46 = vsel %vm14582_vm6, %v6686_v39, %v6724_v21  ;;  %vm6775_vm6 = vmor %vm6773_vm14, %vm6774_vm15 }
 0x4fc   : > { %v12288_v1 = vld.sshfl [vmem:[#allocation2 + $0x10] sm:$0x30 pattern:$0x76325410]  ;;  %v12292_v36 = vcombine.high %v12289_v23, %v12290_v14  ;;  %6726 = vst [vmem:[#allocation2 + $0x30] sm:$0x1f] %v6725_v46  ;;  %v15824_v56 = vrot.slane %v7154_v15, %v15796_v53  ;;  %v15826_v38 = vcombine.high %v7161_v13, %v7161_v13  ;;  %v15830_v10 = vrot.slane %v7122_v8, %v15796_v53  ;;  %vm15865_vm8 = vmor %vm6775_vm6, %vm6776_vm1 }
 0x4fd   : > { %v12291_v35 = vcombine.high %v12287_v19, %v12288_v1  ;;  %v12271_v60 = vld.sshfl [vmem:[#allocation2 + $0x8] sm:$0x12 pattern:$0x76325410]  ;;  %v15821_v16 = vld [vmem:[#allocation2 + $0x10] sm:$0x1c]  ;;  %v15832_v48 = vcombine.high %v7129_v20, %v7129_v20  ;;  %vm15873_vm10 = vmor %vm15865_vm8, %vm6778_vm3 }
 0x4fe   : > { %v7110_v57 = vrot.slane %v12292_v36, %v15796_v53  ;;  %v12272_v30 = vld.sshfl [vmem:[#allocation2 + $0x10] sm:$0x12 pattern:$0x76325410]  ;;  %v6870_v3 = vcombine.high %v12271_v60, %v12271_v60  ;;  %v12275_v5 = vrot.slane %v12271_v60, 9  ;;  %v7138_v42 = vcombine.high %v15821_v16, %v15821_v16 }
 0x4ff   : > { %v7103_v7 = vrot.slane %v12291_v35, %v15796_v53  ;;  %v12273_v2 = vld.sshfl [vmem:[#allocation2 + $0x18] sm:$0x12 pattern:$0x76325410]  ;;  %v6878_v32 = vcombine.high %v12272_v30, %v12272_v30  ;;  %v12276_v11 = vrot.slane %v12272_v30, 9  ;;  %vm14356_vm14 = vmmov 0  }
 0x500   : > { %v12274_v22 = vld.sshfl [vmem:[#allocation2 + $0x20] sm:$0x12 pattern:$0x76325410]  ;;  %v6886_v28 = vcombine.high %v12273_v2, %v12273_v2  ;;  %v6904_v26 = vrot.slane %v6870_v3, 7  ;;  %v12277_v61 = vrot.slane %v12273_v2, 9 }
 0x501   : > { %v7111_v18 = vcombine.low %v7103_v7, %v7110_v57  ;;  %v6894_v17 = vcombine.high %v12274_v22, %v12274_v22  ;;  %v6908_v44 = vrot.slane %v6878_v32, 7  ;;  %v12278_v45 = vrot.slane %v12274_v22, 9  ;;  %v12267_v52 = vld.sshfl [vmem:[#allocation2 + $0x8] sm:$0x13 pattern:$0x76325410] }
 0x502   : > { %v6905_v29 = vsel %vm15838_vm2, %v12275_v5, %v6904_v26  ;;  %v6912_v54 = vrot.slane %v6886_v28, 7  ;;  %v12268_v24 = vld.sshfl [vmem:[#allocation2 + $0x10] sm:$0x13 pattern:$0x76325410]  ;;  %v6748_v12 = vcombine.high %v12267_v52, %v12267_v52  ;;  %v6781_v59 = vshrl.u32 %v12267_v52, 16 }
 0x503   : > { %10997 = vmatprep.mubr.bf16.mxu1 %v7111_v18  ;;  %v15848_v51 = vsel %vm15838_vm2, %v12276_v11, %v6908_v44  ;;  %v6916_v31 = vrot.slane %v6894_v17, 7  ;;  %v12269_v63 = vld.sshfl [vmem:[#allocation2 + $0x18] sm:$0x13 pattern:$0x76325410]  ;;  %v6756_v37 = vcombine.high %v12268_v24, %v12268_v24  ;;  %v6784_v62 = vshll.u32 %v12267_v52, 16 }
 0x504   : > { %v15852_v0 = vsel %vm15838_vm2, %v12277_v61, %v6912_v54  ;;  %v6918_v47 = vcombine.low %v6905_v29, %v15848_v51  ;;  %v12270_v40 = vld.sshfl [vmem:[#allocation2 + $0x20] sm:$0x13 pattern:$0x76325410]  ;;  %v6764_v6 = vcombine.high %v12269_v63, %v12269_v63  ;;  %v6783_v49 = vrot.slane %v6781_v59, 6 }
 0x505   : > { %v15859_v9 = vsel %vm15838_vm2, %v12278_v45, %v6916_v31  ;;  %v6772_v4 = vcombine.high %v12270_v40, %v12270_v40  ;;  %v6786_v33 = vrot.slane %v6784_v62, 7  ;;  %v6790_v55 = vshll.u32 %v6748_v12, 16  ;;  %v12279_v13 = vld.sshfl [vmem:[#allocation2 + $0x8] sm:$0x32 pattern:$0x76325410] }
 0x506   : > { %v6919_v21 = vcombine.low %v15852_v0, %v15859_v9  ;;  %v6926_v23 = vrot.slane %v6918_v47, %v15796_v53  ;;  %v6795_v27 = vshrl.u32 %v12268_v24, 16  ;;  %v6798_v43 = vshll.u32 %v12268_v24, 16  ;;  %v12280_v7 = vld.sshfl [vmem:[#allocation2 + $0x10] sm:$0x32 pattern:$0x76325410] }
 0x507   : > { %v6787_v39 = vor.u32 %v6786_v33, %v6783_v49  ;;  %v6792_v19 = vrot.slane %v6790_v55, 7  ;;  %v6804_v50 = vshll.u32 %v6756_v37, 16  ;;  %v6809_v15 = vshrl.u32 %v12269_v63, 16 }
 0x508   : > { %v6933_v58 = vrot.slane %v6919_v21, %v15796_v53  ;;  %v6797_v14 = vrot.slane %v6795_v27, 6  ;;  %v6800_v8 = vrot.slane %v6798_v43, 7  ;;  %v6812_v20 = vshll.u32 %v12269_v63, 16  ;;  %v14325_v21 = vld [vmem:[%s16865_s9 + $0x600] sm:$0xff]  }
 0x509   : > { %v6788_v46 = vrot.slane %v6787_v39, 2  ;;  %v6806_v1 = vrot.slane %v6804_v50, 7  ;;  %v6811_v36 = vrot.slane %v6809_v15, 6  ;;  %v6818_v41 = vshll.u32 %v6764_v6, 16 }
 0x50a   : > { %v6934_v35 = vcombine.low %v6926_v23, %v6933_v58  ;;  %v6801_v57 = vor.u32 %v6800_v8, %v6797_v14  ;;  %v6814_v30 = vrot.slane %v6812_v20, 7  ;;  %v6823_v3 = vshrl.u32 %v12270_v40, 16  ;;  %v12281_v5 = vld.sshfl [vmem:[#allocation2 + $0x18] sm:$0x32 pattern:$0x76325410] }
 0x50b   : > { %v6826_v2 = vshll.u32 %v12270_v40, 16  ;;  %v6832_v32 = vshll.u32 %v6772_v4, 16  ;;  %v15879_v11 = vrot.slane %v15821_v16, %v15796_v53  ;;  %v15882_v22 = vrot.slane %v7138_v42, %v15796_v53  ;;  %v12282_v52 = vld.sshfl [vmem:[#allocation2 + $0x20] sm:$0x32 pattern:$0x76325410] }
 0x50c   : > { %10956 = vmatprep.mubr.bf16.mxu0 %v6934_v35  ;;  %v6802_v28 = vrot.slane %v6801_v57, 2  ;;  %v6815_v26 = vor.u32 %v6814_v30, %v6811_v36  ;;  %v6825_v61 = vrot.slane %v6823_v3, 6  ;;  %v6952_v18 = vcombine.high %v12279_v13, %v12279_v13  ;;  %v12296_v15 = vld.sshfl [vmem:[#allocation2 + $0x28] sm:$0x13 pattern:$0x76325410] }
 0x50d   : > { %v6793_v17 = vsel %vm15873_vm10, %v6788_v46, %v6792_v19  ;;  %v6820_v44 = vrot.slane %v6818_v41, 7  ;;  %v6828_v45 = vrot.slane %v6826_v2, 7  ;;  %v6960_v29 = vcombine.high %v12280_v7, %v12280_v7  ;;  %v12308_v3 = vld.sshfl [vmem:[#allocation2 + $0x28] sm:$0x32 pattern:$0x76325410] }
 0x50e   : > { %v15890_v16 = vsel %vm15873_vm10, %v6802_v28, %v6806_v1  ;;  %v6816_v42 = vrot.slane %v6815_v26, 2  ;;  %v6968_v54 = vcombine.high %v12281_v5, %v12281_v5  ;;  %v6985_v24 = vshrl.u32 %v12279_v13, 16 }
 0x50f   : > { %v6829_v12 = vor.u32 %v6828_v45, %v6825_v61  ;;  %v6834_v59 = vrot.slane %v6832_v32, 7  ;;  %v6836_v31 = vcombine.low %v6793_v17, %v15890_v16  ;;  %v6990_v63 = vshrl.u32 %v6952_v18, 16  ;;  %v14151_v32 = vld [vmem:[%s16865_s9 + $0x100] sm:$0xff]  }
 0x510   : > { %v6976_v37 = vcombine.high %v12282_v52, %v12282_v52  ;;  %v6993_v62 = vshll.u32 %v6952_v18, 16  ;;  %v6998_v47 = vshrl.u32 %v12280_v7, 16  ;;  %v7003_v40 = vshrl.u32 %v6960_v29, 16  ;;  %v14153_v18 = vld [vmem:[%s16865_s9 + $0x148] sm:$0xff]   ;;  %v7117_v45 = vld [vmem:[#allocation2 + $0x20] sm:$0x1c] }
 0x511   : > { %v6821_v6 = vsel %vm15873_vm10, %v6816_v42, %v6820_v44  ;;  %v6830_v49 = vrot.slane %v6829_v12, 2  ;;  %v12283_v4 = vrot.slane %v6985_v24, 9  ;;  %v6992_v33 = vrot.slane %v6990_v63, 7 }
 0x512   : > { %v6844_v55 = vrot.slane %v6836_v31, %v15796_v53  ;;  %v7005_v23 = vrot.slane %v7003_v40, 7  ;;  %v7006_v27 = vshll.u32 %v6960_v29, 16  ;;  %v7016_v43 = vshrl.u32 %v6968_v54, 16 }
 0x513   : > { %v15904_v25 = vsel %vm15873_vm10, %v6830_v49, %v6834_v59  ;;  %v6995_v39 = vor.u32 %v6993_v62, %v6992_v33  ;;  %v12284_v19 = vrot.slane %v6998_v47, 9  ;;  %v7011_v50 = vshrl.u32 %v12281_v5, 16 }
 0x514   : > { %v6837_v13 = vcombine.low %v6821_v6, %v15904_v25  ;;  %v7008_v58 = vor.u32 %v7006_v27, %v7005_v23  ;;  %v7018_v14 = vrot.slane %v7016_v43, 7  ;;  %v7019_v8 = vshll.u32 %v6968_v54, 16 }
 0x515   : > { %v6996_v20 = vsel %vm15898_vm13, %v12283_v4, %v6995_v39  ;;  %v7024_v46 = vshrl.u32 %v12282_v52, 16  ;;  %v7029_v1 = vshrl.u32 %v6976_v37, 16  ;;  %v7032_v36 = vshll.u32 %v6976_v37, 16 }
 0x516   : > { %v6851_v41 = vrot.slane %v6837_v13, %v15796_v53  ;;  %v15912_v35 = vsel %vm15898_vm13, %v12284_v19, %v7008_v58  ;;  %v7021_v57 = vor.u32 %v7019_v8, %v7018_v14  ;;  %v7300_v30 = vcombine.high %v12296_v15, %v12296_v15  ;;  %v14159_v14 = vld [vmem:[%s16865_s9 + $0x110] sm:$0xff]  }
 0x517   : > { %v7031_v7 = vrot.slane %v7029_v1, 7  ;;  %v7036_v2 = vcombine.low %v6996_v20, %v15912_v35  ;;  %v7344_v5 = vshrl.u32 %v12296_v15, 16  ;;  %v7347_v28 = vshll.u32 %v12296_v15, 16  ;;  %v14152_v15 = vld [vmem:[%s16865_s9 + $0x180] sm:$0xff]  }
 0x518   : > { %v6852_v26 = vcombine.low %v6844_v55, %v6851_v41  ;;  %v12285_v61 = vrot.slane %v7011_v50, 9  ;;  %v7353_v17 = vshll.u32 %v7300_v30, 16  ;;  %v7357_v44 = vcombine.low %v15890_v16, %v6821_v6  ;;  %v14155_v16 = vld [vmem:[%s16865_s9 + $0x108] sm:$0xff]   ;;  %v14161_v41 = vld [vmem:[%s16865_s9 + $0x158] sm:$0xff]  }
 0x519   : > { %v12286_v52 = vrot.slane %v7024_v46, 9  ;;  %v7034_v29 = vor.u32 %v7032_v36, %v7031_v7  ;;  %v7346_v42 = vrot.slane %v7344_v5, 6  ;;  %v7349_v54 = vrot.slane %v7347_v28, 7  ;;  %v14156_v28 = vld [vmem:[%s16865_s9 + $0x188] sm:$0xff]  }
 0x51a   : > { %10957 = vmatmul.mubr.bf16.vlgmr.msra.gmra.mrb[112].mxu0 %v6852_v26  ;;  %v7022_v24 = vsel %vm15898_vm13, %v12285_v61, %v7021_v57  ;;  %v7044_v12 = vrot.slane %v7036_v2, %v15796_v53  ;;  %v7490_v59 = vcombine.high %v12308_v3, %v12308_v3  ;;  %v7153_v31 = vcombine.high %v15879_v11, %v15879_v11  ;;  %v14157_v11 = vld [vmem:[%s16865_s9 + $0x150] sm:$0xff]   ;;  %v14163_v61 = vld [vmem:[%s16865_s9 + $0x118] sm:$0xff]  }
 0x51b   : > { %v7035_v63 = vsel %vm15898_vm13, %v12286_v52, %v7034_v29  ;;  %13209 = vmatpush3.bf16.msra.mxu0 %v14151_v32  ;;  %v7350_v37 = vor.u32 %v7349_v54, %v7346_v42  ;;  %v7531_v62 = vshrl.u32 %v12308_v3, 16  ;;  %v7170_v47 = vcombine.high %v7117_v45, %v7117_v45  ;;  %v14158_v52 = vld [vmem:[%s16865_s9 + $0x1d0] sm:$0xff]   ;;  %v14165_v29 = vld [vmem:[%s16865_s9 + $0x160] sm:$0xff]  }
 0x51c   : > { %v7037_v40 = vcombine.low %v7022_v24, %v7035_v63  ;;  %13210 = vmatprep.subr.bf16.mxu0 %v14153_v18  ;;  %v7355_v6 = vrot.slane %v7353_v17, 7  ;;  %v7365_v49 = vrot.slane %v7357_v44, %v15796_v53  ;;  %v7536_v4 = vshrl.u32 %v7490_v59, 16 }
 0x51d   : > { %v7351_v33 = vrot.slane %v7350_v37, 2  ;;  %v7539_v55 = vshll.u32 %v7490_v59, 16  ;;  %v7543_v23 = vcombine.low %v15912_v35, %v7022_v24  ;;  %v7177_v27 = vrot.slane %v7117_v45, %v15796_v53 }
 0x51e   : > { %v7051_v43 = vrot.slane %v7037_v40, %v15796_v53  ;;  %v7538_v39 = vrot.slane %v7536_v4, 7  ;;  %v7187_v19 = vshrl.u32 %v15832_v48, 16  ;;  %v7190_v50 = vshll.u32 %v15832_v48, 16  ;;  %v14154_v48 = vld [vmem:[%s16865_s9 + $0x1c8] sm:$0xff]   ;;  %v14160_v40 = vld [vmem:[%s16865_s9 + $0x190] sm:$0xff]  }
 0x51f   : > { %13211 = vmatpush3.bf16.msra.mxu0 %v14155_v16  ;;  %v15946_v13 = vsel %vm15873_vm10, %v7351_v33, %v7355_v6  ;;  %v12312_v58 = vrot.slane %v7531_v62, 9  ;;  %v15952_v8 = vrot.slane %v7170_v47, %v15796_v53  ;;  %v7201_v20 = vshrl.u32 %v7153_v31, 16 }
 0x520   : > { %v7052_v46 = vcombine.low %v7044_v12, %v7051_v43  ;;  %v7358_v1 = vcombine.low %v15904_v25, %v15946_v13  ;;  %v7541_v36 = vor.u32 %v7539_v55, %v7538_v39  ;;  %13212 = vmatprep.subr.bf16.mxu0 %v14157_v11  ;;  %v7189_v35 = vrot.slane %v7187_v19, 6  ;;  %v14169_v11 = vld [vmem:[%s16865_s9 + $0x168] sm:$0xff]   ;;  %v7621_v43 = vld [vmem:[#allocation2 + $0x10] sm:$0x1c] }
 0x521   : > { %v7185_v57 = vcombine.high %v7177_v27, %v7177_v27  ;;  %v7192_v30 = vrot.slane %v7190_v50, 7  ;;  %v7203_v3 = vrot.slane %v7201_v20, 6  ;;  %v7204_v7 = vshll.u32 %v7153_v31, 16 }
 0x522   : > { %10998 = vmatmul.mubr.bf16.vlgmr.msra.gmra.mrb[112].mxu1 %v7052_v46  ;;  %v7372_v2 = vrot.slane %v7358_v1, %v15796_v53  ;;  %v7542_v32 = vsel %vm15898_vm13, %v12312_v58, %v7541_v36  ;;  %v7210_v5 = vshll.u32 %v15882_v22, 16  ;;  %v7215_v25 = vshrl.u32 %v15826_v38, 16  ;;  %v12300_v31 = vld.sshfl [vmem:[#allocation2 + $0x28] sm:$0x12 pattern:$0x76325410] }
 0x523   : > { %13231 = vmatpush3.bf16.msra.mxu1 %v14152_v15  ;;  %v7544_v26 = vcombine.low %v7035_v63, %v7542_v32  ;;  %13213 = vmatpush3.bf16.msra.mxu0 %v14159_v14  ;;  %v7193_v18 = vor.u32 %v7192_v30, %v7189_v35  ;;  %v7206_v17 = vrot.slane %v7204_v7, 7  ;;  %v7218_v44 = vshll.u32 %v15826_v38, 16  ;;  %v7622_v15 = vld [vmem:[#allocation2 + $0x18] sm:$0x1c]  ;;  %v14171_v1 = vld [vmem:[%s16865_s9 + $0x128] sm:$0xff]   ;;  %v14173_v7 = vld [vmem:[%s16865_s9 + $0x170] sm:$0xff]  }
 0x524   : > { %13232 = vmatprep.subr.bf16.mxu1 %v14154_v48  ;;  %v7373_v45 = vcombine.low %v7365_v49, %v7372_v2  ;;  %v7551_v22 = vrot.slane %v7543_v23, %v15796_v53  ;;  %13214 = vmatprep.subr.bf16.mxu0 %v14161_v41  ;;  %v7196_v42 = vshll.u32 %v15830_v10, 16  ;;  %v7217_v54 = vrot.slane %v7215_v25, 6  ;;  %v14162_v10 = vld [vmem:[%s16865_s9 + $0x1d8] sm:$0xff]   ;;  %v7623_v35 = vld [vmem:[#allocation2 + $0x20] sm:$0x1c] }
 0x525   : > { %v7558_v24 = vrot.slane %v7544_v26, %v15796_v53  ;;  %v7207_v12 = vor.u32 %v7206_v17, %v7203_v3  ;;  %v7220_v38 = vrot.slane %v7218_v44, 7  ;;  %v7224_v59 = vshll.u32 %v15824_v56, 16  ;;  %v14167_v56 = vld [vmem:[%s16865_s9 + $0x120] sm:$0xff]   ;;  %v14164_v48 = vld [vmem:[%s16865_s9 + $0x198] sm:$0xff]  }
 0x526   : > { %11038 = vmatprep.mubr.bf16.mxu0 %v7373_v45  ;;  %v7194_v63 = vrot.slane %v7193_v18, 2  ;;  %v7212_v16 = vrot.slane %v7210_v5, 7  ;;  %v7229_v37 = vshrl.u32 %v7185_v57, 16  ;;  %v7232_v62 = vshll.u32 %v7185_v57, 16  ;;  %v14166_v3 = vld [vmem:[%s16865_s9 + $0x1e0] sm:$0xff]  }
 0x527   : > { %13233 = vmatpush3.bf16.msra.mxu1 %v14156_v28  ;;  %v7559_v47 = vcombine.low %v7551_v22, %v7558_v24  ;;  %13215 = vmatpush3.bf16.msra.mxu0 %v14163_v61  ;;  %v7208_v6 = vrot.slane %v7207_v12, 2  ;;  %v7221_v49 = vor.u32 %v7220_v38, %v7217_v54  ;;  %v7238_v4 = vshll.u32 %v15952_v8, 16  ;;  %v16001_v46 = vld.sshfl [vmem:[#allocation2 + $0x18] sm:$0x12 pattern:$0x76325410] }
 0x528   : > { %13234 = vmatprep.subr.bf16.mxu1 %v14158_v52  ;;  %13216 = vmatprep.subr.bf16.mxu0 %v14165_v29  ;;  %v7198_v33 = vrot.slane %v7196_v42, 7  ;;  %v7231_v55 = vrot.slane %v7229_v37, 6  ;;  %v7234_v23 = vrot.slane %v7232_v62, 7  ;;  %v7415_v27 = vcombine.high %v12300_v31, %v12300_v31  ;;  %v7624_v28 = vld [vmem:[#allocation2 + $0x28] sm:$0x1c]  ;;  %v14168_v29 = vld [vmem:[%s16865_s9 + $0x1a0] sm:$0xff]  }
 0x529   : > { %11079 = vmatprep.mubr.bf16.mxu1 %v7559_v47  ;;  %v7213_v39 = vsel %vm15873_vm10, %v7208_v6, %v7212_v16  ;;  %v7222_v19 = vrot.slane %v7221_v49, 2  ;;  %v7226_v50 = vrot.slane %v7224_v59, 7  ;;  %v12304_v8 = vrot.slane %v12300_v31, 9  ;;  %v14175_v42 = vld [vmem:[%s16865_s9 + $0x130] sm:$0xff]   ;;  %v14177_v59 = vld [vmem:[%s16865_s9 + $0x178] sm:$0xff]  }
 0x52a   : > { %v7199_v58 = vsel %vm15873_vm10, %v7194_v63, %v7198_v33  ;;  %v7235_v14 = vor.u32 %v7234_v23, %v7231_v55  ;;  %v7430_v20 = vrot.slane %v7415_v27, 7  ;;  %v7240_v36 = vrot.slane %v7238_v4, 7  ;;  %v14179_v33 = vld [vmem:[%s16865_s9 + $0x138] sm:$0xff]  }
 0x52b   : > { %13235 = vmatpush3.bf16.msra.mxu1 %v14160_v40  ;;  %13217 = vmatpush3.bf16.msra.mxu0 %v14167_v56  ;;  %v7432_v41 = vcombine.low %v15848_v51, %v15852_v0  ;;  %v7629_v57 = vcombine.high %v7621_v43, %v7621_v43  ;;  %v7636_v30 = vrot.slane %v7621_v43, %v15796_v53  ;;  %v12327_v17 = vrot.slane %v16001_v46, 9  ;;  %v14192_v51 = vld [vmem:[%s16865_s9 + $0x280] sm:$0xff]  }
 0x52c   : > { %13236 = vmatprep.subr.bf16.mxu1 %v14162_v10  ;;  %13218 = vmatprep.subr.bf16.mxu0 %v14169_v11  ;;  %v7227_v2 = vsel %vm15873_vm10, %v7222_v19, %v7226_v50  ;;  %v7236_v32 = vrot.slane %v7235_v14, 2  ;;  %v7242_v5 = vcombine.low %v7199_v58, %v7213_v39  ;;  %v16022_v25 = vsel %vm15838_vm2, %v12304_v8, %v7430_v20  ;;  %v14172_v11 = vld [vmem:[%s16865_s9 + $0x1a8] sm:$0xff]   ;;  %v14174_v39 = vld [vmem:[%s16865_s9 + $0x1f0] sm:$0xff]   ;;  %v14185_v19 = vld [vmem:[%s16865_s9 + $0x240] sm:$0xff]  }
 0x52d   : > { %v7644_v26 = vcombine.high %v7636_v30, %v7636_v30  ;;  %v7645_v61 = vcombine.high %v7622_v15, %v7622_v15  ;;  %v7652_v18 = vrot.slane %v7622_v15, %v15796_v53  ;;  %v7433_v45 = vcombine.low %v15859_v9, %v16022_v25  ;;  %v14170_v9 = vld [vmem:[%s16865_s9 + $0x1e8] sm:$0xff]   ;;  %v12324_v8 = vld.sshfl [vmem:[#allocation2 + $0x20] sm:$0x12 pattern:$0x76325410] }
 0x52e   : > { %v7241_v44 = vsel %vm15873_vm10, %v7236_v32, %v7240_v36  ;;  %v7661_v22 = vcombine.high %v7623_v35, %v7623_v35  ;;  %v7668_v52 = vrot.slane %v7623_v35, %v15796_v53  ;;  %v7643_v24 = vrot.slane %v7629_v57, %v15796_v53  ;;  %v12326_v35 = vld.sshfl [vmem:[#allocation2 + $0x30] sm:$0x12 pattern:$0x76325410]  ;;  %v14187_v32 = vld [vmem:[%s16865_s9 + $0x200] sm:$0xff]  }
 0x52f   : > { %13237 = vmatpush3.bf16.msra.mxu1 %v14164_v48  ;;  %13219 = vmatpush3.bf16.msra.mxu0 %v14171_v1  ;;  %v7243_v54 = vcombine.low %v7227_v2, %v7241_v44  ;;  %v7677_v12 = vcombine.high %v7624_v28, %v7624_v28  ;;  %v7694_v38 = vshrl.u32 %v7644_v26, 16  ;;  %v7659_v31 = vrot.slane %v7645_v61, %v15796_v53  ;;  %v14176_v2 = vld [vmem:[%s16865_s9 + $0x1b0] sm:$0xff]  }
 0x530   : > { %13238 = vmatprep.subr.bf16.mxu1 %v14166_v3  ;;  %13220 = vmatprep.subr.bf16.mxu0 %v14173_v7  ;;  %v7660_v63 = vcombine.high %v7652_v18, %v7652_v18  ;;  %v7676_v16 = vcombine.high %v7668_v52, %v7668_v52  ;;  %v7697_v37 = vshll.u32 %v7644_v26, 16  ;;  %v7250_v62 = vrot.slane %v7242_v5, %v15796_v53  ;;  %v14178_v18 = vld [vmem:[%s16865_s9 + $0x1f8] sm:$0xff]  }
 0x531   : > { %v7257_v47 = vrot.slane %v7243_v54, %v15796_v53  ;;  %v7675_v40 = vrot.slane %v7661_v22, %v15796_v53  ;;  %v7684_v10 = vrot.slane %v7624_v28, %v15796_v53  ;;  %v16050_v56 = vrot.slane %v7433_v45, %v15796_v53 }
 0x532   : > { %v7696_v6 = vrot.slane %v7694_v38, 6  ;;  %v7699_v49 = vrot.slane %v7697_v37, 7  ;;  %v7708_v4 = vshrl.u32 %v7660_v63, 16  ;;  %v7691_v55 = vrot.slane %v7677_v12, %v15796_v53 }
 0x533   : > { %13239 = vmatpush3.bf16.msra.mxu1 %v14168_v29  ;;  %13221 = vmatpush3.bf16.msra.mxu0 %v14175_v42  ;;  %v7692_v23 = vcombine.high %v7684_v10, %v7684_v10  ;;  %v7703_v27 = vshll.u32 %v7643_v24, 16  ;;  %v7711_v43 = vshll.u32 %v7660_v63, 16  ;;  %v7717_v58 = vshll.u32 %v7659_v31, 16  ;;  %v14193_v29 = vld [vmem:[%s16865_s9 + $0x248] sm:$0xff]  }
 0x534   : > { %13240 = vmatprep.subr.bf16.mxu1 %v14170_v9  ;;  %13222 = vmatprep.subr.bf16.mxu0 %v14177_v59  ;;  %v7700_v50 = vor.u32 %v7699_v49, %v7696_v6  ;;  %v7710_v15 = vrot.slane %v7708_v4, 6  ;;  %v7722_v14 = vshrl.u32 %v7676_v16, 16  ;;  %v7258_v20 = vcombine.low %v7250_v62, %v7257_v47  ;;  %v16081_v63 = vld.sshfl [vmem:[#allocation2 + $0x18] sm:$0x13 pattern:$0x76325410] }
 0x535   : > { %v7713_v48 = vrot.slane %v7711_v43, 7  ;;  %v7725_v1 = vshll.u32 %v7676_v16, 16  ;;  %v7731_v36 = vshll.u32 %v7675_v40, 16  ;;  %v7736_v3 = vshrl.u32 %v7692_v23, 16  ;;  %v14180_v16 = vld [vmem:[%s16865_s9 + $0x1b8] sm:$0xff]   ;;  %v14195_v10 = vld [vmem:[%s16865_s9 + $0x208] sm:$0xff]  }
 0x536   : > { %v7701_v57 = vrot.slane %v7700_v50, 2  ;;  %v7724_v30 = vrot.slane %v7722_v14, 6  ;;  %v7739_v7 = vshll.u32 %v7692_v23, 16  ;;  %v7705_v5 = vrot.slane %v7703_v27, 7  ;;  %v14186_v6 = vld [vmem:[%s16865_s9 + $0x2c0] sm:$0xff]  }
 0x537   : > { %13241 = vmatpush3.bf16.msra.mxu1 %v14172_v11  ;;  %13223 = vmatpush3.bf16.msra.mxu0 %v14179_v33  ;;  %v7714_v28 = vor.u32 %v7713_v48, %v7710_v15  ;;  %v7727_v26 = vrot.slane %v7725_v1, 7  ;;  %v7745_v61 = vshll.u32 %v7691_v55, 16  ;;  %v7719_v44 = vrot.slane %v7717_v58, 7  ;;  %v14197_v55 = vld [vmem:[%s16865_s9 + $0x250] sm:$0xff]   ;;  %v14194_v48 = vld [vmem:[%s16865_s9 + $0x2c8] sm:$0xff]  }
 0x538   : > { %13242 = vmatprep.subr.bf16.mxu1 %v14174_v39  ;;  %13252 = vmatprep.subr.bf16.mxu0 %v14185_v19  ;;  %v7738_v45 = vrot.slane %v7736_v3, 6  ;;  %v7741_v22 = vrot.slane %v7739_v7, 7  ;;  %v7899_v52 = vcombine.high %v16001_v46, %v16001_v46  ;;  %v7733_v24 = vrot.slane %v7731_v36, 7  ;;  %v14199_v58 = vld [vmem:[%s16865_s9 + $0x210] sm:$0xff]   ;;  %v14196_v3 = vld [vmem:[%s16865_s9 + $0x288] sm:$0xff]   ;;  %v14203_v7 = vld [vmem:[%s16865_s9 + $0x218] sm:$0xff]  }
 0x539   : > { %v7715_v42 = vrot.slane %v7714_v28, 2  ;;  %v7728_v54 = vor.u32 %v7727_v26, %v7724_v30  ;;  %v7907_v12 = vcombine.high %v12324_v8, %v12324_v8  ;;  %v7706_v38 = vsel %vm15873_vm10, %v7701_v57, %v7705_v5  ;;  %v12322_v14 = vld.sshfl [vmem:[#allocation2 + $0x30] sm:$0x13 pattern:$0x76325410]  ;;  %v14205_v5 = vld [vmem:[%s16865_s9 + $0x260] sm:$0xff]  }
 0x53a   : > { %11039 = vmatmul.mubr.bf16.vlgmr.msra.gmra.mrb[116].mxu0 %v7258_v20  ;;  %v7742_v9 = vor.u32 %v7741_v22, %v7738_v45  ;;  %v7923_v59 = vcombine.high %v12326_v35, %v12326_v35  ;;  %v7926_v31 = vrot.slane %v7899_v52, 7  ;;  %v7747_v62 = vrot.slane %v7745_v61, 7  ;;  %v16147_v28 = vld.sshfl [vmem:[#allocation2 + $0x18] sm:$0x30 pattern:$0x76325410] }
 0x53b   : > { %13243 = vmatpush3.bf16.msra.mxu1 %v14176_v2  ;;  %13253 = vmatpush3.bf16.msra.mxu0 %v14187_v32  ;;  %v7729_v37 = vrot.slane %v7728_v54, 2  ;;  %v12328_v47 = vrot.slane %v12324_v8, 9  ;;  %v7930_v40 = vrot.slane %v7907_v12, 7  ;;  %v7720_v49 = vsel %vm15873_vm10, %v7715_v42, %v7719_v44  ;;  %v14198_v32 = vld [vmem:[%s16865_s9 + $0x2d0] sm:$0xff]  }
 0x53c   : > { %13244 = vmatprep.subr.bf16.mxu1 %v14178_v18  ;;  %v7743_v4 = vrot.slane %v7742_v9, 2  ;;  %v12330_v11 = vrot.slane %v12326_v35, 9  ;;  %v7938_v33 = vrot.slane %v7923_v59, 7  ;;  %13254 = vmatprep.subr.bf16.mxu0 %v14193_v29  ;;  %v7440_v23 = vrot.slane %v7432_v41, %v15796_v53  ;;  %v14200_v9 = vld [vmem:[%s16865_s9 + $0x290] sm:$0xff]   ;;  %v14207_v59 = vld [vmem:[%s16865_s9 + $0x220] sm:$0xff]  }
 0x53d   : > { %v7749_v27 = vcombine.low %v7706_v38, %v7720_v49  ;;  %v7927_v43 = vsel %vm15838_vm2, %v12327_v17, %v7926_v31  ;;  %v7931_v39 = vsel %vm15838_vm2, %v12328_v47, %v7930_v40  ;;  %v7734_v19 = vsel %vm15873_vm10, %v7729_v37, %v7733_v24  ;;  %v12320_v41 = vld.sshfl [vmem:[#allocation2 + $0x20] sm:$0x13 pattern:$0x76325410] }
 0x53e   : > { %v7748_v50 = vsel %vm15873_vm10, %v7743_v4, %v7747_v62  ;;  %v7939_v0 = vsel %vm15838_vm2, %v12330_v11, %v7938_v33  ;;  %v7940_v46 = vcombine.low %v7927_v43, %v7931_v39  ;;  %v7810_v8 = vshrl.u32 %v16081_v63, 16  ;;  %v12313_v2 = vld.sshfl [vmem:[#allocation2 + $0x10] sm:$0x30 pattern:$0x76325410]  ;;  %v14202_v62 = vld [vmem:[%s16865_s9 + $0x2d8] sm:$0xff]  }
 0x53f   : > { %13245 = vmatpush3.bf16.msra.mxu1 %v14180_v16  ;;  %v7750_v17 = vcombine.low %v7734_v19, %v7748_v50  ;;  %v7941_v15 = vcombine.low %v16022_v25, %v7939_v0  ;;  %13255 = vmatpush3.bf16.msra.mxu0 %v14195_v10  ;;  %v7448_v20 = vcombine.low %v7440_v23, %v16050_v56  ;;  %v14201_v25 = vld [vmem:[%s16865_s9 + $0x258] sm:$0xff]   ;;  %v7813_v36 = vshll.u32 %v16081_v63, 16  ;;  %v16149_v52 = vld.sshfl [vmem:[#allocation2 + $0x28] sm:$0x30 pattern:$0x76325410] }
 0x540   : > { %13274 = vmatprep.subr.bf16.mxu1 %v14186_v6  ;;  %13256 = vmatprep.subr.bf16.mxu0 %v14197_v55  ;;  %v7784_v1 = vcombine.high %v16081_v63, %v16081_v63  ;;  %v7757_v35 = vrot.slane %v7749_v27, %v15796_v53  ;;  %v7948_v56 = vrot.slane %v7940_v46, %v15796_v53  ;;  %v7812_v18 = vrot.slane %v7810_v8, 6  ;;  %v12346_v38 = vld.sshfl [vmem:[#allocation2 + $0x28] sm:$0x13 pattern:$0x76325410]  ;;  %v14204_v8 = vld [vmem:[%s16865_s9 + $0x298] sm:$0xff]  }
 0x541   : > { %v7764_v57 = vrot.slane %v7750_v17, %v15796_v53  ;;  %v7955_v30 = vrot.slane %v7941_v15, %v15796_v53  ;;  %v7792_v26 = vcombine.high %v12320_v41, %v12320_v41  ;;  %v7808_v61 = vcombine.high %v12322_v14, %v12322_v14  ;;  %v16163_v47 = vld.sshfl [vmem:[#allocation2 + $0x20] sm:$0x30 pattern:$0x76325410]  ;;  %v14209_v55 = vld [vmem:[%s16865_s9 + $0x268] sm:$0xff]  }
 0x542   : > { %11080 = vmatmul.mubr.bf16.vlgmr.msra.gmra.mrb[116].mxu1 %v7448_v20  ;;  %v7815_v44 = vrot.slane %v7813_v36, 7  ;;  %v7824_v29 = vshrl.u32 %v12320_v41, 16  ;;  %v7827_v42 = vshll.u32 %v12320_v41, 16  ;;  %v12317_v54 = vcombine.high %v12313_v2, %v16147_v28  ;;  %v14211_v20 = vld [vmem:[%s16865_s9 + $0x228] sm:$0xff]  }
 0x543   : > { %v7765_v45 = vcombine.low %v7757_v35, %v7764_v57  ;;  %13275 = vmatpush3.bf16.msra.mxu1 %v14192_v51  ;;  %v7956_v22 = vcombine.low %v7948_v56, %v7955_v30  ;;  %13257 = vmatpush3.bf16.msra.mxu0 %v14199_v58  ;;  %v16152_v24 = vshll.u32 %v7784_v1, 16  ;;  %v7852_v12 = vshrl.u32 %v12322_v14, 16  ;;  %v12342_v11 = vld.sshfl [vmem:[#allocation2 + $0x30] sm:$0x30 pattern:$0x76325410] }
 0x544   : > { %13276 = vmatprep.subr.bf16.mxu1 %v14194_v48  ;;  %13258 = vmatprep.subr.bf16.mxu0 %v14201_v25  ;;  %v7816_v31 = vor.u32 %v7815_v44, %v7812_v18  ;;  %v7826_v63 = vrot.slane %v7824_v29, 6  ;;  %v7829_v16 = vrot.slane %v7827_v42, 7  ;;  %v7855_v37 = vshll.u32 %v12322_v14, 16  ;;  %v14206_v35 = vld [vmem:[%s16865_s9 + $0x2e0] sm:$0xff]   ;;  %v14213_v57 = vld [vmem:[%s16865_s9 + $0x270] sm:$0xff]   ;;  %v14210_v29 = vld [vmem:[%s16865_s9 + $0x2e8] sm:$0xff]  }
 0x545   : > { %11120 = vmatprep.mubr.bf16.mxu0 %v7765_v45  ;;  %11161 = vmatprep.mubr.bf16.mxu1 %v7956_v22  ;;  %v7833_v40 = vshll.u32 %v7792_v26, 16  ;;  %v7854_v10 = vrot.slane %v7852_v12, 6  ;;  %v7861_v4 = vshll.u32 %v7808_v61, 16  ;;  %v12318_v23 = vcombine.high %v16163_v47, %v16149_v52  ;;  %v14208_v61 = vld [vmem:[%s16865_s9 + $0x2a0] sm:$0xff]  }
 0x546   : > { %v7830_v6 = vor.u32 %v7829_v16, %v7826_v63  ;;  %v7857_v49 = vrot.slane %v7855_v37, 7  ;;  %v12348_v33 = vld.sshfl [vmem:[#allocation2 + $0x38] sm:$0x13 pattern:$0x76325410]  ;;  %v16171_v27 = vrot.slane %v12317_v54, %v15796_v53  ;;  %v8300_v43 = vcombine.high %v12346_v38, %v12346_v38 }
 0x547   : > { %13277 = vmatpush3.bf16.msra.mxu1 %v14196_v3  ;;  %13259 = vmatpush3.bf16.msra.mxu0 %v14203_v7  ;;  %v8332_v39 = vshrl.u32 %v12346_v38, 16  ;;  %v16173_v19 = vld.sshfl [vmem:[#allocation2 + $0x18] sm:$0x32 pattern:$0x76325410]  ;;  %v7817_v50 = vrot.slane %v7816_v31, 2  ;;  %v8316_v1 = vcombine.high %v12348_v33, %v12348_v33  ;;  %v12344_v56 = vcombine.high %v16149_v52, %v12342_v11 }
 0x548   : > { %13278 = vmatprep.subr.bf16.mxu1 %v14198_v32  ;;  %13260 = vmatprep.subr.bf16.mxu0 %v14205_v5  ;;  %v7821_v51 = vrot.slane %v16152_v24, 7  ;;  %v7831_v0 = vrot.slane %v7830_v6, 2  ;;  %v7858_v46 = vor.u32 %v7857_v49, %v7854_v10  ;;  %v16176_v41 = vld.sshfl [vmem:[#allocation2 + $0x20] sm:$0x32 pattern:$0x76325410]  ;;  %v16201_v26 = vcombine.high %v16173_v19, %v16173_v19 }
 0x549   : > { %v7835_v17 = vrot.slane %v7833_v40, 7  ;;  %v8334_v15 = vrot.slane %v8332_v39, 6  ;;  %v8335_v58 = vshll.u32 %v12346_v38, 16  ;;  %v8360_v14 = vshrl.u32 %v12348_v33, 16  ;;  %v14212_v6 = vld [vmem:[%s16865_s9 + $0x2a8] sm:$0xff]   ;;  %v14219_v49 = vld [vmem:[%s16865_s9 + $0x238] sm:$0xff]  }
 0x54a   : > { %v7859_v48 = vrot.slane %v7858_v46, 2  ;;  %v7863_v25 = vrot.slane %v7861_v4, 7  ;;  %v8363_v36 = vshll.u32 %v12348_v33, 16  ;;  %v8341_v3 = vshll.u32 %v8300_v43, 16 }
 0x54b   : > { %13279 = vmatpush3.bf16.msra.mxu1 %v14200_v9  ;;  %13261 = vmatpush3.bf16.msra.mxu0 %v14207_v59  ;;  %v8337_v30 = vrot.slane %v8335_v58, 7  ;;  %v8362_v7 = vrot.slane %v8360_v14, 6  ;;  %v16193_v2 = vsel %vm15873_vm10, %v7831_v0, %v7835_v17  ;;  %v12343_v44 = vcombine.high %v16147_v28, %v16163_v47  ;;  %v16210_v22 = vld.sshfl [vmem:[#allocation2 + $0x28] sm:$0x32 pattern:$0x76325410] }
 0x54c   : > { %13280 = vmatprep.subr.bf16.mxu1 %v14202_v62  ;;  %13262 = vmatprep.subr.bf16.mxu0 %v14209_v55  ;;  %v16197_v32 = vsel %vm15873_vm10, %v7859_v48, %v7863_v25  ;;  %v8365_v5 = vrot.slane %v8363_v36, 7  ;;  %v16214_v52 = vcombine.high %v16176_v41, %v16176_v41  ;;  %v14217_v28 = vld [vmem:[%s16865_s9 + $0x278] sm:$0xff]   ;;  %v16226_v42 = vrot.slane %v12318_v23, %v15796_v53  ;;  %v16234_v31 = vld.sshfl [vmem:[#allocation2 + $0x30] sm:$0x32 pattern:$0x76325410] }
 0x54d   : > { %v7866_v18 = vcombine.low %v15946_v13, %v16197_v32  ;;  %v8338_v45 = vor.u32 %v8337_v30, %v8334_v15  ;;  %v14215_v13 = vld [vmem:[%s16865_s9 + $0x230] sm:$0xff]   ;;  %v7822_v54 = vsel %vm15873_vm10, %v7817_v50, %v7821_v51  ;;  %v8369_v12 = vshll.u32 %v8316_v1, 16  ;;  %v8129_v25 = vld [vmem:[#allocation2 + $0x18] sm:$0x1c] }
 0x54e   : > { %v8366_v24 = vor.u32 %v8365_v5, %v8362_v7  ;;  %v7865_v38 = vcombine.low %v7822_v54, %v16193_v2  ;;  %v16232_v9 = vrot.slane %v12344_v56, %v15796_v53  ;;  %v8005_v63 = vshrl.u32 %v16201_v26, 16  ;;  %v14214_v23 = vld [vmem:[%s16865_s9 + $0x2f0] sm:$0xff]   ;;  %v16286_v56 = vld [vmem:[#allocation2 + $0x20] sm:$0x1c]  ;;  %v14218_v30 = vld [vmem:[%s16865_s9 + $0x2f8] sm:$0xff]  }
 0x54f   : > { %13281 = vmatpush3.bf16.msra.mxu1 %v14204_v8  ;;  %13263 = vmatpush3.bf16.msra.mxu0 %v14211_v20  ;;  %v8339_v59 = vrot.slane %v8338_v45, 2  ;;  %v8343_v16 = vrot.slane %v8341_v3, 7  ;;  %v7990_v62 = vcombine.high %v16210_v22, %v16210_v22  ;;  %v8018_v47 = vshrl.u32 %v16214_v52, 16  ;;  %v14216_v58 = vld [vmem:[%s16865_s9 + $0x2b0] sm:$0xff]   ;;  %v14223_v8 = vld [vmem:[%s16865_s9 + $0x300] sm:$0xff]  }
 0x550   : > { %13282 = vmatprep.subr.bf16.mxu1 %v14206_v35  ;;  %13264 = vmatprep.subr.bf16.mxu0 %v14213_v57  ;;  %v8367_v37 = vrot.slane %v8366_v24, 2  ;;  %v16241_v40 = vrot.slane %v7866_v18, %v15796_v53  ;;  %v16244_v10 = vrot.slane %v12343_v44, %v15796_v53  ;;  %v7618_v4 = vcombine.low %v16171_v27, %v16226_v42  ;;  %v14221_v27 = vld [vmem:[%s16865_s9 + $0x340] sm:$0xff]   ;;  %v14227_v42 = vld [vmem:[%s16865_s9 + $0x308] sm:$0xff]  }
 0x551   : > { %v8344_v11 = vsel %vm15873_vm10, %v8339_v59, %v8343_v16  ;;  %v8371_v33 = vrot.slane %v8369_v12, 7  ;;  %v7998_v55 = vcombine.high %v16234_v31, %v16234_v31  ;;  %v16262_v43 = vrot.slane %v7865_v38, %v15796_v53  ;;  %v8132_v38 = vld [vmem:[#allocation2 + $0x30] sm:$0x1c] }
 0x552   : > { %v8126_v39 = vcombine.low %v16244_v10, %v16232_v9  ;;  %v8000_v50 = vshrl.u32 %v16173_v19, 16  ;;  %v8007_v51 = vrot.slane %v8005_v63, 7  ;;  %v8008_v46 = vshll.u32 %v16201_v26, 16  ;;  %v14222_v9 = vld [vmem:[%s16865_s9 + $0x3c0] sm:$0xff]   ;;  %v14229_v59 = vld [vmem:[%s16865_s9 + $0x350] sm:$0xff]  }
 0x553   : > { %13283 = vmatpush3.bf16.msra.mxu1 %v14208_v61  ;;  %13265 = vmatpush3.bf16.msra.mxu0 %v14215_v13  ;;  %v8372_v0 = vsel %vm15873_vm10, %v8367_v37, %v8371_v33  ;;  %v8020_v17 = vrot.slane %v8018_v47, 7  ;;  %v8031_v15 = vshrl.u32 %v7990_v62, 16  ;;  %v7881_v14 = vcombine.low %v16262_v43, %v16241_v40  ;;  %v14220_v13 = vld [vmem:[%s16865_s9 + $0x2b8] sm:$0xff]   ;;  %v14230_v40 = vld [vmem:[%s16865_s9 + $0x3d0] sm:$0xff]  }
 0x554   : > { %13284 = vmatprep.subr.bf16.mxu1 %v14210_v29  ;;  %13266 = vmatprep.subr.bf16.mxu0 %v14217_v28  ;;  %v8373_v19 = vcombine.low %v16193_v2, %v8344_v11  ;;  %v8374_v20 = vcombine.low %v16197_v32, %v8372_v0  ;;  %v8013_v48 = vshrl.u32 %v16176_v41, 16  ;;  %v8021_v1 = vshll.u32 %v16214_v52, 16  ;;  %v14225_v32 = vld [vmem:[%s16865_s9 + $0x348] sm:$0xff]   ;;  %v14235_v43 = vld [vmem:[%s16865_s9 + $0x318] sm:$0xff]  }
 0x555   : > { %v8033_v36 = vrot.slane %v8031_v15, 7  ;;  %v8039_v35 = vshrl.u32 %v16234_v31, 16  ;;  %v8044_v57 = vshrl.u32 %v7998_v55, 16  ;;  %v16291_v3 = vrot.slane %v8000_v50, 9  ;;  %v16301_v52 = vld [vmem:[#allocation2 + $0x28] sm:$0x1c] }
 0x556   : > { %v16293_v41 = vor.u32 %v8008_v46, %v8007_v51  ;;  %v8026_v7 = vshrl.u32 %v16210_v22, 16  ;;  %v8034_v2 = vshll.u32 %v7990_v62, 16  ;;  %v8023_v5 = vor.u32 %v8021_v1, %v8020_v17  ;;  %v12360_v51 = vld.sshfl [vmem:[#allocation2 + $0x38] sm:$0x32 pattern:$0x76325410] }
 0x557   : > { %13285 = vmatpush3.bf16.msra.mxu1 %v14212_v6  ;;  %13267 = vmatpush3.bf16.msra.mxu0 %v14219_v49  ;;  %v8046_v26 = vrot.slane %v8044_v57, 7  ;;  %v8047_v61 = vshll.u32 %v7998_v55, 16  ;;  %v8144_v18 = vrot.slane %v8129_v25, %v15796_v53  ;;  %v8381_v44 = vrot.slane %v8373_v19, %v15796_v53  ;;  %v14224_v55 = vld [vmem:[%s16865_s9 + $0x380] sm:$0xff]   ;;  %v14226_v0 = vld [vmem:[%s16865_s9 + $0x3c8] sm:$0xff]   ;;  %v14231_v46 = vld [vmem:[%s16865_s9 + $0x310] sm:$0xff]  }
 0x558   : > { %13286 = vmatprep.subr.bf16.mxu1 %v14214_v23  ;;  %13296 = vmatprep.subr.bf16.mxu0 %v14221_v27  ;;  %v12336_v45 = vrot.slane %v8013_v48, 9  ;;  %v8137_v29 = vcombine.high %v8129_v25, %v8129_v25  ;;  %v8160_v22 = vrot.slane %v16286_v56, %v15796_v53  ;;  %v8388_v28 = vrot.slane %v8374_v20, %v15796_v53  ;;  %v14233_v20 = vld [vmem:[%s16865_s9 + $0x358] sm:$0xff]  }
 0x559   : > { %v8036_v54 = vor.u32 %v8034_v2, %v8033_v36  ;;  %v12338_v24 = vrot.slane %v8039_v35, 9  ;;  %v8049_v12 = vor.u32 %v8047_v61, %v8046_v26  ;;  %v8011_v31 = vsel %vm15898_vm13, %v16291_v3, %v16293_v41  ;;  %v14237_v61 = vld [vmem:[%s16865_s9 + $0x360] sm:$0xff]  }
 0x55a   : > { %11121 = vmatmul.mubr.bf16.vlgmr.msra.gmra.mrb[120].mxu0 %v7618_v4  ;;  %v12337_v63 = vrot.slane %v8026_v7, 9  ;;  %v8152_v16 = vcombine.high %v8144_v18, %v8144_v18  ;;  %v8168_v37 = vcombine.high %v8160_v22, %v8160_v22  ;;  %v16324_v62 = vsel %vm15898_vm13, %v12336_v45, %v8023_v5 }
 0x55b   : > { %13287 = vmatpush3.bf16.msra.mxu1 %v14216_v58  ;;  %13297 = vmatpush3.bf16.msra.mxu0 %v14223_v8  ;;  %v16328_v47 = vsel %vm15898_vm13, %v12338_v24, %v8049_v12  ;;  %v8153_v10 = vcombine.high %v16286_v56, %v16286_v56  ;;  %v8176_v6 = vrot.slane %v16301_v52, %v15796_v53  ;;  %v8547_v56 = vshrl.u32 %v12360_v51, 16 }
 0x55c   : > { %13288 = vmatprep.subr.bf16.mxu1 %v14218_v30  ;;  %11202 = vmatprep.mubr.bf16.mxu0 %v8126_v39  ;;  %v16335_v49 = vrot.slane %v8137_v29, %v15796_v53  ;;  %v8192_v4 = vrot.slane %v8132_v38, %v15796_v53  ;;  %v8202_v11 = vshrl.u32 %v8152_v16, 16  ;;  %v8205_v33 = vshll.u32 %v8152_v16, 16  ;;  %v14228_v30 = vld [vmem:[%s16865_s9 + $0x388] sm:$0xff]  }
 0x55d   : > { %13298 = vmatprep.subr.bf16.mxu0 %v14225_v32  ;;  %v16343_v23 = vsel %vm15898_vm13, %v12337_v63, %v8036_v54  ;;  %v8169_v27 = vcombine.high %v16301_v52, %v16301_v52  ;;  %v8184_v39 = vcombine.high %v8176_v6, %v8176_v6  ;;  %v8216_v50 = vshrl.u32 %v8168_v37, 16  ;;  %v14234_v54 = vld [vmem:[%s16865_s9 + $0x3d8] sm:$0xff]   ;;  %v14241_v6 = vld [vmem:[%s16865_s9 + $0x368] sm:$0xff]  }
 0x55e   : > { %v8052_v17 = vcombine.low %v16343_v23, %v16328_v47  ;;  %v8200_v15 = vcombine.high %v8192_v4, %v8192_v4  ;;  %v8204_v58 = vrot.slane %v8202_v11, 6  ;;  %v8207_v8 = vrot.slane %v8205_v33, 7 }
 0x55f   : > { %13289 = vmatpush3.bf16.msra.mxu1 %v14220_v13  ;;  %13299 = vmatpush3.bf16.msra.mxu0 %v14227_v42  ;;  %v8389_v19 = vcombine.low %v8381_v44, %v8388_v28  ;;  %v8167_v48 = vrot.slane %v8153_v10, %v15796_v53  ;;  %v8185_v25 = vcombine.high %v8132_v38, %v8132_v38  ;;  %v8219_v1 = vshll.u32 %v8168_v37, 16  ;;  %v8637_v28 = vld [vmem:[#allocation2 + $0x20] sm:$0x1c]  ;;  %v14232_v42 = vld [vmem:[%s16865_s9 + $0x390] sm:$0xff]   ;;  %v8638_v10 = vld [vmem:[#allocation2 + $0x28] sm:$0x1c] }
 0x560   : > { %13318 = vmatprep.subr.bf16.mxu1 %v14222_v9  ;;  %13300 = vmatprep.subr.bf16.mxu0 %v14229_v59  ;;  %v8051_v36 = vcombine.low %v8011_v31, %v16324_v62  ;;  %v8218_v35 = vrot.slane %v8216_v50, 6  ;;  %v8230_v57 = vshrl.u32 %v8184_v39, 16  ;;  %v8208_v3 = vor.u32 %v8207_v8, %v8204_v58  ;;  %v14239_v59 = vld [vmem:[%s16865_s9 + $0x320] sm:$0xff]   ;;  %v8639_v50 = vld [vmem:[#allocation2 + $0x30] sm:$0x1c] }
 0x561   : > { %v8221_v41 = vrot.slane %v8219_v1, 7  ;;  %v8233_v7 = vshll.u32 %v8184_v39, 16  ;;  %v8244_v2 = vshrl.u32 %v8200_v15, 16  ;;  %v8183_v32 = vrot.slane %v8169_v27, %v15796_v53 }
 0x562   : > { %11162 = vmatmul.mubr.bf16.vlgmr.msra.gmra.mrb[120].mxu1 %v7881_v14  ;;  %v8066_v14 = vrot.slane %v8052_v17, %v15796_v53  ;;  %v8211_v5 = vshll.u32 %v16335_v49, 16  ;;  %v8247_v26 = vshll.u32 %v8200_v15, 16  ;;  %v8199_v18 = vrot.slane %v8185_v25, %v15796_v53  ;;  %v8640_v15 = vld [vmem:[#allocation2 + $0x38] sm:$0x1c] }
 0x563   : > { %13319 = vmatpush3.bf16.msra.mxu1 %v14224_v55  ;;  %11243 = vmatprep.mubr.bf16.mxu1 %v8389_v19  ;;  %v8225_v44 = vshll.u32 %v8167_v48, 16  ;;  %v8506_v45 = vcombine.high %v12360_v51, %v12360_v51  ;;  %v8059_v52 = vrot.slane %v8051_v36, %v15796_v53  ;;  %v8222_v29 = vor.u32 %v8221_v41, %v8218_v35  ;;  %v14238_v19 = vld [vmem:[%s16865_s9 + $0x3e0] sm:$0xff]   ;;  %v14245_v35 = vld [vmem:[%s16865_s9 + $0x370] sm:$0xff]  }
 0x564   : > { %13320 = vmatprep.subr.bf16.mxu1 %v14226_v0  ;;  %13301 = vmatpush3.bf16.msra.mxu0 %v14231_v46  ;;  %v8246_v22 = vrot.slane %v8244_v2, 6  ;;  %v8249_v13 = vrot.slane %v8247_v26, 7  ;;  %v16386_v24 = vrot.slane %v8208_v3, 2  ;;  %v8232_v12 = vrot.slane %v8230_v57, 6  ;;  %v14236_v0 = vld [vmem:[%s16865_s9 + $0x398] sm:$0xff]  }
 0x565   : > { %13302 = vmatprep.subr.bf16.mxu0 %v14233_v20  ;;  %v8235_v38 = vrot.slane %v8233_v7, 7  ;;  %v8552_v9 = vshrl.u32 %v8506_v45, 16  ;;  %v16391_v31 = vcombine.low %v8059_v52, %v8066_v14  ;;  %v16393_v63 = vrot.slane %v8211_v5, 7  ;;  %v14243_v20 = vld [vmem:[%s16865_s9 + $0x328] sm:$0xff]  }
 0x566   : > { %v8239_v16 = vshll.u32 %v8183_v32, 16  ;;  %v12364_v37 = vrot.slane %v8547_v56, 9  ;;  %v16398_v49 = vrot.slane %v8225_v44, 7  ;;  %v8253_v4 = vshll.u32 %v8199_v18, 16  ;;  %v14247_v18 = vld [vmem:[%s16865_s9 + $0x330] sm:$0xff]  }
 0x567   : > { %13321 = vmatpush3.bf16.msra.mxu1 %v14228_v30  ;;  %v8554_v11 = vrot.slane %v8552_v9, 7  ;;  %v8652_v33 = vrot.slane %v8637_v28, %v15796_v53  ;;  %v16401_v55 = vrot.slane %v8222_v29, 2  ;;  %v8250_v27 = vor.u32 %v8249_v13, %v8246_v22  ;;  %v14249_v22 = vld [vmem:[%s16865_s9 + $0x378] sm:$0xff]  }
 0x568   : > { %13322 = vmatprep.subr.bf16.mxu1 %v14230_v40  ;;  %13303 = vmatpush3.bf16.msra.mxu0 %v14235_v43  ;;  %v8555_v39 = vshll.u32 %v8506_v45, 16  ;;  %v8645_v51 = vcombine.high %v8637_v28, %v8637_v28  ;;  %v8214_v46 = vsel %vm15873_vm10, %v16386_v24, %v16393_v63  ;;  %v8236_v17 = vor.u32 %v8235_v38, %v8232_v12  ;;  %v14240_v43 = vld [vmem:[%s16865_s9 + $0x3a0] sm:$0xff]  }
 0x569   : > { %13304 = vmatprep.subr.bf16.mxu0 %v14237_v61  ;;  %v8660_v58 = vcombine.high %v8652_v33, %v8652_v33  ;;  %v8668_v8 = vrot.slane %v8638_v10, %v15796_v53  ;;  %v16417_v48 = vrot.slane %v8239_v16, 7  ;;  %v8559_v1 = vcombine.low %v16324_v62, %v16343_v23  ;;  %v14242_v61 = vld [vmem:[%s16865_s9 + $0x3e8] sm:$0xff]  }
 0x56a   : > { %v8557_v25 = vor.u32 %v8555_v39, %v8554_v11  ;;  %v8661_v36 = vcombine.high %v8638_v10, %v8638_v10  ;;  %v16424_v57 = vrot.slane %v8253_v4, 7  ;;  %v8677_v30 = vcombine.high %v8639_v50, %v8639_v50  ;;  %v14244_v16 = vld [vmem:[%s16865_s9 + $0x3a8] sm:$0xff]   ;;  %v14246_v11 = vld [vmem:[%s16865_s9 + $0x3f0] sm:$0xff]  }
 0x56b   : > { %13323 = vmatpush3.bf16.msra.mxu1 %v14232_v42  ;;  %v8676_v56 = vcombine.high %v8668_v8, %v8668_v8  ;;  %v8684_v3 = vrot.slane %v8639_v50, %v15796_v53  ;;  %v8228_v41 = vsel %vm15873_vm10, %v16401_v55, %v16398_v49  ;;  %v8251_v7 = vrot.slane %v8250_v27, 2 }
 0x56c   : > { %13324 = vmatprep.subr.bf16.mxu1 %v14234_v54  ;;  %13305 = vmatpush3.bf16.msra.mxu0 %v14239_v59  ;;  %v16432_v2 = vrot.slane %v8645_v51, %v15796_v53  ;;  %v8700_v40 = vrot.slane %v8640_v15, %v15796_v53  ;;  %v8693_v32 = vcombine.high %v8640_v15, %v8640_v15  ;;  %v8710_v5 = vshrl.u32 %v8660_v58, 16  ;;  %v14257_v51 = vld [vmem:[%s16865_s9 + $0x440] sm:$0xff]  }
 0x56d   : > { %13306 = vmatprep.subr.bf16.mxu0 %v14241_v6  ;;  %v8692_v14 = vcombine.high %v8684_v3, %v8684_v3  ;;  %v8713_v26 = vshll.u32 %v8660_v58, 16  ;;  %v8237_v44 = vrot.slane %v8236_v17, 2  ;;  %v16446_v45 = vsel %vm15898_vm13, %v12364_v37, %v8557_v25  ;;  %v14250_v3 = vld [vmem:[%s16865_s9 + $0x3f8] sm:$0xff]  }
 0x56e   : > { %v8675_v52 = vrot.slane %v8661_v36, %v15796_v53  ;;  %v8708_v29 = vcombine.high %v8700_v40, %v8700_v40  ;;  %v8691_v13 = vrot.slane %v8677_v30, %v15796_v53  ;;  %v8712_v28 = vrot.slane %v8710_v5, 6  ;;  %v14248_v36 = vld [vmem:[%s16865_s9 + $0x3b0] sm:$0xff]  }
 0x56f   : > { %13325 = vmatpush3.bf16.msra.mxu1 %v14236_v0  ;;  %v8715_v42 = vrot.slane %v8713_v26, 7  ;;  %v8724_v54 = vshrl.u32 %v8676_v56, 16  ;;  %v8256_v12 = vsel %vm15873_vm10, %v8251_v7, %v16424_v57  ;;  %v8560_v38 = vcombine.low %v16328_v47, %v16446_v45  ;;  %v14251_v47 = vld [vmem:[%s16865_s9 + $0x338] sm:$0xff]   ;;  %v14259_v7 = vld [vmem:[%s16865_s9 + $0x400] sm:$0xff]  }
 0x570   : > { %13326 = vmatprep.subr.bf16.mxu1 %v14238_v19  ;;  %13307 = vmatpush3.bf16.msra.mxu0 %v14243_v20  ;;  %v8727_v9 = vshll.u32 %v8676_v56, 16  ;;  %v8738_v59 = vshrl.u32 %v8692_v14, 16  ;;  %v8707_v37 = vrot.slane %v8693_v32, %v15796_v53  ;;  %v8741_v4 = vshll.u32 %v8692_v14, 16 }
 0x571   : > { %13308 = vmatprep.subr.bf16.mxu0 %v14245_v35  ;;  %v8716_v10 = vor.u32 %v8715_v42, %v8712_v28  ;;  %v8726_v6 = vrot.slane %v8724_v54, 6  ;;  %v8733_v27 = vshll.u32 %v8675_v52, 16  ;;  %v8752_v50 = vshrl.u32 %v8708_v29, 16  ;;  %v14260_v28 = vld [vmem:[%s16865_s9 + $0x480] sm:$0xff]  }
 0x572   : > { %v8729_v33 = vrot.slane %v8727_v9, 7  ;;  %v8740_v39 = vrot.slane %v8738_v59, 6  ;;  %v8719_v0 = vshll.u32 %v16432_v2, 16  ;;  %v8743_v17 = vrot.slane %v8741_v4, 7  ;;  %v14271_v9 = vld [vmem:[%s16865_s9 + $0x410] sm:$0xff]  }
 0x573   : > { %13327 = vmatpush3.bf16.msra.mxu1 %v14240_v43  ;;  %v8747_v15 = vshll.u32 %v8691_v13, 16  ;;  %v8755_v58 = vshll.u32 %v8708_v29, 16  ;;  %v8242_v8 = vsel %vm15873_vm10, %v8237_v44, %v16417_v48  ;;  %v8574_v19 = vrot.slane %v8560_v38, %v15796_v53  ;;  %v14269_v29 = vld [vmem:[%s16865_s9 + $0x450] sm:$0xff]   ;;  %v14266_v38 = vld [vmem:[%s16865_s9 + $0x4c8] sm:$0xff]  }
 0x574   : > { %13328 = vmatprep.subr.bf16.mxu1 %v14242_v61  ;;  %13309 = vmatpush3.bf16.msra.mxu0 %v14247_v18  ;;  %v8730_v20 = vor.u32 %v8729_v33, %v8726_v6  ;;  %v8754_v25 = vrot.slane %v8752_v50, 6  ;;  %v8717_v35 = vrot.slane %v8716_v10, 2  ;;  %v8744_v57 = vor.u32 %v8743_v17, %v8740_v39  ;;  %v14265_v61 = vld [vmem:[%s16865_s9 + $0x448] sm:$0xff]   ;;  %v14252_v18 = vld [vmem:[%s16865_s9 + $0x3b8] sm:$0xff]   ;;  %v14270_v10 = vld [vmem:[%s16865_s9 + $0x4d0] sm:$0xff]  }
 0x575   : > { %13310 = vmatprep.subr.bf16.mxu0 %v14249_v22  ;;  %v8757_v56 = vrot.slane %v8755_v58, 7  ;;  %v8761_v30 = vshll.u32 %v8707_v37, 16  ;;  %v8258_v48 = vcombine.low %v8242_v8, %v8256_v12  ;;  %v8567_v2 = vrot.slane %v8559_v1, %v15796_v53  ;;  %v14268_v37 = vld [vmem:[%s16865_s9 + $0x488] sm:$0xff]   ;;  %v14277_v33 = vld [vmem:[%s16865_s9 + $0x460] sm:$0xff]   ;;  %v14272_v39 = vld [vmem:[%s16865_s9 + $0x490] sm:$0xff]  }
 0x576   : > { %v8731_v40 = vrot.slane %v8730_v20, 2  ;;  %v8735_v43 = vrot.slane %v8733_v27, 7  ;;  %v8721_v14 = vrot.slane %v8719_v0, 7  ;;  %v8745_v32 = vrot.slane %v8744_v57, 2  ;;  %v14276_v20 = vld [vmem:[%s16865_s9 + $0x498] sm:$0xff]  }
 0x577   : > { %13329 = vmatpush3.bf16.msra.mxu1 %v14244_v16  ;;  %v8749_v5 = vrot.slane %v8747_v15, 7  ;;  %v8758_v26 = vor.u32 %v8757_v56, %v8754_v25  ;;  %v8257_v62 = vcombine.low %v8214_v46, %v8228_v41  ;;  %v8575_v23 = vcombine.low %v8567_v2, %v8574_v19  ;;  %v14258_v46 = vld [vmem:[%s16865_s9 + $0x4c0] sm:$0xff]   ;;  %v14273_v16 = vld [vmem:[%s16865_s9 + $0x458] sm:$0xff]   ;;  %v14281_v19 = vld [vmem:[%s16865_s9 + $0x468] sm:$0xff]  }
 0x578   : > { %13330 = vmatprep.subr.bf16.mxu1 %v14246_v11  ;;  %13311 = vmatpush3.bf16.msra.mxu0 %v14251_v47  ;;  %v8736_v1 = vsel %vm15873_vm10, %v8731_v40, %v8735_v43  ;;  %v8722_v49 = vsel %vm15873_vm10, %v8717_v35, %v8721_v14  ;;  %v8763_v24 = vrot.slane %v8761_v30, 7  ;;  %v8272_v63 = vrot.slane %v8258_v48, %v15796_v53  ;;  %v12350_v6 = vld.sshfl [vmem:[#allocation2 + $0x28] sm:$0x12 pattern:$0x76325410]  ;;  %v14275_v11 = vld [vmem:[%s16865_s9 + $0x418] sm:$0xff]  }
 0x579   : > { %13340 = vmatprep.subr.bf16.mxu0 %v14257_v51  ;;  %v8750_v55 = vsel %vm15873_vm10, %v8745_v32, %v8749_v5  ;;  %v8759_v44 = vrot.slane %v8758_v26, 2  ;;  %v8765_v41 = vcombine.low %v8722_v49, %v8736_v1  ;;  %v8265_v22 = vrot.slane %v8257_v62, %v15796_v53  ;;  %v12351_v4 = vld.sshfl [vmem:[#allocation2 + $0x30] sm:$0x12 pattern:$0x76325410]  ;;  %v14274_v51 = vld [vmem:[%s16865_s9 + $0x4d8] sm:$0xff]  }
 0x57a   : > { %v12378_v47 = vld.sshfl [vmem:[#allocation2 + $0x40] sm:$0x12 pattern:$0x76325410]  ;;  %v8423_v50 = vcombine.high %v12351_v4, %v12351_v4  ;;  %v8415_v58 = vcombine.high %v12350_v6, %v12350_v6  ;;  %v14283_v56 = vld [vmem:[%s16865_s9 + $0x428] sm:$0xff]   ;;  %v12354_v14 = vrot.slane %v12350_v6, 9 }
 0x57b   : > { %13331 = vmatpush3.bf16.msra.mxu1 %v14248_v36  ;;  %11203 = vmatmul.mubr.bf16.vlgmr.msra.gmra.mrb[124].mxu0 %v16391_v31  ;;  %v14267_v31 = vld [vmem:[%s16865_s9 + $0x408] sm:$0xff]   ;;  %v8764_v52 = vsel %vm15873_vm10, %v8759_v44, %v8763_v24  ;;  %v8273_v42 = vcombine.low %v8265_v22, %v8272_v63  ;;  %v8773_v54 = vrot.slane %v8765_v41, %v15796_v53  ;;  %v12352_v27 = vld.sshfl [vmem:[#allocation2 + $0x38] sm:$0x12 pattern:$0x76325410]  ;;  %v14279_v15 = vld [vmem:[%s16865_s9 + $0x420] sm:$0xff]  }
 0x57c   : > { %13332 = vmatprep.subr.bf16.mxu1 %v14250_v3  ;;  %13341 = vmatpush3.bf16.msra.mxu0 %v14259_v7  ;;  %v8766_v13 = vcombine.low %v8750_v55, %v8764_v52  ;;  %v12349_v0 = vld.sshfl [vmem:[#allocation2 + $0x20] sm:$0x12 pattern:$0x76325410]  ;;  %v8939_v17 = vcombine.high %v12378_v47, %v12378_v47  ;;  %v8431_v8 = vcombine.high %v12352_v27, %v12352_v27  ;;  %v8442_v36 = vrot.slane %v8423_v50, 7  ;;  %v14285_v7 = vld [vmem:[%s16865_s9 + $0x470] sm:$0xff]  }
 0x57d   : > { %11284 = vmatprep.mubr.bf16.mxu0 %v8575_v23  ;;  %13342 = vmatprep.subr.bf16.mxu0 %v14265_v61  ;;  %v8407_v25 = vcombine.high %v12349_v0, %v12349_v0  ;;  %v14278_v35 = vld [vmem:[%s16865_s9 + $0x4e0] sm:$0xff]   ;;  %v8438_v30 = vrot.slane %v8415_v58, 7  ;;  %v12355_v3 = vrot.slane %v12351_v4, 9  ;;  %v12382_v2 = vrot.slane %v12378_v47, 9  ;;  %v14282_v26 = vld [vmem:[%s16865_s9 + $0x4e8] sm:$0xff]   ;;  %v14287_v62 = vld [vmem:[%s16865_s9 + $0x430] sm:$0xff]  }
 0x57e   : > { %v8780_v12 = vrot.slane %v8766_v13, %v15796_v53  ;;  %v8954_v57 = vrot.slane %v8939_v17, 7  ;;  %v8446_v48 = vrot.slane %v8431_v8, 7  ;;  %v14280_v40 = vld [vmem:[%s16865_s9 + $0x4a0] sm:$0xff]   ;;  %v12356_v5 = vrot.slane %v12352_v27, 9  ;;  %v14289_v49 = vld [vmem:[%s16865_s9 + $0x478] sm:$0xff]   ;;  %v14284_v44 = vld [vmem:[%s16865_s9 + $0x4a8] sm:$0xff]  }
 0x57f   : > { %13333 = vmatpush3.bf16.msra.mxu1 %v14252_v18  ;;  %v8434_v43 = vrot.slane %v8407_v25, 7  ;;  %v8443_v32 = vsel %vm15838_vm2, %v12355_v3, %v8442_v36  ;;  %v12353_v23 = vrot.slane %v12349_v0, 9  ;;  %v8439_v1 = vsel %vm15838_vm2, %v12354_v14, %v8438_v30  ;;  %v14286_v41 = vld [vmem:[%s16865_s9 + $0x4f0] sm:$0xff]   ;;  %v14291_v52 = vld [vmem:[%s16865_s9 + $0x438] sm:$0xff]   ;;  %v14294_v0 = vld [vmem:[%s16865_s9 + $0x5c0] sm:$0xff]  }
 0x580   : > { %13362 = vmatprep.subr.bf16.mxu1 %v14258_v46  ;;  %13343 = vmatpush3.bf16.msra.mxu0 %v14267_v31  ;;  %v8781_v59 = vcombine.low %v8773_v54, %v8780_v12  ;;  %v8955_v61 = vsel %vm15838_vm2, %v12382_v2, %v8954_v57  ;;  %v8447_v18 = vsel %vm15838_vm2, %v12356_v5, %v8446_v48  ;;  %v12367_v22 = vld.sshfl [vmem:[#allocation2 + $0x30] sm:$0x30 pattern:$0x76325410]  ;;  %v14292_v27 = vld [vmem:[%s16865_s9 + $0x4b8] sm:$0xff]   ;;  %v14299_v8 = vld [vmem:[%s16865_s9 + $0x508] sm:$0xff]  }
 0x581   : > { %13344 = vmatprep.subr.bf16.mxu0 %v14269_v29  ;;  %v8449_v55 = vcombine.low %v8443_v32, %v8447_v18  ;;  %v8435_v24 = vsel %vm15838_vm2, %v12353_v23, %v8434_v43  ;;  %v8956_v63 = vcombine.low %v8439_v1, %v8443_v32  ;;  %v8957_v46 = vcombine.low %v8447_v18, %v8955_v61  ;;  %v12366_v29 = vld.sshfl [vmem:[#allocation2 + $0x28] sm:$0x30 pattern:$0x76325410]  ;;  %v14303_v2 = vld [vmem:[%s16865_s9 + $0x510] sm:$0xff]  }
 0x582   : > { %11244 = vmatmul.mubr.bf16.vlgmr.msra.gmra.mrb[124].mxu1 %v8273_v42  ;;  %v8448_v31 = vcombine.low %v8435_v24, %v8439_v1  ;;  %v14288_v42 = vld [vmem:[%s16865_s9 + $0x4b0] sm:$0xff]   ;;  %v12368_v54 = vld.sshfl [vmem:[#allocation2 + $0x38] sm:$0x30 pattern:$0x76325410]  ;;  %v12395_v6 = vcombine.high %v12366_v29, %v12367_v22  ;;  %v14300_v5 = vld [vmem:[%s16865_s9 + $0x588] sm:$0xff]  }
 0x583   : > { %13363 = vmatpush3.bf16.msra.mxu1 %v14260_v28  ;;  %11325 = vmatprep.mubr.bf16.mxu1 %v8781_v59  ;;  %v8463_v13 = vrot.slane %v8449_v55, %v15796_v53  ;;  %v12394_v28 = vld.sshfl [vmem:[#allocation2 + $0x40] sm:$0x30 pattern:$0x76325410]  ;;  %v8964_v12 = vrot.slane %v8956_v63, %v15796_v53  ;;  %v14302_v63 = vld [vmem:[%s16865_s9 + $0x5d0] sm:$0xff]  }
 0x584   : > { %13364 = vmatprep.subr.bf16.mxu1 %v14266_v38  ;;  %13345 = vmatpush3.bf16.msra.mxu0 %v14271_v9  ;;  %v8971_v38 = vrot.slane %v8957_v46, %v15796_v53  ;;  %v14290_v9 = vld [vmem:[%s16865_s9 + $0x4f8] sm:$0xff]   ;;  %v8456_v59 = vrot.slane %v8448_v31, %v15796_v53  ;;  %v12396_v4 = vcombine.high %v12368_v54, %v12394_v28  ;;  %v16628_v50 = vld.sshfl [vmem:[#allocation2 + $0x30] sm:$0x13 pattern:$0x76325410] }
 0x585   : > { %13346 = vmatprep.subr.bf16.mxu0 %v14273_v16  ;;  %v12370_v16 = vcombine.high %v12367_v22, %v12368_v54  ;;  %v16634_v17 = vld.sshfl [vmem:[#allocation2 + $0x40] sm:$0x13 pattern:$0x76325410]  ;;  %v8843_v57 = vshll.u32 %v16628_v50, 16  ;;  %v8808_v46 = vcombine.high %v16628_v50, %v16628_v50 }
 0x586   : > { %v9141_v58 = vrot.slane %v12396_v4, %v15796_v53  ;;  %v16645_v36 = vld.sshfl [vmem:[#allocation2 + $0x38] sm:$0x13 pattern:$0x76325410]  ;;  %v8868_v30 = vshrl.u32 %v16634_v17, 16  ;;  %v8871_v3 = vshll.u32 %v16634_v17, 16 }
 0x587   : > { %13365 = vmatpush3.bf16.msra.mxu1 %v14268_v37  ;;  %v12365_v37 = vld.sshfl [vmem:[#allocation2 + $0x20] sm:$0x30 pattern:$0x76325410]  ;;  %v8857_v61 = vshll.u32 %v16645_v36, 16  ;;  %v8845_v1 = vrot.slane %v8843_v57, 7  ;;  %v8816_v54 = vcombine.high %v16645_v36, %v16645_v36 }
 0x588   : > { %13366 = vmatprep.subr.bf16.mxu1 %v14270_v10  ;;  %13347 = vmatpush3.bf16.msra.mxu0 %v14275_v11  ;;  %v14295_v10 = vld [vmem:[%s16865_s9 + $0x500] sm:$0xff]   ;;  %v8464_v11 = vcombine.low %v8456_v59, %v8463_v13  ;;  %v12369_v47 = vcombine.high %v12365_v37, %v12366_v29  ;;  %v8870_v55 = vrot.slane %v8868_v30, 6  ;;  %v16672_v24 = vld.sshfl [vmem:[#allocation2 + $0x28] sm:$0x32 pattern:$0x76325410] }
 0x589   : > { %13348 = vmatprep.subr.bf16.mxu0 %v14277_v33  ;;  %v14297_v33 = vld [vmem:[%s16865_s9 + $0x548] sm:$0xff]   ;;  %v16670_v18 = vld.sshfl [vmem:[#allocation2 + $0x40] sm:$0x32 pattern:$0x76325410]  ;;  %v14307_v29 = vld [vmem:[%s16865_s9 + $0x518] sm:$0xff]  }
 0x58a   : > { %v8626_v25 = vrot.slane %v12369_v47, %v15796_v53  ;;  %v8859_v13 = vrot.slane %v8857_v61, 7  ;;  %v9014_v28 = vcombine.high %v16670_v18, %v16670_v18  ;;  %v14311_v4 = vld [vmem:[%s16865_s9 + $0x520] sm:$0xff]   ;;  %v14317_v30 = vld [vmem:[%s16865_s9 + $0x570] sm:$0xff]  }
 0x58b   : > { %13367 = vmatpush3.bf16.msra.mxu1 %v14272_v39  ;;  %v8972_v39 = vcombine.low %v8964_v12, %v8971_v38  ;;  %v16695_v38 = vcombine.high %v16672_v24, %v16672_v24 }
 0x58c   : > { %13368 = vmatprep.subr.bf16.mxu1 %v14274_v51  ;;  %13349 = vmatpush3.bf16.msra.mxu0 %v14279_v15  ;;  %v8633_v51 = vrot.slane %v12370_v16, %v15796_v53  ;;  %v9134_v15 = vrot.slane %v12395_v6, %v15796_v53  ;;  %v14306_v16 = vld [vmem:[%s16865_s9 + $0x5d8] sm:$0xff]   ;;  %v8849_v6 = vshll.u32 %v8808_v46, 16 }
 0x58d   : > { %13350 = vmatprep.subr.bf16.mxu0 %v14281_v19  ;;  %v14301_v19 = vld [vmem:[%s16865_s9 + $0x550] sm:$0xff]  }
 0x58e   : > { %v8634_v48 = vcombine.low %v8626_v25, %v8633_v51  ;;  %v9142_v32 = vcombine.low %v9134_v15, %v9141_v58  ;;  %v8863_v51 = vshll.u32 %v8816_v54, 16  ;;  %v14310_v58 = vld [vmem:[%s16865_s9 + $0x5e0] sm:$0xff]   ;;  %v14315_v25 = vld [vmem:[%s16865_s9 + $0x528] sm:$0xff]  }
 0x58f   : > { %13369 = vmatpush3.bf16.msra.mxu1 %v14276_v20  ;;  %v12371_v20 = vld.sshfl [vmem:[#allocation2 + $0x28] sm:$0x13 pattern:$0x76325410] }
 0x590   : > { %13370 = vmatprep.subr.bf16.mxu1 %v14278_v35  ;;  %13351 = vmatpush3.bf16.msra.mxu0 %v14283_v56  ;;  %v8840_v35 = vshrl.u32 %v16628_v50, 16  ;;  %v14296_v56 = vld [vmem:[%s16865_s9 + $0x580] sm:$0xff]   ;;  %v8826_v43 = vshrl.u32 %v12371_v20, 16  ;;  %v8829_v14 = vshll.u32 %v12371_v20, 16 }
 0x591   : > { %13352 = vmatprep.subr.bf16.mxu0 %v14285_v7  ;;  %v14298_v7 = vld [vmem:[%s16865_s9 + $0x5c8] sm:$0xff]  }
 0x592   : > { %v8842_v23 = vrot.slane %v8840_v35, 6  ;;  %v8828_v31 = vrot.slane %v8826_v43, 6 }
 0x593   : > { %13371 = vmatpush3.bf16.msra.mxu1 %v14280_v40  ;;  %v14305_v40 = vld [vmem:[%s16865_s9 + $0x558] sm:$0xff]  }
 0x594   : > { %13372 = vmatprep.subr.bf16.mxu1 %v14282_v26  ;;  %13353 = vmatpush3.bf16.msra.mxu0 %v14287_v62  ;;  %v8854_v26 = vshrl.u32 %v16645_v36, 16  ;;  %v16668_v62 = vld.sshfl [vmem:[#allocation2 + $0x30] sm:$0x32 pattern:$0x76325410]  ;;  %v8846_v12 = vor.u32 %v8845_v1, %v8842_v23 }
 0x595   : > { %13354 = vmatprep.subr.bf16.mxu0 %v14289_v49  ;;  %v8800_v49 = vcombine.high %v12371_v20, %v12371_v20  ;;  %v8851_v20 = vrot.slane %v8849_v6, 7  ;;  %v14319_v23 = vld [vmem:[%s16865_s9 + $0x530] sm:$0xff]  }
 0x596   : > { %v8856_v22 = vrot.slane %v8854_v26, 6  ;;  %v8847_v50 = vrot.slane %v8846_v12, 2  ;;  %v14314_v26 = vld [vmem:[%s16865_s9 + $0x5e8] sm:$0xff]  }
 0x597   : > { %13373 = vmatpush3.bf16.msra.mxu1 %v14284_v44  ;;  %v8873_v44 = vrot.slane %v8871_v3, 7 }
 0x598   : > { %13374 = vmatprep.subr.bf16.mxu1 %v14286_v41  ;;  %13355 = vmatpush3.bf16.msra.mxu0 %v14291_v52  ;;  %v8824_v41 = vcombine.high %v16634_v17, %v16634_v17  ;;  %v8831_v52 = vrot.slane %v8829_v14, 7  ;;  %v14308_v17 = vld [vmem:[%s16865_s9 + $0x598] sm:$0xff]   ;;  %v8852_v3 = vsel %vm15873_vm10, %v8847_v50, %v8851_v20  ;;  %v14355_v50 = vmov 0.0  }
 0x599   : > { %13384 = vmatprep.subr.bf16.mxu0 %v14293_v34  ;;  %v8998_v34 = vcombine.high %v16668_v62, %v16668_v62  ;;  %v8874_v59 = vor.u32 %v8873_v44, %v8870_v55  ;;  %v14321_v44 = vld [vmem:[%s16865_s9 + $0x578] sm:$0xff]  }
 0x59a   : > { %v8832_v37 = vor.u32 %v8831_v52, %v8828_v31  ;;  %v8877_v47 = vshll.u32 %v8824_v41, 16 }
 0x59b   : > { %13375 = vmatpush3.bf16.msra.mxu1 %v14288_v42  ;;  %11285 = vmatmul.mubr.bf16.vlgmr.msra.gmra.mrb[128].mxu0 %v8464_v11  ;;  %v14309_v42 = vld [vmem:[%s16865_s9 + $0x560] sm:$0xff]   ;;  %v8860_v11 = vor.u32 %v8859_v13, %v8856_v22  ;;  %v8875_v15 = vrot.slane %v8874_v59, 2  ;;  %v9037_v14 = vshll.u32 %v8998_v34, 16  ;;  %v16752_v22 = vld [vmem:[#allocation2 + $0x30] sm:$0x1c] }
 0x59c   : > { %13376 = vmatprep.subr.bf16.mxu1 %v14290_v9  ;;  %13385 = vmatpush3.bf16.msra.mxu0 %v14295_v10  ;;  %v14304_v9 = vld [vmem:[%s16865_s9 + $0x590] sm:$0xff]   ;;  %v8835_v10 = vshll.u32 %v8800_v49, 16  ;;  %v8879_v35 = vrot.slane %v8877_v47, 7  ;;  %v16754_v13 = vld [vmem:[#allocation2 + $0x40] sm:$0x1c] }
 0x59d   : > { %11366 = vmatprep.mubr.bf16.mxu0 %v8972_v39  ;;  %13386 = vmatprep.subr.bf16.mxu0 %v14297_v33  ;;  %v9034_v33 = vshrl.u32 %v8998_v34, 16  ;;  %v14313_v39 = vld [vmem:[%s16865_s9 + $0x568] sm:$0xff]   ;;  %v8861_v36 = vrot.slane %v8860_v11, 2  ;;  %v14323_v34 = vld [vmem:[%s16865_s9 + $0x538] sm:$0xff]   ;;  %v9208_v6 = vrot.slane %v16754_v13, %v15796_v53 }
 0x59e   : > { %v8880_v43 = vsel %vm15873_vm10, %v8875_v15, %v8879_v35  ;;  %v16767_v59 = vld [vmem:[#allocation2 + $0x38] sm:$0x1c] }
 0x59f   : > { %13377 = vmatpush3.bf16.msra.mxu1 %v14292_v27  ;;  %v9060_v27 = vshrl.u32 %v9014_v28, 16  ;;  %v9036_v57 = vrot.slane %v9034_v33, 7 }
 0x5a0   : > { %13406 = vmatprep.subr.bf16.mxu1 %v14294_v0  ;;  %13387 = vmatpush3.bf16.msra.mxu0 %v14299_v8  ;;  %v9021_v0 = vshrl.u32 %v16695_v38, 16  ;;  %v8833_v8 = vrot.slane %v8832_v37, 2 }
 0x5a1   : > { %13388 = vmatprep.subr.bf16.mxu0 %v14301_v19  ;;  %v8837_v19 = vrot.slane %v8835_v10, 7  ;;  %v9039_v49 = vor.u32 %v9037_v14, %v9036_v57  ;;  %v9176_v10 = vrot.slane %v16752_v22, %v15796_v53  ;;  %v9185_v14 = vcombine.high %v16767_v59, %v16767_v59 }
 0x5a2   : > { %11326 = vmatmul.mubr.bf16.vlgmr.msra.gmra.mrb[128].mxu1 %v8634_v48  ;;  %v8865_v48 = vrot.slane %v8863_v51, 7 }
 0x5a3   : > { %13407 = vmatpush3.bf16.msra.mxu1 %v14296_v56  ;;  %11407 = vmatprep.mubr.bf16.mxu1 %v9142_v32  ;;  %v9062_v56 = vrot.slane %v9060_v27, 7  ;;  %v9055_v32 = vshrl.u32 %v16670_v18, 16  ;;  %v8838_v61 = vsel %vm15873_vm10, %v8833_v8, %v8837_v19  ;;  %v9024_v18 = vshll.u32 %v16695_v38, 16 }
 0x5a4   : > { %13408 = vmatprep.subr.bf16.mxu1 %v14298_v7  ;;  %13389 = vmatpush3.bf16.msra.mxu0 %v14303_v2  ;;  %v9023_v7 = vrot.slane %v9021_v0, 7  ;;  %v9029_v2 = vshrl.u32 %v16668_v62, 16  ;;  %v9016_v62 = vshrl.u32 %v16672_v24, 16  ;;  %v8866_v1 = vsel %vm15873_vm10, %v8861_v36, %v8865_v48  ;;  %v14316_v24 = vld [vmem:[%s16865_s9 + $0x5a8] sm:$0xff]  }
 0x5a5   : > { %13390 = vmatprep.subr.bf16.mxu0 %v14305_v40  ;;  %v14312_v40 = vld [vmem:[%s16865_s9 + $0x5a0] sm:$0xff]   ;;  %v8882_v46 = vcombine.low %v8866_v1, %v8880_v43  ;;  %v12390_v52 = vrot.slane %v9055_v32, 9  ;;  %v9192_v27 = vrot.slane %v16767_v59, %v15796_v53  ;;  %v9184_v51 = vcombine.high %v9176_v10, %v9176_v10  ;;  %v14328_v1 = vld [vmem:[%s16865_s9 + $0x618] sm:$0xff]  }
 0x5a6   : > { %v9026_v41 = vor.u32 %v9024_v18, %v9023_v7  ;;  %v12388_v31 = vrot.slane %v9029_v2, 9  ;;  %v9216_v0 = vcombine.high %v9208_v6, %v9208_v6 }
 0x5a7   : > { %13409 = vmatpush3.bf16.msra.mxu1 %v14300_v5  ;;  %v9063_v5 = vshll.u32 %v9014_v28, 16  ;;  %v12387_v28 = vrot.slane %v9016_v62, 9  ;;  %v8896_v38 = vrot.slane %v8882_v46, %v15796_v53  ;;  %v9200_v19 = vcombine.high %v9192_v27, %v9192_v27 }
 0x5a8   : > { %13410 = vmatprep.subr.bf16.mxu1 %v14302_v63  ;;  %13391 = vmatpush3.bf16.msra.mxu0 %v14307_v29  ;;  %v8881_v63 = vcombine.low %v8838_v61, %v8852_v3  ;;  %v14318_v29 = vld [vmem:[%s16865_s9 + $0x5f0] sm:$0xff]   ;;  %v9232_v20 = vshrl.u32 %v9184_v51, 16  ;;  %v9260_v36 = vshrl.u32 %v9216_v0, 16  ;;  %v9263_v35 = vshll.u32 %v9216_v0, 16 }
 0x5a9   : > { %13392 = vmatprep.subr.bf16.mxu0 %v14309_v42  ;;  %v9065_v55 = vor.u32 %v9063_v5, %v9062_v56  ;;  %v9040_v42 = vsel %vm15898_vm13, %v12388_v31, %v9039_v49  ;;  %v9027_v37 = vsel %vm15898_vm13, %v12387_v28, %v9026_v41  ;;  %v9169_v56 = vcombine.high %v16752_v22, %v16752_v22  ;;  %v14327_v3 = vld [vmem:[%s16865_s9 + $0x610] sm:$0xff]   ;;  %v14329_v31 = vld [vmem:[%s16865_s9 + $0x620] sm:$0xff]  }
 0x5aa   : > { %v8889_v12 = vrot.slane %v8881_v63, %v15796_v53  ;;  %v9067_v11 = vcombine.low %v9027_v37, %v9040_v42  ;;  %v9246_v2 = vshrl.u32 %v9200_v19, 16  ;;  %v9234_v32 = vrot.slane %v9232_v20, 6  ;;  %v12397_v20 = vld [vmem:[%s16866_s10] ss:$0 sm:$0xff] }
 0x5ab   : > { %13411 = vmatpush3.bf16.msra.mxu1 %v14304_v9  ;;  %v9066_v54 = vsel %vm15898_vm13, %v12390_v52, %v9065_v55  ;;  %v16765_v9 = vld [vmem:[#allocation2 + $0x28] sm:$0x1c]  ;;  %v9265_v61 = vrot.slane %v9263_v35, 7  ;;  %v9183_v62 = vrot.slane %v9169_v56, %v15796_v53  ;;  %v9199_v46 = vrot.slane %v9185_v14, %v15796_v53 }
 0x5ac   : > { %13412 = vmatprep.subr.bf16.mxu1 %v14306_v16  ;;  %13393 = vmatpush3.bf16.msra.mxu0 %v14311_v4  ;;  %v14320_v16 = vld [vmem:[%s16865_s9 + $0x5b0] sm:$0xff]   ;;  %v14322_v4 = vld [vmem:[%s16865_s9 + $0x5f8] sm:$0xff]   ;;  %v9068_v47 = vcombine.low %v16446_v45, %v9066_v54  ;;  %v9160_v33 = vrot.slane %v16765_v9, %v15796_v53  ;;  %v9153_v43 = vcombine.high %v16765_v9, %v16765_v9  ;;  %v9248_v55 = vrot.slane %v9246_v2, 6 }
 0x5ad   : > { %13394 = vmatprep.subr.bf16.mxu0 %v14313_v39  ;;  %v8897_v39 = vcombine.low %v8889_v12, %v8896_v38  ;;  %v14324_v45 = vld [vmem:[%s16865_s9 + $0x5b8] sm:$0xff]   ;;  %v9255_v42 = vshll.u32 %v9199_v46, 16  ;;  %v14330_v12 = vld [vmem:[%s16865_s9 + $0x628] sm:$0xff]  }
 0x5ae   : > { %v9082_v15 = vrot.slane %v9068_v47, %v15796_v53  ;;  %v9168_v8 = vcombine.high %v9160_v33, %v9160_v33  ;;  %v9167_v63 = vrot.slane %v9153_v43, %v15796_v53 }
 0x5af   : > { %13413 = vmatpush3.bf16.msra.mxu1 %v14308_v17  ;;  %v9075_v17 = vrot.slane %v9067_v11, %v15796_v53  ;;  %v9257_v6 = vrot.slane %v9255_v42, 7  ;;  %v14331_v11 = vld [vmem:[%s16865_s9 + $0x630] sm:$0xff]  }
 0x5b0   : > { %13414 = vmatprep.subr.bf16.mxu1 %v14310_v58  ;;  %13395 = vmatpush3.bf16.msra.mxu0 %v14315_v25  ;;  %v14326_v58 = vld [vmem:[%s16865_s9 + $0x608] sm:$0xff]   ;;  %v9235_v25 = vshll.u32 %v9184_v51, 16  ;;  %v9218_v48 = vshrl.u32 %v9168_v8, 16  ;;  %v9221_v7 = vshll.u32 %v9168_v8, 16 }
 0x5b1   : > { %13396 = vmatprep.subr.bf16.mxu0 %v14317_v30  ;;  %v9083_v57 = vcombine.low %v9075_v17, %v9082_v15  ;;  %v9201_v30 = vcombine.high %v16754_v13, %v16754_v13 }
 0x5b2   : > { %v9237_v5 = vrot.slane %v9235_v25, 7  ;;  %v9220_v18 = vrot.slane %v9218_v48, 6  ;;  %v9223_v49 = vrot.slane %v9221_v7, 7 }
 0x5b3   : > { %13415 = vmatpush3.bf16.msra.mxu1 %v14312_v40  ;;  %v9249_v40 = vshll.u32 %v9200_v19, 16 }
 0x5b4   : > { %13416 = vmatprep.subr.bf16.mxu1 %v14314_v26  ;;  %13397 = vmatpush3.bf16.msra.mxu0 %v14319_v23  ;;  %v9262_v26 = vrot.slane %v9260_v36, 6  ;;  %v9215_v23 = vrot.slane %v9201_v30, %v15796_v53  ;;  %v9224_v52 = vor.u32 %v9223_v49, %v9220_v18 }
 0x5b5   : > { %13398 = vmatprep.subr.bf16.mxu0 %v14321_v44  ;;  %v9251_v44 = vrot.slane %v9249_v40, 7 }
 0x5b6   : > { %v9266_v41 = vor.u32 %v9265_v61, %v9262_v26  ;;  %v9269_v13 = vshll.u32 %v9215_v23, 16  ;;  %v9225_v38 = vrot.slane %v9224_v52, 2 }
 0x5b7   : > { %13417 = vmatpush3.bf16.msra.mxu1 %v14316_v24  ;;  %v9238_v24 = vor.u32 %v9237_v5, %v9234_v32  ;;  %v9252_v22 = vor.u32 %v9251_v44, %v9248_v55 }
 0x5b8   : > { %13418 = vmatprep.subr.bf16.mxu1 %v14318_v29  ;;  %13399 = vmatpush3.bf16.msra.mxu0 %v14323_v34  ;;  %v9241_v29 = vshll.u32 %v9183_v62, 16  ;;  %v9227_v34 = vshll.u32 %v9167_v63, 16  ;;  %v9267_v54 = vrot.slane %v9266_v41, 2 }
 0x5b9   : > { %13533 = vmatprep.subr.bf16.mxu0 %v14355_v50  ;;  %v9239_v28 = vrot.slane %v9238_v24, 2  ;;  %v9253_v59 = vrot.slane %v9252_v22, 2 }
 0x5ba   : > { %v9243_v9 = vrot.slane %v9241_v29, 7  ;;  %v9229_v37 = vrot.slane %v9227_v34, 7 }
 0x5bb   : > { %13419 = vmatpush3.bf16.msra.mxu1 %v14320_v16  ;;  %11367 = vmatmul.mubr.bf16.vlgmr.msra.gmra.mrb[132].mxu0 %v8897_v39  ;;  %v9271_v16 = vrot.slane %v9269_v13, 7  ;;  %v14332_v39 = vld [vmem:[%s16865_s9 + $0x638] sm:$0xff]  }
 0x5bc   : > { %13420 = vmatprep.subr.bf16.mxu1 %v14322_v4  ;;  %13534 = vmatpush3.bf16.msra.mxu0 %v14325_v21  ;;  %v9244_v10 = vsel %vm15873_vm10, %v9239_v28, %v9243_v9  ;;  %v9230_v47 = vsel %vm15873_vm10, %v9225_v38, %v9229_v37  ;;  %v9258_v21 = vsel %vm15873_vm10, %v9253_v59, %v9257_v6 }
 0x5bd   : > { %13549 = vmatprep.mubr.msk.bf16.mxu0 %vm14356_vm14, %v14355_v50  ;;  %13535 = vmatprep.subr.bf16.mxu0 %v14355_v50  ;;  %v9272_v4 = vsel %vm15873_vm10, %v9267_v54, %v9271_v16  ;;  %v9273_v33 = vcombine.low %v9230_v47, %v9244_v10 }
 0x5be   : > { %v9274_v27 = vcombine.low %v9258_v21, %v9272_v4 }
 0x5bf   : > { %13421 = vmatpush3.bf16.msra.mxu1 %v14324_v45  ;;  %v9281_v45 = vrot.slane %v9273_v33, %v15796_v53 }
 0x5c0   : > { %13536 = vmatpush3.bf16.msra.mxu0 %v14326_v58  ;;  %v9288_v51 = vrot.slane %v9274_v27, %v15796_v53 }
 0x5c1   : > { %13537 = vmatprep.subr.bf16.mxu0 %v14355_v50 }
 0x5c2   : > { %11408 = vmatmul.mubr.bf16.vlgmr.msra.gmra.mrb[132].mxu1 %v9083_v57  ;;  %v9289_v0 = vcombine.low %v9281_v45, %v9288_v51 }
 0x5c4   : > { %13538 = vmatpush3.bf16.msra.mxu0 %v14327_v3 }
 0x5c5   : > { %13539 = vmatprep.subr.bf16.mxu0 %v14355_v50 }
 0x5c8   : > { %13540 = vmatpush3.bf16.msra.mxu0 %v14328_v1 }
 0x5c9   : > { %13541 = vmatprep.subr.bf16.mxu0 %v14355_v50 }
 0x5cc   : > { %13542 = vmatpush3.bf16.msra.mxu0 %v14329_v31 }
 0x5cd   : > { %13543 = vmatprep.subr.bf16.mxu0 %v14355_v50 }
 0x5d0   : > { %13544 = vmatpush3.bf16.msra.mxu0 %v14330_v12 }
 0x5d1   : > { %13545 = vmatprep.subr.bf16.mxu0 %v14355_v50 }
 0x5d4   : > { %13546 = vmatpush3.bf16.msra.mxu0 %v14331_v11 }
 0x5d5   : > { %13547 = vmatprep.subr.bf16.mxu0 %v14355_v50 }
 0x5d8   : > { %13548 = vmatpush3.bf16.msra.mxu0 %v14332_v39 }
 0x5db   : > { %13550 = vmatmul.mubr.bf16.vlgmr.msra.gmra.mrb[136].mxu0 %v9289_v0 }
 0x5ed   : > { %v13180_v60 = vpop.f32.mrb[112].mxu0 }
 0x5ee   : > { %v13181_v17 = vpop.f32.mrb[113].mxu0 }
 0x5ef   : > { %v13182_v15 = vadd.f32 %v13181_v17, %v13180_v60  ;;  %v13183_v58 = vpop.f32.mrb[114].mxu0 }
 0x5f0   : > { %v13184_v8 = vpop.f32.mrb[115].mxu0 }
 0x5f1   : > { %v13185_v19 = vadd.f32 %v13184_v8, %v13183_v58  ;;  %v10959_v36 = vadd.f32 %v13182_v15, %v12397_v20 }
 0x5f3   : > { %v10962_v56 = vadd.f32 %v13185_v19, %v12397_v20 }
 0x5f5   : > { %v13202_v25 = vpop.f32.mrb[112].mxu1 }
 0x5f6   : > { %v13203_v50 = vpop.f32.mrb[113].mxu1 }
 0x5f7   : > { %v13204_v35 = vadd.f32 %v13203_v50, %v13202_v25  ;;  %v13205_v57 = vpop.f32.mrb[114].mxu1 }
 0x5f8   : > { %v13206_v53 = vpop.f32.mrb[115].mxu1 }
 0x5f9   : > { %v11000_v30 = vadd.f32 %v13204_v35, %v10959_v36  ;;  %v13207_v3 = vadd.f32 %v13206_v53, %v13205_v57 }
 0x5fb   : > { %v11003_v48 = vadd.f32 %v13207_v3, %v10962_v56 }
 0x60d   : > { %v13224_v7 = vpop.f32.mrb[116].mxu0 }
 0x60e   : > { %v13225_v2 = vpop.f32.mrb[117].mxu0 }
 0x60f   : > { %v13226_v40 = vadd.f32 %v13225_v2, %v13224_v7  ;;  %v13227_v43 = vpop.f32.mrb[118].mxu0 }
 0x610   : > { %v13228_v14 = vpop.f32.mrb[119].mxu0 }
 0x611   : > { %v11041_v32 = vadd.f32 %v13226_v40, %v11000_v30  ;;  %v13229_v5 = vadd.f32 %v13228_v14, %v13227_v43 }
 0x613   : > { %v11044_v26 = vadd.f32 %v13229_v5, %v11003_v48 }
 0x615   : > { %v13246_v61 = vpop.f32.mrb[116].mxu1 }
 0x616   : > { %v13247_v62 = vpop.f32.mrb[117].mxu1 }
 0x617   : > { %v13248_v23 = vadd.f32 %v13247_v62, %v13246_v61  ;;  %v13249_v1 = vpop.f32.mrb[118].mxu1 }
 0x618   : > { %v13250_v18 = vpop.f32.mrb[119].mxu1 }
 0x619   : > { %v11082_v49 = vadd.f32 %v13248_v23, %v11041_v32  ;;  %v13251_v55 = vadd.f32 %v13250_v18, %v13249_v1 }
 0x61b   : > { %v11085_v44 = vadd.f32 %v13251_v55, %v11044_v26 }
 0x62d   : > { %v13268_v63 = vpop.f32.mrb[120].mxu0 }
 0x62e   : > { %v13269_v46 = vpop.f32.mrb[121].mxu0 }
 0x62f   : > { %v13270_v24 = vadd.f32 %v13269_v46, %v13268_v63  ;;  %v13271_v41 = vpop.f32.mrb[122].mxu0 }
 0x630   : > { %v13272_v31 = vpop.f32.mrb[123].mxu0 }
 0x631   : > { %v11123_v52 = vadd.f32 %v13270_v24, %v11082_v49  ;;  %v13273_v29 = vadd.f32 %v13272_v31, %v13271_v41 }
 0x633   : > { %v11126_v22 = vadd.f32 %v13273_v29, %v11085_v44 }
 0x635   : > { %v13290_v13 = vpop.f32.mrb[120].mxu1 }
 0x636   : > { %v13291_v34 = vpop.f32.mrb[121].mxu1 }
 0x637   : > { %v13292_v28 = vadd.f32 %v13291_v34, %v13290_v13  ;;  %v13293_v42 = vpop.f32.mrb[122].mxu1 }
 0x638   : > { %v13294_v54 = vpop.f32.mrb[123].mxu1 }
 0x639   : > { %v11164_v12 = vadd.f32 %v13292_v28, %v11123_v52  ;;  %v13295_v38 = vadd.f32 %v13294_v54, %v13293_v42 }
 0x63b   : > { %v11167_v9 = vadd.f32 %v13295_v38, %v11126_v22 }
 0x64e   : > { %v13312_v59 = vpop.f32.mrb[124].mxu0 }
 0x64f   : > { %v13313_v16 = vpop.f32.mrb[125].mxu0 }
 0x650   : > { %v13314_v37 = vadd.f32 %v13313_v16, %v13312_v59  ;;  %v13315_v10 = vpop.f32.mrb[126].mxu0 }
 0x651   : > { %v13316_v6 = vpop.f32.mrb[127].mxu0 }
 0x652   : > { %v11205_v4 = vadd.f32 %v13314_v37, %v11164_v12  ;;  %v13317_v11 = vadd.f32 %v13316_v6, %v13315_v10 }
 0x654   : > { %v11208_v47 = vadd.f32 %v13317_v11, %v11167_v9 }
 0x655   : > { %v13334_v21 = vpop.f32.mrb[124].mxu1 }
 0x656   : > { %v13335_v33 = vpop.f32.mrb[125].mxu1 }
 0x657   : > { %v13336_v27 = vadd.f32 %v13335_v33, %v13334_v21  ;;  %v13337_v39 = vpop.f32.mrb[126].mxu1 }
 0x658   : > { %v13338_v45 = vpop.f32.mrb[127].mxu1 }
 0x659   : > { %v11246_v51 = vadd.f32 %v13336_v27, %v11205_v4  ;;  %v13339_v0 = vadd.f32 %v13338_v45, %v13337_v39 }
 0x65b   : > { %v11249_v60 = vadd.f32 %v13339_v0, %v11208_v47 }
 0x66e   : > { %v13356_v17 = vpop.f32.mrb[128].mxu0 }
 0x66f   : > { %v13357_v15 = vpop.f32.mrb[129].mxu0 }
 0x670   : > { %v13358_v58 = vadd.f32 %v13357_v15, %v13356_v17  ;;  %v13359_v8 = vpop.f32.mrb[130].mxu0 }
 0x671   : > { %v13360_v19 = vpop.f32.mrb[131].mxu0 }
 0x672   : > { %v11287_v20 = vadd.f32 %v13358_v58, %v11246_v51  ;;  %v13361_v25 = vadd.f32 %v13360_v19, %v13359_v8 }
 0x674   : > { %v11290_v50 = vadd.f32 %v13361_v25, %v11249_v60 }
 0x675   : > { %v13378_v36 = vpop.f32.mrb[128].mxu1 }
 0x676   : > { %v13379_v35 = vpop.f32.mrb[129].mxu1 }
 0x677   : > { %v13380_v57 = vadd.f32 %v13379_v35, %v13378_v36  ;;  %v13381_v56 = vpop.f32.mrb[130].mxu1 }
 0x678   : > { %v13382_v53 = vpop.f32.mrb[131].mxu1 }
 0x679   : > { %v11328_v30 = vadd.f32 %v13380_v57, %v11287_v20  ;;  %v13383_v3 = vadd.f32 %v13382_v53, %v13381_v56 }
 0x67b   : > { %v11331_v48 = vadd.f32 %v13383_v3, %v11290_v50 }
 0x68e   : > { %v13400_v7 = vpop.f32.mrb[132].mxu0 }
 0x68f   : > { %v13401_v2 = vpop.f32.mrb[133].mxu0 }
 0x690   : > { %v13402_v40 = vadd.f32 %v13401_v2, %v13400_v7  ;;  %v13403_v43 = vpop.f32.mrb[134].mxu0 }
 0x691   : > { %v13404_v14 = vpop.f32.mrb[135].mxu0 }
 0x692   : > { %v11369_v32 = vadd.f32 %v13402_v40, %v11328_v30  ;;  %v13405_v5 = vadd.f32 %v13404_v14, %v13403_v43 }
 0x694   : > { %v11372_v61 = vadd.f32 %v13405_v5, %v11331_v48 }
 0x695   : > { %v13422_v26 = vpop.f32.mrb[132].mxu1 }
 0x696   : > { %v13423_v62 = vpop.f32.mrb[133].mxu1 }
 0x697   : > { %v13424_v23 = vadd.f32 %v13423_v62, %v13422_v26  ;;  %v13425_v1 = vpop.f32.mrb[134].mxu1 }
 0x698   : > { %v13426_v18 = vpop.f32.mrb[135].mxu1 }
 0x699   : > { %v13427_v49 = vadd.f32 %v13426_v18, %v13425_v1  ;;  %v11410_v55 = vadd.f32 %v13424_v23, %v11369_v32 }
 0x69b   : > { %v11413_v44 = vadd.f32 %v13427_v49, %v11372_v61 }
 0x6ae   : > { %v11450_v63 = vpop.f32.mrb[136].mxu0 }
 0x6af   : > { %v11451_v46 = vadd.f32 %v11450_v63, %v11410_v55  ;;  %v13551_v24 = vpop.f32.mrb[137].mxu0 }
 0x6b0   : > { %v11453_v41 = vpop.f32.mrb[138].mxu0 }
 0x6b1   : > { %v12598_v31 = vmul.f32 -1.442695, %v11451_v46  ;;  %v11454_v52 = vadd.f32 %v11453_v41, %v11413_v44  ;;  %v13552_v29 = vpop.f32.mrb[139].mxu0 }
 0x6b3   : > { %14337 = vpow2.f32 %v12598_v31  ;;  %v12599_v22 = vmul.f32 -1.442695, %v11454_v52 }
 0x6b5   : > { %14339 = vpow2.f32 %v12599_v22 }
 0x6bd   : > { %v14338_v13 = vpop.eup %14337 }
 0x6be   : > { %v11463_v34 = vadd.f32 1.0, %v14338_v13 }
 0x6bf   : > { %v14340_v28 = vpop.eup %14339 }
 0x6c0   : > { %14341 = vrcp.f32 %v11463_v34  ;;  %v11464_v42 = vadd.f32 1.0, %v14340_v28 }
 0x6c2   : > { %14343 = vrcp.f32 %v11464_v42 }
 0x6ca   : > { %v14342_v54 = vpop.eup %14341 }
 0x6cb   : > { %11469 = vst [vmem:[%s386_s28] sm:$0xff] %v14342_v54 }
 0x6cc   : > { %v14344_v12 = vpop.eup %14343 }
 0x6cd   : > { %11470 = vst [vmem:[%s386_s28 + $0x8] sm:$0xff] %v14344_v12 }
 0x6ce PF: > { %s21_s17 = sadd.s32 1, %s14351_s17  }
 0x6cf   : > { %p18_p4 = scmp.ge.s32.totalorder %s21_s17, 4  }
 0x6d1   :  { %20 = sbr.rel (!%p18_p4) target bundleno = 1 (0x1), region = 99 }

</bundles_post_ra>
